<compile_context>
chip_gen: v7x
topology: tpu7x:2x2x1
jax: 0.10.0
libtpu: 0.0.40
codegen_flags: <defaults>
</compile_context>

<pallas_src>
import jax
import jax.numpy as jnp
from jax.experimental import pallas as pl
from jax.experimental.pallas import tpu as pltpu

D = 96            # GRU input size
DPAD = 128        # zero-padded input size (lane-dense last dim)
H = 256           # GRU hidden size
T = 5             # sequence length (2560 / (2*H))
OUT = 512         # reduction output size
GATES = 3 * H     # 768  (r, z, n) for one direction
GATES2 = 6 * H    # 1536 both directions concatenated
EMB = 2 * H * T   # 2560 flattened bidirectional embedding


def extractor_kernel(x_ref,        # (T, Bt, DPAD) bf16
                     wih_ref,      # (DPAD, 6H)    bf16  [fwd | bwd], zero rows for pad
                     gib_ref,      # (1, 6H)       f32   folded gi biases
                     whhf_ref,     # (H, 3H)       bf16
                     whhb_ref,     # (H, 3H)       bf16
                     bhhnf_ref,    # (1, H)        f32   b_hn forward
                     bhhnb_ref,    # (1, H)        f32   b_hn backward
                     wred_ref,     # (EMB, OUT)    bf16
                     bred_ref,     # (1, OUT)      f32
                     out_ref,      # (Bt, OUT)     f32
                     gi_ref,       # scratch (T*Bt, 6H)  bf16   hoisted gi
                     acc_ref):     # scratch (Bt, OUT)   f32    folded Linear acc
    Bt = out_ref.shape[0]

    # ---- hoisted input->hidden matmul: all timesteps, both directions, once.
    x_all = x_ref[...].reshape(T * Bt, DPAD)
    gi_ref[...] = (jnp.dot(x_all, wih_ref[...],
                           preferred_element_type=jnp.float32)
                   + gib_ref[...]).astype(gi_ref.dtype)

    whh_f = whhf_ref[...]
    whh_b = whhb_ref[...]
    # Hoisted broadcasts (not CSE'd by JAX if left inside the unrolled loop).
    bhn_f = jnp.broadcast_to(bhhnf_ref[...], (Bt, H))
    bhn_b = jnp.broadcast_to(bhhnb_ref[...], (Bt, H))

    def gru_cell(gi, h, whh, bhn):
        # gi already contains b_ih (+ b_hh for r,z); only b_hn is applied here.
        gh = jnp.dot(h.astype(jnp.bfloat16), whh,
                     preferred_element_type=jnp.float32)           # (Bt, 3H)
        # fused r/z sigmoid over the (Bt, 2H) slice (one EUP push/drain)
        rz = jax.nn.sigmoid(gi[:, 0:2 * H] + gh[:, 0:2 * H])
        r = rz[:, 0:H]
        z = rz[:, H:2 * H]
        n = jnp.tanh(gi[:, 2 * H:3 * H] + r * (gh[:, 2 * H:3 * H] + bhn))
        return (1.0 - z) * n + z * h

    h_f = jnp.zeros((Bt, H), jnp.float32)
    h_b = jnp.zeros((Bt, H), jnp.float32)

    # Folded Linear(2560, 512) accumulator, initialized with its bias.
    acc_ref[...] = jnp.broadcast_to(bred_ref[...], (Bt, OUT))

    # ---- merged, fully-unrolled recurrence: fwd walks t, bwd walks T-1-t.
    # The per-step (Bt,H)x(H,OUT) reduction matmuls are off the serial chain
    # and fill MXU slack under the recurrence.
    for step in range(T):
        t_f = step
        t_b = T - 1 - step
        gi_f = gi_ref[t_f * Bt:(t_f + 1) * Bt, 0:GATES]
        gi_b = gi_ref[t_b * Bt:(t_b + 1) * Bt, GATES:GATES2]
        h_f = gru_cell(gi_f, h_f, whh_f, bhn_f)
        h_b = gru_cell(gi_b, h_b, whh_b, bhn_b)
        # PyTorch flatten layout: feature t*2H..t*2H+H = fwd(t), +H..2H = bwd(t)
        contrib_f = jnp.dot(h_f.astype(jnp.bfloat16),
                            wred_ref[t_f * 2 * H:t_f * 2 * H + H, :],
                            preferred_element_type=jnp.float32)
        contrib_b = jnp.dot(h_b.astype(jnp.bfloat16),
                            wred_ref[t_b * 2 * H + H:(t_b + 1) * 2 * H, :],
                            preferred_element_type=jnp.float32)
        acc_ref[...] += contrib_f + contrib_b

    # Output kept f32 to match the reference; downstream consumers that accept
    # bf16 could make this a bf16 out_shape to halve writeback DMA.
    out_ref[...] = acc_ref[...].astype(out_ref.dtype)


def _default_b_tile(B):
    # Full sublanes (and clean bf16 packing) need a multiple of 16; cap at 128:
    #   * 128 keeps live VMEM ~10 MiB -> fits v5e's 16 MiB default scoped VMEM,
    #   * for B >= 16 we guarantee >= 2 grid tiles so the "parallel" batch axis
    #     shards across v7x's two TensorCores,
    #   * the kernel is latency-bound on the GRU chain, so 128-row MXU passes
    #     cost little vs 256 on v6e.
    if B <= 16:
        return 16
    t = 16
    while t < 128 and t * 2 < B:
        t *= 2
    return t


def extractor_forward(x, params, b_tile=None):
    B = x.shape[0]
    if b_tile is None:
        b_tile = _default_b_tile(B)
    b_pad = ((B + b_tile - 1) // b_tile) * b_tile

    # (B, T, D) -> (T, B, DPAD) bf16: per-timestep rows contiguous, lane-dense
    # last dim, and half the x HBM->VMEM DMA.  Padded batch rows are zeros;
    # they run harmless sigmoid/tanh on bias-only inputs and are sliced off.
    x_tbd = jnp.transpose(x, (1, 0, 2)).astype(jnp.bfloat16)
    x_tbd = jnp.pad(x_tbd, ((0, 0), (0, b_pad - B), (0, DPAD - D)))

    grid = (b_pad // b_tile,)
    const2 = lambda i: (0, 0)   # weights stay resident across batch tiles
    # TODO(synk): weight BlockSpecs could be single-buffered
    # (pipeline_mode=pl.Buffered(1)) to drop ~3.6 MiB of duplicate resident
    # weights; left at the default since VMEM already fits all generations.

    in_specs = [
        pl.BlockSpec((T, b_tile, DPAD), lambda i: (0, i, 0)),   # x
        pl.BlockSpec((DPAD, GATES2), const2),                   # wih  [fwd|bwd]
        pl.BlockSpec((1, GATES2), const2),                      # folded gi bias
        pl.BlockSpec((H, GATES), const2),                       # whh fwd
        pl.BlockSpec((H, GATES), const2),                       # whh bwd
        pl.BlockSpec((1, H), const2),                           # b_hn fwd
        pl.BlockSpec((1, H), const2),                           # b_hn bwd
        pl.BlockSpec((EMB, OUT), const2),                       # reduction weight
        pl.BlockSpec((1, OUT), const2),                         # reduction bias
    ]

    # Advisory cost estimate for XLA's scheduler around the custom call.
    weight_bytes = (DPAD * GATES2 * 2 + GATES2 * 4 + 2 * H * GATES * 2
                    + 2 * H * 4 + EMB * OUT * 2 + OUT * 4)
    cost = pl.CostEstimate(
        flops=int(2 * b_pad * (T * DPAD * GATES2
                               + 2 * T * H * GATES
                               + EMB * OUT)),
        transcendentals=int(6 * T * b_pad * H),
        bytes_accessed=int(T * b_pad * DPAD * 2 + weight_bytes
                           + b_pad * OUT * 4),
    )

    out = pl.pallas_call(
        extractor_kernel,
        grid=grid,
        out_shape=jax.ShapeDtypeStruct((b_pad, OUT), jnp.float32),
        in_specs=in_specs,
        out_specs=pl.BlockSpec((b_tile, OUT), lambda i: (i, 0)),
        scratch_shapes=[
            pltpu.VMEM((T * b_tile, GATES2), jnp.bfloat16),   # hoisted gi
            pltpu.VMEM((b_tile, OUT), jnp.float32),           # folded Linear acc
        ],
        compiler_params=pltpu.CompilerParams(
            dimension_semantics=("parallel",),
            vmem_limit_bytes=32 * 1024 * 1024),
        cost_estimate=cost,
    )(x_tbd, *params)
    return out[:B]


# ----------------------------------------------------------------------------
# Parameter construction (PyTorch layout) and packing into kernel layout.
# ----------------------------------------------------------------------------
def init_torch_params(key):
    ks = jax.random.split(key, 10)
    s = 1.0 / jnp.sqrt(H)
    u = lambda k, shape, lim: jax.random.uniform(k, shape, jnp.float32, -lim, lim)
    tp = dict(
        w_ih_f=u(ks[0], (GATES, D), s), w_hh_f=u(ks[1], (GATES, H), s),
        b_ih_f=u(ks[2], (GATES,), s),   b_hh_f=u(ks[3], (GATES,), s),
        w_ih_b=u(ks[4], (GATES, D), s), w_hh_b=u(ks[5], (GATES, H), s),
        b_ih_b=u(ks[6], (GATES,), s),   b_hh_b=u(ks[7], (GATES,), s),
    )
    s2 = 1.0 / jnp.sqrt(EMB)
    tp["w_red"] = u(ks[8], (OUT, EMB), s2)   # Linear(2560, 512).weight
    tp["b_red"] = u(ks[9], (OUT,), s2)
    return tp


def pack_params(tp):
    def fold(b_ih, b_hh):
        # r,z gates: b_ih + b_hh pre-summed; n gate keeps only b_in here
        # (b_hn is applied inside r * (gh_n + b_hn) in the kernel).
        return jnp.concatenate([b_ih[:2 * H] + b_hh[:2 * H], b_ih[2 * H:]])

    wih = jnp.concatenate([tp["w_ih_f"].T, tp["w_ih_b"].T], axis=1)   # (D, 6H)
    wih = jnp.pad(wih, ((0, DPAD - D), (0, 0)))                       # (128, 6H)
    gib = jnp.concatenate([fold(tp["b_ih_f"], tp["b_hh_f"]),
                           fold(tp["b_ih_b"], tp["b_hh_b"])]).reshape(1, GATES2)
    return (
        wih.astype(jnp.bfloat16),
        gib,                                        # f32
        tp["w_hh_f"].T.astype(jnp.bfloat16),        # (H, 3H)
        tp["w_hh_b"].T.astype(jnp.bfloat16),
        tp["b_hh_f"][2 * H:].reshape(1, H),         # f32
        tp["b_hh_b"][2 * H:].reshape(1, H),
        tp["w_red"].T.astype(jnp.bfloat16),         # (EMB, OUT)
        tp["b_red"].reshape(1, OUT),                # f32
    )


def reference_forward(x, tp):
    """Pure-JAX f32 reference replicating PyTorch bidirectional GRU + flatten + linear."""
    B = x.shape[0]

    def direction(w_ih, w_hh, b_ih, b_hh, xs):
        h = jnp.zeros((B, H), jnp.float32)
        outs = []
        for x_t in xs:
            gi = x_t @ w_ih.T + b_ih
            gh = h @ w_hh.T + b_hh
            r = jax.nn.sigmoid(gi[:, :H] + gh[:, :H])
            z = jax.nn.sigmoid(gi[:, H:2 * H] + gh[:, H:2 * H])
            n = jnp.tanh(gi[:, 2 * H:] + r * gh[:, 2 * H:])
            h = (1.0 - z) * n + z * h
            outs.append(h)
        return outs

    xs = [x[:, t, :] for t in range(T)]
    outs_f = direction(tp["w_ih_f"], tp["w_hh_f"], tp["b_ih_f"], tp["b_hh_f"], xs)
    outs_b = direction(tp["w_ih_b"], tp["w_hh_b"], tp["b_ih_b"], tp["b_hh_b"],
                       xs[::-1])[::-1]
    emb = jnp.concatenate(
        [jnp.concatenate([outs_f[t], outs_b[t]], axis=-1) for t in range(T)],
        axis=-1)                                           # (B, T*2H)
    return emb @ tp["w_red"].T + tp["b_red"]


if __name__ == "__main__":
    key = jax.random.PRNGKey(0)
    k_x, k_p = jax.random.split(key)

    B = 2
    x = jax.random.normal(k_x, (B, T, D), jnp.float32)     # (2, 5, 96)
    tp = init_torch_params(k_p)
    params = pack_params(tp)

    out = jax.block_until_ready(extractor_forward(x, params))
    assert out.shape == (B, OUT)

    ref = reference_forward(x, tp)
    max_err = float(jnp.max(jnp.abs(out - ref)))
    # bf16 matmul operands + bf16 gi scratch with f32 accumulation -> loose tol.
    assert jnp.allclose(out, ref, rtol=4e-2, atol=4e-2), max_err

    print("KERNEL_OK")
</pallas_src>

<mosaic_0001>
module attributes {stable_mosaic.version = 11 : i64} {
  func.func @extractor_kernel(%arg0: i32, %arg1: memref<5x16x128xbf16, #tpu.memory_space<vmem>>, %arg2: memref<128x1536xbf16, #tpu.memory_space<vmem>>, %arg3: memref<1x1536xf32, #tpu.memory_space<vmem>>, %arg4: memref<256x768xbf16, #tpu.memory_space<vmem>>, %arg5: memref<256x768xbf16, #tpu.memory_space<vmem>>, %arg6: memref<1x256xf32, #tpu.memory_space<vmem>>, %arg7: memref<1x256xf32, #tpu.memory_space<vmem>>, %arg8: memref<2560x512xbf16, #tpu.memory_space<vmem>>, %arg9: memref<1x512xf32, #tpu.memory_space<vmem>>, %arg10: memref<16x512xf32, #tpu.memory_space<vmem>>, %arg11: memref<80x1536xbf16, #tpu.memory_space<vmem>>, %arg12: memref<16x512xf32, #tpu.memory_space<vmem>>) attributes {dimension_semantics = [#tpu.dimension_semantics<parallel>], iteration_bounds = array<i64: 1>, scalar_prefetch = 0 : i64, scratch_operands = 2 : i64, tpu.core_type = #tpu.core_type<tc>, window_params = [{transform_indices = @transform_0, window_bounds = array<i64: 5, 16, 128>}, {pipeline_mode = #tpu.pipeline_mode<synchronous>, transform_indices = @transform_1, window_bounds = array<i64: 128, 1536>}, {pipeline_mode = #tpu.pipeline_mode<synchronous>, transform_indices = @transform_2, window_bounds = array<i64: 1, 1536>}, {pipeline_mode = #tpu.pipeline_mode<synchronous>, transform_indices = @transform_3, window_bounds = array<i64: 256, 768>}, {pipeline_mode = #tpu.pipeline_mode<synchronous>, transform_indices = @transform_4, window_bounds = array<i64: 256, 768>}, {pipeline_mode = #tpu.pipeline_mode<synchronous>, transform_indices = @transform_5, window_bounds = array<i64: 1, 256>}, {pipeline_mode = #tpu.pipeline_mode<synchronous>, transform_indices = @transform_6, window_bounds = array<i64: 1, 256>}, {pipeline_mode = #tpu.pipeline_mode<synchronous>, transform_indices = @transform_7, window_bounds = array<i64: 2560, 512>}, {pipeline_mode = #tpu.pipeline_mode<synchronous>, transform_indices = @transform_8, window_bounds = array<i64: 1, 512>}, {transform_indices = @transform_9, window_bounds = array<i64: 16, 512>}]} {
    %c0 = arith.constant 0 : index
    %c0_0 = arith.constant 0 : index
    %c0_1 = arith.constant 0 : index
    %0 = vector.load %arg1[%c0, %c0_0, %c0_1] : memref<5x16x128xbf16, #tpu.memory_space<vmem>>, vector<5x16x128xbf16>
    %1 = vector.shape_cast %0 : vector<5x16x128xbf16> to vector<80x128xbf16>
    %c0_2 = arith.constant 0 : index
    %c0_3 = arith.constant 0 : index
    %2 = vector.load %arg2[%c0_2, %c0_3] : memref<128x1536xbf16, #tpu.memory_space<vmem>>, vector<128x1536xbf16>
    %cst = arith.constant dense<0.000000e+00> : vector<80x1536xf32>
    %3 = tpu.matmul %1, %2, %cst {dimension_numbers = #tpu.dot_dimension_numbers<[1], [0], [0], [1], [0, 0, 1, 1], [], []>} : vector<80x128xbf16>, vector<128x1536xbf16>, vector<80x1536xf32> -> vector<80x1536xf32>
    %c0_4 = arith.constant 0 : index
    %c0_5 = arith.constant 0 : index
    %4 = vector.load %arg3[%c0_4, %c0_5] : memref<1x1536xf32, #tpu.memory_space<vmem>>, vector<1x1536xf32>
    %5 = vector.broadcast %4 : vector<1x1536xf32> to vector<80x1536xf32>
    %6 = arith.addf %3, %5 : vector<80x1536xf32>
    %7 = arith.truncf %6 : vector<80x1536xf32> to vector<80x1536xbf16>
    %c0_6 = arith.constant 0 : index
    %c0_7 = arith.constant 0 : index
    %8 = vector.load %arg11[%c0_6, %c0_7] : memref<80x1536xbf16, #tpu.memory_space<vmem>>, vector<80x1536xbf16>
    tpu.vector_store %arg11[%c0_6, %c0_7], %7 {strides = array<i32>} : memref<80x1536xbf16, #tpu.memory_space<vmem>>, vector<80x1536xbf16>,
    %c0_8 = arith.constant 0 : index
    %c0_9 = arith.constant 0 : index
    %9 = vector.load %arg4[%c0_8, %c0_9] : memref<256x768xbf16, #tpu.memory_space<vmem>>, vector<256x768xbf16>
    %c0_10 = arith.constant 0 : index
    %c0_11 = arith.constant 0 : index
    %10 = vector.load %arg5[%c0_10, %c0_11] : memref<256x768xbf16, #tpu.memory_space<vmem>>, vector<256x768xbf16>
    %c0_12 = arith.constant 0 : index
    %c0_13 = arith.constant 0 : index
    %11 = vector.load %arg6[%c0_12, %c0_13] : memref<1x256xf32, #tpu.memory_space<vmem>>, vector<1x256xf32>
    %12 = vector.shape_cast %11 : vector<1x256xf32> to vector<1x256xf32>
    %13 = vector.broadcast %12 : vector<1x256xf32> to vector<16x256xf32>
    %c0_14 = arith.constant 0 : index
    %c0_15 = arith.constant 0 : index
    %14 = vector.load %arg7[%c0_14, %c0_15] : memref<1x256xf32, #tpu.memory_space<vmem>>, vector<1x256xf32>
    %15 = vector.shape_cast %14 : vector<1x256xf32> to vector<1x256xf32>
    %16 = vector.broadcast %15 : vector<1x256xf32> to vector<16x256xf32>
    %cst_16 = arith.constant 0.000000e+00 : f32
    %17 = vector.broadcast %cst_16 : f32 to vector<16x256xf32>
    %cst_17 = arith.constant 0.000000e+00 : f32
    %18 = vector.broadcast %cst_17 : f32 to vector<16x256xf32>
    %c0_18 = arith.constant 0 : index
    %c0_19 = arith.constant 0 : index
    %19 = vector.load %arg9[%c0_18, %c0_19] : memref<1x512xf32, #tpu.memory_space<vmem>>, vector<1x512xf32>
    %20 = vector.shape_cast %19 : vector<1x512xf32> to vector<1x512xf32>
    %21 = vector.broadcast %20 : vector<1x512xf32> to vector<16x512xf32>
    %c0_20 = arith.constant 0 : index
    %c0_21 = arith.constant 0 : index
    %22 = vector.load %arg12[%c0_20, %c0_21] : memref<16x512xf32, #tpu.memory_space<vmem>>, vector<16x512xf32>
    tpu.vector_store %arg12[%c0_20, %c0_21], %21 {strides = array<i32>} : memref<16x512xf32, #tpu.memory_space<vmem>>, vector<16x512xf32>,
    %c0_22 = arith.constant 0 : index
    %c0_23 = arith.constant 0 : index
    %23 = vector.load %arg11[%c0_22, %c0_23] : memref<80x1536xbf16, #tpu.memory_space<vmem>>, vector<16x768xbf16>
    %c64 = arith.constant 64 : index
    %c768 = arith.constant 768 : index
    %24 = vector.load %arg11[%c64, %c768] : memref<80x1536xbf16, #tpu.memory_space<vmem>>, vector<16x768xbf16>
    %25 = arith.truncf %17 : vector<16x256xf32> to vector<16x256xbf16>
    %cst_24 = arith.constant dense<0.000000e+00> : vector<16x768xf32>
    %26 = tpu.matmul %25, %9, %cst_24 {dimension_numbers = #tpu.dot_dimension_numbers<[1], [0], [0], [1], [0, 0, 1, 1], [], []>} : vector<16x256xbf16>, vector<256x768xbf16>, vector<16x768xf32> -> vector<16x768xf32>
    %27 = vector.extract_strided_slice %23 {offsets = [0, 0], sizes = [16, 512], strides = [1, 1]} : vector<16x768xbf16> to vector<16x512xbf16>
    %28 = vector.extract_strided_slice %26 {offsets = [0, 0], sizes = [16, 512], strides = [1, 1]} : vector<16x768xf32> to vector<16x512xf32>
    %29 = arith.extf %27 : vector<16x512xbf16> to vector<16x512xf32>
    %30 = arith.addf %29, %28 : vector<16x512xf32>
    %31 = arith.negf %30 : vector<16x512xf32>
    %32 = math.exp %31 : vector<16x512xf32>
    %cst_25 = arith.constant 1.000000e+00 : f32
    %33 = vector.broadcast %cst_25 : f32 to vector<16x512xf32>
    %34 = arith.addf %33, %32 : vector<16x512xf32>
    %35 = arith.divf %33, %34 : vector<16x512xf32>
    %36 = vector.extract_strided_slice %35 {offsets = [0, 0], sizes = [16, 256], strides = [1, 1]} : vector<16x512xf32> to vector<16x256xf32>
    %37 = vector.extract_strided_slice %35 {offsets = [0, 256], sizes = [16, 256], strides = [1, 1]} : vector<16x512xf32> to vector<16x256xf32>
    %38 = vector.extract_strided_slice %23 {offsets = [0, 512], sizes = [16, 256], strides = [1, 1]} : vector<16x768xbf16> to vector<16x256xbf16>
    %39 = vector.extract_strided_slice %26 {offsets = [0, 512], sizes = [16, 256], strides = [1, 1]} : vector<16x768xf32> to vector<16x256xf32>
    %40 = arith.addf %39, %13 : vector<16x256xf32>
    %41 = arith.mulf %36, %40 : vector<16x256xf32>
    %42 = arith.extf %38 : vector<16x256xbf16> to vector<16x256xf32>
    %43 = arith.addf %42, %41 : vector<16x256xf32>
    %44 = math.tanh %43 : vector<16x256xf32>
    %cst_26 = arith.constant 1.000000e+00 : f32
    %45 = vector.broadcast %cst_26 : f32 to vector<16x256xf32>
    %46 = arith.subf %45, %37 : vector<16x256xf32>
    %47 = arith.mulf %46, %44 : vector<16x256xf32>
    %48 = arith.mulf %37, %17 : vector<16x256xf32>
    %49 = arith.addf %47, %48 : vector<16x256xf32>
    %50 = arith.truncf %18 : vector<16x256xf32> to vector<16x256xbf16>
    %cst_27 = arith.constant dense<0.000000e+00> : vector<16x768xf32>
    %51 = tpu.matmul %50, %10, %cst_27 {dimension_numbers = #tpu.dot_dimension_numbers<[1], [0], [0], [1], [0, 0, 1, 1], [], []>} : vector<16x256xbf16>, vector<256x768xbf16>, vector<16x768xf32> -> vector<16x768xf32>
    %52 = vector.extract_strided_slice %24 {offsets = [0, 0], sizes = [16, 512], strides = [1, 1]} : vector<16x768xbf16> to vector<16x512xbf16>
    %53 = vector.extract_strided_slice %51 {offsets = [0, 0], sizes = [16, 512], strides = [1, 1]} : vector<16x768xf32> to vector<16x512xf32>
    %54 = arith.extf %52 : vector<16x512xbf16> to vector<16x512xf32>
    %55 = arith.addf %54, %53 : vector<16x512xf32>
    %56 = arith.negf %55 : vector<16x512xf32>
    %57 = math.exp %56 : vector<16x512xf32>
    %cst_28 = arith.constant 1.000000e+00 : f32
    %58 = vector.broadcast %cst_28 : f32 to vector<16x512xf32>
    %59 = arith.addf %58, %57 : vector<16x512xf32>
    %60 = arith.divf %58, %59 : vector<16x512xf32>
    %61 = vector.extract_strided_slice %60 {offsets = [0, 0], sizes = [16, 256], strides = [1, 1]} : vector<16x512xf32> to vector<16x256xf32>
    %62 = vector.extract_strided_slice %60 {offsets = [0, 256], sizes = [16, 256], strides = [1, 1]} : vector<16x512xf32> to vector<16x256xf32>
    %63 = vector.extract_strided_slice %24 {offsets = [0, 512], sizes = [16, 256], strides = [1, 1]} : vector<16x768xbf16> to vector<16x256xbf16>
    %64 = vector.extract_strided_slice %51 {offsets = [0, 512], sizes = [16, 256], strides = [1, 1]} : vector<16x768xf32> to vector<16x256xf32>
    %65 = arith.addf %64, %16 : vector<16x256xf32>
    %66 = arith.mulf %61, %65 : vector<16x256xf32>
    %67 = arith.extf %63 : vector<16x256xbf16> to vector<16x256xf32>
    %68 = arith.addf %67, %66 : vector<16x256xf32>
    %69 = math.tanh %68 : vector<16x256xf32>
    %cst_29 = arith.constant 1.000000e+00 : f32
    %70 = vector.broadcast %cst_29 : f32 to vector<16x256xf32>
    %71 = arith.subf %70, %62 : vector<16x256xf32>
    %72 = arith.mulf %71, %69 : vector<16x256xf32>
    %73 = arith.mulf %62, %18 : vector<16x256xf32>
    %74 = arith.addf %72, %73 : vector<16x256xf32>
    %75 = arith.truncf %49 : vector<16x256xf32> to vector<16x256xbf16>
    %c0_30 = arith.constant 0 : index
    %c0_31 = arith.constant 0 : index
    %76 = vector.load %arg8[%c0_30, %c0_31] : memref<2560x512xbf16, #tpu.memory_space<vmem>>, vector<256x512xbf16>
    %cst_32 = arith.constant dense<0.000000e+00> : vector<16x512xf32>
    %77 = tpu.matmul %75, %76, %cst_32 {dimension_numbers = #tpu.dot_dimension_numbers<[1], [0], [0], [1], [0, 0, 1, 1], [], []>} : vector<16x256xbf16>, vector<256x512xbf16>, vector<16x512xf32> -> vector<16x512xf32>
    %78 = arith.truncf %74 : vector<16x256xf32> to vector<16x256xbf16>
    %c2304 = arith.constant 2304 : index
    %c0_33 = arith.constant 0 : index
    %79 = vector.load %arg8[%c2304, %c0_33] : memref<2560x512xbf16, #tpu.memory_space<vmem>>, vector<256x512xbf16>
    %cst_34 = arith.constant dense<0.000000e+00> : vector<16x512xf32>
    %80 = tpu.matmul %78, %79, %cst_34 {dimension_numbers = #tpu.dot_dimension_numbers<[1], [0], [0], [1], [0, 0, 1, 1], [], []>} : vector<16x256xbf16>, vector<256x512xbf16>, vector<16x512xf32> -> vector<16x512xf32>
    %c0_35 = arith.constant 0 : index
    %c0_36 = arith.constant 0 : index
    %81 = vector.load %arg12[%c0_35, %c0_36] : memref<16x512xf32, #tpu.memory_space<vmem>>, vector<16x512xf32>
    %82 = arith.addf %77, %80 : vector<16x512xf32>
    %83 = arith.addf %81, %82 : vector<16x512xf32>
    %c0_37 = arith.constant 0 : index
    %c0_38 = arith.constant 0 : index
    %84 = vector.load %arg12[%c0_37, %c0_38] : memref<16x512xf32, #tpu.memory_space<vmem>>, vector<16x512xf32>
    tpu.vector_store %arg12[%c0_37, %c0_38], %83 {strides = array<i32>} : memref<16x512xf32, #tpu.memory_space<vmem>>, vector<16x512xf32>,
    %c16 = arith.constant 16 : index
    %c0_39 = arith.constant 0 : index
    %85 = vector.load %arg11[%c16, %c0_39] : memref<80x1536xbf16, #tpu.memory_space<vmem>>, vector<16x768xbf16>
    %c48 = arith.constant 48 : index
    %c768_40 = arith.constant 768 : index
    %86 = vector.load %arg11[%c48, %c768_40] : memref<80x1536xbf16, #tpu.memory_space<vmem>>, vector<16x768xbf16>
    %87 = arith.truncf %49 : vector<16x256xf32> to vector<16x256xbf16>
    %cst_41 = arith.constant dense<0.000000e+00> : vector<16x768xf32>
    %88 = tpu.matmul %87, %9, %cst_41 {dimension_numbers = #tpu.dot_dimension_numbers<[1], [0], [0], [1], [0, 0, 1, 1], [], []>} : vector<16x256xbf16>, vector<256x768xbf16>, vector<16x768xf32> -> vector<16x768xf32>
    %89 = vector.extract_strided_slice %85 {offsets = [0, 0], sizes = [16, 512], strides = [1, 1]} : vector<16x768xbf16> to vector<16x512xbf16>
    %90 = vector.extract_strided_slice %88 {offsets = [0, 0], sizes = [16, 512], strides = [1, 1]} : vector<16x768xf32> to vector<16x512xf32>
    %91 = arith.extf %89 : vector<16x512xbf16> to vector<16x512xf32>
    %92 = arith.addf %91, %90 : vector<16x512xf32>
    %93 = arith.negf %92 : vector<16x512xf32>
    %94 = math.exp %93 : vector<16x512xf32>
    %cst_42 = arith.constant 1.000000e+00 : f32
    %95 = vector.broadcast %cst_42 : f32 to vector<16x512xf32>
    %96 = arith.addf %95, %94 : vector<16x512xf32>
    %97 = arith.divf %95, %96 : vector<16x512xf32>
    %98 = vector.extract_strided_slice %97 {offsets = [0, 0], sizes = [16, 256], strides = [1, 1]} : vector<16x512xf32> to vector<16x256xf32>
    %99 = vector.extract_strided_slice %97 {offsets = [0, 256], sizes = [16, 256], strides = [1, 1]} : vector<16x512xf32> to vector<16x256xf32>
    %100 = vector.extract_strided_slice %85 {offsets = [0, 512], sizes = [16, 256], strides = [1, 1]} : vector<16x768xbf16> to vector<16x256xbf16>
    %101 = vector.extract_strided_slice %88 {offsets = [0, 512], sizes = [16, 256], strides = [1, 1]} : vector<16x768xf32> to vector<16x256xf32>
    %102 = arith.addf %101, %13 : vector<16x256xf32>
    %103 = arith.mulf %98, %102 : vector<16x256xf32>
    %104 = arith.extf %100 : vector<16x256xbf16> to vector<16x256xf32>
    %105 = arith.addf %104, %103 : vector<16x256xf32>
    %106 = math.tanh %105 : vector<16x256xf32>
    %cst_43 = arith.constant 1.000000e+00 : f32
    %107 = vector.broadcast %cst_43 : f32 to vector<16x256xf32>
    %108 = arith.subf %107, %99 : vector<16x256xf32>
    %109 = arith.mulf %108, %106 : vector<16x256xf32>
    %110 = arith.mulf %99, %49 : vector<16x256xf32>
    %111 = arith.addf %109, %110 : vector<16x256xf32>
    %112 = arith.truncf %74 : vector<16x256xf32> to vector<16x256xbf16>
    %cst_44 = arith.constant dense<0.000000e+00> : vector<16x768xf32>
    %113 = tpu.matmul %112, %10, %cst_44 {dimension_numbers = #tpu.dot_dimension_numbers<[1], [0], [0], [1], [0, 0, 1, 1], [], []>} : vector<16x256xbf16>, vector<256x768xbf16>, vector<16x768xf32> -> vector<16x768xf32>
    %114 = vector.extract_strided_slice %86 {offsets = [0, 0], sizes = [16, 512], strides = [1, 1]} : vector<16x768xbf16> to vector<16x512xbf16>
    %115 = vector.extract_strided_slice %113 {offsets = [0, 0], sizes = [16, 512], strides = [1, 1]} : vector<16x768xf32> to vector<16x512xf32>
    %116 = arith.extf %114 : vector<16x512xbf16> to vector<16x512xf32>
    %117 = arith.addf %116, %115 : vector<16x512xf32>
    %118 = arith.negf %117 : vector<16x512xf32>
    %119 = math.exp %118 : vector<16x512xf32>
    %cst_45 = arith.constant 1.000000e+00 : f32
    %120 = vector.broadcast %cst_45 : f32 to vector<16x512xf32>
    %121 = arith.addf %120, %119 : vector<16x512xf32>
    %122 = arith.divf %120, %121 : vector<16x512xf32>
    %123 = vector.extract_strided_slice %122 {offsets = [0, 0], sizes = [16, 256], strides = [1, 1]} : vector<16x512xf32> to vector<16x256xf32>
    %124 = vector.extract_strided_slice %122 {offsets = [0, 256], sizes = [16, 256], strides = [1, 1]} : vector<16x512xf32> to vector<16x256xf32>
    %125 = vector.extract_strided_slice %86 {offsets = [0, 512], sizes = [16, 256], strides = [1, 1]} : vector<16x768xbf16> to vector<16x256xbf16>
    %126 = vector.extract_strided_slice %113 {offsets = [0, 512], sizes = [16, 256], strides = [1, 1]} : vector<16x768xf32> to vector<16x256xf32>
    %127 = arith.addf %126, %16 : vector<16x256xf32>
    %128 = arith.mulf %123, %127 : vector<16x256xf32>
    %129 = arith.extf %125 : vector<16x256xbf16> to vector<16x256xf32>
    %130 = arith.addf %129, %128 : vector<16x256xf32>
    %131 = math.tanh %130 : vector<16x256xf32>
    %cst_46 = arith.constant 1.000000e+00 : f32
    %132 = vector.broadcast %cst_46 : f32 to vector<16x256xf32>
    %133 = arith.subf %132, %124 : vector<16x256xf32>
    %134 = arith.mulf %133, %131 : vector<16x256xf32>
    %135 = arith.mulf %124, %74 : vector<16x256xf32>
    %136 = arith.addf %134, %135 : vector<16x256xf32>
    %137 = arith.truncf %111 : vector<16x256xf32> to vector<16x256xbf16>
    %c512 = arith.constant 512 : index
    %c0_47 = arith.constant 0 : index
    %138 = vector.load %arg8[%c512, %c0_47] : memref<2560x512xbf16, #tpu.memory_space<vmem>>, vector<256x512xbf16>
    %cst_48 = arith.constant dense<0.000000e+00> : vector<16x512xf32>
    %139 = tpu.matmul %137, %138, %cst_48 {dimension_numbers = #tpu.dot_dimension_numbers<[1], [0], [0], [1], [0, 0, 1, 1], [], []>} : vector<16x256xbf16>, vector<256x512xbf16>, vector<16x512xf32> -> vector<16x512xf32>
    %140 = arith.truncf %136 : vector<16x256xf32> to vector<16x256xbf16>
    %c1792 = arith.constant 1792 : index
    %c0_49 = arith.constant 0 : index
    %141 = vector.load %arg8[%c1792, %c0_49] : memref<2560x512xbf16, #tpu.memory_space<vmem>>, vector<256x512xbf16>
    %cst_50 = arith.constant dense<0.000000e+00> : vector<16x512xf32>
    %142 = tpu.matmul %140, %141, %cst_50 {dimension_numbers = #tpu.dot_dimension_numbers<[1], [0], [0], [1], [0, 0, 1, 1], [], []>} : vector<16x256xbf16>, vector<256x512xbf16>, vector<16x512xf32> -> vector<16x512xf32>
    %c0_51 = arith.constant 0 : index
    %c0_52 = arith.constant 0 : index
    %143 = vector.load %arg12[%c0_51, %c0_52] : memref<16x512xf32, #tpu.memory_space<vmem>>, vector<16x512xf32>
    %144 = arith.addf %139, %142 : vector<16x512xf32>
    %145 = arith.addf %143, %144 : vector<16x512xf32>
    %c0_53 = arith.constant 0 : index
    %c0_54 = arith.constant 0 : index
    %146 = vector.load %arg12[%c0_53, %c0_54] : memref<16x512xf32, #tpu.memory_space<vmem>>, vector<16x512xf32>
    tpu.vector_store %arg12[%c0_53, %c0_54], %145 {strides = array<i32>} : memref<16x512xf32, #tpu.memory_space<vmem>>, vector<16x512xf32>,
    %c32 = arith.constant 32 : index
    %c0_55 = arith.constant 0 : index
    %147 = vector.load %arg11[%c32, %c0_55] : memref<80x1536xbf16, #tpu.memory_space<vmem>>, vector<16x768xbf16>
    %c32_56 = arith.constant 32 : index
    %c768_57 = arith.constant 768 : index
    %148 = vector.load %arg11[%c32_56, %c768_57] : memref<80x1536xbf16, #tpu.memory_space<vmem>>, vector<16x768xbf16>
    %149 = arith.truncf %111 : vector<16x256xf32> to vector<16x256xbf16>
    %cst_58 = arith.constant dense<0.000000e+00> : vector<16x768xf32>
    %150 = tpu.matmul %149, %9, %cst_58 {dimension_numbers = #tpu.dot_dimension_numbers<[1], [0], [0], [1], [0, 0, 1, 1], [], []>} : vector<16x256xbf16>, vector<256x768xbf16>, vector<16x768xf32> -> vector<16x768xf32>
    %151 = vector.extract_strided_slice %147 {offsets = [0, 0], sizes = [16, 512], strides = [1, 1]} : vector<16x768xbf16> to vector<16x512xbf16>
    %152 = vector.extract_strided_slice %150 {offsets = [0, 0], sizes = [16, 512], strides = [1, 1]} : vector<16x768xf32> to vector<16x512xf32>
    %153 = arith.extf %151 : vector<16x512xbf16> to vector<16x512xf32>
    %154 = arith.addf %153, %152 : vector<16x512xf32>
    %155 = arith.negf %154 : vector<16x512xf32>
    %156 = math.exp %155 : vector<16x512xf32>
    %cst_59 = arith.constant 1.000000e+00 : f32
    %157 = vector.broadcast %cst_59 : f32 to vector<16x512xf32>
    %158 = arith.addf %157, %156 : vector<16x512xf32>
    %159 = arith.divf %157, %158 : vector<16x512xf32>
    %160 = vector.extract_strided_slice %159 {offsets = [0, 0], sizes = [16, 256], strides = [1, 1]} : vector<16x512xf32> to vector<16x256xf32>
    %161 = vector.extract_strided_slice %159 {offsets = [0, 256], sizes = [16, 256], strides = [1, 1]} : vector<16x512xf32> to vector<16x256xf32>
    %162 = vector.extract_strided_slice %147 {offsets = [0, 512], sizes = [16, 256], strides = [1, 1]} : vector<16x768xbf16> to vector<16x256xbf16>
    %163 = vector.extract_strided_slice %150 {offsets = [0, 512], sizes = [16, 256], strides = [1, 1]} : vector<16x768xf32> to vector<16x256xf32>
    %164 = arith.addf %163, %13 : vector<16x256xf32>
    %165 = arith.mulf %160, %164 : vector<16x256xf32>
    %166 = arith.extf %162 : vector<16x256xbf16> to vector<16x256xf32>
    %167 = arith.addf %166, %165 : vector<16x256xf32>
    %168 = math.tanh %167 : vector<16x256xf32>
    %cst_60 = arith.constant 1.000000e+00 : f32
    %169 = vector.broadcast %cst_60 : f32 to vector<16x256xf32>
    %170 = arith.subf %169, %161 : vector<16x256xf32>
    %171 = arith.mulf %170, %168 : vector<16x256xf32>
    %172 = arith.mulf %161, %111 : vector<16x256xf32>
    %173 = arith.addf %171, %172 : vector<16x256xf32>
    %174 = arith.truncf %136 : vector<16x256xf32> to vector<16x256xbf16>
    %cst_61 = arith.constant dense<0.000000e+00> : vector<16x768xf32>
    %175 = tpu.matmul %174, %10, %cst_61 {dimension_numbers = #tpu.dot_dimension_numbers<[1], [0], [0], [1], [0, 0, 1, 1], [], []>} : vector<16x256xbf16>, vector<256x768xbf16>, vector<16x768xf32> -> vector<16x768xf32>
    %176 = vector.extract_strided_slice %148 {offsets = [0, 0], sizes = [16, 512], strides = [1, 1]} : vector<16x768xbf16> to vector<16x512xbf16>
    %177 = vector.extract_strided_slice %175 {offsets = [0, 0], sizes = [16, 512], strides = [1, 1]} : vector<16x768xf32> to vector<16x512xf32>
    %178 = arith.extf %176 : vector<16x512xbf16> to vector<16x512xf32>
    %179 = arith.addf %178, %177 : vector<16x512xf32>
    %180 = arith.negf %179 : vector<16x512xf32>
    %181 = math.exp %180 : vector<16x512xf32>
    %cst_62 = arith.constant 1.000000e+00 : f32
    %182 = vector.broadcast %cst_62 : f32 to vector<16x512xf32>
    %183 = arith.addf %182, %181 : vector<16x512xf32>
    %184 = arith.divf %182, %183 : vector<16x512xf32>
    %185 = vector.extract_strided_slice %184 {offsets = [0, 0], sizes = [16, 256], strides = [1, 1]} : vector<16x512xf32> to vector<16x256xf32>
    %186 = vector.extract_strided_slice %184 {offsets = [0, 256], sizes = [16, 256], strides = [1, 1]} : vector<16x512xf32> to vector<16x256xf32>
    %187 = vector.extract_strided_slice %148 {offsets = [0, 512], sizes = [16, 256], strides = [1, 1]} : vector<16x768xbf16> to vector<16x256xbf16>
    %188 = vector.extract_strided_slice %175 {offsets = [0, 512], sizes = [16, 256], strides = [1, 1]} : vector<16x768xf32> to vector<16x256xf32>
    %189 = arith.addf %188, %16 : vector<16x256xf32>
    %190 = arith.mulf %185, %189 : vector<16x256xf32>
    %191 = arith.extf %187 : vector<16x256xbf16> to vector<16x256xf32>
    %192 = arith.addf %191, %190 : vector<16x256xf32>
    %193 = math.tanh %192 : vector<16x256xf32>
    %cst_63 = arith.constant 1.000000e+00 : f32
    %194 = vector.broadcast %cst_63 : f32 to vector<16x256xf32>
    %195 = arith.subf %194, %186 : vector<16x256xf32>
    %196 = arith.mulf %195, %193 : vector<16x256xf32>
    %197 = arith.mulf %186, %136 : vector<16x256xf32>
    %198 = arith.addf %196, %197 : vector<16x256xf32>
    %199 = arith.truncf %173 : vector<16x256xf32> to vector<16x256xbf16>
    %c1024 = arith.constant 1024 : index
    %c0_64 = arith.constant 0 : index
    %200 = vector.load %arg8[%c1024, %c0_64] : memref<2560x512xbf16, #tpu.memory_space<vmem>>, vector<256x512xbf16>
    %cst_65 = arith.constant dense<0.000000e+00> : vector<16x512xf32>
    %201 = tpu.matmul %199, %200, %cst_65 {dimension_numbers = #tpu.dot_dimension_numbers<[1], [0], [0], [1], [0, 0, 1, 1], [], []>} : vector<16x256xbf16>, vector<256x512xbf16>, vector<16x512xf32> -> vector<16x512xf32>
    %202 = arith.truncf %198 : vector<16x256xf32> to vector<16x256xbf16>
    %c1280 = arith.constant 1280 : index
    %c0_66 = arith.constant 0 : index
    %203 = vector.load %arg8[%c1280, %c0_66] : memref<2560x512xbf16, #tpu.memory_space<vmem>>, vector<256x512xbf16>
    %cst_67 = arith.constant dense<0.000000e+00> : vector<16x512xf32>
    %204 = tpu.matmul %202, %203, %cst_67 {dimension_numbers = #tpu.dot_dimension_numbers<[1], [0], [0], [1], [0, 0, 1, 1], [], []>} : vector<16x256xbf16>, vector<256x512xbf16>, vector<16x512xf32> -> vector<16x512xf32>
    %c0_68 = arith.constant 0 : index
    %c0_69 = arith.constant 0 : index
    %205 = vector.load %arg12[%c0_68, %c0_69] : memref<16x512xf32, #tpu.memory_space<vmem>>, vector<16x512xf32>
    %206 = arith.addf %201, %204 : vector<16x512xf32>
    %207 = arith.addf %205, %206 : vector<16x512xf32>
    %c0_70 = arith.constant 0 : index
    %c0_71 = arith.constant 0 : index
    %208 = vector.load %arg12[%c0_70, %c0_71] : memref<16x512xf32, #tpu.memory_space<vmem>>, vector<16x512xf32>
    tpu.vector_store %arg12[%c0_70, %c0_71], %207 {strides = array<i32>} : memref<16x512xf32, #tpu.memory_space<vmem>>, vector<16x512xf32>,
    %c48_72 = arith.constant 48 : index
    %c0_73 = arith.constant 0 : index
    %209 = vector.load %arg11[%c48_72, %c0_73] : memref<80x1536xbf16, #tpu.memory_space<vmem>>, vector<16x768xbf16>
    %c16_74 = arith.constant 16 : index
    %c768_75 = arith.constant 768 : index
    %210 = vector.load %arg11[%c16_74, %c768_75] : memref<80x1536xbf16, #tpu.memory_space<vmem>>, vector<16x768xbf16>
    %211 = arith.truncf %173 : vector<16x256xf32> to vector<16x256xbf16>
    %cst_76 = arith.constant dense<0.000000e+00> : vector<16x768xf32>
    %212 = tpu.matmul %211, %9, %cst_76 {dimension_numbers = #tpu.dot_dimension_numbers<[1], [0], [0], [1], [0, 0, 1, 1], [], []>} : vector<16x256xbf16>, vector<256x768xbf16>, vector<16x768xf32> -> vector<16x768xf32>
    %213 = vector.extract_strided_slice %209 {offsets = [0, 0], sizes = [16, 512], strides = [1, 1]} : vector<16x768xbf16> to vector<16x512xbf16>
    %214 = vector.extract_strided_slice %212 {offsets = [0, 0], sizes = [16, 512], strides = [1, 1]} : vector<16x768xf32> to vector<16x512xf32>
    %215 = arith.extf %213 : vector<16x512xbf16> to vector<16x512xf32>
    %216 = arith.addf %215, %214 : vector<16x512xf32>
    %217 = arith.negf %216 : vector<16x512xf32>
    %218 = math.exp %217 : vector<16x512xf32>
    %cst_77 = arith.constant 1.000000e+00 : f32
    %219 = vector.broadcast %cst_77 : f32 to vector<16x512xf32>
    %220 = arith.addf %219, %218 : vector<16x512xf32>
    %221 = arith.divf %219, %220 : vector<16x512xf32>
    %222 = vector.extract_strided_slice %221 {offsets = [0, 0], sizes = [16, 256], strides = [1, 1]} : vector<16x512xf32> to vector<16x256xf32>
    %223 = vector.extract_strided_slice %221 {offsets = [0, 256], sizes = [16, 256], strides = [1, 1]} : vector<16x512xf32> to vector<16x256xf32>
    %224 = vector.extract_strided_slice %209 {offsets = [0, 512], sizes = [16, 256], strides = [1, 1]} : vector<16x768xbf16> to vector<16x256xbf16>
    %225 = vector.extract_strided_slice %212 {offsets = [0, 512], sizes = [16, 256], strides = [1, 1]} : vector<16x768xf32> to vector<16x256xf32>
    %226 = arith.addf %225, %13 : vector<16x256xf32>
    %227 = arith.mulf %222, %226 : vector<16x256xf32>
    %228 = arith.extf %224 : vector<16x256xbf16> to vector<16x256xf32>
    %229 = arith.addf %228, %227 : vector<16x256xf32>
    %230 = math.tanh %229 : vector<16x256xf32>
    %cst_78 = arith.constant 1.000000e+00 : f32
    %231 = vector.broadcast %cst_78 : f32 to vector<16x256xf32>
    %232 = arith.subf %231, %223 : vector<16x256xf32>
    %233 = arith.mulf %232, %230 : vector<16x256xf32>
    %234 = arith.mulf %223, %173 : vector<16x256xf32>
    %235 = arith.addf %233, %234 : vector<16x256xf32>
    %236 = arith.truncf %198 : vector<16x256xf32> to vector<16x256xbf16>
    %cst_79 = arith.constant dense<0.000000e+00> : vector<16x768xf32>
    %237 = tpu.matmul %236, %10, %cst_79 {dimension_numbers = #tpu.dot_dimension_numbers<[1], [0], [0], [1], [0, 0, 1, 1], [], []>} : vector<16x256xbf16>, vector<256x768xbf16>, vector<16x768xf32> -> vector<16x768xf32>
    %238 = vector.extract_strided_slice %210 {offsets = [0, 0], sizes = [16, 512], strides = [1, 1]} : vector<16x768xbf16> to vector<16x512xbf16>
    %239 = vector.extract_strided_slice %237 {offsets = [0, 0], sizes = [16, 512], strides = [1, 1]} : vector<16x768xf32> to vector<16x512xf32>
    %240 = arith.extf %238 : vector<16x512xbf16> to vector<16x512xf32>
    %241 = arith.addf %240, %239 : vector<16x512xf32>
    %242 = arith.negf %241 : vector<16x512xf32>
    %243 = math.exp %242 : vector<16x512xf32>
    %cst_80 = arith.constant 1.000000e+00 : f32
    %244 = vector.broadcast %cst_80 : f32 to vector<16x512xf32>
    %245 = arith.addf %244, %243 : vector<16x512xf32>
    %246 = arith.divf %244, %245 : vector<16x512xf32>
    %247 = vector.extract_strided_slice %246 {offsets = [0, 0], sizes = [16, 256], strides = [1, 1]} : vector<16x512xf32> to vector<16x256xf32>
    %248 = vector.extract_strided_slice %246 {offsets = [0, 256], sizes = [16, 256], strides = [1, 1]} : vector<16x512xf32> to vector<16x256xf32>
    %249 = vector.extract_strided_slice %210 {offsets = [0, 512], sizes = [16, 256], strides = [1, 1]} : vector<16x768xbf16> to vector<16x256xbf16>
    %250 = vector.extract_strided_slice %237 {offsets = [0, 512], sizes = [16, 256], strides = [1, 1]} : vector<16x768xf32> to vector<16x256xf32>
    %251 = arith.addf %250, %16 : vector<16x256xf32>
    %252 = arith.mulf %247, %251 : vector<16x256xf32>
    %253 = arith.extf %249 : vector<16x256xbf16> to vector<16x256xf32>
    %254 = arith.addf %253, %252 : vector<16x256xf32>
    %255 = math.tanh %254 : vector<16x256xf32>
    %cst_81 = arith.constant 1.000000e+00 : f32
    %256 = vector.broadcast %cst_81 : f32 to vector<16x256xf32>
    %257 = arith.subf %256, %248 : vector<16x256xf32>
    %258 = arith.mulf %257, %255 : vector<16x256xf32>
    %259 = arith.mulf %248, %198 : vector<16x256xf32>
    %260 = arith.addf %258, %259 : vector<16x256xf32>
    %261 = arith.truncf %235 : vector<16x256xf32> to vector<16x256xbf16>
    %c1536 = arith.constant 1536 : index
    %c0_82 = arith.constant 0 : index
    %262 = vector.load %arg8[%c1536, %c0_82] : memref<2560x512xbf16, #tpu.memory_space<vmem>>, vector<256x512xbf16>
    %cst_83 = arith.constant dense<0.000000e+00> : vector<16x512xf32>
    %263 = tpu.matmul %261, %262, %cst_83 {dimension_numbers = #tpu.dot_dimension_numbers<[1], [0], [0], [1], [0, 0, 1, 1], [], []>} : vector<16x256xbf16>, vector<256x512xbf16>, vector<16x512xf32> -> vector<16x512xf32>
    %264 = arith.truncf %260 : vector<16x256xf32> to vector<16x256xbf16>
    %c768_84 = arith.constant 768 : index
    %c0_85 = arith.constant 0 : index
    %265 = vector.load %arg8[%c768_84, %c0_85] : memref<2560x512xbf16, #tpu.memory_space<vmem>>, vector<256x512xbf16>
    %cst_86 = arith.constant dense<0.000000e+00> : vector<16x512xf32>
    %266 = tpu.matmul %264, %265, %cst_86 {dimension_numbers = #tpu.dot_dimension_numbers<[1], [0], [0], [1], [0, 0, 1, 1], [], []>} : vector<16x256xbf16>, vector<256x512xbf16>, vector<16x512xf32> -> vector<16x512xf32>
    %c0_87 = arith.constant 0 : index
    %c0_88 = arith.constant 0 : index
    %267 = vector.load %arg12[%c0_87, %c0_88] : memref<16x512xf32, #tpu.memory_space<vmem>>, vector<16x512xf32>
    %268 = arith.addf %263, %266 : vector<16x512xf32>
    %269 = arith.addf %267, %268 : vector<16x512xf32>
    %c0_89 = arith.constant 0 : index
    %c0_90 = arith.constant 0 : index
    %270 = vector.load %arg12[%c0_89, %c0_90] : memref<16x512xf32, #tpu.memory_space<vmem>>, vector<16x512xf32>
    tpu.vector_store %arg12[%c0_89, %c0_90], %269 {strides = array<i32>} : memref<16x512xf32, #tpu.memory_space<vmem>>, vector<16x512xf32>,
    %c64_91 = arith.constant 64 : index
    %c0_92 = arith.constant 0 : index
    %271 = vector.load %arg11[%c64_91, %c0_92] : memref<80x1536xbf16, #tpu.memory_space<vmem>>, vector<16x768xbf16>
    %c0_93 = arith.constant 0 : index
    %c768_94 = arith.constant 768 : index
    %272 = vector.load %arg11[%c0_93, %c768_94] : memref<80x1536xbf16, #tpu.memory_space<vmem>>, vector<16x768xbf16>
    %273 = arith.truncf %235 : vector<16x256xf32> to vector<16x256xbf16>
    %cst_95 = arith.constant dense<0.000000e+00> : vector<16x768xf32>
    %274 = tpu.matmul %273, %9, %cst_95 {dimension_numbers = #tpu.dot_dimension_numbers<[1], [0], [0], [1], [0, 0, 1, 1], [], []>} : vector<16x256xbf16>, vector<256x768xbf16>, vector<16x768xf32> -> vector<16x768xf32>
    %275 = vector.extract_strided_slice %271 {offsets = [0, 0], sizes = [16, 512], strides = [1, 1]} : vector<16x768xbf16> to vector<16x512xbf16>
    %276 = vector.extract_strided_slice %274 {offsets = [0, 0], sizes = [16, 512], strides = [1, 1]} : vector<16x768xf32> to vector<16x512xf32>
    %277 = arith.extf %275 : vector<16x512xbf16> to vector<16x512xf32>
    %278 = arith.addf %277, %276 : vector<16x512xf32>
    %279 = arith.negf %278 : vector<16x512xf32>
    %280 = math.exp %279 : vector<16x512xf32>
    %cst_96 = arith.constant 1.000000e+00 : f32
    %281 = vector.broadcast %cst_96 : f32 to vector<16x512xf32>
    %282 = arith.addf %281, %280 : vector<16x512xf32>
    %283 = arith.divf %281, %282 : vector<16x512xf32>
    %284 = vector.extract_strided_slice %283 {offsets = [0, 0], sizes = [16, 256], strides = [1, 1]} : vector<16x512xf32> to vector<16x256xf32>
    %285 = vector.extract_strided_slice %283 {offsets = [0, 256], sizes = [16, 256], strides = [1, 1]} : vector<16x512xf32> to vector<16x256xf32>
    %286 = vector.extract_strided_slice %271 {offsets = [0, 512], sizes = [16, 256], strides = [1, 1]} : vector<16x768xbf16> to vector<16x256xbf16>
    %287 = vector.extract_strided_slice %274 {offsets = [0, 512], sizes = [16, 256], strides = [1, 1]} : vector<16x768xf32> to vector<16x256xf32>
    %288 = arith.addf %287, %13 : vector<16x256xf32>
    %289 = arith.mulf %284, %288 : vector<16x256xf32>
    %290 = arith.extf %286 : vector<16x256xbf16> to vector<16x256xf32>
    %291 = arith.addf %290, %289 : vector<16x256xf32>
    %292 = math.tanh %291 : vector<16x256xf32>
    %cst_97 = arith.constant 1.000000e+00 : f32
    %293 = vector.broadcast %cst_97 : f32 to vector<16x256xf32>
    %294 = arith.subf %293, %285 : vector<16x256xf32>
    %295 = arith.mulf %294, %292 : vector<16x256xf32>
    %296 = arith.mulf %285, %235 : vector<16x256xf32>
    %297 = arith.addf %295, %296 : vector<16x256xf32>
    %298 = arith.truncf %260 : vector<16x256xf32> to vector<16x256xbf16>
    %cst_98 = arith.constant dense<0.000000e+00> : vector<16x768xf32>
    %299 = tpu.matmul %298, %10, %cst_98 {dimension_numbers = #tpu.dot_dimension_numbers<[1], [0], [0], [1], [0, 0, 1, 1], [], []>} : vector<16x256xbf16>, vector<256x768xbf16>, vector<16x768xf32> -> vector<16x768xf32>
    %300 = vector.extract_strided_slice %272 {offsets = [0, 0], sizes = [16, 512], strides = [1, 1]} : vector<16x768xbf16> to vector<16x512xbf16>
    %301 = vector.extract_strided_slice %299 {offsets = [0, 0], sizes = [16, 512], strides = [1, 1]} : vector<16x768xf32> to vector<16x512xf32>
    %302 = arith.extf %300 : vector<16x512xbf16> to vector<16x512xf32>
    %303 = arith.addf %302, %301 : vector<16x512xf32>
    %304 = arith.negf %303 : vector<16x512xf32>
    %305 = math.exp %304 : vector<16x512xf32>
    %cst_99 = arith.constant 1.000000e+00 : f32
    %306 = vector.broadcast %cst_99 : f32 to vector<16x512xf32>
    %307 = arith.addf %306, %305 : vector<16x512xf32>
    %308 = arith.divf %306, %307 : vector<16x512xf32>
    %309 = vector.extract_strided_slice %308 {offsets = [0, 0], sizes = [16, 256], strides = [1, 1]} : vector<16x512xf32> to vector<16x256xf32>
    %310 = vector.extract_strided_slice %308 {offsets = [0, 256], sizes = [16, 256], strides = [1, 1]} : vector<16x512xf32> to vector<16x256xf32>
    %311 = vector.extract_strided_slice %272 {offsets = [0, 512], sizes = [16, 256], strides = [1, 1]} : vector<16x768xbf16> to vector<16x256xbf16>
    %312 = vector.extract_strided_slice %299 {offsets = [0, 512], sizes = [16, 256], strides = [1, 1]} : vector<16x768xf32> to vector<16x256xf32>
    %313 = arith.addf %312, %16 : vector<16x256xf32>
    %314 = arith.mulf %309, %313 : vector<16x256xf32>
    %315 = arith.extf %311 : vector<16x256xbf16> to vector<16x256xf32>
    %316 = arith.addf %315, %314 : vector<16x256xf32>
    %317 = math.tanh %316 : vector<16x256xf32>
    %cst_100 = arith.constant 1.000000e+00 : f32
    %318 = vector.broadcast %cst_100 : f32 to vector<16x256xf32>
    %319 = arith.subf %318, %310 : vector<16x256xf32>
    %320 = arith.mulf %319, %317 : vector<16x256xf32>
    %321 = arith.mulf %310, %260 : vector<16x256xf32>
    %322 = arith.addf %320, %321 : vector<16x256xf32>
    %323 = arith.truncf %297 : vector<16x256xf32> to vector<16x256xbf16>
    %c2048 = arith.constant 2048 : index
    %c0_101 = arith.constant 0 : index
    %324 = vector.load %arg8[%c2048, %c0_101] : memref<2560x512xbf16, #tpu.memory_space<vmem>>, vector<256x512xbf16>
    %cst_102 = arith.constant dense<0.000000e+00> : vector<16x512xf32>
    %325 = tpu.matmul %323, %324, %cst_102 {dimension_numbers = #tpu.dot_dimension_numbers<[1], [0], [0], [1], [0, 0, 1, 1], [], []>} : vector<16x256xbf16>, vector<256x512xbf16>, vector<16x512xf32> -> vector<16x512xf32>
    %326 = arith.truncf %322 : vector<16x256xf32> to vector<16x256xbf16>
    %c256 = arith.constant 256 : index
    %c0_103 = arith.constant 0 : index
    %327 = vector.load %arg8[%c256, %c0_103] : memref<2560x512xbf16, #tpu.memory_space<vmem>>, vector<256x512xbf16>
    %cst_104 = arith.constant dense<0.000000e+00> : vector<16x512xf32>
    %328 = tpu.matmul %326, %327, %cst_104 {dimension_numbers = #tpu.dot_dimension_numbers<[1], [0], [0], [1], [0, 0, 1, 1], [], []>} : vector<16x256xbf16>, vector<256x512xbf16>, vector<16x512xf32> -> vector<16x512xf32>
    %c0_105 = arith.constant 0 : index
    %c0_106 = arith.constant 0 : index
    %329 = vector.load %arg12[%c0_105, %c0_106] : memref<16x512xf32, #tpu.memory_space<vmem>>, vector<16x512xf32>
    %330 = arith.addf %325, %328 : vector<16x512xf32>
    %331 = arith.addf %329, %330 : vector<16x512xf32>
    %c0_107 = arith.constant 0 : index
    %c0_108 = arith.constant 0 : index
    %332 = vector.load %arg12[%c0_107, %c0_108] : memref<16x512xf32, #tpu.memory_space<vmem>>, vector<16x512xf32>
    tpu.vector_store %arg12[%c0_107, %c0_108], %331 {strides = array<i32>} : memref<16x512xf32, #tpu.memory_space<vmem>>, vector<16x512xf32>,
    %c0_109 = arith.constant 0 : index
    %c0_110 = arith.constant 0 : index
    %333 = vector.load %arg12[%c0_109, %c0_110] : memref<16x512xf32, #tpu.memory_space<vmem>>, vector<16x512xf32>
    %c0_111 = arith.constant 0 : index
    %c0_112 = arith.constant 0 : index
    %334 = vector.load %arg10[%c0_111, %c0_112] : memref<16x512xf32, #tpu.memory_space<vmem>>, vector<16x512xf32>
    tpu.vector_store %arg10[%c0_111, %c0_112], %333 {strides = array<i32>} : memref<16x512xf32, #tpu.memory_space<vmem>>, vector<16x512xf32>,
    return
  }
  func.func @transform_0(%arg0: i32) -> (i32, i32, i32) {
    %c0_i32 = arith.constant 0 : i32
    %c0_i32_0 = arith.constant 0 : i32
    %c0_i32_1 = arith.constant 0 : i32
    return %c0_i32, %arg0, %c0_i32_0 : i32, i32, i32
  }
  func.func @transform_1(%arg0: i32) -> (i32, i32) {
    %c0_i32 = arith.constant 0 : i32
    %c0_i32_0 = arith.constant 0 : i32
    %c0_i32_1 = arith.constant 0 : i32
    return %c0_i32, %c0_i32_0 : i32, i32
  }
  func.func @transform_2(%arg0: i32) -> (i32, i32) {
    %c0_i32 = arith.constant 0 : i32
    %c0_i32_0 = arith.constant 0 : i32
    %c0_i32_1 = arith.constant 0 : i32
    return %c0_i32, %c0_i32_0 : i32, i32
  }
  func.func @transform_3(%arg0: i32) -> (i32, i32) {
    %c0_i32 = arith.constant 0 : i32
    %c0_i32_0 = arith.constant 0 : i32
    %c0_i32_1 = arith.constant 0 : i32
    return %c0_i32, %c0_i32_0 : i32, i32
  }
  func.func @transform_4(%arg0: i32) -> (i32, i32) {
    %c0_i32 = arith.constant 0 : i32
    %c0_i32_0 = arith.constant 0 : i32
    %c0_i32_1 = arith.constant 0 : i32
    return %c0_i32, %c0_i32_0 : i32, i32
  }
  func.func @transform_5(%arg0: i32) -> (i32, i32) {
    %c0_i32 = arith.constant 0 : i32
    %c0_i32_0 = arith.constant 0 : i32
    %c0_i32_1 = arith.constant 0 : i32
    return %c0_i32, %c0_i32_0 : i32, i32
  }
  func.func @transform_6(%arg0: i32) -> (i32, i32) {
    %c0_i32 = arith.constant 0 : i32
    %c0_i32_0 = arith.constant 0 : i32
    %c0_i32_1 = arith.constant 0 : i32
    return %c0_i32, %c0_i32_0 : i32, i32
  }
  func.func @transform_7(%arg0: i32) -> (i32, i32) {
    %c0_i32 = arith.constant 0 : i32
    %c0_i32_0 = arith.constant 0 : i32
    %c0_i32_1 = arith.constant 0 : i32
    return %c0_i32, %c0_i32_0 : i32, i32
  }
  func.func @transform_8(%arg0: i32) -> (i32, i32) {
    %c0_i32 = arith.constant 0 : i32
    %c0_i32_0 = arith.constant 0 : i32
    %c0_i32_1 = arith.constant 0 : i32
    return %c0_i32, %c0_i32_0 : i32, i32
  }
  func.func @transform_9(%arg0: i32) -> (i32, i32) {
    %c0_i32 = arith.constant 0 : i32
    %c0_i32_0 = arith.constant 0 : i32
    return %arg0, %c0_i32 : i32, i32
  }
}

</mosaic_0001>

<bundles_post_ra>
// kernel: tpu_custom_call.1
= control target key start
LH: loop header
LB: loop body
LE: loop exit
PB: predicated region body
PF: predicated region fallthrough
CT: control target
= control target key end

     0   :  { %14 = vsyncpa [#allocation5], 0  ;;  %s14918_s0 = inlined_call_operand.hbm [shape: bf16[5,16,128], index: 0, kind: input, shape index: {}]   ;;  %s14919_s1 = inlined_call_operand.hbm [shape: bf16[128,1536], index: 1, kind: input, shape index: {}]   ;;  %s14920_s2 = inlined_call_operand.hbm [shape: f32[1,1536], index: 2, kind: input, shape index: {}]   ;;  %s14921_s3 = inlined_call_operand.hbm [shape: bf16[256,768], index: 3, kind: input, shape index: {}]   ;;  %s14922_s4 = inlined_call_operand.hbm [shape: bf16[256,768], index: 4, kind: input, shape index: {}]   ;;  %s14923_s5 = inlined_call_operand.hbm [shape: f32[1,256], index: 5, kind: input, shape index: {}]   ;;  %s14924_s6 = inlined_call_operand.hbm [shape: f32[1,256], index: 6, kind: input, shape index: {}]   ;;  %s14925_s7 = inlined_call_operand.hbm [shape: bf16[2560,512], index: 7, kind: input, shape index: {}]   ;;  %s14926_s8 = inlined_call_operand.hbm [shape: f32[1,512], index: 8, kind: input, shape index: {}]   ;;  %s14927_s9 = inlined_call_operand.hbm [shape: f32[16,512], index: 9, kind: output, shape index: {}]  }
   0x1   :  { %15 = vsyncpa [#allocation8], 0 }
   0x2   :  { %16 = vsyncpa [#allocation11], 0 }
   0x3   :  { %17 = vsyncpa [#allocation14], 0 }
   0x4   :  { %18 = vsyncpa [#allocation17], 0 }
   0x5   :  { %19 = vsyncpa [#allocation6], 0  ;;  %s13791_s30 = smov [#allocation7]   ;;  %s13559_s13 = scalar_lea.hbm %s14919_s1, 12288 }
   0x6   :  { %s37_s10 = sshll.u32 %s13791_s30, 4  ;;  %p13560_p0 = scmp.ne.s32.totalorder %s14919_s1, %s13559_s13  ;;  %s38_s10 = int_to_ptr.vmem [resolvable:$true] %s37_s10 }
   0x7   :  { %p13563_p1 = scmp.lt.u32.totalorder %s13559_s13, %s14919_s1 }
   0x9   :  { %p13565_p2 = pnand %p13563_p1, %p13560_p0 }
   0xb   :  { %13568 = shalt.err (!%p13565_p2)
}
   0xc   :  { %s13569_s18 = scalar_lea.vmem %s38_s10, 12288  ;;  %p13574_p4 = scmp.lt.s32.totalorder %s38_s10, %s38_s10 }
   0xd   :  { %p13570_p3 = scmp.ne.s32.totalorder %s38_s10, %s13569_s18  ;;  %p13575_p5 = scmp.lt.s32.totalorder %s13569_s18, %s13569_s18 }
   0xf   :  { %p13576_p6 = por %p13575_p5, %p13574_p4 }
  0x11   :  { %p13577_p7 = pnand %p13576_p6, %p13570_p3 }
  0x13   :  { %13580 = shalt.err (!%p13577_p7)
}
  0x14   :  { %s13792_s19 = smov 768   ;;  %s13793_s20 = smov 48  }
  0x15   :  { %43 = dma.hbm_to_vmem [thread:$0]  %s14919_s1, 12288, %s38_s10, [#allocation8], %s13792_s19, %s13792_s19, %s13793_s20  }
  0x16   :  { %s13794_s23 = smov [#allocation10]   ;;  %s13581_s27 = scalar_lea.hbm %s14921_s3, 12288 }
  0x17   :  { %s59_s24 = sshll.u32 %s13794_s23, 4  ;;  %p13582_p8 = scmp.ne.s32.totalorder %s14921_s3, %s13581_s27  ;;  %s60_s24 = int_to_ptr.vmem [resolvable:$true] %s59_s24 }
  0x18   :  { %p13585_p9 = scmp.lt.u32.totalorder %s13581_s27, %s14921_s3 }
  0x1a   :  { %p13587_p10 = pnand %p13585_p9, %p13582_p8 }
  0x1c   :  { %13590 = shalt.err (!%p13587_p10)
}
  0x1d   :  { %s13591_s12 = scalar_lea.vmem %s60_s24, 12288  ;;  %p13596_p12 = scmp.lt.s32.totalorder %s60_s24, %s60_s24 }
  0x1e   :  { %p13592_p11 = scmp.ne.s32.totalorder %s60_s24, %s13591_s12  ;;  %p13597_p13 = scmp.lt.s32.totalorder %s13591_s12, %s13591_s12 }
  0x20   :  { %p13598_p0 = por %p13597_p13, %p13596_p12 }
  0x22   :  { %p13599_p1 = pnand %p13598_p0, %p13592_p11 }
  0x24   :  { %13602 = shalt.err (!%p13599_p1)
}
  0x25   :  { %s13795_s1 = smov 384   ;;  %s13796_s10 = smov 24  }
  0x26   :  { %65 = dma.hbm_to_vmem [thread:$0]  %s14921_s3, 12288, %s60_s24, [#allocation11], %s13795_s1, %s13795_s1, %s13796_s10  }
  0x27   :  { %s13797_s15 = smov [#allocation13]   ;;  %s13798_s17 = smov [#allocation16]  }
  0x28   :  { %s84_s16 = sshll.u32 %s13797_s15, 4  ;;  %s103_s18 = sshll.u32 %s13798_s17, 4  ;;  %s85_s16 = int_to_ptr.vmem [resolvable:$true] %s84_s16  ;;  %s13889_s18 = int_to_ptr.vmem [resolvable:$true] %s103_s18 }
  0x29   :  { %s13603_s21 = scalar_lea.hbm %s14923_s5, 32 }
  0x2a   :  { %p13604_p2 = scmp.ne.s32.totalorder %s14923_s5, %s13603_s21  ;;  %p13607_p3 = scmp.lt.u32.totalorder %s13603_s21, %s14923_s5 }
  0x2c   :  { %p13609_p4 = pnand %p13607_p3, %p13604_p2 }
  0x2e   :  { %13612 = shalt.err (!%p13609_p4)
}
  0x2f   :  { %s13613_s3 = scalar_lea.vmem %s85_s16, 32  ;;  %p13618_p6 = scmp.lt.s32.totalorder %s85_s16, %s85_s16 }
  0x30   :  { %p13614_p5 = scmp.ne.s32.totalorder %s85_s16, %s13613_s3  ;;  %p13619_p7 = scmp.lt.s32.totalorder %s13613_s3, %s13613_s3 }
  0x32   :  { %p13620_p8 = por %p13619_p7, %p13618_p6 }
  0x34   :  { %p13621_p9 = pnand %p13620_p8, %p13614_p5 }
  0x36   :  { %13624 = shalt.err (!%p13621_p9)
}
  0x37   :  { %87 = dma.hbm_to_vmem [thread:$0]  %s14923_s5, 32, %s85_s16, [#allocation14]  }
  0x38   :  { %s13625_s30 = scalar_lea.hbm %s14925_s7, 81920 }
  0x39   :  { %p13626_p10 = scmp.ne.s32.totalorder %s14925_s7, %s13625_s30  ;;  %p13629_p11 = scmp.lt.u32.totalorder %s13625_s30, %s14925_s7 }
  0x3b   :  { %p13631_p12 = pnand %p13629_p11, %p13626_p10 }
  0x3d   :  { %13634 = shalt.err (!%p13631_p12)
}
  0x3e   :  { %s13635_s15 = scalar_lea.vmem %s13889_s18, 81920  ;;  %p13640_p0 = scmp.lt.s32.totalorder %s13889_s18, %s13889_s18 }
  0x3f   :  { %p13636_p13 = scmp.ne.s32.totalorder %s13889_s18, %s13635_s15  ;;  %p13641_p1 = scmp.lt.s32.totalorder %s13635_s15, %s13635_s15 }
  0x41   :  { %p13642_p2 = por %p13641_p1, %p13640_p0 }
  0x43   :  { %p13643_p3 = pnand %p13642_p2, %p13636_p13 }
  0x45   :  { %13646 = shalt.err (!%p13643_p3)
}
  0x46   :  { %s13799_s5 = smov 256   ;;  %s13800_s16 = smov 16  }
  0x47   :  { %109 = dma.hbm_to_vmem [thread:$0]  %s14925_s7, 81920, %s13889_s18, [#allocation17], %s13799_s5, %s13799_s5, %s13800_s16  }
  0x48   :  { %s13801_s20 = smov [#allocation4]   ;;  %s13647_s25 = scalar_lea.hbm %s14918_s0, 640 }
  0x49   :  { %s25_s21 = sshll.u32 %s13801_s20, 4  ;;  %p13648_p4 = scmp.ne.s32.totalorder %s14918_s0, %s13647_s25  ;;  %s26_s21 = int_to_ptr.vmem [resolvable:$true] %s25_s21 }
  0x4a   :  { %p13651_p5 = scmp.lt.u32.totalorder %s13647_s25, %s14918_s0 }
  0x4c   :  { %p13653_p6 = pnand %p13651_p5, %p13648_p4 }
  0x4e   :  { %13656 = shalt.err (!%p13653_p6)
}
  0x4f   :  { %s13657_s28 = scalar_lea.vmem %s26_s21, 640  ;;  %p13662_p8 = scmp.lt.s32.totalorder %s26_s21, %s26_s21 }
  0x50   :  { %p13658_p7 = scmp.ne.s32.totalorder %s26_s21, %s13657_s28  ;;  %p13663_p9 = scmp.lt.s32.totalorder %s13657_s28, %s13657_s28 }
  0x52   :  { %p13664_p10 = por %p13663_p9, %p13662_p8 }
  0x54   :  { %p13665_p11 = pnand %p13664_p10, %p13658_p7 }
  0x56   :  { %13668 = shalt.err (!%p13665_p11)
}
  0x57   :  { %s13802_s7 = smov 64   ;;  %s13803_s18 = smov 4  }
  0x58   :  { %31 = dma.hbm_to_vmem [thread:$0]  %s14918_s0, 640, %s26_s21, [#allocation5], %s13802_s7, %s13802_s7, %s13803_s18  }
  0x59   :  { %s13804_s11 = smov [#allocation9]   ;;  %s13805_s13 = smov [#allocation12]  }
  0x5a   :  { %s50_s12 = sshll.u32 %s13804_s11, 4  ;;  %s71_s14 = sshll.u32 %s13805_s13, 4  ;;  %s51_s12 = int_to_ptr.vmem [resolvable:$true] %s50_s12  ;;  %s72_s14 = int_to_ptr.vmem [resolvable:$true] %s71_s14 }
  0x5b   :  { %s13669_s16 = scalar_lea.hbm %s14920_s2, 192 }
  0x5c   :  { %p13670_p12 = scmp.ne.s32.totalorder %s14920_s2, %s13669_s16  ;;  %p13673_p13 = scmp.lt.u32.totalorder %s13669_s16, %s14920_s2 }
  0x5e   :  { %p13675_p0 = pnand %p13673_p13, %p13670_p12 }
  0x60   :  { %13678 = shalt.err (!%p13675_p0)
}
  0x61   :  { %s13679_s0 = scalar_lea.vmem %s51_s12, 192  ;;  %p13684_p2 = scmp.lt.s32.totalorder %s51_s12, %s51_s12 }
  0x62   :  { %p13680_p1 = scmp.ne.s32.totalorder %s51_s12, %s13679_s0  ;;  %p13685_p3 = scmp.lt.s32.totalorder %s13679_s0, %s13679_s0 }
  0x64   :  { %p13686_p4 = por %p13685_p3, %p13684_p2 }
  0x66   :  { %p13687_p5 = pnand %p13686_p4, %p13680_p1 }
  0x68   :  { %13690 = shalt.err (!%p13687_p5)
}
  0x69   :  { %53 = dma.hbm_to_vmem [thread:$0]  %s14920_s2, 192, %s51_s12, [#allocation8]  }
  0x6a   :  { %s13691_s3 = scalar_lea.hbm %s14922_s4, 12288 }
  0x6b   :  { %p13692_p6 = scmp.ne.s32.totalorder %s14922_s4, %s13691_s3  ;;  %p13695_p7 = scmp.lt.u32.totalorder %s13691_s3, %s14922_s4 }
  0x6d   :  { %p13697_p8 = pnand %p13695_p7, %p13692_p6 }
  0x6f   :  { %13700 = shalt.err (!%p13697_p8)
}
  0x70   :  { %s13701_s18 = scalar_lea.vmem %s72_s14, 12288  ;;  %p13706_p10 = scmp.lt.s32.totalorder %s72_s14, %s72_s14 }
  0x71   :  { %p13702_p9 = scmp.ne.s32.totalorder %s72_s14, %s13701_s18  ;;  %p13707_p11 = scmp.lt.s32.totalorder %s13701_s18, %s13701_s18 }
  0x73   :  { %p13708_p12 = por %p13707_p11, %p13706_p10 }
  0x75   :  { %p13709_p13 = pnand %p13708_p12, %p13702_p9 }
  0x77   :  { %13712 = shalt.err (!%p13709_p13)
}
  0x78   :  { %77 = dma.hbm_to_vmem [thread:$0]  %s14922_s4, 12288, %s72_s14, [#allocation11], %s13795_s1, %s13795_s1, %s13796_s10  }
  0x79   :  { %s13806_s30 = smov [#allocation15]   ;;  %s13807_s12 = smov [#allocation18]  }
  0x7a   :  { %s94_s11 = sshll.u32 %s13806_s30, 4  ;;  %s116_s13 = sshll.u32 %s13807_s12, 4  ;;  %s95_s11 = int_to_ptr.vmem [resolvable:$true] %s94_s11  ;;  %s117_s13 = int_to_ptr.vmem [resolvable:$true] %s116_s13 }
  0x7b   :  { %s13713_s16 = scalar_lea.hbm %s14924_s6, 32 }
  0x7c   :  { %p13714_p0 = scmp.ne.s32.totalorder %s14924_s6, %s13713_s16  ;;  %p13717_p1 = scmp.lt.u32.totalorder %s13713_s16, %s14924_s6 }
  0x7e   :  { %p13719_p2 = pnand %p13717_p1, %p13714_p0 }
  0x80   :  { %13722 = shalt.err (!%p13719_p2)
}
  0x81   :  { %s13723_s4 = scalar_lea.vmem %s95_s11, 32  ;;  %p13728_p4 = scmp.lt.s32.totalorder %s95_s11, %s95_s11 }
  0x82   :  { %p13724_p3 = scmp.ne.s32.totalorder %s95_s11, %s13723_s4  ;;  %p13729_p5 = scmp.lt.s32.totalorder %s13723_s4, %s13723_s4 }
  0x84   :  { %p13730_p6 = por %p13729_p5, %p13728_p4 }
  0x86   :  { %p13731_p7 = pnand %p13730_p6, %p13724_p3 }
  0x88   :  { %13734 = shalt.err (!%p13731_p7)
}
  0x89   :  { %97 = dma.hbm_to_vmem [thread:$0]  %s14924_s6, 32, %s95_s11, [#allocation14]  }
  0x8a   :  { %s13735_s21 = scalar_lea.hbm %s14926_s8, 64 }
  0x8b   :  { %p13736_p8 = scmp.ne.s32.totalorder %s14926_s8, %s13735_s21  ;;  %p13739_p9 = scmp.lt.u32.totalorder %s13735_s21, %s14926_s8 }
  0x8d   :  { %p13741_p10 = pnand %p13739_p9, %p13736_p8 }
  0x8f   :  { %13744 = shalt.err (!%p13741_p10)
}
  0x90   :  { %s13745_s24 = scalar_lea.vmem %s117_s13, 64  ;;  %p13750_p12 = scmp.lt.s32.totalorder %s117_s13, %s117_s13 }
  0x91   :  { %p13746_p11 = scmp.ne.s32.totalorder %s117_s13, %s13745_s24  ;;  %p13751_p13 = scmp.lt.s32.totalorder %s13745_s24, %s13745_s24 }
  0x93   :  { %p13752_p0 = por %p13751_p13, %p13750_p12 }
  0x95   :  { %p13753_p1 = pnand %p13752_p0, %p13746_p11 }
  0x97   :  { %13756 = shalt.err (!%p13753_p1)
}
  0x98   :  { %119 = dma.hbm_to_vmem [thread:$0]  %s14926_s8, 64, %s117_s13, [#allocation17]  }
  0x99   :  { %13779 = dma.done.wait [#allocation5], 640  }
  0x9a   :  { %13780 = vsyncadd [#allocation5], 4294966656 }
  0x9b   :  { %13781 = dma.done.wait [#allocation8], 12480  }
  0x9c   :  { %13782 = vsyncadd [#allocation8], 4294954816 }
  0x9d   :  { %13783 = dma.done.wait [#allocation11], 24576  }
  0x9e   :  { %13784 = vsyncadd [#allocation11], 4294942720 }
  0x9f   :  { %13785 = dma.done.wait [#allocation14], 64  }
  0xa0   :  { %13786 = vsyncadd [#allocation14], 4294967232 }
  0xa1   :  { %13787 = dma.done.wait [#allocation17], 81984  }
  0xa2   :  { %13788 = vsyncadd [#allocation17], 4294885312  ;;  %v13808_v0 = vmov 0   ;;  %v10993_v1 = vld [vmem:[#allocation7 + $0x4] ss:$48 sps:$4 sm:$0xff]   ;;  %v13985_v35 = vld [vmem:[#allocation4] sm:$0xff]  }
  0xa3   :  { %860 = vmatprep.mubr.bf16.mxu0 %v13808_v0  ;;  %943 = vmatprep.mubr.bf16.mxu1 %v13808_v0  ;;  %v10995_v2 = vld [vmem:[#allocation7 + $0xc] ss:$48 sps:$4 sm:$0xff]   ;;  %v10997_v3 = vld [vmem:[#allocation7] ss:$48 sps:$4 sm:$0xff]   ;;  %v10998_v4 = vld [vmem:[#allocation7 + $0x8] ss:$48 sps:$4 sm:$0xff]  }
  0xa4   :  { %828 = vmatprep.subr.bf16.mxu0 %v10993_v1  ;;  %911 = vmatprep.subr.bf16.mxu1 %v10995_v2  ;;  %v10999_v5 = vld [vmem:[#allocation7 + $0x64] ss:$48 sps:$4 sm:$0xff]   ;;  %v11001_v6 = vld [vmem:[#allocation7 + $0x6c] ss:$48 sps:$4 sm:$0xff]   ;;  %v11003_v7 = vld [vmem:[#allocation7 + $0x60] ss:$48 sps:$4 sm:$0xff]  }
  0xa5   :  { %829 = vmatpush1.bf16.msra.mxu0 %v10997_v3  ;;  %912 = vmatpush1.bf16.msra.mxu1 %v10998_v4  ;;  %v11004_v8 = vld [vmem:[#allocation7 + $0x68] ss:$48 sps:$4 sm:$0xff]   ;;  %v11005_v9 = vld [vmem:[#allocation7 + $0xc4] ss:$48 sps:$4 sm:$0xff]   ;;  %v11007_v10 = vld [vmem:[#allocation7 + $0xcc] ss:$48 sps:$4 sm:$0xff]  }
  0xa6   :  { %830 = vmatprep.subr.bf16.mxu0 %v10999_v5  ;;  %913 = vmatprep.subr.bf16.mxu1 %v11001_v6  ;;  %v11009_v11 = vld [vmem:[#allocation7 + $0xc0] ss:$48 sps:$4 sm:$0xff]   ;;  %v11010_v12 = vld [vmem:[#allocation7 + $0xc8] ss:$48 sps:$4 sm:$0xff]   ;;  %v11011_v13 = vld [vmem:[#allocation7 + $0x124] ss:$48 sps:$4 sm:$0xff]  }
  0xa7   :  { %v11013_v14 = vld [vmem:[#allocation7 + $0x12c] ss:$48 sps:$4 sm:$0xff]   ;;  %v11015_v15 = vld [vmem:[#allocation7 + $0x120] ss:$48 sps:$4 sm:$0xff]   ;;  %v11016_v16 = vld [vmem:[#allocation7 + $0x128] ss:$48 sps:$4 sm:$0xff]  }
  0xa8   :  { %v11017_v17 = vld [vmem:[#allocation7 + $0x184] ss:$48 sps:$4 sm:$0xff]   ;;  %v11019_v18 = vld [vmem:[#allocation7 + $0x18c] ss:$48 sps:$4 sm:$0xff]   ;;  %v11021_v19 = vld [vmem:[#allocation7 + $0x180] ss:$48 sps:$4 sm:$0xff]  }
  0xa9   :  { %831 = vmatpush1.bf16.msra.mxu0 %v11003_v7  ;;  %914 = vmatpush1.bf16.msra.mxu1 %v11004_v8  ;;  %v11022_v20 = vld [vmem:[#allocation7 + $0x188] ss:$48 sps:$4 sm:$0xff]   ;;  %v11023_v21 = vld [vmem:[#allocation7 + $0x1e4] ss:$48 sps:$4 sm:$0xff]   ;;  %v11025_v22 = vld [vmem:[#allocation7 + $0x1ec] ss:$48 sps:$4 sm:$0xff]  }
  0xaa   :  { %832 = vmatprep.subr.bf16.mxu0 %v11005_v9  ;;  %915 = vmatprep.subr.bf16.mxu1 %v11007_v10  ;;  %v11027_v23 = vld [vmem:[#allocation7 + $0x1e0] ss:$48 sps:$4 sm:$0xff]   ;;  %v11028_v24 = vld [vmem:[#allocation7 + $0x1e8] ss:$48 sps:$4 sm:$0xff]   ;;  %v11029_v25 = vld [vmem:[#allocation7 + $0x244] ss:$48 sps:$4 sm:$0xff]  }
  0xab   :  { %v11031_v26 = vld [vmem:[#allocation7 + $0x24c] ss:$48 sps:$4 sm:$0xff]   ;;  %v11033_v27 = vld [vmem:[#allocation7 + $0x240] ss:$48 sps:$4 sm:$0xff]   ;;  %v11034_v28 = vld [vmem:[#allocation7 + $0x248] ss:$48 sps:$4 sm:$0xff]  }
  0xac   :  { %v11035_v29 = vld [vmem:[#allocation7 + $0x2a4] ss:$48 sps:$4 sm:$0xff]   ;;  %v11037_v30 = vld [vmem:[#allocation7 + $0x2ac] ss:$48 sps:$4 sm:$0xff]   ;;  %v11039_v31 = vld [vmem:[#allocation7 + $0x2a0] ss:$48 sps:$4 sm:$0xff]  }
  0xad   :  { %833 = vmatpush1.bf16.msra.mxu0 %v11009_v11  ;;  %916 = vmatpush1.bf16.msra.mxu1 %v11010_v12  ;;  %v11040_v32 = vld [vmem:[#allocation7 + $0x2a8] ss:$48 sps:$4 sm:$0xff]   ;;  %v11044_v33 = vld [vmem:[#allocation7 + $0x14] ss:$48 sps:$4 sm:$0xff]   ;;  %v11051_v34 = vld [vmem:[#allocation7 + $0x1c] ss:$48 sps:$4 sm:$0xff]  }
  0xae   :  { %834 = vmatprep.subr.bf16.mxu0 %v11011_v13  ;;  %917 = vmatprep.subr.bf16.mxu1 %v11013_v14  ;;  %v11042_v36 = vld [vmem:[#allocation7 + $0x10] ss:$48 sps:$4 sm:$0xff]   ;;  %v11047_v37 = vld [vmem:[#allocation7 + $0x74] ss:$48 sps:$4 sm:$0xff]   ;;  %v11049_v38 = vld [vmem:[#allocation7 + $0x18] ss:$48 sps:$4 sm:$0xff]  }
  0xaf   :  { %v11057_v39 = vld [vmem:[#allocation7 + $0x7c] ss:$48 sps:$4 sm:$0xff]   ;;  %v11045_v40 = vld [vmem:[#allocation7 + $0x70] ss:$48 sps:$4 sm:$0xff]   ;;  %v11054_v41 = vld [vmem:[#allocation7 + $0xd4] ss:$48 sps:$4 sm:$0xff]  }
  0xb0   :  { %v11055_v42 = vld [vmem:[#allocation7 + $0x78] ss:$48 sps:$4 sm:$0xff]   ;;  %v13991_v43 = vld [vmem:[#allocation4 + $0x8] sm:$0xff]   ;;  %v11064_v46 = vld [vmem:[#allocation7 + $0xdc] ss:$48 sps:$4 sm:$0xff]   ;;  %s13809_s8 = smov [#allocation19]  }
  0xb1   :  { %835 = vmatpush1.bf16.msra.mxu0 %v11015_v15  ;;  %918 = vmatpush1.bf16.msra.mxu1 %v11016_v16  ;;  %v11052_v44 = vld [vmem:[#allocation7 + $0xd0] ss:$48 sps:$4 sm:$0xff]   ;;  %v11060_v45 = vld [vmem:[#allocation7 + $0x134] ss:$48 sps:$4 sm:$0xff]   ;;  %v11062_v47 = vld [vmem:[#allocation7 + $0xd8] ss:$48 sps:$4 sm:$0xff]  }
  0xb2   :  { %836 = vmatprep.subr.bf16.mxu0 %v11017_v17  ;;  %919 = vmatprep.subr.bf16.mxu1 %v11019_v18  ;;  %v11058_v48 = vld [vmem:[#allocation7 + $0x130] ss:$48 sps:$4 sm:$0xff]   ;;  %v11070_v49 = vld [vmem:[#allocation7 + $0x13c] ss:$48 sps:$4 sm:$0xff]   ;;  %v11067_v50 = vld [vmem:[#allocation7 + $0x194] ss:$48 sps:$4 sm:$0xff]  }
  0xb3   :  { %v13997_v51 = vld [vmem:[#allocation4 + $0x10] sm:$0xff]   ;;  %v11065_v52 = vld [vmem:[#allocation7 + $0x190] ss:$48 sps:$4 sm:$0xff]   ;;  %v11077_v55 = vld [vmem:[#allocation7 + $0x1f4] ss:$48 sps:$4 sm:$0xff]   ;;  %s9863_s28 = sshll.u32 %s13809_s8, 4  ;;  %s9864_s28 = int_to_ptr.vmem [resolvable:$true] %s9863_s28 }
  0xb4   :  { %v11068_v53 = vld [vmem:[#allocation7 + $0x138] ss:$48 sps:$4 sm:$0xff]   ;;  %v11074_v54 = vld [vmem:[#allocation7 + $0x19c] ss:$48 sps:$4 sm:$0xff]   ;;  %v11075_v57 = vld [vmem:[#allocation7 + $0x1f0] ss:$48 sps:$4 sm:$0xff]   ;;  %p13762_p3 = scmp.lt.s32.totalorder %s9864_s28, %s9864_s28 }
  0xb5   :  { %837 = vmatpush1.bf16.msra.mxu0 %v11021_v19  ;;  %920 = vmatpush1.bf16.msra.mxu1 %v11022_v20  ;;  %v11072_v56 = vld [vmem:[#allocation7 + $0x198] ss:$48 sps:$4 sm:$0xff]   ;;  %v11080_v58 = vld [vmem:[#allocation7 + $0x1fc] ss:$48 sps:$4 sm:$0xff]   ;;  %v11083_v59 = vld [vmem:[#allocation7 + $0x254] ss:$48 sps:$4 sm:$0xff]  }
  0xb6   :  { %838 = vmatprep.subr.bf16.mxu0 %v11023_v21  ;;  %921 = vmatprep.subr.bf16.mxu1 %v11025_v22  ;;  %v14003_v60 = vld [vmem:[#allocation4 + $0x18] sm:$0xff]   ;;  %v11078_v61 = vld [vmem:[#allocation7 + $0x1f8] ss:$48 sps:$4 sm:$0xff]   ;;  %v11087_v63 = vld [vmem:[#allocation7 + $0x25c] ss:$48 sps:$4 sm:$0xff]   ;;  %s13757_s7 = scalar_lea.vmem %s9864_s28, 1024 }
  0xb7   :  { %v11081_v62 = vld [vmem:[#allocation7 + $0x250] ss:$48 sps:$4 sm:$0xff]   ;;  %v11090_v1 = vld [vmem:[#allocation7 + $0x2b4] ss:$48 sps:$4 sm:$0xff]   ;;  %v11085_v2 = vld [vmem:[#allocation7 + $0x258] ss:$48 sps:$4 sm:$0xff]   ;;  %p13758_p2 = scmp.ne.s32.totalorder %s9864_s28, %s13757_s7  ;;  %p13763_p4 = scmp.lt.s32.totalorder %s13757_s7, %s13757_s7 }
  0xb8   :  { %v11088_v3 = vld [vmem:[#allocation7 + $0x2b0] ss:$48 sps:$4 sm:$0xff]   ;;  %v11093_v4 = vld [vmem:[#allocation7 + $0x2bc] ss:$48 sps:$4 sm:$0xff]   ;;  %v11096_v5 = vld [vmem:[#allocation7 + $0x24] ss:$48 sps:$4 sm:$0xff]  }
  0xb9   :  { %839 = vmatpush1.bf16.msra.mxu0 %v11027_v23  ;;  %922 = vmatpush1.bf16.msra.mxu1 %v11028_v24  ;;  %v14009_v6 = vld [vmem:[#allocation4 + $0x20] sm:$0xff]   ;;  %v11094_v9 = vld [vmem:[#allocation7 + $0x20] ss:$48 sps:$4 sm:$0xff]   ;;  %v11099_v10 = vld [vmem:[#allocation7 + $0x84] ss:$48 sps:$4 sm:$0xff]   ;;  %p13764_p5 = por %p13763_p4, %p13762_p3 }
  0xba   :  { %840 = vmatprep.subr.bf16.mxu0 %v11029_v25  ;;  %923 = vmatprep.subr.bf16.mxu1 %v11031_v26  ;;  %v11091_v7 = vld [vmem:[#allocation7 + $0x2b8] ss:$48 sps:$4 sm:$0xff]   ;;  %v11102_v8 = vld [vmem:[#allocation7 + $0x2c] ss:$48 sps:$4 sm:$0xff]   ;;  %v11097_v13 = vld [vmem:[#allocation7 + $0x80] ss:$48 sps:$4 sm:$0xff]  }
  0xbb   :  { %v11100_v11 = vld [vmem:[#allocation7 + $0x28] ss:$48 sps:$4 sm:$0xff]   ;;  %v11108_v12 = vld [vmem:[#allocation7 + $0x8c] ss:$48 sps:$4 sm:$0xff]   ;;  %v11105_v14 = vld [vmem:[#allocation7 + $0xe4] ss:$48 sps:$4 sm:$0xff]   ;;  %p13765_p6 = pnand %p13764_p5, %p13758_p2 }
  0xbc   :  { %v11106_v15 = vld [vmem:[#allocation7 + $0x88] ss:$48 sps:$4 sm:$0xff]   ;;  %v11103_v16 = vld [vmem:[#allocation7 + $0xe0] ss:$48 sps:$4 sm:$0xff]   ;;  %v11111_v17 = vld [vmem:[#allocation7 + $0x144] ss:$48 sps:$4 sm:$0xff]  }
  0xbd   :  { %841 = vmatpush1.bf16.msra.mxu0 %v11033_v27  ;;  %924 = vmatpush1.bf16.msra.mxu1 %v11034_v28  ;;  %v11114_v18 = vld [vmem:[#allocation7 + $0xec] ss:$48 sps:$4 sm:$0xff]   ;;  %v11112_v19 = vld [vmem:[#allocation7 + $0xe8] ss:$48 sps:$4 sm:$0xff]   ;;  %v11109_v20 = vld [vmem:[#allocation7 + $0x140] ss:$48 sps:$4 sm:$0xff]  }
  0xbe   :  { %842 = vmatprep.subr.bf16.mxu0 %v11035_v29  ;;  %925 = vmatprep.subr.bf16.mxu1 %v11037_v30  ;;  %v11117_v21 = vld [vmem:[#allocation7 + $0x14c] ss:$48 sps:$4 sm:$0xff]   ;;  %v11120_v22 = vld [vmem:[#allocation7 + $0x1a4] ss:$48 sps:$4 sm:$0xff]   ;;  %v11115_v23 = vld [vmem:[#allocation7 + $0x148] ss:$48 sps:$4 sm:$0xff]  }
  0xbf   :  { %v11118_v24 = vld [vmem:[#allocation7 + $0x1a0] ss:$48 sps:$4 sm:$0xff]   ;;  %v11123_v25 = vld [vmem:[#allocation7 + $0x1ac] ss:$48 sps:$4 sm:$0xff]   ;;  %v11126_v26 = vld [vmem:[#allocation7 + $0x204] ss:$48 sps:$4 sm:$0xff]  }
  0xc0   :  { %v11121_v27 = vld [vmem:[#allocation7 + $0x1a8] ss:$48 sps:$4 sm:$0xff]   ;;  %v11124_v28 = vld [vmem:[#allocation7 + $0x200] ss:$48 sps:$4 sm:$0xff]   ;;  %v11129_v29 = vld [vmem:[#allocation7 + $0x20c] ss:$48 sps:$4 sm:$0xff]  }
  0xc1   :  { %843 = vmatpush1.bf16.msra.mxu0 %v11039_v31  ;;  %926 = vmatpush1.bf16.msra.mxu1 %v11040_v32  ;;  %v11132_v30 = vld [vmem:[#allocation7 + $0x264] ss:$48 sps:$4 sm:$0xff]   ;;  %v11127_v31 = vld [vmem:[#allocation7 + $0x208] ss:$48 sps:$4 sm:$0xff]   ;;  %v11130_v32 = vld [vmem:[#allocation7 + $0x260] ss:$48 sps:$4 sm:$0xff]  }
  0xc2   :  { %994 = vmatprep.subr.bf16.mxu0 %v11044_v33  ;;  %1077 = vmatprep.subr.bf16.mxu1 %v11051_v34  ;;  %v11135_v33 = vld [vmem:[#allocation7 + $0x26c] ss:$48 sps:$4 sm:$0xff]   ;;  %v11138_v34 = vld [vmem:[#allocation7 + $0x2c4] ss:$48 sps:$4 sm:$0xff]  }
  0xc4   :  { %861 = vmatmul.mubr.bf16.vlgmr.msra.gmra.mrb[0].mxu0 %v13985_v35  ;;  %944 = vmatmul.mubr.bf16.vlgmr.msra.gmra.mrb[0].mxu1 %v13985_v35 }
  0xc5   :  { %995 = vmatpush1.bf16.msra.mxu0 %v11042_v36  ;;  %870 = vmatprep.mubr.bf16.mxu0 %v13808_v0  ;;  %v11133_v36 = vld [vmem:[#allocation7 + $0x268] ss:$48 sps:$4 sm:$0xff]  }
  0xc6   :  { %996 = vmatprep.subr.bf16.mxu0 %v11047_v37  ;;  %953 = vmatprep.mubr.bf16.mxu1 %v13808_v0  ;;  %v11136_v37 = vld [vmem:[#allocation7 + $0x2c0] ss:$48 sps:$4 sm:$0xff]  }
  0xc7   :  { %1078 = vmatpush1.bf16.msra.mxu1 %v11049_v38  ;;  %v11141_v38 = vld [vmem:[#allocation7 + $0x2cc] ss:$48 sps:$4 sm:$0xff]  }
  0xc8   :  { %1079 = vmatprep.subr.bf16.mxu1 %v11057_v39  ;;  %v11142_v39 = vld [vmem:[#allocation10 + $0x4] ss:$24 sps:$4 sm:$0xff]  }
  0xc9   :  { %997 = vmatpush1.bf16.msra.mxu0 %v11045_v40  ;;  %v11139_v40 = vld [vmem:[#allocation7 + $0x2c8] ss:$48 sps:$4 sm:$0xff]  }
  0xca   :  { %998 = vmatprep.subr.bf16.mxu0 %v11054_v41  ;;  %v11144_v41 = vld [vmem:[#allocation10 + $0xc] ss:$24 sps:$4 sm:$0xff]  }
  0xcb   :  { %1080 = vmatpush1.bf16.msra.mxu1 %v11055_v42  ;;  %v11146_v42 = vld [vmem:[#allocation10] ss:$24 sps:$4 sm:$0xff]  }
  0xcc   :  { %871 = vmatmul.mubr.bf16.gmra.mrb[4].mxu0 %v13991_v43  ;;  %954 = vmatmul.mubr.bf16.gmra.mrb[4].mxu1 %v13991_v43 }
  0xcd   :  { %999 = vmatpush1.bf16.msra.mxu0 %v11052_v44  ;;  %880 = vmatprep.mubr.bf16.mxu0 %v13808_v0  ;;  %v11147_v44 = vld [vmem:[#allocation10 + $0x8] ss:$24 sps:$4 sm:$0xff]  }
  0xce   :  { %963 = vmatprep.mubr.bf16.mxu1 %v13808_v0  ;;  %1000 = vmatprep.subr.bf16.mxu0 %v11060_v45  ;;  %v11148_v45 = vld [vmem:[#allocation10 + $0x34] ss:$24 sps:$4 sm:$0xff]  }
  0xcf   :  { %1081 = vmatprep.subr.bf16.mxu1 %v11064_v46  ;;  %v11150_v46 = vld [vmem:[#allocation10 + $0x3c] ss:$24 sps:$4 sm:$0xff]  }
  0xd0   :  { %1082 = vmatpush1.bf16.msra.mxu1 %v11062_v47  ;;  %v11152_v47 = vld [vmem:[#allocation10 + $0x30] ss:$24 sps:$4 sm:$0xff]  }
  0xd1   :  { %1001 = vmatpush1.bf16.msra.mxu0 %v11058_v48  ;;  %1083 = vmatprep.subr.bf16.mxu1 %v11070_v49  ;;  %v11153_v48 = vld [vmem:[#allocation10 + $0x38] ss:$24 sps:$4 sm:$0xff]   ;;  %v11154_v49 = vld [vmem:[#allocation10 + $0x64] ss:$24 sps:$4 sm:$0xff]  }
  0xd2   :  { %1002 = vmatprep.subr.bf16.mxu0 %v11067_v50  ;;  %v11156_v50 = vld [vmem:[#allocation10 + $0x6c] ss:$24 sps:$4 sm:$0xff]  }
  0xd4   :  { %881 = vmatmul.mubr.bf16.gmra.mrb[8].mxu0 %v13997_v51  ;;  %964 = vmatmul.mubr.bf16.gmra.mrb[8].mxu1 %v13997_v51 }
  0xd5   :  { %1003 = vmatpush1.bf16.msra.mxu0 %v11065_v52  ;;  %1084 = vmatpush1.bf16.msra.mxu1 %v11068_v53  ;;  %v11158_v52 = vld [vmem:[#allocation10 + $0x60] ss:$24 sps:$4 sm:$0xff]  }
  0xd6   :  { %890 = vmatprep.mubr.bf16.mxu0 %v13808_v0  ;;  %973 = vmatprep.mubr.bf16.mxu1 %v13808_v0  ;;  %v11159_v53 = vld [vmem:[#allocation10 + $0x68] ss:$24 sps:$4 sm:$0xff]  }
  0xd7   :  { %1085 = vmatprep.subr.bf16.mxu1 %v11074_v54  ;;  %1004 = vmatprep.subr.bf16.mxu0 %v11077_v55  ;;  %v11160_v54 = vld [vmem:[#allocation10 + $0x94] ss:$24 sps:$4 sm:$0xff]   ;;  %v11164_v55 = vld [vmem:[#allocation10 + $0x90] ss:$24 sps:$4 sm:$0xff]  }
  0xd9   :  { %1086 = vmatpush1.bf16.msra.mxu1 %v11072_v56  ;;  %1005 = vmatpush1.bf16.msra.mxu0 %v11075_v57  ;;  %v11165_v56 = vld [vmem:[#allocation10 + $0x98] ss:$24 sps:$4 sm:$0xff]   ;;  %v11166_v57 = vld [vmem:[#allocation10 + $0xc4] ss:$24 sps:$4 sm:$0xff]  }
  0xda   :  { %1087 = vmatprep.subr.bf16.mxu1 %v11080_v58  ;;  %1006 = vmatprep.subr.bf16.mxu0 %v11083_v59  ;;  %v11168_v58 = vld [vmem:[#allocation10 + $0xcc] ss:$24 sps:$4 sm:$0xff]   ;;  %v11170_v59 = vld [vmem:[#allocation10 + $0xc0] ss:$24 sps:$4 sm:$0xff]  }
  0xdc   :  { %891 = vmatmul.mubr.bf16.gmra.mrb[12].mxu0 %v14003_v60  ;;  %974 = vmatmul.mubr.bf16.gmra.mrb[12].mxu1 %v14003_v60 }
  0xdd   :  { %1088 = vmatpush1.bf16.msra.mxu1 %v11078_v61  ;;  %900 = vmatprep.mubr.bf16.mxu0 %v13808_v0  ;;  %v11171_v61 = vld [vmem:[#allocation10 + $0xc8] ss:$24 sps:$4 sm:$0xff]  }
  0xde   :  { %983 = vmatprep.mubr.bf16.mxu1 %v13808_v0  ;;  %1007 = vmatpush1.bf16.msra.mxu0 %v11081_v62  ;;  %v11172_v62 = vld [vmem:[#allocation10 + $0xf4] ss:$24 sps:$4 sm:$0xff]  }
  0xdf   :  { %1089 = vmatprep.subr.bf16.mxu1 %v11087_v63  ;;  %1008 = vmatprep.subr.bf16.mxu0 %v11090_v1  ;;  %v11176_v63 = vld [vmem:[#allocation10 + $0xf0] ss:$24 sps:$4 sm:$0xff]  }
  0xe0   :  { %v11177_v1 = vld [vmem:[#allocation10 + $0xf8] ss:$24 sps:$4 sm:$0xff]  }
  0xe1   :  { %1090 = vmatpush1.bf16.msra.mxu1 %v11085_v2  ;;  %v11178_v2 = vld [vmem:[#allocation10 + $0x124] ss:$24 sps:$4 sm:$0xff]  }
  0xe2   :  { %1009 = vmatpush1.bf16.msra.mxu0 %v11088_v3  ;;  %1091 = vmatprep.subr.bf16.mxu1 %v11093_v4  ;;  %v11180_v3 = vld [vmem:[#allocation10 + $0x12c] ss:$24 sps:$4 sm:$0xff]   ;;  %v11182_v4 = vld [vmem:[#allocation10 + $0x120] ss:$24 sps:$4 sm:$0xff]  }
  0xe3   :  { %1160 = vmatprep.subr.bf16.mxu0 %v11096_v5  ;;  %v11183_v5 = vld [vmem:[#allocation10 + $0x128] ss:$24 sps:$4 sm:$0xff]  }
  0xe4   :  { %901 = vmatmul.mubr.bf16.gmra.mrb[16].mxu0 %v14009_v6  ;;  %984 = vmatmul.mubr.bf16.gmra.mrb[16].mxu1 %v14009_v6 }
  0xe5   :  { %1092 = vmatpush1.bf16.msra.mxu1 %v11091_v7  ;;  %1026 = vmatprep.mubr.bf16.mxu0 %v13808_v0  ;;  %v11184_v7 = vld [vmem:[#allocation10 + $0x154] ss:$24 sps:$4 sm:$0xff]  }
  0xe6   :  { %1109 = vmatprep.mubr.bf16.mxu1 %v13808_v0  ;;  %1243 = vmatprep.subr.bf16.mxu1 %v11102_v8  ;;  %v11188_v8 = vld [vmem:[#allocation10 + $0x150] ss:$24 sps:$4 sm:$0xff]  }
  0xec   :  { %1027 = vmatmul.mubr.bf16.vlgmr.msra.gmra.mrb[20].mxu0 %v13985_v35  ;;  %1110 = vmatmul.mubr.bf16.vlgmr.msra.gmra.mrb[20].mxu1 %v13985_v35 }
  0xed   :  { %1161 = vmatpush1.bf16.msra.mxu0 %v11094_v9  ;;  %1036 = vmatprep.mubr.bf16.mxu0 %v13808_v0  ;;  %v11189_v9 = vld [vmem:[#allocation10 + $0x158] ss:$24 sps:$4 sm:$0xff]  }
  0xee   :  { %1162 = vmatprep.subr.bf16.mxu0 %v11099_v10  ;;  %1119 = vmatprep.mubr.bf16.mxu1 %v13808_v0  ;;  %v11190_v10 = vld [vmem:[#allocation10 + $0x184] ss:$24 sps:$4 sm:$0xff]  }
  0xef   :  { %1244 = vmatpush1.bf16.msra.mxu1 %v11100_v11  ;;  %v11192_v11 = vld [vmem:[#allocation10 + $0x18c] ss:$24 sps:$4 sm:$0xff]  }
  0xf0   :  { %1245 = vmatprep.subr.bf16.mxu1 %v11108_v12  ;;  %v11194_v12 = vld [vmem:[#allocation10 + $0x180] ss:$24 sps:$4 sm:$0xff]  }
  0xf1   :  { %1163 = vmatpush1.bf16.msra.mxu0 %v11097_v13  ;;  %v11195_v13 = vld [vmem:[#allocation10 + $0x188] ss:$24 sps:$4 sm:$0xff]  }
  0xf2   :  { %1164 = vmatprep.subr.bf16.mxu0 %v11105_v14  ;;  %v11196_v14 = vld [vmem:[#allocation10 + $0x1b4] ss:$24 sps:$4 sm:$0xff]  }
  0xf3   :  { %1246 = vmatpush1.bf16.msra.mxu1 %v11106_v15  ;;  %v11200_v15 = vld [vmem:[#allocation10 + $0x1b0] ss:$24 sps:$4 sm:$0xff]  }
  0xf4   :  { %1037 = vmatmul.mubr.bf16.gmra.mrb[24].mxu0 %v13991_v43  ;;  %1120 = vmatmul.mubr.bf16.gmra.mrb[24].mxu1 %v13991_v43 }
  0xf5   :  { %1165 = vmatpush1.bf16.msra.mxu0 %v11103_v16  ;;  %1046 = vmatprep.mubr.bf16.mxu0 %v13808_v0  ;;  %v11201_v16 = vld [vmem:[#allocation10 + $0x1b8] ss:$24 sps:$4 sm:$0xff]  }
  0xf6   :  { %1129 = vmatprep.mubr.bf16.mxu1 %v13808_v0  ;;  %1166 = vmatprep.subr.bf16.mxu0 %v11111_v17  ;;  %v11202_v17 = vld [vmem:[#allocation10 + $0x1e4] ss:$24 sps:$4 sm:$0xff]  }
  0xf7   :  { %1247 = vmatprep.subr.bf16.mxu1 %v11114_v18  ;;  %v11204_v18 = vld [vmem:[#allocation10 + $0x1ec] ss:$24 sps:$4 sm:$0xff]  }
  0xf8   :  { %1248 = vmatpush1.bf16.msra.mxu1 %v11112_v19  ;;  %v11206_v19 = vld [vmem:[#allocation10 + $0x1e0] ss:$24 sps:$4 sm:$0xff]  }
  0xf9   :  { %1167 = vmatpush1.bf16.msra.mxu0 %v11109_v20  ;;  %1249 = vmatprep.subr.bf16.mxu1 %v11117_v21  ;;  %v258_v20 = vlaneseq  ;;  %v11207_v21 = vld [vmem:[#allocation10 + $0x1e8] ss:$24 sps:$4 sm:$0xff]  }
  0xfa   :  { %1168 = vmatprep.subr.bf16.mxu0 %v11120_v22  ;;  %v11210_v22 = vld [vmem:[#allocation10 + $0x21c] ss:$24 sps:$4 sm:$0xff]  }
  0xfc   :  { %1047 = vmatmul.mubr.bf16.gmra.mrb[28].mxu0 %v13997_v51  ;;  %1130 = vmatmul.mubr.bf16.gmra.mrb[28].mxu1 %v13997_v51 }
  0xfd   :  { %1250 = vmatpush1.bf16.msra.mxu1 %v11115_v23  ;;  %1169 = vmatpush1.bf16.msra.mxu0 %v11118_v24  ;;  %v14055_v23 = vshrl.u32 %v258_v20, 7  ;;  %v11212_v24 = vld [vmem:[#allocation10 + $0x210] ss:$24 sps:$4 sm:$0xff]   ;;  %v11294_v20 = vld [vmem:[#allocation12 + $0x1b4] ss:$24 sps:$4 sm:$0xff]  }
  0xfe   :  { %1056 = vmatprep.mubr.bf16.mxu0 %v13808_v0  ;;  %1139 = vmatprep.mubr.bf16.mxu1 %v13808_v0 }
  0xff   :  { %1251 = vmatprep.subr.bf16.mxu1 %v11123_v25  ;;  %1170 = vmatprep.subr.bf16.mxu0 %v11126_v26  ;;  %v11213_v25 = vld [vmem:[#allocation10 + $0x218] ss:$24 sps:$4 sm:$0xff]   ;;  %v11214_v26 = vld [vmem:[#allocation10 + $0x244] ss:$24 sps:$4 sm:$0xff]  }
 0x101   :  { %1252 = vmatpush1.bf16.msra.mxu1 %v11121_v27  ;;  %1171 = vmatpush1.bf16.msra.mxu0 %v11124_v28  ;;  %v11216_v27 = vld [vmem:[#allocation10 + $0x24c] ss:$24 sps:$4 sm:$0xff]   ;;  %v276_v28 = vsub.s32 4, %v14055_v23 }
 0x102   :  { %1253 = vmatprep.subr.bf16.mxu1 %v11129_v29  ;;  %1172 = vmatprep.subr.bf16.mxu0 %v11132_v30  ;;  %v14058_v29 = vld [vmem:[#allocation9] sm:$0xff] }
 0x103   :  { %v11218_v30 = vld [vmem:[#allocation10 + $0x240] ss:$24 sps:$4 sm:$0xff]  }
 0x104   :  { %1057 = vmatmul.mubr.bf16.gmra.mrb[32].mxu0 %v14003_v60  ;;  %1140 = vmatmul.mubr.bf16.gmra.mrb[32].mxu1 %v14003_v60 }
 0x105   :  { %1254 = vmatpush1.bf16.msra.mxu1 %v11127_v31  ;;  %1066 = vmatprep.mubr.bf16.mxu0 %v13808_v0  ;;  %v11219_v31 = vld [vmem:[#allocation10 + $0x248] ss:$24 sps:$4 sm:$0xff]  }
 0x106   :  { %1149 = vmatprep.mubr.bf16.mxu1 %v13808_v0  ;;  %1173 = vmatpush1.bf16.msra.mxu0 %v11130_v32  ;;  %v14061_v32 = vrot.slane %v14058_v29, %v276_v28  ;;  %v11306_v28 = vld [vmem:[#allocation12 + $0x214] ss:$24 sps:$4 sm:$0xff]  }
 0x107   :  { %1255 = vmatprep.subr.bf16.mxu1 %v11135_v33  ;;  %1174 = vmatprep.subr.bf16.mxu0 %v11138_v34  ;;  %v11220_v33 = vld [vmem:[#allocation10 + $0x274] ss:$24 sps:$4 sm:$0xff]  }
 0x108   :  { %v11222_v34 = vld [vmem:[#allocation10 + $0x27c] ss:$24 sps:$4 sm:$0xff]  }
 0x109   :  { %1256 = vmatpush1.bf16.msra.mxu1 %v11133_v36  ;;  %v11224_v36 = vld [vmem:[#allocation10 + $0x270] ss:$24 sps:$4 sm:$0xff]  }
 0x10a   :  { %1257 = vmatprep.subr.bf16.mxu1 %v11141_v38  ;;  %1175 = vmatpush1.bf16.msra.mxu0 %v11136_v37  ;;  %v11225_v37 = vld [vmem:[#allocation10 + $0x278] ss:$24 sps:$4 sm:$0xff]   ;;  %v11226_v38 = vld [vmem:[#allocation10 + $0x2a4] ss:$24 sps:$4 sm:$0xff]  }
 0x10b   :  { %2184 = vmatprep.subr.bf16.mxu0 %v11142_v39  ;;  %v11228_v39 = vld [vmem:[#allocation10 + $0x2ac] ss:$24 sps:$4 sm:$0xff]  }
 0x10c   :  { %1067 = vmatmul.mubr.bf16.gmra.mrb[36].mxu0 %v14009_v6  ;;  %1150 = vmatmul.mubr.bf16.gmra.mrb[36].mxu1 %v14009_v6 }
 0x10d   :  { %1258 = vmatpush1.bf16.msra.mxu1 %v11139_v40  ;;  %1192 = vmatprep.mubr.bf16.mxu0 %v13808_v0  ;;  %v11230_v40 = vld [vmem:[#allocation10 + $0x2a0] ss:$24 sps:$4 sm:$0xff]  }
 0x10e   :  { %1275 = vmatprep.mubr.bf16.mxu1 %v13808_v0  ;;  %2227 = vmatprep.subr.bf16.mxu1 %v11144_v41  ;;  %v11231_v41 = vld [vmem:[#allocation10 + $0x2a8] ss:$24 sps:$4 sm:$0xff]  }
 0x114   :  { %1193 = vmatmul.mubr.bf16.vlgmr.msra.gmra.mrb[40].mxu0 %v13985_v35  ;;  %1276 = vmatmul.mubr.bf16.vlgmr.msra.gmra.mrb[40].mxu1 %v13985_v35  ;;  %v11162_v35 = vld [vmem:[#allocation10 + $0x9c] ss:$24 sps:$4 sm:$0xff]  }
 0x115   :  { %2185 = vmatpush1.bf16.msra.mxu0 %v11146_v42  ;;  %2228 = vmatpush1.bf16.msra.mxu1 %v11147_v44  ;;  %v11232_v42 = vld [vmem:[#allocation10 + $0x2d4] ss:$24 sps:$4 sm:$0xff]  }
 0x116   :  { %2186 = vmatprep.subr.bf16.mxu0 %v11148_v45  ;;  %2229 = vmatprep.subr.bf16.mxu1 %v11150_v46  ;;  %v11234_v44 = vld [vmem:[#allocation10 + $0x2dc] ss:$24 sps:$4 sm:$0xff]   ;;  %v11236_v45 = vld [vmem:[#allocation10 + $0x2d0] ss:$24 sps:$4 sm:$0xff]  }
 0x117   :  { %1202 = vmatprep.mubr.bf16.mxu0 %v13808_v0  ;;  %1285 = vmatprep.mubr.bf16.mxu1 %v13808_v0  ;;  %v11237_v46 = vld [vmem:[#allocation10 + $0x2d8] ss:$24 sps:$4 sm:$0xff]  }
 0x119   :  { %2187 = vmatpush1.bf16.msra.mxu0 %v11152_v47  ;;  %2230 = vmatpush1.bf16.msra.mxu1 %v11153_v48  ;;  %v11238_v47 = vld [vmem:[#allocation10 + $0x14] ss:$24 sps:$4 sm:$0xff]   ;;  %v11240_v48 = vld [vmem:[#allocation12 + $0x4] ss:$24 sps:$4 sm:$0xff]  }
 0x11a   :  { %2188 = vmatprep.subr.bf16.mxu0 %v11154_v49  ;;  %2231 = vmatprep.subr.bf16.mxu1 %v11156_v50  ;;  %v11242_v49 = vld [vmem:[#allocation10 + $0x10] ss:$24 sps:$4 sm:$0xff]   ;;  %v11243_v50 = vld [vmem:[#allocation12] ss:$24 sps:$4 sm:$0xff]  }
 0x11c   :  { %1203 = vmatmul.mubr.bf16.gmra.mrb[44].mxu0 %v13991_v43  ;;  %1286 = vmatmul.mubr.bf16.gmra.mrb[44].mxu1 %v13991_v43  ;;  %v11174_v43 = vld [vmem:[#allocation10 + $0xfc] ss:$24 sps:$4 sm:$0xff]  }
 0x11d   :  { %2189 = vmatpush1.bf16.msra.mxu0 %v11158_v52  ;;  %2232 = vmatpush1.bf16.msra.mxu1 %v11159_v53  ;;  %v11244_v52 = vld [vmem:[#allocation10 + $0x44] ss:$24 sps:$4 sm:$0xff]   ;;  %v11246_v53 = vld [vmem:[#allocation12 + $0x34] ss:$24 sps:$4 sm:$0xff]  }
 0x11e   :  { %2190 = vmatprep.subr.bf16.mxu0 %v11160_v54  ;;  %2233 = vmatprep.subr.bf16.mxu1 %v11162_v35  ;;  %v11248_v54 = vld [vmem:[#allocation10 + $0x40] ss:$24 sps:$4 sm:$0xff]   ;;  %v11249_v35 = vld [vmem:[#allocation12 + $0x30] ss:$24 sps:$4 sm:$0xff]  }
 0x11f   :  { %1212 = vmatprep.mubr.bf16.mxu0 %v13808_v0  ;;  %1295 = vmatprep.mubr.bf16.mxu1 %v13808_v0 }
 0x121   :  { %2191 = vmatpush1.bf16.msra.mxu0 %v11164_v55  ;;  %2234 = vmatpush1.bf16.msra.mxu1 %v11165_v56  ;;  %v11250_v55 = vld [vmem:[#allocation10 + $0x74] ss:$24 sps:$4 sm:$0xff]   ;;  %v11252_v56 = vld [vmem:[#allocation12 + $0x64] ss:$24 sps:$4 sm:$0xff]  }
 0x122   :  { %2192 = vmatprep.subr.bf16.mxu0 %v11166_v57  ;;  %2235 = vmatprep.subr.bf16.mxu1 %v11168_v58  ;;  %v11254_v57 = vld [vmem:[#allocation10 + $0x70] ss:$24 sps:$4 sm:$0xff]   ;;  %v11255_v58 = vld [vmem:[#allocation12 + $0x60] ss:$24 sps:$4 sm:$0xff]  }
 0x124   :  { %1213 = vmatmul.mubr.bf16.gmra.mrb[48].mxu0 %v13997_v51  ;;  %1296 = vmatmul.mubr.bf16.gmra.mrb[48].mxu1 %v13997_v51  ;;  %v11186_v51 = vld [vmem:[#allocation10 + $0x15c] ss:$24 sps:$4 sm:$0xff]  }
 0x125   :  { %2193 = vmatpush1.bf16.msra.mxu0 %v11170_v59  ;;  %2236 = vmatpush1.bf16.msra.mxu1 %v11171_v61  ;;  %v11256_v59 = vld [vmem:[#allocation10 + $0xa4] ss:$24 sps:$4 sm:$0xff]   ;;  %v11258_v61 = vld [vmem:[#allocation12 + $0x94] ss:$24 sps:$4 sm:$0xff]  }
 0x126   :  { %2194 = vmatprep.subr.bf16.mxu0 %v11172_v62  ;;  %2237 = vmatprep.subr.bf16.mxu1 %v11174_v43  ;;  %v11260_v62 = vld [vmem:[#allocation10 + $0xa0] ss:$24 sps:$4 sm:$0xff]   ;;  %v11261_v43 = vld [vmem:[#allocation12 + $0x90] ss:$24 sps:$4 sm:$0xff]  }
 0x127   :  { %1222 = vmatprep.mubr.bf16.mxu0 %v13808_v0  ;;  %1305 = vmatprep.mubr.bf16.mxu1 %v13808_v0 }
 0x129   :  { %2195 = vmatpush1.bf16.msra.mxu0 %v11176_v63  ;;  %2238 = vmatpush1.bf16.msra.mxu1 %v11177_v1  ;;  %v11262_v63 = vld [vmem:[#allocation10 + $0xd4] ss:$24 sps:$4 sm:$0xff]   ;;  %v11264_v1 = vld [vmem:[#allocation12 + $0xc4] ss:$24 sps:$4 sm:$0xff]  }
 0x12a   :  { %2196 = vmatprep.subr.bf16.mxu0 %v11178_v2  ;;  %2239 = vmatprep.subr.bf16.mxu1 %v11180_v3  ;;  %v11266_v2 = vld [vmem:[#allocation10 + $0xd0] ss:$24 sps:$4 sm:$0xff]   ;;  %v11267_v3 = vld [vmem:[#allocation12 + $0xc0] ss:$24 sps:$4 sm:$0xff]  }
 0x12c   :  { %1223 = vmatmul.mubr.bf16.gmra.mrb[52].mxu0 %v14003_v60  ;;  %1306 = vmatmul.mubr.bf16.gmra.mrb[52].mxu1 %v14003_v60  ;;  %v11198_v60 = vld [vmem:[#allocation10 + $0x1bc] ss:$24 sps:$4 sm:$0xff]  }
 0x12d   :  { %2197 = vmatpush1.bf16.msra.mxu0 %v11182_v4  ;;  %2240 = vmatpush1.bf16.msra.mxu1 %v11183_v5  ;;  %v11268_v4 = vld [vmem:[#allocation10 + $0x104] ss:$24 sps:$4 sm:$0xff]   ;;  %v11270_v5 = vld [vmem:[#allocation12 + $0xf4] ss:$24 sps:$4 sm:$0xff]  }
 0x12e   :  { %2198 = vmatprep.subr.bf16.mxu0 %v11184_v7  ;;  %2241 = vmatprep.subr.bf16.mxu1 %v11186_v51  ;;  %v11272_v7 = vld [vmem:[#allocation10 + $0x100] ss:$24 sps:$4 sm:$0xff]   ;;  %v11273_v51 = vld [vmem:[#allocation12 + $0xf0] ss:$24 sps:$4 sm:$0xff]  }
 0x12f   :  { %1232 = vmatprep.mubr.bf16.mxu0 %v13808_v0  ;;  %1315 = vmatprep.mubr.bf16.mxu1 %v13808_v0 }
 0x131   :  { %2199 = vmatpush1.bf16.msra.mxu0 %v11188_v8  ;;  %2242 = vmatpush1.bf16.msra.mxu1 %v11189_v9  ;;  %v11274_v8 = vld [vmem:[#allocation10 + $0x134] ss:$24 sps:$4 sm:$0xff]   ;;  %v11276_v9 = vld [vmem:[#allocation12 + $0x124] ss:$24 sps:$4 sm:$0xff]  }
 0x132   :  { %2200 = vmatprep.subr.bf16.mxu0 %v11190_v10  ;;  %2243 = vmatprep.subr.bf16.mxu1 %v11192_v11  ;;  %v11278_v10 = vld [vmem:[#allocation10 + $0x130] ss:$24 sps:$4 sm:$0xff]   ;;  %v11279_v11 = vld [vmem:[#allocation12 + $0x120] ss:$24 sps:$4 sm:$0xff]  }
 0x134   :  { %1233 = vmatmul.mubr.bf16.gmra.mrb[56].mxu0 %v14009_v6  ;;  %1316 = vmatmul.mubr.bf16.gmra.mrb[56].mxu1 %v14009_v6  ;;  %v11208_v6 = vld [vmem:[#allocation10 + $0x214] ss:$24 sps:$4 sm:$0xff]  }
 0x135   :  { %2201 = vmatpush1.bf16.msra.mxu0 %v11194_v12  ;;  %2244 = vmatpush1.bf16.msra.mxu1 %v11195_v13  ;;  %v11280_v12 = vld [vmem:[#allocation10 + $0x164] ss:$24 sps:$4 sm:$0xff]   ;;  %v11282_v13 = vld [vmem:[#allocation12 + $0x154] ss:$24 sps:$4 sm:$0xff]  }
 0x136   :  { %2202 = vmatprep.subr.bf16.mxu0 %v11196_v14  ;;  %2245 = vmatprep.subr.bf16.mxu1 %v11198_v60  ;;  %v11284_v14 = vld [vmem:[#allocation10 + $0x160] ss:$24 sps:$4 sm:$0xff]   ;;  %v11285_v60 = vld [vmem:[#allocation12 + $0x150] ss:$24 sps:$4 sm:$0xff]  }
 0x137   :  { %2216 = vmatprep.mubr.bf16.mxu0 %v13808_v0  ;;  %2259 = vmatprep.mubr.bf16.mxu1 %v13808_v0 }
 0x139   :  { %2203 = vmatpush1.bf16.msra.mxu0 %v11200_v15  ;;  %2246 = vmatpush1.bf16.msra.mxu1 %v11201_v16  ;;  %v11286_v15 = vld [vmem:[#allocation10 + $0x194] ss:$24 sps:$4 sm:$0xff]   ;;  %v11288_v16 = vld [vmem:[#allocation12 + $0x184] ss:$24 sps:$4 sm:$0xff]  }
 0x13a   :  { %2204 = vmatprep.subr.bf16.mxu0 %v11202_v17  ;;  %2247 = vmatprep.subr.bf16.mxu1 %v11204_v18  ;;  %v11290_v17 = vld [vmem:[#allocation10 + $0x190] ss:$24 sps:$4 sm:$0xff]   ;;  %v11291_v18 = vld [vmem:[#allocation12 + $0x180] ss:$24 sps:$4 sm:$0xff]  }
 0x13d   :  { %2205 = vmatpush1.bf16.msra.mxu0 %v11206_v19  ;;  %2248 = vmatpush1.bf16.msra.mxu1 %v11207_v21  ;;  %v11292_v19 = vld [vmem:[#allocation10 + $0x1c4] ss:$24 sps:$4 sm:$0xff]   ;;  %v11296_v21 = vld [vmem:[#allocation10 + $0x1c0] ss:$24 sps:$4 sm:$0xff]  }
 0x13e   :  { %2206 = vmatprep.subr.bf16.mxu0 %v11208_v6  ;;  %2249 = vmatprep.subr.bf16.mxu1 %v11210_v22  ;;  %v11297_v6 = vld [vmem:[#allocation12 + $0x1b0] ss:$24 sps:$4 sm:$0xff]   ;;  %v11298_v22 = vld [vmem:[#allocation10 + $0x1f4] ss:$24 sps:$4 sm:$0xff]  }
 0x141   :  { %2207 = vmatpush1.bf16.msra.mxu0 %v11212_v24  ;;  %2250 = vmatpush1.bf16.msra.mxu1 %v11213_v25  ;;  %v11300_v24 = vld [vmem:[#allocation12 + $0x1e4] ss:$24 sps:$4 sm:$0xff]   ;;  %v11302_v25 = vld [vmem:[#allocation10 + $0x1f0] ss:$24 sps:$4 sm:$0xff]  }
 0x142   :  { %2208 = vmatprep.subr.bf16.mxu0 %v11214_v26  ;;  %2251 = vmatprep.subr.bf16.mxu1 %v11216_v27  ;;  %v11303_v26 = vld [vmem:[#allocation12 + $0x1e0] ss:$24 sps:$4 sm:$0xff]   ;;  %v11304_v27 = vld [vmem:[#allocation10 + $0x224] ss:$24 sps:$4 sm:$0xff]  }
 0x145   :  { %2209 = vmatpush1.bf16.msra.mxu0 %v11218_v30  ;;  %2252 = vmatpush1.bf16.msra.mxu1 %v11219_v31  ;;  %v11308_v30 = vld [vmem:[#allocation10 + $0x220] ss:$24 sps:$4 sm:$0xff]   ;;  %v11309_v31 = vld [vmem:[#allocation12 + $0x210] ss:$24 sps:$4 sm:$0xff]  }
 0x146   :  { %2210 = vmatprep.subr.bf16.mxu0 %v11220_v33  ;;  %2253 = vmatprep.subr.bf16.mxu1 %v11222_v34  ;;  %v11310_v33 = vld [vmem:[#allocation10 + $0x254] ss:$24 sps:$4 sm:$0xff]   ;;  %v11312_v34 = vld [vmem:[#allocation12 + $0x244] ss:$24 sps:$4 sm:$0xff]  }
 0x149   :  { %2211 = vmatpush1.bf16.msra.mxu0 %v11224_v36  ;;  %2254 = vmatpush1.bf16.msra.mxu1 %v11225_v37  ;;  %v11314_v36 = vld [vmem:[#allocation10 + $0x250] ss:$24 sps:$4 sm:$0xff]   ;;  %v11315_v37 = vld [vmem:[#allocation12 + $0x240] ss:$24 sps:$4 sm:$0xff]  }
 0x14a   :  { %2212 = vmatprep.subr.bf16.mxu0 %v11226_v38  ;;  %2255 = vmatprep.subr.bf16.mxu1 %v11228_v39  ;;  %v11316_v38 = vld [vmem:[#allocation10 + $0x284] ss:$24 sps:$4 sm:$0xff]   ;;  %v11318_v39 = vld [vmem:[#allocation12 + $0x274] ss:$24 sps:$4 sm:$0xff]  }
 0x14d   :  { %2213 = vmatpush1.bf16.msra.mxu0 %v11230_v40  ;;  %2256 = vmatpush1.bf16.msra.mxu1 %v11231_v41  ;;  %v11320_v40 = vld [vmem:[#allocation10 + $0x280] ss:$24 sps:$4 sm:$0xff]   ;;  %v11321_v41 = vld [vmem:[#allocation12 + $0x270] ss:$24 sps:$4 sm:$0xff]  }
 0x14e   :  { %2214 = vmatprep.subr.bf16.mxu0 %v11232_v42  ;;  %2257 = vmatprep.subr.bf16.mxu1 %v11234_v44  ;;  %v11322_v42 = vld [vmem:[#allocation10 + $0x2b4] ss:$24 sps:$4 sm:$0xff]   ;;  %v11324_v44 = vld [vmem:[#allocation12 + $0x2a4] ss:$24 sps:$4 sm:$0xff]  }
 0x151   :  { %2215 = vmatpush1.bf16.msra.mxu0 %v11236_v45  ;;  %2258 = vmatpush1.bf16.msra.mxu1 %v11237_v46  ;;  %v11326_v45 = vld [vmem:[#allocation10 + $0x2b0] ss:$24 sps:$4 sm:$0xff]   ;;  %v11327_v46 = vld [vmem:[#allocation12 + $0x2a0] ss:$24 sps:$4 sm:$0xff]  }
 0x152   :  { %2270 = vmatprep.subr.bf16.mxu0 %v11238_v47  ;;  %2893 = vmatprep.subr.bf16.mxu1 %v11240_v48  ;;  %v11328_v47 = vld [vmem:[#allocation10 + $0x2e4] ss:$24 sps:$4 sm:$0xff]   ;;  %v11330_v48 = vld [vmem:[#allocation12 + $0x2d4] ss:$24 sps:$4 sm:$0xff]  }
 0x154   :  { %2217 = vmatmul.mubr.bf16.vlgmr.msra.gmra.mrb[60].mxu0 %v13808_v0  ;;  %2260 = vmatmul.mubr.bf16.vlgmr.msra.gmra.mrb[60].mxu1 %v13808_v0 }
 0x155   :  { %2271 = vmatpush1.bf16.msra.mxu0 %v11242_v49  ;;  %2894 = vmatpush1.bf16.msra.mxu1 %v11243_v50  ;;  %v11332_v49 = vld [vmem:[#allocation10 + $0x2e0] ss:$24 sps:$4 sm:$0xff]   ;;  %v11333_v50 = vld [vmem:[#allocation12 + $0x2d0] ss:$24 sps:$4 sm:$0xff]  }
 0x156   :  { %2272 = vmatprep.subr.bf16.mxu0 %v11244_v52  ;;  %2895 = vmatprep.subr.bf16.mxu1 %v11246_v53  ;;  %v11334_v52 = vld [vmem:[#allocation12 + $0xc] ss:$24 sps:$4 sm:$0xff]  }
 0x157   :  { %2302 = vmatprep.mubr.bf16.mxu0 %v13808_v0  ;;  %2925 = vmatprep.mubr.bf16.mxu1 %v13808_v0  ;;  %v11336_v53 = vld [vmem:[#allocation12 + $0x14] ss:$24 sps:$4 sm:$0xff]  }
 0x159   :  { %2273 = vmatpush1.bf16.msra.mxu0 %v11248_v54  ;;  %2896 = vmatpush1.bf16.msra.mxu1 %v11249_v35  ;;  %v11338_v54 = vld [vmem:[#allocation12 + $0x8] ss:$24 sps:$4 sm:$0xff]  }
 0x15a   :  { %2274 = vmatprep.subr.bf16.mxu0 %v11250_v55  ;;  %2897 = vmatprep.subr.bf16.mxu1 %v11252_v56  ;;  %v11339_v35 = vld [vmem:[#allocation12 + $0x10] ss:$24 sps:$4 sm:$0xff]   ;;  %v14068_v55 = vsub.s32 0, %v14055_v23  ;;  %v11340_v56 = vld [vmem:[#allocation12 + $0x3c] ss:$24 sps:$4 sm:$0xff]  }
 0x15d   :  { %2275 = vmatpush1.bf16.msra.mxu0 %v11254_v57  ;;  %2898 = vmatpush1.bf16.msra.mxu1 %v11255_v58  ;;  %v11342_v57 = vld [vmem:[#allocation12 + $0x44] ss:$24 sps:$4 sm:$0xff]   ;;  %v14071_v58 = vsub.s32 2, %v14055_v23 }
 0x15e   :  { %2276 = vmatprep.subr.bf16.mxu0 %v11256_v59  ;;  %2899 = vmatprep.subr.bf16.mxu1 %v11258_v61  ;;  %v14074_v59 = vsub.s32 3, %v14055_v23  ;;  %v14077_v61 = vsub.s32 1, %v14055_v23 }
 0x15f   :  { %14954 = vst [vmem:[#allocation26_spill] sm:$0xff] %v14071_v58 }
 0x160   :  { %14955 = vst [vmem:[#allocation27_spill] sm:$0xff] %v14074_v59  ;;  %14956 = vst [vmem:[#allocation28_spill] sm:$0xff] %v14077_v61 }
 0x161   :  { %2277 = vmatpush1.bf16.msra.mxu0 %v11260_v62  ;;  %2900 = vmatpush1.bf16.msra.mxu1 %v11261_v43  ;;  %v11344_v62 = vld [vmem:[#allocation12 + $0x38] ss:$24 sps:$4 sm:$0xff]  }
 0x162   :  { %2278 = vmatprep.subr.bf16.mxu0 %v11262_v63  ;;  %2901 = vmatprep.subr.bf16.mxu1 %v11264_v1  ;;  %v11345_v43 = vld [vmem:[#allocation12 + $0x40] ss:$24 sps:$4 sm:$0xff]   ;;  %v14083_v63 = vrot.slane %v14058_v29, %v14068_v55  ;;  %v11346_v1 = vld [vmem:[#allocation12 + $0x6c] ss:$24 sps:$4 sm:$0xff]  }
 0x165   :  { %2279 = vmatpush1.bf16.msra.mxu0 %v11266_v2  ;;  %2902 = vmatpush1.bf16.msra.mxu1 %v11267_v3  ;;  %v11348_v2 = vld [vmem:[#allocation12 + $0x74] ss:$24 sps:$4 sm:$0xff]   ;;  %v14087_v3 = vrot.slane %v14058_v29, %v14071_v58 }
 0x166   :  { %2280 = vmatprep.subr.bf16.mxu0 %v11268_v4  ;;  %2903 = vmatprep.subr.bf16.mxu1 %v11270_v5  ;;  %v14091_v4 = vrot.slane %v14058_v29, %v14074_v59 }
 0x169   :  { %2281 = vmatpush1.bf16.msra.mxu0 %v11272_v7  ;;  %2904 = vmatpush1.bf16.msra.mxu1 %v11273_v51  ;;  %v14095_v7 = vrot.slane %v14058_v29, %v14077_v61  ;;  %v11350_v51 = vld [vmem:[#allocation12 + $0x68] ss:$24 sps:$4 sm:$0xff]  }
 0x16a   :  { %2282 = vmatprep.subr.bf16.mxu0 %v11274_v8  ;;  %2905 = vmatprep.subr.bf16.mxu1 %v11276_v9  ;;  %v11351_v8 = vld [vmem:[#allocation12 + $0x70] ss:$24 sps:$4 sm:$0xff]  }
 0x16d   :  { %2283 = vmatpush1.bf16.msra.mxu0 %v11278_v10  ;;  %2906 = vmatpush1.bf16.msra.mxu1 %v11279_v11 }
 0x16e   :  { %2284 = vmatprep.subr.bf16.mxu0 %v11280_v12  ;;  %2907 = vmatprep.subr.bf16.mxu1 %v11282_v13  ;;  %v11352_v12 = vld [vmem:[#allocation12 + $0x9c] ss:$24 sps:$4 sm:$0xff]  }
 0x16f   :  { %v11354_v13 = vld [vmem:[#allocation12 + $0xa4] ss:$24 sps:$4 sm:$0xff]  }
 0x171   :  { %2285 = vmatpush1.bf16.msra.mxu0 %v11284_v14  ;;  %2908 = vmatpush1.bf16.msra.mxu1 %v11285_v60 }
 0x172   :  { %2286 = vmatprep.subr.bf16.mxu0 %v11286_v15  ;;  %2909 = vmatprep.subr.bf16.mxu1 %v11288_v16 }
 0x175   :  { %2287 = vmatpush1.bf16.msra.mxu0 %v11290_v17  ;;  %2910 = vmatpush1.bf16.msra.mxu1 %v11291_v18 }
 0x176   :  { %2288 = vmatprep.subr.bf16.mxu0 %v11292_v19  ;;  %2911 = vmatprep.subr.bf16.mxu1 %v11294_v20 }
 0x179   :  { %2289 = vmatpush1.bf16.msra.mxu0 %v11296_v21  ;;  %2912 = vmatpush1.bf16.msra.mxu1 %v11297_v6 }
 0x17a   :  { %2290 = vmatprep.subr.bf16.mxu0 %v11298_v22  ;;  %2913 = vmatprep.subr.bf16.mxu1 %v11300_v24  ;;  %v11356_v22 = vld [vmem:[#allocation12 + $0x98] ss:$24 sps:$4 sm:$0xff]  }
 0x17b   :  { %v11357_v24 = vld [vmem:[#allocation12 + $0xa0] ss:$24 sps:$4 sm:$0xff]  }
 0x17d   :  { %2291 = vmatpush1.bf16.msra.mxu0 %v11302_v25  ;;  %2914 = vmatpush1.bf16.msra.mxu1 %v11303_v26 }
 0x17e   :  { %2292 = vmatprep.subr.bf16.mxu0 %v11304_v27  ;;  %2915 = vmatprep.subr.bf16.mxu1 %v11306_v28  ;;  %v11358_v27 = vld [vmem:[#allocation12 + $0xcc] ss:$24 sps:$4 sm:$0xff]  }
 0x17f   :  { %v11360_v28 = vld [vmem:[#allocation12 + $0xd4] ss:$24 sps:$4 sm:$0xff]  }
 0x181   :  { %2293 = vmatpush1.bf16.msra.mxu0 %v11308_v30  ;;  %2916 = vmatpush1.bf16.msra.mxu1 %v11309_v31 }
 0x182   :  { %2294 = vmatprep.subr.bf16.mxu0 %v11310_v33  ;;  %2917 = vmatprep.subr.bf16.mxu1 %v11312_v34 }
 0x185   :  { %2295 = vmatpush1.bf16.msra.mxu0 %v11314_v36  ;;  %2918 = vmatpush1.bf16.msra.mxu1 %v11315_v37  ;;  %v11362_v36 = vld [vmem:[#allocation12 + $0xc8] ss:$24 sps:$4 sm:$0xff]  }
 0x186   :  { %2296 = vmatprep.subr.bf16.mxu0 %v11316_v38  ;;  %2919 = vmatprep.subr.bf16.mxu1 %v11318_v39  ;;  %v11363_v37 = vld [vmem:[#allocation12 + $0xd0] ss:$24 sps:$4 sm:$0xff]  }
 0x189   :  { %2297 = vmatpush1.bf16.msra.mxu0 %v11320_v40  ;;  %2920 = vmatpush1.bf16.msra.mxu1 %v11321_v41  ;;  %v11364_v41 = vld [vmem:[#allocation12 + $0xfc] ss:$24 sps:$4 sm:$0xff]  }
 0x18a   :  { %2298 = vmatprep.subr.bf16.mxu0 %v11322_v42  ;;  %2921 = vmatprep.subr.bf16.mxu1 %v11324_v44  ;;  %v11366_v42 = vld [vmem:[#allocation12 + $0x104] ss:$24 sps:$4 sm:$0xff]  }
 0x18d   :  { %2299 = vmatpush1.bf16.msra.mxu0 %v11326_v45  ;;  %2922 = vmatpush1.bf16.msra.mxu1 %v11327_v46 }
 0x18e   :  { %2300 = vmatprep.subr.bf16.mxu0 %v11328_v47  ;;  %2923 = vmatprep.subr.bf16.mxu1 %v11330_v48 }
 0x191   :  { %2301 = vmatpush1.bf16.msra.mxu0 %v11332_v49  ;;  %2924 = vmatpush1.bf16.msra.mxu1 %v11333_v50 }
 0x192   :  { %2936 = vmatprep.subr.bf16.mxu0 %v11334_v52  ;;  %2979 = vmatprep.subr.bf16.mxu1 %v11336_v53 }
 0x194   :  { %2303 = vmatmul.mubr.bf16.vlgmr.msra.gmra.mrb[64].mxu0 %v13808_v0  ;;  %2926 = vmatmul.mubr.bf16.vlgmr.msra.gmra.mrb[64].mxu1 %v13808_v0 }
 0x195   :  { %2937 = vmatpush1.bf16.msra.mxu0 %v11338_v54  ;;  %2980 = vmatpush1.bf16.msra.mxu1 %v11339_v35 }
 0x196   :  { %2938 = vmatprep.subr.bf16.mxu0 %v11340_v56  ;;  %2981 = vmatprep.subr.bf16.mxu1 %v11342_v57  ;;  %v11368_v56 = vld [vmem:[#allocation12 + $0xf8] ss:$24 sps:$4 sm:$0xff]  }
 0x197   :  { %v862_v5 = vpop.f32.mrb[0].mxu0  ;;  %v945_v9 = vpop.f32.mrb[0].mxu1  ;;  %2968 = vmatprep.mubr.bf16.mxu0 %v13808_v0  ;;  %3011 = vmatprep.mubr.bf16.mxu1 %v13808_v0  ;;  %v11369_v57 = vld [vmem:[#allocation12 + $0x100] ss:$24 sps:$4 sm:$0xff]  }
 0x198   :  { %v863_v10 = vadd.f32 %v862_v5, %v14083_v63  ;;  %v864_v11 = vpop.f32.mrb[1].mxu0  ;;  %v946_v14 = vadd.f32 %v945_v9, %v14087_v3  ;;  %v947_v60 = vpop.f32.mrb[1].mxu1 }
 0x199   :  { %2939 = vmatpush1.bf16.msra.mxu0 %v11344_v62  ;;  %2982 = vmatpush1.bf16.msra.mxu1 %v11345_v43  ;;  %v866_v15 = vpop.f32.mrb[2].mxu0  ;;  %v948_v29 = vadd.f32 %v947_v60, %v14091_v4  ;;  %v949_v16 = vpop.f32.mrb[2].mxu1  ;;  %v865_v21 = vadd.f32 %v864_v11, %v14095_v7  ;;  %v11375_v11 = vld [vmem:[#allocation12 + $0x130] ss:$24 sps:$4 sm:$0xff]   ;;  %v11376_v60 = vld [vmem:[#allocation12 + $0x15c] ss:$24 sps:$4 sm:$0xff]  }
 0x19a   :  { %v867_v17 = vadd.f32 %v866_v15, %v14083_v63  ;;  %v868_v18 = vpop.f32.mrb[3].mxu0  ;;  %2940 = vmatprep.subr.bf16.mxu0 %v11346_v1  ;;  %2983 = vmatprep.subr.bf16.mxu1 %v11348_v2  ;;  %v950_v19 = vadd.f32 %v949_v16, %v14087_v3  ;;  %v951_v20 = vpop.f32.mrb[3].mxu1  ;;  %v11370_v1 = vld [vmem:[#allocation12 + $0x12c] ss:$24 sps:$4 sm:$0xff]  }
 0x19b   :  { %v869_v6 = vadd.f32 %v868_v18, %v14095_v7  ;;  %v952_v25 = vadd.f32 %v951_v20, %v14091_v4  ;;  %v11372_v2 = vld [vmem:[#allocation12 + $0x134] ss:$24 sps:$4 sm:$0xff]   ;;  %v11378_v15 = vld [vmem:[#allocation12 + $0x164] ss:$24 sps:$4 sm:$0xff]  }
 0x19c   :  { %v14107_v26 = vpack.c.bf16 %v867_v17, %v863_v10  ;;  %v14109_v30 = vpack.c.bf16 %v950_v19, %v946_v14  ;;  %v11374_v10 = vld [vmem:[#allocation12 + $0x128] ss:$24 sps:$4 sm:$0xff]  }
 0x19d   :  { %v14111_v31 = vpack.c.bf16 %v869_v6, %v865_v21  ;;  %2941 = vmatpush1.bf16.msra.mxu0 %v11350_v51  ;;  %2984 = vmatpush1.bf16.msra.mxu1 %v11351_v8  ;;  %v14113_v33 = vpack.c.bf16 %v952_v25, %v948_v29 }
 0x19e   :  { %2942 = vmatprep.subr.bf16.mxu0 %v11352_v12  ;;  %2985 = vmatprep.subr.bf16.mxu1 %v11354_v13 }
 0x19f   :  { %v872_v34 = vpop.f32.mrb[4].mxu0  ;;  %v955_v38 = vpop.f32.mrb[4].mxu1 }
 0x1a0   :  { %v873_v39 = vadd.f32 %v872_v34, %v14083_v63  ;;  %v874_v40 = vpop.f32.mrb[5].mxu0  ;;  %v956_v44 = vadd.f32 %v955_v38, %v14087_v3  ;;  %v957_v45 = vpop.f32.mrb[5].mxu1  ;;  %v11384_v38 = vld [vmem:[#allocation12 + $0x194] ss:$24 sps:$4 sm:$0xff]  }
 0x1a1   :  { %v875_v46 = vadd.f32 %v874_v40, %v14095_v7  ;;  %2943 = vmatpush1.bf16.msra.mxu0 %v11356_v22  ;;  %2986 = vmatpush1.bf16.msra.mxu1 %v11357_v24  ;;  %v876_v47 = vpop.f32.mrb[6].mxu0  ;;  %v958_v48 = vadd.f32 %v957_v45, %v14091_v4  ;;  %v959_v49 = vpop.f32.mrb[6].mxu1  ;;  %v11387_v45 = vld [vmem:[#allocation12 + $0x190] ss:$24 sps:$4 sm:$0xff]  }
 0x1a2   :  { %v877_v50 = vadd.f32 %v876_v47, %v14083_v63  ;;  %v878_v52 = vpop.f32.mrb[7].mxu0  ;;  %2944 = vmatprep.subr.bf16.mxu0 %v11358_v27  ;;  %2987 = vmatprep.subr.bf16.mxu1 %v11360_v28  ;;  %v960_v53 = vadd.f32 %v959_v49, %v14087_v3  ;;  %v961_v54 = vpop.f32.mrb[7].mxu1  ;;  %v11380_v27 = vld [vmem:[#allocation12 + $0x158] ss:$24 sps:$4 sm:$0xff]   ;;  %v11388_v49 = vld [vmem:[#allocation12 + $0x1bc] ss:$24 sps:$4 sm:$0xff]  }
 0x1a3   :  { %v879_v35 = vadd.f32 %v878_v52, %v14095_v7  ;;  %v962_v62 = vadd.f32 %v961_v54, %v14091_v4  ;;  %v11381_v28 = vld [vmem:[#allocation12 + $0x160] ss:$24 sps:$4 sm:$0xff]  }
 0x1a4   :  { %v14123_v43 = vpack.c.bf16 %v877_v50, %v873_v39  ;;  %v14125_v5 = vpack.c.bf16 %v960_v53, %v956_v44  ;;  %v11386_v44 = vld [vmem:[#allocation12 + $0x188] ss:$24 sps:$4 sm:$0xff]   ;;  %v11390_v50 = vld [vmem:[#allocation12 + $0x1c4] ss:$24 sps:$4 sm:$0xff]  }
 0x1a5   :  { %v14127_v51 = vpack.c.bf16 %v879_v35, %v875_v46  ;;  %2945 = vmatpush1.bf16.msra.mxu0 %v11362_v36  ;;  %2988 = vmatpush1.bf16.msra.mxu1 %v11363_v37  ;;  %v14129_v8 = vpack.c.bf16 %v962_v62, %v958_v48  ;;  %v11382_v37 = vld [vmem:[#allocation12 + $0x18c] ss:$24 sps:$4 sm:$0xff]  }
 0x1a6   :  { %2946 = vmatprep.subr.bf16.mxu0 %v11364_v41  ;;  %2989 = vmatprep.subr.bf16.mxu1 %v11366_v42 }
 0x1a7   :  { %v882_v9 = vpop.f32.mrb[8].mxu0  ;;  %v965_v12 = vpop.f32.mrb[8].mxu1 }
 0x1a8   :  { %v883_v13 = vadd.f32 %v882_v9, %v14083_v63  ;;  %v884_v14 = vpop.f32.mrb[9].mxu0  ;;  %v966_v29 = vadd.f32 %v965_v12, %v14087_v3  ;;  %v967_v16 = vpop.f32.mrb[9].mxu1  ;;  %v11393_v12 = vld [vmem:[#allocation12 + $0x1c0] ss:$24 sps:$4 sm:$0xff]  }
 0x1a9   :  { %v885_v17 = vadd.f32 %v884_v14, %v14095_v7  ;;  %2947 = vmatpush1.bf16.msra.mxu0 %v11368_v56  ;;  %2990 = vmatpush1.bf16.msra.mxu1 %v11369_v57  ;;  %v886_v18 = vpop.f32.mrb[10].mxu0  ;;  %v968_v19 = vadd.f32 %v967_v16, %v14091_v4  ;;  %v969_v20 = vpop.f32.mrb[10].mxu1 }
 0x1aa   :  { %v887_v21 = vadd.f32 %v886_v18, %v14083_v63  ;;  %v888_v6 = vpop.f32.mrb[11].mxu0  ;;  %2948 = vmatprep.subr.bf16.mxu0 %v11370_v1  ;;  %2991 = vmatprep.subr.bf16.mxu1 %v11372_v2  ;;  %v970_v22 = vadd.f32 %v969_v20, %v14087_v3  ;;  %v971_v24 = vpop.f32.mrb[11].mxu1  ;;  %v11399_v20 = vld [vmem:[#allocation12 + $0x1f0] ss:$24 sps:$4 sm:$0xff]  }
 0x1ab   :  { %v889_v25 = vadd.f32 %v888_v6, %v14095_v7  ;;  %v972_v34 = vadd.f32 %v971_v24, %v14091_v4  ;;  %v11400_v24 = vld [vmem:[#allocation12 + $0x21c] ss:$24 sps:$4 sm:$0xff]  }
 0x1ac   :  { %v14139_v36 = vpack.c.bf16 %v887_v21, %v883_v13  ;;  %v14141_v39 = vpack.c.bf16 %v970_v22, %v966_v29 }
 0x1ad   :  { %v14143_v40 = vpack.c.bf16 %v889_v25, %v885_v17  ;;  %2949 = vmatpush1.bf16.msra.mxu0 %v11374_v10  ;;  %2992 = vmatpush1.bf16.msra.mxu1 %v11375_v11  ;;  %v14145_v41 = vpack.c.bf16 %v972_v34, %v968_v19  ;;  %v11392_v11 = vld [vmem:[#allocation12 + $0x1b8] ss:$24 sps:$4 sm:$0xff]   ;;  %v11398_v19 = vld [vmem:[#allocation12 + $0x1e8] ss:$24 sps:$4 sm:$0xff]   ;;  %v11402_v25 = vld [vmem:[#allocation12 + $0x224] ss:$24 sps:$4 sm:$0xff]  }
 0x1ae   :  { %2950 = vmatprep.subr.bf16.mxu0 %v11376_v60  ;;  %2993 = vmatprep.subr.bf16.mxu1 %v11378_v15  ;;  %v11394_v60 = vld [vmem:[#allocation12 + $0x1ec] ss:$24 sps:$4 sm:$0xff]   ;;  %v284_v34 = vsub.s32 6, %v14055_v23 }
 0x1af   :  { %v892_v42 = vpop.f32.mrb[12].mxu0  ;;  %v975_v46 = vpop.f32.mrb[12].mxu1  ;;  %v11396_v15 = vld [vmem:[#allocation12 + $0x1f4] ss:$24 sps:$4 sm:$0xff]  }
 0x1b0   :  { %v893_v47 = vadd.f32 %v892_v42, %v14083_v63  ;;  %v894_v48 = vpop.f32.mrb[13].mxu0  ;;  %v976_v52 = vadd.f32 %v975_v46, %v14087_v3  ;;  %v977_v53 = vpop.f32.mrb[13].mxu1 }
 0x1b1   :  { %v895_v54 = vadd.f32 %v894_v48, %v14095_v7  ;;  %2951 = vmatpush1.bf16.msra.mxu0 %v11380_v27  ;;  %2994 = vmatpush1.bf16.msra.mxu1 %v11381_v28  ;;  %v896_v35 = vpop.f32.mrb[14].mxu0  ;;  %v978_v56 = vadd.f32 %v977_v53, %v14091_v4  ;;  %v979_v57 = vpop.f32.mrb[14].mxu1  ;;  %v11404_v53 = vld [vmem:[#allocation12 + $0x218] ss:$24 sps:$4 sm:$0xff]  }
 0x1b2   :  { %v897_v62 = vadd.f32 %v896_v35, %v14083_v63  ;;  %v898_v1 = vpop.f32.mrb[15].mxu0  ;;  %2952 = vmatprep.subr.bf16.mxu0 %v11382_v37  ;;  %2995 = vmatprep.subr.bf16.mxu1 %v11384_v38  ;;  %v980_v2 = vadd.f32 %v979_v57, %v14087_v3  ;;  %v981_v9 = vpop.f32.mrb[15].mxu1  ;;  %v11406_v57 = vld [vmem:[#allocation12 + $0x24c] ss:$24 sps:$4 sm:$0xff]  }
 0x1b3   :  { %v899_v10 = vadd.f32 %v898_v1, %v14095_v7  ;;  %v982_v13 = vadd.f32 %v981_v9, %v14091_v4 }
 0x1b4   :  { %v14155_v14 = vpack.c.bf16 %v897_v62, %v893_v47  ;;  %v14157_v29 = vpack.c.bf16 %v980_v2, %v976_v52  ;;  %v280_v52 = vsub.s32 5, %v14055_v23  ;;  %v11408_v62 = vld [vmem:[#allocation12 + $0x254] ss:$24 sps:$4 sm:$0xff]  }
 0x1b5   :  { %v14159_v16 = vpack.c.bf16 %v899_v10, %v895_v54  ;;  %2953 = vmatpush1.bf16.msra.mxu0 %v11386_v44  ;;  %2996 = vmatpush1.bf16.msra.mxu1 %v11387_v45  ;;  %v14161_v17 = vpack.c.bf16 %v982_v13, %v978_v56  ;;  %v288_v45 = vsub.s32 7, %v14055_v23  ;;  %v11405_v54 = vld [vmem:[#allocation12 + $0x220] ss:$24 sps:$4 sm:$0xff]  }
 0x1b6   :  { %14957 = vst [vmem:[#allocation29_spill] sm:$0xff] %v14157_v29  ;;  %2954 = vmatprep.subr.bf16.mxu0 %v11388_v49  ;;  %2997 = vmatprep.subr.bf16.mxu1 %v11390_v50  ;;  %v11410_v10 = vld [vmem:[#allocation12 + $0x248] ss:$24 sps:$4 sm:$0xff]  }
 0x1b7   :  { %14958 = vst [vmem:[#allocation30_spill] sm:$0xff] %v14159_v16  ;;  %14959 = vst [vmem:[#allocation31_spill] sm:$0xff] %v14161_v17  ;;  %v902_v18 = vpop.f32.mrb[16].mxu0  ;;  %v985_v21 = vpop.f32.mrb[16].mxu1 }
 0x1b8   :  { %v903_v6 = vadd.f32 %v902_v18, %v14083_v63  ;;  %v904_v22 = vpop.f32.mrb[17].mxu0  ;;  %v986_v27 = vadd.f32 %v985_v21, %v14087_v3  ;;  %v987_v28 = vpop.f32.mrb[17].mxu1  ;;  %v11414_v18 = vld [vmem:[#allocation12 + $0x284] ss:$24 sps:$4 sm:$0xff]  }
 0x1b9   :  { %v905_v37 = vadd.f32 %v904_v22, %v14095_v7  ;;  %2955 = vmatpush1.bf16.msra.mxu0 %v11392_v11  ;;  %2998 = vmatpush1.bf16.msra.mxu1 %v11393_v12  ;;  %v906_v38 = vpop.f32.mrb[18].mxu0  ;;  %v988_v42 = vadd.f32 %v987_v28, %v14091_v4  ;;  %v989_v44 = vpop.f32.mrb[18].mxu1  ;;  %v11411_v11 = vld [vmem:[#allocation12 + $0x250] ss:$24 sps:$4 sm:$0xff]  }
 0x1ba   :  { %v907_v46 = vadd.f32 %v906_v38, %v14083_v63  ;;  %v908_v47 = vpop.f32.mrb[19].mxu0  ;;  %2956 = vmatprep.subr.bf16.mxu0 %v11394_v60  ;;  %2999 = vmatprep.subr.bf16.mxu1 %v11396_v15  ;;  %v990_v48 = vadd.f32 %v989_v44, %v14087_v3  ;;  %v991_v49 = vpop.f32.mrb[19].mxu1  ;;  %v12790_v63 = vld [vmem:[#allocation9] sm:$0xff] }
 0x1bb   :  { %v909_v50 = vadd.f32 %v908_v47, %v14095_v7  ;;  %v992_v35 = vadd.f32 %v991_v49, %v14091_v4  ;;  %v14178_v2 = vrot.slane %v12790_v63, %v284_v34  ;;  %v14184_v23 = vrot.slane %v12790_v63, %v288_v45  ;;  %v11412_v15 = vld [vmem:[#allocation12 + $0x27c] ss:$24 sps:$4 sm:$0xff]   ;;  %v11416_v38 = vld [vmem:[#allocation12 + $0x278] ss:$24 sps:$4 sm:$0xff]  }
 0x1bc   :  { %v14174_v56 = vpack.c.bf16 %v907_v46, %v903_v6  ;;  %v14176_v1 = vpack.c.bf16 %v990_v48, %v986_v27  ;;  %v14186_v7 = vrot.slane %v12790_v63, %v280_v52  ;;  %v11418_v46 = vld [vmem:[#allocation12 + $0x2ac] ss:$24 sps:$4 sm:$0xff]   ;;  %v11424_v63 = vld [vmem:[#allocation12 + $0x2dc] ss:$24 sps:$4 sm:$0xff]  }
 0x1bd   :  { %v14180_v9 = vpack.c.bf16 %v909_v50, %v905_v37  ;;  %2957 = vmatpush1.bf16.msra.mxu0 %v11398_v19  ;;  %3000 = vmatpush1.bf16.msra.mxu1 %v11399_v20  ;;  %v14182_v3 = vpack.c.bf16 %v992_v35, %v988_v42  ;;  %v11417_v42 = vld [vmem:[#allocation12 + $0x280] ss:$24 sps:$4 sm:$0xff]   ;;  %v11420_v47 = vld [vmem:[#allocation12 + $0x2b4] ss:$24 sps:$4 sm:$0xff]  }
 0x1be   :  { %14960 = vst [vmem:[#allocation32_spill] sm:$0xff] %v14174_v56  ;;  %14961 = vst [vmem:[#allocation33_spill] sm:$0xff] %v14176_v1  ;;  %2958 = vmatprep.subr.bf16.mxu0 %v11400_v24  ;;  %3001 = vmatprep.subr.bf16.mxu1 %v11402_v25  ;;  %v11430_v1 = vld [vmem:[#allocation16 + $0x1200] ss:$16 sps:$4 sm:$0xff]   ;;  %v11438_v56 = vld [vmem:[#allocation16 + $0x1224] ss:$16 sps:$4 sm:$0xff]  }
 0x1bf   :  { %14962 = vst [vmem:[#allocation34_spill] sm:$0xff] %v14180_v9  ;;  %14963 = vst [vmem:[#allocation35_spill] sm:$0xff] %v14182_v3  ;;  %v1028_v4 = vpop.f32.mrb[20].mxu0  ;;  %v1111_v12 = vpop.f32.mrb[20].mxu1 }
 0x1c0   :  { %v1029_v13 = vadd.f32 %v1028_v4, %v14061_v32  ;;  %v1030_v60 = vpop.f32.mrb[21].mxu0  ;;  %v1112_v19 = vadd.f32 %v1111_v12, %v14178_v2  ;;  %v1113_v20 = vpop.f32.mrb[21].mxu1  ;;  %v11426_v4 = vld [vmem:[#allocation12 + $0x2e4] ss:$24 sps:$4 sm:$0xff]  }
 0x1c1   :  { %2959 = vmatpush1.bf16.msra.mxu0 %v11404_v53  ;;  %3002 = vmatpush1.bf16.msra.mxu1 %v11405_v54  ;;  %v1032_v21 = vpop.f32.mrb[22].mxu0  ;;  %v1114_v6 = vadd.f32 %v1113_v20, %v14184_v23  ;;  %v1115_v22 = vpop.f32.mrb[22].mxu1  ;;  %v1031_v34 = vadd.f32 %v1030_v60, %v14186_v7  ;;  %v11422_v53 = vld [vmem:[#allocation12 + $0x2a8] ss:$24 sps:$4 sm:$0xff]  }
 0x1c2   :  { %v1033_v24 = vadd.f32 %v1032_v21, %v14061_v32  ;;  %v1034_v25 = vpop.f32.mrb[23].mxu0  ;;  %2960 = vmatprep.subr.bf16.mxu0 %v11406_v57  ;;  %3003 = vmatprep.subr.bf16.mxu1 %v11408_v62  ;;  %v1116_v27 = vadd.f32 %v1115_v22, %v14178_v2  ;;  %v1117_v28 = vpop.f32.mrb[23].mxu1  ;;  %v11423_v54 = vld [vmem:[#allocation12 + $0x2b0] ss:$24 sps:$4 sm:$0xff]  }
 0x1c3   :  { %v1035_v37 = vadd.f32 %v1034_v25, %v14186_v7  ;;  %v1118_v44 = vadd.f32 %v1117_v28, %v14184_v23  ;;  %v11428_v22 = vld [vmem:[#allocation12 + $0x2d8] ss:$24 sps:$4 sm:$0xff]  }
 0x1c4   :  { %v14196_v45 = vpack.c.bf16 %v1033_v24, %v1029_v13  ;;  %v14198_v48 = vpack.c.bf16 %v1116_v27, %v1112_v19  ;;  %v11429_v24 = vld [vmem:[#allocation12 + $0x2e0] ss:$24 sps:$4 sm:$0xff]  }
 0x1c5   :  { %v14200_v49 = vpack.c.bf16 %v1035_v37, %v1031_v34  ;;  %2961 = vmatpush1.bf16.msra.mxu0 %v11410_v10  ;;  %3004 = vmatpush1.bf16.msra.mxu1 %v11411_v11  ;;  %v14202_v50 = vpack.c.bf16 %v1118_v44, %v1114_v6 }
 0x1c6   :  { %14964 = vst [vmem:[#allocation36_spill] sm:$0xff] %v14198_v48  ;;  %2962 = vmatprep.subr.bf16.mxu0 %v11412_v15  ;;  %3005 = vmatprep.subr.bf16.mxu1 %v11414_v18 }
 0x1c7   :  { %14965 = vst [vmem:[#allocation37_spill] sm:$0xff] %v14202_v50  ;;  %v1038_v52 = vpop.f32.mrb[24].mxu0  ;;  %v1121_v35 = vpop.f32.mrb[24].mxu1 }
 0x1c8   :  { %v1039_v57 = vadd.f32 %v1038_v52, %v14061_v32  ;;  %v1040_v62 = vpop.f32.mrb[25].mxu0  ;;  %v1122_v12 = vadd.f32 %v1121_v35, %v14178_v2  ;;  %v1123_v13 = vpop.f32.mrb[25].mxu1 }
 0x1c9   :  { %v1041_v60 = vadd.f32 %v1040_v62, %v14186_v7  ;;  %2963 = vmatpush1.bf16.msra.mxu0 %v11416_v38  ;;  %3006 = vmatpush1.bf16.msra.mxu1 %v11417_v42  ;;  %v1042_v10 = vpop.f32.mrb[26].mxu0  ;;  %v1124_v11 = vadd.f32 %v1123_v13, %v14184_v23  ;;  %v1125_v15 = vpop.f32.mrb[26].mxu1 }
 0x1ca   :  { %v1043_v18 = vadd.f32 %v1042_v10, %v14061_v32  ;;  %v1044_v19 = vpop.f32.mrb[27].mxu0  ;;  %2964 = vmatprep.subr.bf16.mxu0 %v11418_v46  ;;  %3007 = vmatprep.subr.bf16.mxu1 %v11420_v47  ;;  %v1126_v20 = vadd.f32 %v1125_v15, %v14178_v2  ;;  %v1127_v21 = vpop.f32.mrb[27].mxu1 }
 0x1cb   :  { %v1045_v6 = vadd.f32 %v1044_v19, %v14186_v7  ;;  %v1128_v25 = vadd.f32 %v1127_v21, %v14184_v23 }
 0x1cc   :  { %v14212_v27 = vpack.c.bf16 %v1043_v18, %v1039_v57  ;;  %v14214_v28 = vpack.c.bf16 %v1126_v20, %v1122_v12 }
 0x1cd   :  { %v14216_v34 = vpack.c.bf16 %v1045_v6, %v1041_v60  ;;  %2965 = vmatpush1.bf16.msra.mxu0 %v11422_v53  ;;  %3008 = vmatpush1.bf16.msra.mxu1 %v11423_v54  ;;  %v14218_v37 = vpack.c.bf16 %v1128_v25, %v1124_v11 }
 0x1ce   :  { %14966 = vst [vmem:[#allocation38_spill] sm:$0xff] %v14214_v28  ;;  %2966 = vmatprep.subr.bf16.mxu0 %v11424_v63  ;;  %3009 = vmatprep.subr.bf16.mxu1 %v11426_v4 }
 0x1cf   :  { %14967 = vst [vmem:[#allocation39_spill] sm:$0xff] %v14218_v37  ;;  %v1048_v38 = vpop.f32.mrb[28].mxu0  ;;  %v1131_v42 = vpop.f32.mrb[28].mxu1  ;;  %v11451_v37 = vld [vmem:[#allocation16 + $0x1268] ss:$16 sps:$4 sm:$0xff]  }
 0x1d0   :  { %v1049_v44 = vadd.f32 %v1048_v38, %v14061_v32  ;;  %v1050_v46 = vpop.f32.mrb[29].mxu0  ;;  %v1132_v47 = vadd.f32 %v1131_v42, %v14178_v2  ;;  %v1133_v52 = vpop.f32.mrb[29].mxu1 }
 0x1d1   :  { %v1051_v35 = vadd.f32 %v1050_v46, %v14186_v7  ;;  %2967 = vmatpush1.bf16.msra.mxu0 %v11428_v22  ;;  %3010 = vmatpush1.bf16.msra.mxu1 %v11429_v24  ;;  %v1052_v57 = vpop.f32.mrb[30].mxu0  ;;  %v1134_v53 = vadd.f32 %v1133_v52, %v14184_v23  ;;  %v1135_v54 = vpop.f32.mrb[30].mxu1 }
 0x1d2   :  { %v1053_v62 = vadd.f32 %v1052_v57, %v14061_v32  ;;  %v1054_v63 = vpop.f32.mrb[31].mxu0  ;;  %v1136_v4 = vadd.f32 %v1135_v54, %v14178_v2  ;;  %v1137_v12 = vpop.f32.mrb[31].mxu1 }
 0x1d3   :  { %v1055_v13 = vadd.f32 %v1054_v63, %v14186_v7  ;;  %v1138_v60 = vadd.f32 %v1137_v12, %v14184_v23  ;;  %v255_v12 = vld [vmem:[#allocation9 + $0x8] sm:$0xf] }
 0x1d4   :  { %v14228_v10 = vpack.c.bf16 %v1053_v62, %v1049_v44  ;;  %2969 = vmatmul.mubr.bf16.vlgmr.msra.gmra.mrb[68].mxu0 %v13808_v0  ;;  %3012 = vmatmul.mubr.bf16.vlgmr.msra.gmra.mrb[68].mxu1 %v13808_v0  ;;  %v14232_v11 = vpack.c.bf16 %v1136_v4, %v1132_v47 }
 0x1d5   :  { %v14234_v15 = vpack.c.bf16 %v1055_v13, %v1051_v35  ;;  %v14236_v18 = vpack.c.bf16 %v1138_v60, %v1134_v53 }
 0x1d7   :  { %v1058_v19 = vpop.f32.mrb[32].mxu0  ;;  %v1141_v20 = vpop.f32.mrb[32].mxu1 }
 0x1d8   :  { %v1059_v21 = vadd.f32 %v1058_v19, %v14061_v32  ;;  %v1060_v6 = vpop.f32.mrb[33].mxu0  ;;  %v1142_v22 = vadd.f32 %v1141_v20, %v14178_v2  ;;  %v1143_v24 = vpop.f32.mrb[33].mxu1 }
 0x1d9   :  { %v1061_v25 = vadd.f32 %v1060_v6, %v14186_v7  ;;  %v1062_v38 = vpop.f32.mrb[34].mxu0  ;;  %v1144_v42 = vadd.f32 %v1143_v24, %v14184_v23  ;;  %v1145_v0 = vpop.f32.mrb[34].mxu1 }
 0x1da   :  { %v1063_v44 = vadd.f32 %v1062_v38, %v14061_v32  ;;  %v1064_v46 = vpop.f32.mrb[35].mxu0  ;;  %v1146_v47 = vadd.f32 %v1145_v0, %v14178_v2  ;;  %v1147_v52 = vpop.f32.mrb[35].mxu1 }
 0x1db   :  { %v1065_v35 = vadd.f32 %v1064_v46, %v14186_v7  ;;  %v1148_v57 = vadd.f32 %v1147_v52, %v14184_v23 }
 0x1dc   :  { %v14246_v53 = vpack.c.bf16 %v1063_v44, %v1059_v21  ;;  %v14248_v54 = vpack.c.bf16 %v1146_v47, %v1142_v22 }
 0x1dd   :  { %v14250_v62 = vpack.c.bf16 %v1065_v35, %v1061_v25  ;;  %v14252_v63 = vpack.c.bf16 %v1148_v57, %v1144_v42  ;;  %v14265_v35 = vrot.slane %v255_v12, %v14068_v55 }
 0x1de   :  { %14968 = vst [vmem:[#allocation40_spill] sm:$0xff] %v14246_v53 }
 0x1df   :  { %14969 = vst [vmem:[#allocation41_spill] sm:$0xff] %v14250_v62  ;;  %v1068_v4 = vpop.f32.mrb[36].mxu0  ;;  %v1151_v13 = vpop.f32.mrb[36].mxu1 }
 0x1e0   :  { %v1069_v60 = vadd.f32 %v1068_v4, %v14061_v32  ;;  %v1070_v19 = vpop.f32.mrb[37].mxu0  ;;  %v1152_v20 = vadd.f32 %v1151_v13, %v14178_v2  ;;  %v1153_v6 = vpop.f32.mrb[37].mxu1  ;;  %v14270_v4 = vrot.slane %v255_v12, %v14071_v58 }
 0x1e1   :  { %v1071_v24 = vadd.f32 %v1070_v19, %v14186_v7  ;;  %v1072_v38 = vpop.f32.mrb[38].mxu0  ;;  %v1154_v21 = vadd.f32 %v1153_v6, %v14184_v23  ;;  %v1155_v22 = vpop.f32.mrb[38].mxu1 }
 0x1e2   :  { %v1073_v25 = vadd.f32 %v1072_v38, %v14061_v32  ;;  %v1074_v0 = vpop.f32.mrb[39].mxu0  ;;  %v1156_v42 = vadd.f32 %v1155_v22, %v14178_v2  ;;  %v1157_v44 = vpop.f32.mrb[39].mxu1  ;;  %v14275_v32 = vrot.slane %v255_v12, %v14077_v61 }
 0x1e3   :  { %v1075_v46 = vadd.f32 %v1074_v0, %v14186_v7  ;;  %v1158_v47 = vadd.f32 %v1157_v44, %v14184_v23  ;;  %v14280_v7 = vrot.slane %v255_v12, %v14074_v59 }
 0x1e4   :  { %v14262_v52 = vpack.c.bf16 %v1073_v25, %v1069_v60  ;;  %v14267_v57 = vpack.c.bf16 %v1156_v42, %v1152_v20 }
 0x1e5   :  { %v14272_v13 = vpack.c.bf16 %v1075_v46, %v1071_v24  ;;  %v14277_v2 = vpack.c.bf16 %v1158_v47, %v1154_v21 }
 0x1e6   :  { %14970 = vst [vmem:[#allocation42_spill] sm:$0xff] %v14262_v52 }
 0x1e7   :  { %14971 = vst [vmem:[#allocation43_spill] sm:$0xff] %v14272_v13  ;;  %v1194_v23 = vpop.f32.mrb[40].mxu0  ;;  %v1277_v60 = vpop.f32.mrb[40].mxu1 }
 0x1e8   :  { %v1195_v19 = vadd.f32 %v1194_v23, %v14265_v35  ;;  %v1196_v6 = vpop.f32.mrb[41].mxu0  ;;  %v1278_v20 = vadd.f32 %v1277_v60, %v14270_v4  ;;  %v1279_v38 = vpop.f32.mrb[41].mxu1 }
 0x1e9   :  { %v1197_v22 = vadd.f32 %v1196_v6, %v14275_v32  ;;  %v1198_v24 = vpop.f32.mrb[42].mxu0  ;;  %v1280_v25 = vadd.f32 %v1279_v38, %v14280_v7  ;;  %v1281_v0 = vpop.f32.mrb[42].mxu1 }
 0x1ea   :  { %v1199_v21 = vadd.f32 %v1198_v24, %v14265_v35  ;;  %v1200_v42 = vpop.f32.mrb[43].mxu0  ;;  %v1282_v12 = vadd.f32 %v1281_v0, %v14270_v4  ;;  %v1283_v44 = vpop.f32.mrb[43].mxu1 }
 0x1eb   :  { %v1201_v46 = vadd.f32 %v1200_v42, %v14275_v32  ;;  %v1284_v47 = vadd.f32 %v1283_v44, %v14280_v7 }
 0x1ec   :  { %v14290_v23 = vpack.c.bf16 %v1199_v21, %v1195_v19  ;;  %v14292_v60 = vpack.c.bf16 %v1282_v12, %v1278_v20 }
 0x1ed   :  { %v14294_v59 = vpack.c.bf16 %v1201_v46, %v1197_v22  ;;  %v14296_v6 = vpack.c.bf16 %v1284_v47, %v1280_v25 }
 0x1ee   :  { %14972 = vst [vmem:[#allocation44_spill] sm:$0xff] %v14290_v23  ;;  %14973 = vst [vmem:[#allocation45_spill] sm:$0xff] %v14292_v60 }
 0x1ef   :  { %14974 = vst [vmem:[#allocation46_spill] sm:$0xff] %v14294_v59  ;;  %14975 = vst [vmem:[#allocation47_spill] sm:$0xff] %v14296_v6  ;;  %v1204_v38 = vpop.f32.mrb[44].mxu0  ;;  %v1287_v58 = vpop.f32.mrb[44].mxu1 }
 0x1f0   :  { %v1205_v24 = vadd.f32 %v1204_v38, %v14265_v35  ;;  %v1206_v13 = vpop.f32.mrb[45].mxu0  ;;  %v1288_v0 = vadd.f32 %v1287_v58, %v14270_v4  ;;  %v1289_v52 = vpop.f32.mrb[45].mxu1 }
 0x1f1   :  { %v1207_v42 = vadd.f32 %v1206_v13, %v14275_v32  ;;  %v1208_v50 = vpop.f32.mrb[46].mxu0  ;;  %v1290_v19 = vadd.f32 %v1289_v52, %v14280_v7  ;;  %v1291_v21 = vpop.f32.mrb[46].mxu1 }
 0x1f2   :  { %v1209_v20 = vadd.f32 %v1208_v50, %v14265_v35  ;;  %v1210_v22 = vpop.f32.mrb[47].mxu0  ;;  %v1292_v25 = vadd.f32 %v1291_v21, %v14270_v4  ;;  %v1293_v12 = vpop.f32.mrb[47].mxu1 }
 0x1f3   :  { %v1211_v44 = vadd.f32 %v1210_v22, %v14275_v32  ;;  %v1294_v46 = vadd.f32 %v1293_v12, %v14280_v7 }
 0x1f4   :  { %v14306_v47 = vpack.c.bf16 %v1209_v20, %v1205_v24  ;;  %v14308_v58 = vpack.c.bf16 %v1292_v25, %v1288_v0 }
 0x1f5   :  { %v14310_v38 = vpack.c.bf16 %v1211_v44, %v1207_v42  ;;  %v14312_v13 = vpack.c.bf16 %v1294_v46, %v1290_v19 }
 0x1f6   :  { %14976 = vst [vmem:[#allocation48_spill] sm:$0xff] %v14306_v47  ;;  %14977 = vst [vmem:[#allocation49_spill] sm:$0xff] %v14308_v58  ;;  %v11441_v58 = vld [vmem:[#allocation16 + $0x122c] ss:$16 sps:$4 sm:$0xff]   ;;  %v11444_v47 = vld [vmem:[#allocation16 + $0x1244] ss:$16 sps:$4 sm:$0xff]  }
 0x1f7   :  { %14978 = vst [vmem:[#allocation50_spill] sm:$0xff] %v14310_v38  ;;  %14979 = vst [vmem:[#allocation51_spill] sm:$0xff] %v14312_v13  ;;  %v1214_v52 = vpop.f32.mrb[48].mxu0  ;;  %v1297_v6 = vpop.f32.mrb[48].mxu1 }
 0x1f8   :  { %v1215_v50 = vadd.f32 %v1214_v52, %v14265_v35  ;;  %v1216_v60 = vpop.f32.mrb[49].mxu0  ;;  %v1298_v21 = vadd.f32 %v1297_v6, %v14270_v4  ;;  %v1299_v59 = vpop.f32.mrb[49].mxu1 }
 0x1f9   :  { %v1217_v22 = vadd.f32 %v1216_v60, %v14275_v32  ;;  %v1218_v23 = vpop.f32.mrb[50].mxu0  ;;  %v1300_v24 = vadd.f32 %v1299_v59, %v14280_v7  ;;  %v1301_v20 = vpop.f32.mrb[50].mxu1 }
 0x1fa   :  { %v1219_v0 = vadd.f32 %v1218_v23, %v14265_v35  ;;  %v1220_v42 = vpop.f32.mrb[51].mxu0  ;;  %v1302_v19 = vadd.f32 %v1301_v20, %v14270_v4  ;;  %v1303_v25 = vpop.f32.mrb[51].mxu1 }
 0x1fb   :  { %v1221_v12 = vadd.f32 %v1220_v42, %v14275_v32  ;;  %v1304_v44 = vadd.f32 %v1303_v25, %v14280_v7  ;;  %v11432_v42 = vld [vmem:[#allocation16 + $0x1204] ss:$16 sps:$4 sm:$0xff]  }
 0x1fc   :  { %v14322_v46 = vpack.c.bf16 %v1219_v0, %v1215_v50  ;;  %v14324_v6 = vpack.c.bf16 %v1302_v19, %v1298_v21  ;;  %v11435_v19 = vld [vmem:[#allocation16 + $0x120c] ss:$16 sps:$4 sm:$0xff]   ;;  %3574 = vmatprep.subr.bf16.mxu0 %v11432_v42 }
 0x1fd   :  { %v14326_v52 = vpack.c.bf16 %v1221_v12, %v1217_v22  ;;  %v14328_v60 = vpack.c.bf16 %v1304_v44, %v1300_v24  ;;  %v11433_v22 = vld [vmem:[#allocation16 + $0x1208] ss:$16 sps:$4 sm:$0xff]   ;;  %3617 = vmatprep.subr.bf16.mxu1 %v11435_v19  ;;  %3575 = vmatpush1.bf16.msra.mxu0 %v11430_v1  ;;  %v11442_v1 = vld [vmem:[#allocation16 + $0x1240] ss:$16 sps:$4 sm:$0xff]  }
 0x1fe   :  { %3618 = vmatpush1.bf16.msra.mxu1 %v11433_v22  ;;  %3576 = vmatprep.subr.bf16.mxu0 %v11438_v56  ;;  %v11445_v56 = vld [vmem:[#allocation16 + $0x1248] ss:$16 sps:$4 sm:$0xff]   ;;  %v11450_v22 = vld [vmem:[#allocation16 + $0x1264] ss:$16 sps:$4 sm:$0xff]  }
 0x1ff   :  { %v1224_v59 = vpop.f32.mrb[52].mxu0  ;;  %v1307_v48 = vpop.f32.mrb[52].mxu1  ;;  %3619 = vmatprep.subr.bf16.mxu1 %v11441_v58 }
 0x200   :  { %v1225_v23 = vadd.f32 %v1224_v59, %v14265_v35  ;;  %v1226_v3 = vpop.f32.mrb[53].mxu0  ;;  %v1308_v20 = vadd.f32 %v1307_v48, %v14270_v4  ;;  %v1309_v9 = vpop.f32.mrb[53].mxu1 }
 0x201   :  { %v1227_v25 = vadd.f32 %v1226_v3, %v14275_v32  ;;  %v1228_v50 = vpop.f32.mrb[54].mxu0  ;;  %v1310_v21 = vadd.f32 %v1309_v9, %v14280_v7  ;;  %v1311_v0 = vpop.f32.mrb[54].mxu1  ;;  %v11436_v3 = vld [vmem:[#allocation16 + $0x1220] ss:$16 sps:$4 sm:$0xff]  }
 0x202   :  { %v1229_v24 = vadd.f32 %v1228_v50, %v14265_v35  ;;  %v1230_v12 = vpop.f32.mrb[55].mxu0  ;;  %v1312_v44 = vadd.f32 %v1311_v0, %v14270_v4  ;;  %v1313_v59 = vpop.f32.mrb[55].mxu1  ;;  %v11439_v50 = vld [vmem:[#allocation16 + $0x1228] ss:$16 sps:$4 sm:$0xff]   ;;  %3577 = vmatpush1.bf16.msra.mxu0 %v11436_v3 }
 0x203   :  { %v1231_v48 = vadd.f32 %v1230_v12, %v14275_v32  ;;  %v1314_v13 = vadd.f32 %v1313_v59, %v14280_v7  ;;  %v11447_v12 = vld [vmem:[#allocation16 + $0x124c] ss:$16 sps:$4 sm:$0xff]   ;;  %3620 = vmatpush1.bf16.msra.mxu1 %v11439_v50  ;;  %3578 = vmatprep.subr.bf16.mxu0 %v11444_v47  ;;  %v11456_v50 = vld [vmem:[#allocation16 + $0x1284] ss:$16 sps:$4 sm:$0xff]  }
 0x204   :  { %v14338_v9 = vpack.c.bf16 %v1229_v24, %v1225_v23  ;;  %v14340_v38 = vpack.c.bf16 %v1312_v44, %v1308_v20  ;;  %3621 = vmatprep.subr.bf16.mxu1 %v11447_v12  ;;  %v11448_v44 = vld [vmem:[#allocation16 + $0x1260] ss:$16 sps:$4 sm:$0xff]  }
 0x205   :  { %v14342_v0 = vpack.c.bf16 %v1231_v48, %v1227_v25  ;;  %v14344_v42 = vpack.c.bf16 %v1314_v13, %v1310_v21  ;;  %v11453_v48 = vld [vmem:[#allocation16 + $0x126c] ss:$16 sps:$4 sm:$0xff]  }
 0x206   :  { %3579 = vmatpush1.bf16.msra.mxu0 %v11442_v1  ;;  %v11463_v1 = vld [vmem:[#allocation16 + $0x12a8] ss:$16 sps:$4 sm:$0xff]  }
 0x207   :  { %v1234_v62 = vpop.f32.mrb[56].mxu0  ;;  %v1317_v59 = vpop.f32.mrb[56].mxu1  ;;  %3622 = vmatpush1.bf16.msra.mxu1 %v11445_v56  ;;  %3580 = vmatprep.subr.bf16.mxu0 %v11450_v22  ;;  %v2314_v56 = vunpack.c.l.bf16 %v14111_v31 }
 0x208   :  { %v1235_v19 = vadd.f32 %v1234_v62, %v14265_v35  ;;  %v1236_v23 = vpop.f32.mrb[57].mxu0  ;;  %v1318_v20 = vadd.f32 %v1317_v59, %v14270_v4  ;;  %v1319_v24 = vpop.f32.mrb[57].mxu1  ;;  %3623 = vmatprep.subr.bf16.mxu1 %v11453_v48  ;;  %v2317_v48 = vunpack.c.h.bf16 %v14107_v26 }
 0x209   :  { %v1237_v25 = vadd.f32 %v1236_v23, %v14275_v32  ;;  %v1238_v13 = vpop.f32.mrb[58].mxu0  ;;  %v1320_v58 = vadd.f32 %v1319_v24, %v14280_v7  ;;  %v1321_v21 = vpop.f32.mrb[58].mxu1  ;;  %v11459_v23 = vld [vmem:[#allocation16 + $0x128c] ss:$16 sps:$4 sm:$0xff]  }
 0x20a   :  { %v1239_v3 = vadd.f32 %v1238_v13, %v14265_v35  ;;  %v1240_v62 = vpop.f32.mrb[59].mxu0  ;;  %v1322_v53 = vadd.f32 %v1321_v21, %v14270_v4  ;;  %v1323_v59 = vpop.f32.mrb[59].mxu1  ;;  %v11454_v4 = vld [vmem:[#allocation16 + $0x1280] ss:$16 sps:$4 sm:$0xff]   ;;  %v11457_v13 = vld [vmem:[#allocation16 + $0x1288] ss:$16 sps:$4 sm:$0xff]   ;;  %3581 = vmatpush1.bf16.msra.mxu0 %v11448_v44 }
 0x20b   :  { %v1241_v47 = vadd.f32 %v1240_v62, %v14275_v32  ;;  %v1324_v28 = vadd.f32 %v1323_v59, %v14280_v7  ;;  %v11462_v21 = vld [vmem:[#allocation16 + $0x12a4] ss:$16 sps:$4 sm:$0xff]   ;;  %v11465_v32 = vld [vmem:[#allocation16 + $0x12ac] ss:$16 sps:$4 sm:$0xff]   ;;  %3624 = vmatpush1.bf16.msra.mxu1 %v11451_v37  ;;  %3582 = vmatprep.subr.bf16.mxu0 %v11456_v50  ;;  %v11460_v7 = vld [vmem:[#allocation16 + $0x12a0] ss:$16 sps:$4 sm:$0xff]   ;;  %v2316_v37 = vunpack.c.l.bf16 %v14113_v33 }
 0x20c   :  { %v14354_v17 = vpack.c.bf16 %v1239_v3, %v1235_v19  ;;  %v14356_v24 = vpack.c.bf16 %v1322_v53, %v1318_v20  ;;  %3625 = vmatprep.subr.bf16.mxu1 %v11459_v23  ;;  %v2315_v53 = vunpack.c.l.bf16 %v14109_v30  ;;  %v2319_v3 = vunpack.c.h.bf16 %v14109_v30 }
 0x20d   :  { %v14358_v12 = vpack.c.bf16 %v1241_v47, %v1237_v25  ;;  %v14360_v35 = vpack.c.bf16 %v1324_v28, %v1320_v58  ;;  %v2313_v28 = vunpack.c.l.bf16 %v14107_v26  ;;  %v2318_v23 = vunpack.c.h.bf16 %v14111_v31  ;;  %v11474_v31 = vld [vmem:[#allocation16 + $0x12e4] ss:$16 sps:$4 sm:$0xff]  }
 0x20e   :  { %3583 = vmatpush1.bf16.msra.mxu0 %v11454_v4  ;;  %v2320_v4 = vunpack.c.h.bf16 %v14113_v33  ;;  %v11477_v33 = vld [vmem:[#allocation16 + $0x12ec] ss:$16 sps:$4 sm:$0xff]  }
 0x20f   :  { %3626 = vmatpush1.bf16.msra.mxu1 %v11457_v13  ;;  %3584 = vmatprep.subr.bf16.mxu0 %v11462_v21  ;;  %v11468_v13 = vld [vmem:[#allocation16 + $0x12c4] ss:$16 sps:$4 sm:$0xff]  }
 0x210   :  { %3627 = vmatprep.subr.bf16.mxu1 %v11465_v32 }
 0x212   :  { %3585 = vmatpush1.bf16.msra.mxu0 %v11460_v7 }
 0x213   :  { %3628 = vmatpush1.bf16.msra.mxu1 %v11463_v1  ;;  %3586 = vmatprep.subr.bf16.mxu0 %v11468_v13  ;;  %v11495_v13 = vld [vmem:[#allocation16 + $0x134c] ss:$16 sps:$4 sm:$0xff]  }
 0x227   :  { %v2218_v19 = vpop.f32.mrb[60].mxu0  ;;  %v2261_v20 = vpop.f32.mrb[60].mxu1 }
 0x228   :  { %v14366_v22 = vadd.f32 %v2313_v28, %v2218_v19  ;;  %v14368_v25 = vadd.f32 %v2315_v53, %v2261_v20  ;;  %v2220_v58 = vpop.f32.mrb[61].mxu0  ;;  %v2263_v44 = vpop.f32.mrb[61].mxu1  ;;  %v11466_v28 = vld [vmem:[#allocation16 + $0x12c0] ss:$16 sps:$4 sm:$0xff]   ;;  %v11469_v53 = vld [vmem:[#allocation16 + $0x12c8] ss:$16 sps:$4 sm:$0xff]  }
 0x229   :  { %v14372_v62 = vadd.f32 %v2314_v56, %v2220_v58  ;;  %v14374_v59 = vadd.f32 %v2316_v37, %v2263_v44  ;;  %v2222_v50 = vpop.f32.mrb[62].mxu0  ;;  %v2265_v47 = vpop.f32.mrb[62].mxu1  ;;  %v11471_v19 = vld [vmem:[#allocation16 + $0x12cc] ss:$16 sps:$4 sm:$0xff]   ;;  %3587 = vmatpush1.bf16.msra.mxu0 %v11466_v28  ;;  %v11472_v20 = vld [vmem:[#allocation16 + $0x12e0] ss:$16 sps:$4 sm:$0xff]  }
 0x22a   :  { %v14378_v21 = vadd.f32 %v2317_v48, %v2222_v50  ;;  %v14380_v32 = vadd.f32 %v2319_v3, %v2265_v47  ;;  %v2224_v7 = vpop.f32.mrb[63].mxu0  ;;  %v2267_v1 = vpop.f32.mrb[63].mxu1  ;;  %v11475_v56 = vld [vmem:[#allocation16 + $0x12e8] ss:$16 sps:$4 sm:$0xff]   ;;  %3629 = vmatprep.subr.bf16.mxu1 %v11471_v19  ;;  %3588 = vmatprep.subr.bf16.mxu0 %v11474_v31  ;;  %v11480_v37 = vld [vmem:[#allocation16 + $0x1304] ss:$16 sps:$4 sm:$0xff]  }
 0x22b   :  { %v14382_v26 = vadd.f32 %v2318_v23, %v2224_v7  ;;  %v14384_v30 = vadd.f32 %v2320_v4, %v2267_v1  ;;  %3630 = vmatpush1.bf16.msra.mxu1 %v11469_v53  ;;  %v11483_v58 = vld [vmem:[#allocation16 + $0x130c] ss:$16 sps:$4 sm:$0xff]   ;;  %v11478_v44 = vld [vmem:[#allocation16 + $0x1300] ss:$16 sps:$4 sm:$0xff]   ;;  %v11481_v48 = vld [vmem:[#allocation16 + $0x1308] ss:$16 sps:$4 sm:$0xff]  }
 0x22c   :  { %3631 = vmatprep.subr.bf16.mxu1 %v11477_v33  ;;  %v11486_v3 = vld [vmem:[#allocation16 + $0x1324] ss:$16 sps:$4 sm:$0xff]   ;;  %v11489_v50 = vld [vmem:[#allocation16 + $0x132c] ss:$16 sps:$4 sm:$0xff]   ;;  %v11484_v47 = vld [vmem:[#allocation16 + $0x1320] ss:$16 sps:$4 sm:$0xff]  }
 0x22d   :  { %3589 = vmatpush1.bf16.msra.mxu0 %v11472_v20  ;;  %v11487_v23 = vld [vmem:[#allocation16 + $0x1328] ss:$16 sps:$4 sm:$0xff]   ;;  %v11492_v4 = vld [vmem:[#allocation16 + $0x1344] ss:$16 sps:$4 sm:$0xff]   ;;  %v11490_v7 = vld [vmem:[#allocation16 + $0x1340] ss:$16 sps:$4 sm:$0xff]  }
 0x22e   :  { %3590 = vmatprep.subr.bf16.mxu0 %v11480_v37  ;;  %v11493_v1 = vld [vmem:[#allocation16 + $0x1348] ss:$16 sps:$4 sm:$0xff]   ;;  %v11498_v28 = vld [vmem:[#allocation16 + $0x1364] ss:$16 sps:$4 sm:$0xff]   ;;  %v11501_v53 = vld [vmem:[#allocation16 + $0x136c] ss:$16 sps:$4 sm:$0xff]  }
 0x22f   :  { %3632 = vmatpush1.bf16.msra.mxu1 %v11475_v56  ;;  %v11496_v19 = vld [vmem:[#allocation16 + $0x1360] ss:$16 sps:$4 sm:$0xff]   ;;  %v11499_v20 = vld [vmem:[#allocation16 + $0x1368] ss:$16 sps:$4 sm:$0xff]   ;;  %v11504_v31 = vld [vmem:[#allocation16 + $0x1384] ss:$16 sps:$4 sm:$0xff]  }
 0x230   :  { %3633 = vmatprep.subr.bf16.mxu1 %v11483_v58  ;;  %v11507_v56 = vld [vmem:[#allocation16 + $0x138c] ss:$16 sps:$4 sm:$0xff]   ;;  %v11502_v33 = vld [vmem:[#allocation16 + $0x1380] ss:$16 sps:$4 sm:$0xff]   ;;  %v11505_v37 = vld [vmem:[#allocation16 + $0x1388] ss:$16 sps:$4 sm:$0xff]  }
 0x231   :  { %3591 = vmatpush1.bf16.msra.mxu0 %v11478_v44  ;;  %v11510_v58 = vld [vmem:[#allocation16 + $0x13a4] ss:$16 sps:$4 sm:$0xff]   ;;  %v11513_v44 = vld [vmem:[#allocation16 + $0x13ac] ss:$16 sps:$4 sm:$0xff]  }
 0x232   :  { %3592 = vmatprep.subr.bf16.mxu0 %v11486_v3  ;;  %v11511_v3 = vld [vmem:[#allocation16 + $0x13a8] ss:$16 sps:$4 sm:$0xff]  }
 0x233   :  { %3634 = vmatpush1.bf16.msra.mxu1 %v11481_v48  ;;  %v11508_v48 = vld [vmem:[#allocation16 + $0x13a0] ss:$16 sps:$4 sm:$0xff]  }
 0x234   :  { %3635 = vmatprep.subr.bf16.mxu1 %v11489_v50  ;;  %v11516_v50 = vld [vmem:[#allocation16 + $0x13c4] ss:$16 sps:$4 sm:$0xff]  }
 0x235   :  { %3593 = vmatpush1.bf16.msra.mxu0 %v11484_v47  ;;  %v11519_v47 = vld [vmem:[#allocation16 + $0x13cc] ss:$16 sps:$4 sm:$0xff]  }
 0x236   :  { %3594 = vmatprep.subr.bf16.mxu0 %v11492_v4  ;;  %v10077_v4 = vmul.f32 -1.442695, %v14372_v62  ;;  %v11531_v62 = vld [vmem:[#allocation16 + $0xc] ss:$16 sps:$4 sm:$0xff]  }
 0x237   :  { %3636 = vmatpush1.bf16.msra.mxu1 %v11487_v23  ;;  %v10076_v23 = vmul.f32 -1.442695, %v14366_v22  ;;  %v11528_v22 = vld [vmem:[#allocation16 + $0x4] ss:$16 sps:$4 sm:$0xff]  }
 0x238   :  { %3637 = vmatprep.subr.bf16.mxu1 %v11495_v13  ;;  %v11514_v13 = vld [vmem:[#allocation16 + $0x13c0] ss:$16 sps:$4 sm:$0xff]  }
 0x239   :  { %3595 = vmatpush1.bf16.msra.mxu0 %v11490_v7  ;;  %v11517_v7 = vld [vmem:[#allocation16 + $0x13c8] ss:$16 sps:$4 sm:$0xff]   ;;  %12390 = vpow2.f32 %v10076_v23 }
 0x23a   :  { %3596 = vmatprep.subr.bf16.mxu0 %v11498_v28  ;;  %v11522_v28 = vld [vmem:[#allocation16 + $0x13e4] ss:$16 sps:$4 sm:$0xff]   ;;  %12392 = vpow2.f32 %v10077_v4 }
 0x23b   :  { %3638 = vmatpush1.bf16.msra.mxu1 %v11493_v1  ;;  %v11520_v1 = vld [vmem:[#allocation16 + $0x13e0] ss:$16 sps:$4 sm:$0xff]  }
 0x23c   :  { %3639 = vmatprep.subr.bf16.mxu1 %v11501_v53  ;;  %v10080_v53 = vmul.f32 -1.442695, %v14378_v21  ;;  %v10078_v21 = vmul.f32 -1.442695, %v14368_v25  ;;  %v1638_v25 = vld [vmem:[#allocation13] sm:$0x3] }
 0x23d   :  { %3597 = vmatpush1.bf16.msra.mxu0 %v11496_v19  ;;  %v11525_v19 = vld [vmem:[#allocation16 + $0x13ec] ss:$16 sps:$4 sm:$0xff]  }
 0x23e   :  { %3598 = vmatprep.subr.bf16.mxu0 %v11504_v31  ;;  %v11523_v31 = vld [vmem:[#allocation16 + $0x13e8] ss:$16 sps:$4 sm:$0xff]   ;;  %12394 = vpow2.f32 %v10080_v53  ;;  %v2385_v53 = vunpack.c.l.bf16 %v14196_v45 }
 0x23f   :  { %3640 = vmatpush1.bf16.msra.mxu1 %v11499_v20  ;;  %v10081_v20 = vmul.f32 -1.442695, %v14382_v26  ;;  %v10079_v26 = vmul.f32 -1.442695, %v14374_v59 }
 0x240   :  { %3641 = vmatprep.subr.bf16.mxu1 %v11507_v56  ;;  %v10082_v56 = vmul.f32 -1.442695, %v14380_v32 }
 0x241   :  { %3599 = vmatpush1.bf16.msra.mxu0 %v11502_v33  ;;  %12396 = vpow2.f32 %v10081_v20 }
 0x242   :  { %3600 = vmatprep.subr.bf16.mxu0 %v11510_v58  ;;  %12398 = vpow2.f32 %v10078_v21 }
 0x243   :  { %3642 = vmatpush1.bf16.msra.mxu1 %v11505_v37  ;;  %v12391_v33 = vpop.eup %12390  ;;  %v10083_v37 = vmul.f32 -1.442695, %v14384_v30  ;;  %12400 = vpow2.f32 %v10079_v26  ;;  %v14395_v30 = vrot.slane %v1638_v25, %v14068_v55 }
 0x244   :  { %3643 = vmatprep.subr.bf16.mxu1 %v11513_v44  ;;  %v12393_v58 = vpop.eup %12392  ;;  %12402 = vpow2.f32 %v10082_v56 }
 0x245   :  { %3601 = vmatpush1.bf16.msra.mxu0 %v11508_v48  ;;  %12404 = vpow2.f32 %v10083_v37 }
 0x246   :  { %3602 = vmatprep.subr.bf16.mxu0 %v11516_v50  ;;  %v2354_v50 = vadd.f32 1.0, %v12393_v58  ;;  %v3026_v58 = vunpack.c.h.bf16 %v14267_v57 }
 0x247   :  { %3644 = vmatpush1.bf16.msra.mxu1 %v11511_v3  ;;  %v2353_v3 = vadd.f32 1.0, %v12391_v33 }
 0x248   :  { %3645 = vmatprep.subr.bf16.mxu1 %v11519_v47  ;;  %v12395_v44 = vpop.eup %12394 }
 0x249   :  { %3603 = vmatpush1.bf16.msra.mxu0 %v11514_v13  ;;  %v2357_v47 = vadd.f32 1.0, %v12395_v44  ;;  %12406 = vrcp.f32 %v2353_v3  ;;  %v14398_v13 = vrot.slane %v1638_v25, %v14077_v61  ;;  %v3027_v25 = vunpack.c.h.bf16 %v14277_v2 }
 0x24a   :  { %3604 = vmatprep.subr.bf16.mxu0 %v11522_v28  ;;  %12408 = vrcp.f32 %v2354_v50  ;;  %v3022_v28 = vunpack.c.l.bf16 %v14267_v57 }
 0x24b   :  { %3646 = vmatpush1.bf16.msra.mxu1 %v11517_v7  ;;  %v12397_v48 = vpop.eup %12396  ;;  %12410 = vrcp.f32 %v2357_v47 }
 0x24c   :  { %3647 = vmatprep.subr.bf16.mxu1 %v11525_v19  ;;  %v2358_v23 = vadd.f32 1.0, %v12397_v48  ;;  %v12399_v59 = vpop.eup %12398  ;;  %v2386_v19 = vunpack.c.l.bf16 %v14200_v49 }
 0x24d   :  { %3605 = vmatpush1.bf16.msra.mxu0 %v11520_v1  ;;  %v12401_v32 = vpop.eup %12400  ;;  %v2355_v1 = vadd.f32 1.0, %v12399_v59 }
 0x24e   :  { %3988 = vmatprep.subr.bf16.mxu0 %v11528_v22  ;;  %12412 = vrcp.f32 %v2358_v23  ;;  %v12403_v4 = vpop.eup %12402  ;;  %v2356_v20 = vadd.f32 1.0, %v12401_v32 }
 0x24f   :  { %3648 = vmatpush1.bf16.msra.mxu1 %v11523_v31  ;;  %v12405_v7 = vpop.eup %12404  ;;  %v2359_v21 = vadd.f32 1.0, %v12403_v4  ;;  %12414 = vrcp.f32 %v2355_v1  ;;  %v2388_v1 = vunpack.c.h.bf16 %v14200_v49 }
 0x250   :  { %4031 = vmatprep.subr.bf16.mxu1 %v11531_v62  ;;  %v3023_v62 = vunpack.c.l.bf16 %v14277_v2  ;;  %v2360_v48 = vadd.f32 1.0, %v12405_v7  ;;  %12416 = vrcp.f32 %v2356_v20 }
 0x251   :  { %12418 = vrcp.f32 %v2359_v21 }
 0x252   :  { %12420 = vrcp.f32 %v2360_v48 }
 0x253   :  { %v12407_v44 = vpop.eup %12406 }
 0x254   :  { %v12409_v59 = vpop.eup %12408 }
 0x255   :  { %v12411_v16 = vpop.eup %12410 }
 0x267   :  { %v2304_v31 = vpop.f32.mrb[64].mxu0  ;;  %v2927_v22 = vpop.f32.mrb[64].mxu1 }
 0x268   :  { %v2377_v26 = vadd.f32 %v2304_v31, %v14395_v30  ;;  %v3030_v56 = vadd.f32 %v3022_v28, %v2927_v22  ;;  %v2306_v33 = vpop.f32.mrb[65].mxu0  ;;  %v2929_v37 = vpop.f32.mrb[65].mxu1 }
 0x269   :  { %v2378_v3 = vadd.f32 %v2306_v33, %v14398_v13  ;;  %v3031_v50 = vadd.f32 %v3023_v62, %v2929_v37  ;;  %v2308_v47 = vpop.f32.mrb[66].mxu0  ;;  %v2931_v23 = vpop.f32.mrb[66].mxu1  ;;  %v2387_v62 = vunpack.c.h.bf16 %v14196_v45 }
 0x26a   :  { %v2381_v32 = vmul.f32 %v12407_v44, %v2377_v26  ;;  %v2379_v4 = vadd.f32 %v2308_v47, %v14395_v30  ;;  %v3034_v31 = vadd.f32 %v3026_v58, %v2931_v23  ;;  %v2310_v28 = vpop.f32.mrb[67].mxu0  ;;  %v2933_v22 = vpop.f32.mrb[67].mxu1 }
 0x26b   :  { %v2382_v57 = vmul.f32 %v12409_v59, %v2378_v3  ;;  %v2380_v7 = vadd.f32 %v2310_v28, %v14398_v13  ;;  %v3035_v29 = vadd.f32 %v3027_v25, %v2933_v22  ;;  %v12413_v33 = vpop.eup %12412 }
 0x26c   :  { %v2389_v37 = vadd.f32 %v2385_v53, %v2381_v32  ;;  %v2383_v2 = vmul.f32 %v12411_v16, %v2379_v4  ;;  %v12415_v20 = vpop.eup %12414 }
 0x26d   :  { %v2390_v26 = vadd.f32 %v2386_v19, %v2382_v57  ;;  %v2384_v44 = vmul.f32 %v12413_v33, %v2380_v7  ;;  %v12417_v3 = vpop.eup %12416  ;;  %v2397_v59 = vsub.f32 1.0, %v12415_v20  ;;  %v2405_v16 = vmul.f32 0.0, %v12415_v20 }
 0x26e   :  { %12422 = vtanh.f32 %v2389_v37  ;;  %v2391_v58 = vadd.f32 %v2387_v62, %v2383_v2  ;;  %v12419_v23 = vpop.eup %12418  ;;  %v2398_v21 = vsub.f32 1.0, %v12417_v3  ;;  %v2406_v19 = vmul.f32 0.0, %v12417_v3 }
 0x26f   :  { %12424 = vtanh.f32 %v2390_v26  ;;  %v2392_v47 = vadd.f32 %v2388_v1, %v2384_v44  ;;  %v12421_v25 = vpop.eup %12420  ;;  %v2399_v32 = vsub.f32 1.0, %v12419_v23  ;;  %v2407_v28 = vmul.f32 0.0, %v12419_v23 }
 0x270   :  { %12426 = vtanh.f32 %v2391_v58  ;;  %v2400_v22 = vsub.f32 1.0, %v12421_v25  ;;  %v2408_v37 = vmul.f32 0.0, %v12421_v25  ;;  %v10180_v44 = vmul.f32 -1.442695, %v3030_v56 }
 0x271   :  { %12428 = vtanh.f32 %v2392_v47  ;;  %v10181_v58 = vmul.f32 -1.442695, %v3031_v50  ;;  %v10184_v47 = vmul.f32 -1.442695, %v3034_v31  ;;  %v10185_v20 = vmul.f32 -1.442695, %v3035_v29 }
 0x272   :  { %12430 = vpow2.f32 %v10180_v44  ;;  %v3024_v50 = vunpack.c.l.bf16 %v14354_v17  ;;  %v3094_v31 = vunpack.c.l.bf16 %v14356_v24  ;;  %v3095_v44 = vunpack.c.l.bf16 %v14360_v35 }
 0x273   :  { %12432 = vpow2.f32 %v10181_v58 }
 0x274   :  { %12434 = vpow2.f32 %v10184_v47 }
 0x275   :  { %12436 = vpow2.f32 %v10185_v20 }
 0x278   :  { %v12423_v45 = vpop.eup %12422 }
 0x279   :  { %v12425_v53 = vpop.eup %12424  ;;  %v2401_v49 = vmul.f32 %v12423_v45, %v2397_v59 }
 0x27a   :  { %v12427_v48 = vpop.eup %12426  ;;  %v2402_v4 = vmul.f32 %v12425_v53, %v2398_v21 }
 0x27b   :  { %v2403_v57 = vmul.f32 %v12427_v48, %v2399_v32  ;;  %v14412_v7 = vadd.f32 %v2405_v16, %v2401_v49  ;;  %v12429_v33 = vpop.eup %12428  ;;  %v1650_v32 = vld [vmem:[#allocation15] sm:$0x3] }
 0x27c   :  { %v14414_v62 = vadd.f32 %v2406_v19, %v2402_v4  ;;  %v2404_v2 = vmul.f32 %v12429_v33, %v2400_v22  ;;  %v12431_v3 = vpop.eup %12430  ;;  %v14421_v56 = vrot.slane %v1650_v32, %v14068_v55  ;;  %v14424_v29 = vrot.slane %v1650_v32, %v14077_v61 }
 0x27d   :  { %v14416_v1 = vadd.f32 %v2407_v28, %v2403_v57  ;;  %v12433_v23 = vpop.eup %12432  ;;  %v3062_v21 = vadd.f32 1.0, %v12431_v3  ;;  %v3025_v19 = vunpack.c.l.bf16 %v14358_v12  ;;  %v3096_v4 = vunpack.c.h.bf16 %v14356_v24 }
 0x27e   :  { %v14418_v26 = vadd.f32 %v2408_v37, %v2404_v2  ;;  %v12435_v59 = vpop.eup %12434  ;;  %v3063_v53 = vadd.f32 1.0, %v12433_v23  ;;  %v3028_v37 = vunpack.c.h.bf16 %v14354_v17  ;;  %v3029_v23 = vunpack.c.h.bf16 %v14358_v12 }
 0x27f   :  { %v12437_v45 = vpop.eup %12436  ;;  %v3066_v25 = vadd.f32 1.0, %v12435_v59  ;;  %12438 = vrcp.f32 %v3062_v21  ;;  %v3097_v12 = vunpack.c.h.bf16 %v14360_v35 }
 0x280   :  { %v3067_v16 = vadd.f32 1.0, %v12437_v45  ;;  %12440 = vrcp.f32 %v3063_v53 }
 0x281   :  { %12442 = vrcp.f32 %v3066_v25 }
 0x282   :  { %12444 = vrcp.f32 %v3067_v16 }
 0x289   :  { %v12439_v2 = vpop.eup %12438 }
 0x28a   :  { %v12441_v59 = vpop.eup %12440 }
 0x28b   :  { %v12443_v32 = vpop.eup %12442 }
 0x2a7   :  { %v2970_v49 = vpop.f32.mrb[68].mxu0  ;;  %v3013_v48 = vpop.f32.mrb[68].mxu1 }
 0x2a8   :  { %v3032_v28 = vadd.f32 %v3024_v50, %v2970_v49  ;;  %v3086_v22 = vadd.f32 %v3013_v48, %v14421_v56  ;;  %v2972_v57 = vpop.f32.mrb[69].mxu0  ;;  %v3015_v33 = vpop.f32.mrb[69].mxu1 }
 0x2a9   :  { %v3033_v58 = vadd.f32 %v3025_v19, %v2972_v57  ;;  %v3087_v47 = vadd.f32 %v3015_v33, %v14424_v29  ;;  %v2974_v20 = vpop.f32.mrb[70].mxu0  ;;  %v3017_v3 = vpop.f32.mrb[70].mxu1 }
 0x2aa   :  { %v10182_v45 = vmul.f32 -1.442695, %v3032_v28  ;;  %v3090_v24 = vmul.f32 %v12439_v2, %v3086_v22  ;;  %v3036_v21 = vadd.f32 %v3028_v37, %v2974_v20  ;;  %v3088_v53 = vadd.f32 %v3017_v3, %v14421_v56  ;;  %v2976_v25 = vpop.f32.mrb[71].mxu0  ;;  %v3019_v16 = vpop.f32.mrb[71].mxu1 }
 0x2ab   :  { %v10183_v17 = vmul.f32 -1.442695, %v3033_v58  ;;  %v3091_v50 = vmul.f32 %v12441_v59, %v3087_v47  ;;  %v3037_v49 = vadd.f32 %v3029_v23, %v2976_v25  ;;  %v3089_v48 = vadd.f32 %v3019_v16, %v14424_v29  ;;  %v12445_v19 = vpop.eup %12444 }
 0x2ac   :  { %12446 = vpow2.f32 %v10182_v45  ;;  %v3098_v57 = vadd.f32 %v3094_v31, %v3090_v24  ;;  %v10186_v33 = vmul.f32 -1.442695, %v3036_v21  ;;  %v3092_v61 = vmul.f32 %v12443_v32, %v3088_v53 }
 0x2ad   :  { %12448 = vpow2.f32 %v10183_v17  ;;  %v3099_v28 = vadd.f32 %v3095_v44, %v3091_v50  ;;  %v3093_v22 = vmul.f32 %v12445_v19, %v3089_v48  ;;  %v10187_v2 = vmul.f32 -1.442695, %v3037_v49 }
 0x2ae   :  { %v3100_v37 = vadd.f32 %v3096_v4, %v3092_v61  ;;  %12450 = vpow2.f32 %v10186_v33 }
 0x2af   :  { %v3101_v20 = vadd.f32 %v3097_v12, %v3093_v22  ;;  %12452 = vpow2.f32 %v10187_v2 }
 0x2b6   :  { %v12447_v58 = vpop.eup %12446 }
 0x2b7   :  { %v12449_v47 = vpop.eup %12448  ;;  %v3064_v3 = vadd.f32 1.0, %v12447_v58 }
 0x2b8   :  { %v3065_v23 = vadd.f32 1.0, %v12449_v47  ;;  %v12451_v59 = vpop.eup %12450 }
 0x2b9   :  { %12454 = vrcp.f32 %v3064_v3  ;;  %v3068_v31 = vadd.f32 1.0, %v12451_v59  ;;  %v12453_v45 = vpop.eup %12452  ;;  %v11529_v59 = vld [vmem:[#allocation16 + $0x8] ss:$16 sps:$4 sm:$0xff]  }
 0x2ba   :  { %12456 = vrcp.f32 %v3065_v23  ;;  %v3069_v35 = vadd.f32 1.0, %v12453_v45  ;;  %v11526_v23 = vld [vmem:[#allocation16] ss:$16 sps:$4 sm:$0xff]   ;;  %v11534_v45 = vld [vmem:[#allocation16 + $0x24] ss:$16 sps:$4 sm:$0xff]  }
 0x2bb   :  { %12458 = vtanh.f32 %v3098_v57 }
 0x2bc   :  { %12460 = vtanh.f32 %v3099_v28 }
 0x2bd   :  { %12462 = vrcp.f32 %v3068_v31 }
 0x2be   :  { %12464 = vtanh.f32 %v3100_v37 }
 0x2bf   :  { %12466 = vrcp.f32 %v3069_v35  ;;  %v11537_v35 = vld [vmem:[#allocation16 + $0x2c] ss:$16 sps:$4 sm:$0xff]  }
 0x2c0   :  { %12468 = vtanh.f32 %v3101_v20 }
 0x2c3   :  { %v12455_v61 = vpop.eup %12454 }
 0x2c4   :  { %v12457_v4 = vpop.eup %12456  ;;  %v3106_v44 = vsub.f32 1.0, %v12455_v61  ;;  %v3114_v25 = vmul.f32 0.0, %v12455_v61  ;;  %v14460_v61 = vpack.c.bf16 %v14418_v26, %v14414_v62 }
 0x2c5   :  { %v12459_v24 = vpop.eup %12458  ;;  %v3107_v21 = vsub.f32 1.0, %v12457_v4  ;;  %v3115_v17 = vmul.f32 0.0, %v12457_v4  ;;  %v11532_v4 = vld [vmem:[#allocation16 + $0x20] ss:$16 sps:$4 sm:$0xff]  }
 0x2c6   :  { %v12461_v53 = vpop.eup %12460  ;;  %v3110_v16 = vmul.f32 %v12459_v24, %v3106_v44  ;;  %v11535_v44 = vld [vmem:[#allocation16 + $0x28] ss:$16 sps:$4 sm:$0xff]   ;;  %v11540_v24 = vld [vmem:[#allocation16 + $0x44] ss:$16 sps:$4 sm:$0xff]  }
 0x2c7   :  { %v12463_v32 = vpop.eup %12462  ;;  %v3111_v50 = vmul.f32 %v12461_v53, %v3107_v21  ;;  %v11543_v21 = vld [vmem:[#allocation16 + $0x4c] ss:$16 sps:$4 sm:$0xff]   ;;  %v11538_v53 = vld [vmem:[#allocation16 + $0x40] ss:$16 sps:$4 sm:$0xff]  }
 0x2c8   :  { %v12465_v49 = vpop.eup %12464  ;;  %v3108_v48 = vsub.f32 1.0, %v12463_v32  ;;  %v14438_v19 = vadd.f32 %v3114_v25, %v3110_v16  ;;  %v3116_v12 = vmul.f32 0.0, %v12463_v32  ;;  %v11541_v25 = vld [vmem:[#allocation16 + $0x48] ss:$16 sps:$4 sm:$0xff]   ;;  %v11546_v16 = vld [vmem:[#allocation16 + $0x64] ss:$16 sps:$4 sm:$0xff]  }
 0x2c9   :  { %v12467_v57 = vpop.eup %12466  ;;  %v14440_v33 = vadd.f32 %v3115_v17, %v3111_v50  ;;  %v11549_v32 = vld [vmem:[#allocation16 + $0x6c] ss:$16 sps:$4 sm:$0xff]   ;;  %v11544_v17 = vld [vmem:[#allocation16 + $0x60] ss:$16 sps:$4 sm:$0xff]   ;;  %v11547_v50 = vld [vmem:[#allocation16 + $0x68] ss:$16 sps:$4 sm:$0xff]  }
 0x2ca   :  { %v3109_v28 = vsub.f32 1.0, %v12467_v57  ;;  %v3112_v22 = vmul.f32 %v12465_v49, %v3108_v48  ;;  %v12469_v37 = vpop.eup %12468  ;;  %v3117_v2 = vmul.f32 0.0, %v12467_v57  ;;  %v11552_v49 = vld [vmem:[#allocation16 + $0x84] ss:$16 sps:$4 sm:$0xff]   ;;  %v11555_v48 = vld [vmem:[#allocation16 + $0x8c] ss:$16 sps:$4 sm:$0xff]  }
 0x2cb   :  { %v11550_v57 = vld [vmem:[#allocation16 + $0x80] ss:$16 sps:$4 sm:$0xff]  }
 0x2cc   :  { %v3113_v20 = vmul.f32 %v12469_v37, %v3109_v28  ;;  %v14442_v58 = vadd.f32 %v3116_v12, %v3112_v22  ;;  %v11553_v12 = vld [vmem:[#allocation16 + $0x88] ss:$16 sps:$4 sm:$0xff]   ;;  %v11558_v28 = vld [vmem:[#allocation16 + $0xa4] ss:$16 sps:$4 sm:$0xff]   ;;  %v11561_v22 = vld [vmem:[#allocation16 + $0xac] ss:$16 sps:$4 sm:$0xff]  }
 0x2cd   :  { %v11556_v37 = vld [vmem:[#allocation16 + $0xa0] ss:$16 sps:$4 sm:$0xff]  }
 0x2ce   :  { %v14444_v47 = vadd.f32 %v3117_v2, %v3113_v20  ;;  %v14452_v31 = vpack.c.bf16 %v14442_v58, %v14438_v19  ;;  %v11559_v2 = vld [vmem:[#allocation16 + $0xa8] ss:$16 sps:$4 sm:$0xff]   ;;  %v11564_v20 = vld [vmem:[#allocation16 + $0xc4] ss:$16 sps:$4 sm:$0xff]  }
 0x2d0   :  { %v14448_v3 = vpack.c.bf16 %v14444_v47, %v14440_v33 }
 0x2d2   :  { %3606 = vmatprep.mubr.bf16.mxu0 %v14448_v3  ;;  %3649 = vmatprep.mubr.bf16.mxu1 %v14448_v3 }
 0x2d3   :  { %3607 = vmatmul.mubr.bf16.vlgmr.msra.gmra.mrb[72].mxu0 %v14452_v31  ;;  %3650 = vmatmul.mubr.bf16.vlgmr.msra.gmra.mrb[72].mxu1 %v14452_v31 }
 0x2d4   :  { %3989 = vmatpush1.bf16.msra.mxu0 %v11526_v23  ;;  %4032 = vmatpush1.bf16.msra.mxu1 %v11529_v59  ;;  %v11567_v23 = vld [vmem:[#allocation16 + $0xcc] ss:$16 sps:$4 sm:$0xff]   ;;  %v11562_v59 = vld [vmem:[#allocation16 + $0xc0] ss:$16 sps:$4 sm:$0xff]  }
 0x2d5   :  { %4020 = vmatprep.mubr.bf16.mxu0 %v14460_v61  ;;  %4063 = vmatprep.mubr.bf16.mxu1 %v14460_v61 }
 0x2d6   :  { %3990 = vmatprep.subr.bf16.mxu0 %v11534_v45  ;;  %4033 = vmatprep.subr.bf16.mxu1 %v11537_v35  ;;  %v11565_v45 = vld [vmem:[#allocation16 + $0xc8] ss:$16 sps:$4 sm:$0xff]   ;;  %v11570_v35 = vld [vmem:[#allocation16 + $0xe4] ss:$16 sps:$4 sm:$0xff]  }
 0x2d8   :  { %3991 = vmatpush1.bf16.msra.mxu0 %v11532_v4  ;;  %4034 = vmatpush1.bf16.msra.mxu1 %v11535_v44  ;;  %v11573_v4 = vld [vmem:[#allocation16 + $0xec] ss:$16 sps:$4 sm:$0xff]   ;;  %v11568_v44 = vld [vmem:[#allocation16 + $0xe0] ss:$16 sps:$4 sm:$0xff]  }
 0x2d9   :  { %3992 = vmatprep.subr.bf16.mxu0 %v11540_v24  ;;  %4035 = vmatprep.subr.bf16.mxu1 %v11543_v21  ;;  %v11571_v24 = vld [vmem:[#allocation16 + $0xe8] ss:$16 sps:$4 sm:$0xff]   ;;  %v11576_v21 = vld [vmem:[#allocation16 + $0x104] ss:$16 sps:$4 sm:$0xff]  }
 0x2dc   :  { %3993 = vmatpush1.bf16.msra.mxu0 %v11538_v53  ;;  %4036 = vmatpush1.bf16.msra.mxu1 %v11541_v25  ;;  %v11579_v53 = vld [vmem:[#allocation16 + $0x10c] ss:$16 sps:$4 sm:$0xff]   ;;  %v11574_v25 = vld [vmem:[#allocation16 + $0x100] ss:$16 sps:$4 sm:$0xff]  }
 0x2dd   :  { %3994 = vmatprep.subr.bf16.mxu0 %v11546_v16  ;;  %4037 = vmatprep.subr.bf16.mxu1 %v11549_v32  ;;  %v11577_v16 = vld [vmem:[#allocation16 + $0x108] ss:$16 sps:$4 sm:$0xff]   ;;  %v11582_v32 = vld [vmem:[#allocation16 + $0x124] ss:$16 sps:$4 sm:$0xff]  }
 0x2e0   :  { %3995 = vmatpush1.bf16.msra.mxu0 %v11544_v17  ;;  %4038 = vmatpush1.bf16.msra.mxu1 %v11547_v50  ;;  %v11585_v17 = vld [vmem:[#allocation16 + $0x12c] ss:$16 sps:$4 sm:$0xff]   ;;  %v11580_v50 = vld [vmem:[#allocation16 + $0x120] ss:$16 sps:$4 sm:$0xff]  }
 0x2e1   :  { %3996 = vmatprep.subr.bf16.mxu0 %v11552_v49  ;;  %4039 = vmatprep.subr.bf16.mxu1 %v11555_v48  ;;  %v11583_v49 = vld [vmem:[#allocation16 + $0x128] ss:$16 sps:$4 sm:$0xff]   ;;  %v11588_v48 = vld [vmem:[#allocation16 + $0x144] ss:$16 sps:$4 sm:$0xff]  }
 0x2e4   :  { %3997 = vmatpush1.bf16.msra.mxu0 %v11550_v57  ;;  %4040 = vmatpush1.bf16.msra.mxu1 %v11553_v12  ;;  %v11591_v57 = vld [vmem:[#allocation16 + $0x14c] ss:$16 sps:$4 sm:$0xff]   ;;  %v11586_v12 = vld [vmem:[#allocation16 + $0x140] ss:$16 sps:$4 sm:$0xff]  }
 0x2e5   :  { %3998 = vmatprep.subr.bf16.mxu0 %v11558_v28  ;;  %4041 = vmatprep.subr.bf16.mxu1 %v11561_v22  ;;  %v11589_v28 = vld [vmem:[#allocation16 + $0x148] ss:$16 sps:$4 sm:$0xff]   ;;  %v11594_v22 = vld [vmem:[#allocation16 + $0x164] ss:$16 sps:$4 sm:$0xff]  }
 0x2e8   :  { %3999 = vmatpush1.bf16.msra.mxu0 %v11556_v37  ;;  %4042 = vmatpush1.bf16.msra.mxu1 %v11559_v2  ;;  %v11597_v37 = vld [vmem:[#allocation16 + $0x16c] ss:$16 sps:$4 sm:$0xff]   ;;  %v11592_v2 = vld [vmem:[#allocation16 + $0x160] ss:$16 sps:$4 sm:$0xff]  }
 0x2e9   :  { %4000 = vmatprep.subr.bf16.mxu0 %v11564_v20  ;;  %4043 = vmatprep.subr.bf16.mxu1 %v11567_v23  ;;  %v11595_v20 = vld [vmem:[#allocation16 + $0x168] ss:$16 sps:$4 sm:$0xff]   ;;  %v11600_v23 = vld [vmem:[#allocation16 + $0x184] ss:$16 sps:$4 sm:$0xff]  }
 0x2ec   :  { %4001 = vmatpush1.bf16.msra.mxu0 %v11562_v59  ;;  %4044 = vmatpush1.bf16.msra.mxu1 %v11565_v45  ;;  %v11603_v59 = vld [vmem:[#allocation16 + $0x18c] ss:$16 sps:$4 sm:$0xff]   ;;  %v11598_v45 = vld [vmem:[#allocation16 + $0x180] ss:$16 sps:$4 sm:$0xff]  }
 0x2ed   :  { %4002 = vmatprep.subr.bf16.mxu0 %v11570_v35  ;;  %4045 = vmatprep.subr.bf16.mxu1 %v11573_v4  ;;  %v11601_v35 = vld [vmem:[#allocation16 + $0x188] ss:$16 sps:$4 sm:$0xff]   ;;  %v11606_v4 = vld [vmem:[#allocation16 + $0x1a4] ss:$16 sps:$4 sm:$0xff]  }
 0x2f0   :  { %4003 = vmatpush1.bf16.msra.mxu0 %v11568_v44  ;;  %4046 = vmatpush1.bf16.msra.mxu1 %v11571_v24  ;;  %v11609_v44 = vld [vmem:[#allocation16 + $0x1ac] ss:$16 sps:$4 sm:$0xff]   ;;  %v11604_v24 = vld [vmem:[#allocation16 + $0x1a0] ss:$16 sps:$4 sm:$0xff]  }
 0x2f1   :  { %4004 = vmatprep.subr.bf16.mxu0 %v11576_v21  ;;  %4047 = vmatprep.subr.bf16.mxu1 %v11579_v53  ;;  %v11607_v21 = vld [vmem:[#allocation16 + $0x1a8] ss:$16 sps:$4 sm:$0xff]   ;;  %v11612_v53 = vld [vmem:[#allocation16 + $0x1c4] ss:$16 sps:$4 sm:$0xff]  }
 0x2f4   :  { %4005 = vmatpush1.bf16.msra.mxu0 %v11574_v25  ;;  %4048 = vmatpush1.bf16.msra.mxu1 %v11577_v16  ;;  %v11615_v25 = vld [vmem:[#allocation16 + $0x1cc] ss:$16 sps:$4 sm:$0xff]   ;;  %v11610_v16 = vld [vmem:[#allocation16 + $0x1c0] ss:$16 sps:$4 sm:$0xff]  }
 0x2f5   :  { %4006 = vmatprep.subr.bf16.mxu0 %v11582_v32  ;;  %4049 = vmatprep.subr.bf16.mxu1 %v11585_v17  ;;  %v11613_v32 = vld [vmem:[#allocation16 + $0x1c8] ss:$16 sps:$4 sm:$0xff]   ;;  %v11618_v17 = vld [vmem:[#allocation16 + $0x1e4] ss:$16 sps:$4 sm:$0xff]  }
 0x2f8   :  { %4007 = vmatpush1.bf16.msra.mxu0 %v11580_v50  ;;  %4050 = vmatpush1.bf16.msra.mxu1 %v11583_v49  ;;  %v11621_v50 = vld [vmem:[#allocation16 + $0x1ec] ss:$16 sps:$4 sm:$0xff]   ;;  %v11616_v49 = vld [vmem:[#allocation16 + $0x1e0] ss:$16 sps:$4 sm:$0xff]  }
 0x2f9   :  { %4008 = vmatprep.subr.bf16.mxu0 %v11588_v48  ;;  %4051 = vmatprep.subr.bf16.mxu1 %v11591_v57  ;;  %v11619_v48 = vld [vmem:[#allocation16 + $0x1e8] ss:$16 sps:$4 sm:$0xff]   ;;  %v14466_v57 = vpack.c.bf16 %v14416_v1, %v14412_v7 }
 0x2fc   :  { %4009 = vmatpush1.bf16.msra.mxu0 %v11586_v12  ;;  %4052 = vmatpush1.bf16.msra.mxu1 %v11589_v28  ;;  %v12791_v12 = vld [vmem:[#allocation10 + $0x4] ss:$24 sps:$4 sm:$0xff]  }
 0x2fd   :  { %4010 = vmatprep.subr.bf16.mxu0 %v11594_v22  ;;  %4053 = vmatprep.subr.bf16.mxu1 %v11597_v37  ;;  %v12792_v28 = vld [vmem:[#allocation10 + $0xc] ss:$24 sps:$4 sm:$0xff]   ;;  %v12793_v22 = vld [vmem:[#allocation10] ss:$24 sps:$4 sm:$0xff]  }
 0x2fe   :  { %v12794_v37 = vld [vmem:[#allocation10 + $0x8] ss:$24 sps:$4 sm:$0xff]  }
 0x300   :  { %4011 = vmatpush1.bf16.msra.mxu0 %v11592_v2  ;;  %4054 = vmatpush1.bf16.msra.mxu1 %v11595_v20  ;;  %v12795_v2 = vld [vmem:[#allocation10 + $0x34] ss:$24 sps:$4 sm:$0xff]  }
 0x301   :  { %4012 = vmatprep.subr.bf16.mxu0 %v11600_v23  ;;  %4055 = vmatprep.subr.bf16.mxu1 %v11603_v59  ;;  %v12796_v20 = vld [vmem:[#allocation10 + $0x3c] ss:$24 sps:$4 sm:$0xff]   ;;  %v12797_v23 = vld [vmem:[#allocation10 + $0x30] ss:$24 sps:$4 sm:$0xff]  }
 0x302   :  { %v12798_v59 = vld [vmem:[#allocation10 + $0x38] ss:$24 sps:$4 sm:$0xff]  }
 0x304   :  { %4013 = vmatpush1.bf16.msra.mxu0 %v11598_v45  ;;  %4056 = vmatpush1.bf16.msra.mxu1 %v11601_v35  ;;  %v12799_v45 = vld [vmem:[#allocation10 + $0x64] ss:$24 sps:$4 sm:$0xff]  }
 0x305   :  { %4014 = vmatprep.subr.bf16.mxu0 %v11606_v4  ;;  %4057 = vmatprep.subr.bf16.mxu1 %v11609_v44  ;;  %v12800_v35 = vld [vmem:[#allocation10 + $0x6c] ss:$24 sps:$4 sm:$0xff]   ;;  %v12801_v4 = vld [vmem:[#allocation10 + $0x60] ss:$24 sps:$4 sm:$0xff]  }
 0x306   :  { %v12802_v44 = vld [vmem:[#allocation10 + $0x68] ss:$24 sps:$4 sm:$0xff]  }
 0x308   :  { %4015 = vmatpush1.bf16.msra.mxu0 %v11604_v24  ;;  %4058 = vmatpush1.bf16.msra.mxu1 %v11607_v21  ;;  %v12803_v24 = vld [vmem:[#allocation10 + $0x94] ss:$24 sps:$4 sm:$0xff]  }
 0x309   :  { %4016 = vmatprep.subr.bf16.mxu0 %v11612_v53  ;;  %4059 = vmatprep.subr.bf16.mxu1 %v11615_v25  ;;  %v12804_v21 = vld [vmem:[#allocation10 + $0x9c] ss:$24 sps:$4 sm:$0xff]   ;;  %v12805_v53 = vld [vmem:[#allocation10 + $0x90] ss:$24 sps:$4 sm:$0xff]  }
 0x30a   :  { %v12806_v25 = vld [vmem:[#allocation10 + $0x98] ss:$24 sps:$4 sm:$0xff]  }
 0x30c   :  { %4017 = vmatpush1.bf16.msra.mxu0 %v11610_v16  ;;  %4060 = vmatpush1.bf16.msra.mxu1 %v11613_v32  ;;  %v12807_v16 = vld [vmem:[#allocation10 + $0xc4] ss:$24 sps:$4 sm:$0xff]  }
 0x30d   :  { %4018 = vmatprep.subr.bf16.mxu0 %v11618_v17  ;;  %4061 = vmatprep.subr.bf16.mxu1 %v11621_v50  ;;  %v12808_v32 = vld [vmem:[#allocation10 + $0xcc] ss:$24 sps:$4 sm:$0xff]   ;;  %v12809_v17 = vld [vmem:[#allocation10 + $0xc0] ss:$24 sps:$4 sm:$0xff]  }
 0x30e   :  { %v12810_v50 = vld [vmem:[#allocation10 + $0xc8] ss:$24 sps:$4 sm:$0xff]  }
 0x310   :  { %4019 = vmatpush1.bf16.msra.mxu0 %v11616_v49  ;;  %4062 = vmatpush1.bf16.msra.mxu1 %v11619_v48  ;;  %v12811_v49 = vld [vmem:[#allocation10 + $0xf4] ss:$24 sps:$4 sm:$0xff]  }
 0x311   :  { %4102 = vmatprep.subr.bf16.mxu0 %v12791_v12  ;;  %4145 = vmatprep.subr.bf16.mxu1 %v12792_v28  ;;  %v12812_v48 = vld [vmem:[#allocation10 + $0xfc] ss:$24 sps:$4 sm:$0xff]   ;;  %v12813_v12 = vld [vmem:[#allocation10 + $0xf0] ss:$24 sps:$4 sm:$0xff]  }
 0x312   :  { %v12814_v28 = vld [vmem:[#allocation10 + $0xf8] ss:$24 sps:$4 sm:$0xff]  }
 0x313   :  { %4021 = vmatmul.mubr.bf16.vlgmr.msra.gmra.mrb[72].mxu0 %v14466_v57  ;;  %4064 = vmatmul.mubr.bf16.vlgmr.msra.gmra.mrb[72].mxu1 %v14466_v57 }
 0x314   :  { %4103 = vmatpush1.bf16.msra.mxu0 %v12793_v22  ;;  %4134 = vmatprep.mubr.bf16.mxu0 %v14460_v61  ;;  %v12815_v22 = vld [vmem:[#allocation10 + $0x124] ss:$24 sps:$4 sm:$0xff]  }
 0x315   :  { %4146 = vmatpush1.bf16.msra.mxu1 %v12794_v37  ;;  %4177 = vmatprep.mubr.bf16.mxu1 %v14460_v61  ;;  %v12816_v37 = vld [vmem:[#allocation10 + $0x12c] ss:$24 sps:$4 sm:$0xff]  }
 0x316   :  { %4104 = vmatprep.subr.bf16.mxu0 %v12795_v2  ;;  %4147 = vmatprep.subr.bf16.mxu1 %v12796_v20  ;;  %v12817_v2 = vld [vmem:[#allocation10 + $0x120] ss:$24 sps:$4 sm:$0xff]  }
 0x317   :  { %v12818_v20 = vld [vmem:[#allocation10 + $0x128] ss:$24 sps:$4 sm:$0xff]  }
 0x318   :  { %4105 = vmatpush1.bf16.msra.mxu0 %v12797_v23  ;;  %v12819_v23 = vld [vmem:[#allocation10 + $0x154] ss:$24 sps:$4 sm:$0xff]  }
 0x319   :  { %4148 = vmatpush1.bf16.msra.mxu1 %v12798_v59  ;;  %4106 = vmatprep.subr.bf16.mxu0 %v12799_v45  ;;  %v12820_v59 = vld [vmem:[#allocation10 + $0x15c] ss:$24 sps:$4 sm:$0xff]   ;;  %v12821_v45 = vld [vmem:[#allocation10 + $0x150] ss:$24 sps:$4 sm:$0xff]  }
 0x31a   :  { %4149 = vmatprep.subr.bf16.mxu1 %v12800_v35  ;;  %v12822_v35 = vld [vmem:[#allocation10 + $0x158] ss:$24 sps:$4 sm:$0xff]  }
 0x31c   :  { %4107 = vmatpush1.bf16.msra.mxu0 %v12801_v4  ;;  %v12823_v4 = vld [vmem:[#allocation10 + $0x184] ss:$24 sps:$4 sm:$0xff]  }
 0x31d   :  { %4150 = vmatpush1.bf16.msra.mxu1 %v12802_v44  ;;  %4108 = vmatprep.subr.bf16.mxu0 %v12803_v24  ;;  %v12824_v44 = vld [vmem:[#allocation10 + $0x18c] ss:$24 sps:$4 sm:$0xff]   ;;  %v12825_v24 = vld [vmem:[#allocation10 + $0x180] ss:$24 sps:$4 sm:$0xff]  }
 0x31e   :  { %4151 = vmatprep.subr.bf16.mxu1 %v12804_v21  ;;  %v12826_v21 = vld [vmem:[#allocation10 + $0x188] ss:$24 sps:$4 sm:$0xff]  }
 0x320   :  { %4109 = vmatpush1.bf16.msra.mxu0 %v12805_v53  ;;  %v12827_v53 = vld [vmem:[#allocation10 + $0x1b4] ss:$24 sps:$4 sm:$0xff]  }
 0x321   :  { %4152 = vmatpush1.bf16.msra.mxu1 %v12806_v25  ;;  %4110 = vmatprep.subr.bf16.mxu0 %v12807_v16  ;;  %v12828_v25 = vld [vmem:[#allocation10 + $0x1bc] ss:$24 sps:$4 sm:$0xff]   ;;  %v12829_v16 = vld [vmem:[#allocation10 + $0x1b0] ss:$24 sps:$4 sm:$0xff]  }
 0x322   :  { %4153 = vmatprep.subr.bf16.mxu1 %v12808_v32  ;;  %v12830_v32 = vld [vmem:[#allocation10 + $0x1b8] ss:$24 sps:$4 sm:$0xff]  }
 0x324   :  { %4111 = vmatpush1.bf16.msra.mxu0 %v12809_v17  ;;  %v12831_v17 = vld [vmem:[#allocation10 + $0x1e4] ss:$24 sps:$4 sm:$0xff]  }
 0x325   :  { %4154 = vmatpush1.bf16.msra.mxu1 %v12810_v50  ;;  %4112 = vmatprep.subr.bf16.mxu0 %v12811_v49  ;;  %v12832_v50 = vld [vmem:[#allocation10 + $0x1ec] ss:$24 sps:$4 sm:$0xff]   ;;  %v12833_v49 = vld [vmem:[#allocation10 + $0x1e0] ss:$24 sps:$4 sm:$0xff]  }
 0x326   :  { %4155 = vmatprep.subr.bf16.mxu1 %v12812_v48  ;;  %v12834_v48 = vld [vmem:[#allocation10 + $0x1e8] ss:$24 sps:$4 sm:$0xff]  }
 0x328   :  { %4113 = vmatpush1.bf16.msra.mxu0 %v12813_v12  ;;  %v12835_v12 = vld [vmem:[#allocation10 + $0x214] ss:$24 sps:$4 sm:$0xff]  }
 0x329   :  { %4156 = vmatpush1.bf16.msra.mxu1 %v12814_v28  ;;  %4114 = vmatprep.subr.bf16.mxu0 %v12815_v22  ;;  %v12836_v28 = vld [vmem:[#allocation10 + $0x21c] ss:$24 sps:$4 sm:$0xff]   ;;  %v12837_v22 = vld [vmem:[#allocation10 + $0x210] ss:$24 sps:$4 sm:$0xff]  }
 0x32a   :  { %4157 = vmatprep.subr.bf16.mxu1 %v12816_v37  ;;  %v12838_v37 = vld [vmem:[#allocation10 + $0x218] ss:$24 sps:$4 sm:$0xff]  }
 0x32c   :  { %4115 = vmatpush1.bf16.msra.mxu0 %v12817_v2  ;;  %v12839_v2 = vld [vmem:[#allocation10 + $0x244] ss:$24 sps:$4 sm:$0xff]  }
 0x32d   :  { %4158 = vmatpush1.bf16.msra.mxu1 %v12818_v20  ;;  %4116 = vmatprep.subr.bf16.mxu0 %v12819_v23  ;;  %v12840_v20 = vld [vmem:[#allocation10 + $0x24c] ss:$24 sps:$4 sm:$0xff]   ;;  %v12841_v23 = vld [vmem:[#allocation10 + $0x240] ss:$24 sps:$4 sm:$0xff]  }
 0x32e   :  { %4159 = vmatprep.subr.bf16.mxu1 %v12820_v59  ;;  %v12842_v59 = vld [vmem:[#allocation10 + $0x248] ss:$24 sps:$4 sm:$0xff]  }
 0x330   :  { %4117 = vmatpush1.bf16.msra.mxu0 %v12821_v45  ;;  %v12843_v45 = vld [vmem:[#allocation10 + $0x274] ss:$24 sps:$4 sm:$0xff]  }
 0x331   :  { %4160 = vmatpush1.bf16.msra.mxu1 %v12822_v35  ;;  %4118 = vmatprep.subr.bf16.mxu0 %v12823_v4  ;;  %v12844_v35 = vld [vmem:[#allocation10 + $0x27c] ss:$24 sps:$4 sm:$0xff]   ;;  %v12845_v4 = vld [vmem:[#allocation10 + $0x270] ss:$24 sps:$4 sm:$0xff]  }
 0x332   :  { %4161 = vmatprep.subr.bf16.mxu1 %v12824_v44  ;;  %v12846_v44 = vld [vmem:[#allocation10 + $0x278] ss:$24 sps:$4 sm:$0xff]  }
 0x334   :  { %4119 = vmatpush1.bf16.msra.mxu0 %v12825_v24  ;;  %v12847_v24 = vld [vmem:[#allocation10 + $0x2a4] ss:$24 sps:$4 sm:$0xff]  }
 0x335   :  { %4162 = vmatpush1.bf16.msra.mxu1 %v12826_v21  ;;  %4120 = vmatprep.subr.bf16.mxu0 %v12827_v53  ;;  %v12848_v21 = vld [vmem:[#allocation10 + $0x2ac] ss:$24 sps:$4 sm:$0xff]   ;;  %v12849_v53 = vld [vmem:[#allocation10 + $0x2a0] ss:$24 sps:$4 sm:$0xff]  }
 0x336   :  { %4163 = vmatprep.subr.bf16.mxu1 %v12828_v25  ;;  %v12850_v25 = vld [vmem:[#allocation10 + $0x2a8] ss:$24 sps:$4 sm:$0xff]  }
 0x338   :  { %4121 = vmatpush1.bf16.msra.mxu0 %v12829_v16  ;;  %v12851_v16 = vld [vmem:[#allocation10 + $0x2d4] ss:$24 sps:$4 sm:$0xff]  }
 0x339   :  { %4164 = vmatpush1.bf16.msra.mxu1 %v12830_v32  ;;  %4122 = vmatprep.subr.bf16.mxu0 %v12831_v17  ;;  %v12852_v32 = vld [vmem:[#allocation10 + $0x2dc] ss:$24 sps:$4 sm:$0xff]   ;;  %v12853_v17 = vld [vmem:[#allocation10 + $0x2d0] ss:$24 sps:$4 sm:$0xff]  }
 0x33a   :  { %4165 = vmatprep.subr.bf16.mxu1 %v12832_v50  ;;  %v12854_v50 = vld [vmem:[#allocation10 + $0x2d8] ss:$24 sps:$4 sm:$0xff]  }
 0x33c   :  { %4123 = vmatpush1.bf16.msra.mxu0 %v12833_v49  ;;  %v12855_v49 = vld [vmem:[#allocation10 + $0x14] ss:$24 sps:$4 sm:$0xff]  }
 0x33d   :  { %4166 = vmatpush1.bf16.msra.mxu1 %v12834_v48  ;;  %4124 = vmatprep.subr.bf16.mxu0 %v12835_v12  ;;  %v12856_v48 = vld [vmem:[#allocation12 + $0x4] ss:$24 sps:$4 sm:$0xff]   ;;  %v12857_v12 = vld [vmem:[#allocation10 + $0x10] ss:$24 sps:$4 sm:$0xff]  }
 0x33e   :  { %4167 = vmatprep.subr.bf16.mxu1 %v12836_v28  ;;  %v12858_v28 = vld [vmem:[#allocation12] ss:$24 sps:$4 sm:$0xff]  }
 0x340   :  { %4125 = vmatpush1.bf16.msra.mxu0 %v12837_v22  ;;  %v12859_v22 = vld [vmem:[#allocation10 + $0x44] ss:$24 sps:$4 sm:$0xff]  }
 0x341   :  { %4168 = vmatpush1.bf16.msra.mxu1 %v12838_v37  ;;  %4126 = vmatprep.subr.bf16.mxu0 %v12839_v2  ;;  %v12860_v37 = vld [vmem:[#allocation12 + $0x34] ss:$24 sps:$4 sm:$0xff]   ;;  %v12861_v2 = vld [vmem:[#allocation10 + $0x40] ss:$24 sps:$4 sm:$0xff]  }
 0x342   :  { %4169 = vmatprep.subr.bf16.mxu1 %v12840_v20  ;;  %v12862_v20 = vld [vmem:[#allocation12 + $0x30] ss:$24 sps:$4 sm:$0xff]  }
 0x344   :  { %4127 = vmatpush1.bf16.msra.mxu0 %v12841_v23  ;;  %v12863_v23 = vld [vmem:[#allocation10 + $0x74] ss:$24 sps:$4 sm:$0xff]  }
 0x345   :  { %4170 = vmatpush1.bf16.msra.mxu1 %v12842_v59  ;;  %4128 = vmatprep.subr.bf16.mxu0 %v12843_v45  ;;  %v12864_v59 = vld [vmem:[#allocation12 + $0x64] ss:$24 sps:$4 sm:$0xff]   ;;  %v12865_v45 = vld [vmem:[#allocation10 + $0x70] ss:$24 sps:$4 sm:$0xff]  }
 0x346   :  { %4171 = vmatprep.subr.bf16.mxu1 %v12844_v35  ;;  %v12866_v35 = vld [vmem:[#allocation12 + $0x60] ss:$24 sps:$4 sm:$0xff]  }
 0x348   :  { %4129 = vmatpush1.bf16.msra.mxu0 %v12845_v4  ;;  %v12868_v4 = vld [vmem:[#allocation12 + $0x94] ss:$24 sps:$4 sm:$0xff]  }
 0x349   :  { %4172 = vmatpush1.bf16.msra.mxu1 %v12846_v44  ;;  %4130 = vmatprep.subr.bf16.mxu0 %v12847_v24  ;;  %v12869_v44 = vld [vmem:[#allocation10 + $0xa0] ss:$24 sps:$4 sm:$0xff]   ;;  %v12870_v24 = vld [vmem:[#allocation12 + $0x90] ss:$24 sps:$4 sm:$0xff]  }
 0x34a   :  { %4173 = vmatprep.subr.bf16.mxu1 %v12848_v21  ;;  %v12871_v21 = vld [vmem:[#allocation10 + $0xd4] ss:$24 sps:$4 sm:$0xff]  }
 0x34c   :  { %4131 = vmatpush1.bf16.msra.mxu0 %v12849_v53  ;;  %v12872_v53 = vld [vmem:[#allocation12 + $0xc4] ss:$24 sps:$4 sm:$0xff]  }
 0x34d   :  { %4174 = vmatpush1.bf16.msra.mxu1 %v12850_v25  ;;  %4132 = vmatprep.subr.bf16.mxu0 %v12851_v16  ;;  %v12873_v25 = vld [vmem:[#allocation10 + $0xd0] ss:$24 sps:$4 sm:$0xff]   ;;  %v12874_v16 = vld [vmem:[#allocation12 + $0xc0] ss:$24 sps:$4 sm:$0xff]  }
 0x34e   :  { %4175 = vmatprep.subr.bf16.mxu1 %v12852_v32  ;;  %v12875_v32 = vld [vmem:[#allocation10 + $0x104] ss:$24 sps:$4 sm:$0xff]  }
 0x350   :  { %4133 = vmatpush1.bf16.msra.mxu0 %v12853_v17  ;;  %v12876_v17 = vld [vmem:[#allocation12 + $0xf4] ss:$24 sps:$4 sm:$0xff]  }
 0x351   :  { %4176 = vmatpush1.bf16.msra.mxu1 %v12854_v50  ;;  %4188 = vmatprep.subr.bf16.mxu0 %v12855_v49  ;;  %v12877_v50 = vld [vmem:[#allocation10 + $0x100] ss:$24 sps:$4 sm:$0xff]   ;;  %v12878_v49 = vld [vmem:[#allocation12 + $0xf0] ss:$24 sps:$4 sm:$0xff]  }
 0x352   :  { %4331 = vmatprep.subr.bf16.mxu1 %v12856_v48  ;;  %v12879_v48 = vld [vmem:[#allocation10 + $0x134] ss:$24 sps:$4 sm:$0xff]  }
 0x353   :  { %4135 = vmatmul.mubr.bf16.vlgmr.msra.gmra.mrb[76].mxu0 %v14466_v57 }
 0x354   :  { %4178 = vmatmul.mubr.bf16.vlgmr.msra.gmra.mrb[76].mxu1 %v14466_v57  ;;  %4189 = vmatpush1.bf16.msra.mxu0 %v12857_v12  ;;  %v12880_v12 = vld [vmem:[#allocation12 + $0x124] ss:$24 sps:$4 sm:$0xff]  }
 0x355   :  { %4220 = vmatprep.mubr.bf16.mxu0 %v14460_v61  ;;  %4332 = vmatpush1.bf16.msra.mxu1 %v12858_v28  ;;  %v12867_v61 = vld [vmem:[#allocation10 + $0xa4] ss:$24 sps:$4 sm:$0xff]   ;;  %v12881_v28 = vld [vmem:[#allocation10 + $0x130] ss:$24 sps:$4 sm:$0xff]  }
 0x356   :  { %4363 = vmatprep.mubr.bf16.mxu1 %v14448_v3  ;;  %4190 = vmatprep.subr.bf16.mxu0 %v12859_v22  ;;  %v12882_v22 = vld [vmem:[#allocation12 + $0x120] ss:$24 sps:$4 sm:$0xff]  }
 0x357   :  { %4333 = vmatprep.subr.bf16.mxu1 %v12860_v37  ;;  %v12883_v37 = vld [vmem:[#allocation10 + $0x164] ss:$24 sps:$4 sm:$0xff]  }
 0x358   :  { %4191 = vmatpush1.bf16.msra.mxu0 %v12861_v2  ;;  %v12884_v2 = vld [vmem:[#allocation12 + $0x154] ss:$24 sps:$4 sm:$0xff]  }
 0x359   :  { %4334 = vmatpush1.bf16.msra.mxu1 %v12862_v20  ;;  %4192 = vmatprep.subr.bf16.mxu0 %v12863_v23  ;;  %v12885_v20 = vld [vmem:[#allocation10 + $0x160] ss:$24 sps:$4 sm:$0xff]   ;;  %v12886_v23 = vld [vmem:[#allocation12 + $0x150] ss:$24 sps:$4 sm:$0xff]  }
 0x35a   :  { %4335 = vmatprep.subr.bf16.mxu1 %v12864_v59  ;;  %v12887_v59 = vld [vmem:[#allocation10 + $0x194] ss:$24 sps:$4 sm:$0xff]  }
 0x35c   :  { %4193 = vmatpush1.bf16.msra.mxu0 %v12865_v45  ;;  %v12888_v45 = vld [vmem:[#allocation12 + $0x184] ss:$24 sps:$4 sm:$0xff]  }
 0x35d   :  { %4336 = vmatpush1.bf16.msra.mxu1 %v12866_v35  ;;  %4194 = vmatprep.subr.bf16.mxu0 %v12867_v61  ;;  %v12889_v35 = vld [vmem:[#allocation10 + $0x190] ss:$24 sps:$4 sm:$0xff]   ;;  %v12890_v61 = vld [vmem:[#allocation12 + $0x180] ss:$24 sps:$4 sm:$0xff]  }
 0x35e   :  { %4337 = vmatprep.subr.bf16.mxu1 %v12868_v4  ;;  %v12891_v4 = vld [vmem:[#allocation10 + $0x1c4] ss:$24 sps:$4 sm:$0xff]  }
 0x360   :  { %4195 = vmatpush1.bf16.msra.mxu0 %v12869_v44  ;;  %v12892_v44 = vld [vmem:[#allocation12 + $0x1b4] ss:$24 sps:$4 sm:$0xff]  }
 0x361   :  { %4338 = vmatpush1.bf16.msra.mxu1 %v12870_v24  ;;  %4196 = vmatprep.subr.bf16.mxu0 %v12871_v21  ;;  %v12893_v24 = vld [vmem:[#allocation10 + $0x1c0] ss:$24 sps:$4 sm:$0xff]   ;;  %v12894_v21 = vld [vmem:[#allocation12 + $0x1b0] ss:$24 sps:$4 sm:$0xff]  }
 0x362   :  { %4339 = vmatprep.subr.bf16.mxu1 %v12872_v53  ;;  %v12895_v53 = vld [vmem:[#allocation10 + $0x1f4] ss:$24 sps:$4 sm:$0xff]  }
 0x364   :  { %4197 = vmatpush1.bf16.msra.mxu0 %v12873_v25  ;;  %v12896_v25 = vld [vmem:[#allocation12 + $0x1e4] ss:$24 sps:$4 sm:$0xff]  }
 0x365   :  { %4340 = vmatpush1.bf16.msra.mxu1 %v12874_v16  ;;  %4198 = vmatprep.subr.bf16.mxu0 %v12875_v32  ;;  %v12897_v16 = vld [vmem:[#allocation10 + $0x1f0] ss:$24 sps:$4 sm:$0xff]   ;;  %v12898_v32 = vld [vmem:[#allocation12 + $0x1e0] ss:$24 sps:$4 sm:$0xff]  }
 0x366   :  { %4341 = vmatprep.subr.bf16.mxu1 %v12876_v17  ;;  %v12899_v17 = vld [vmem:[#allocation10 + $0x224] ss:$24 sps:$4 sm:$0xff]  }
 0x368   :  { %4199 = vmatpush1.bf16.msra.mxu0 %v12877_v50  ;;  %v12900_v50 = vld [vmem:[#allocation12 + $0x214] ss:$24 sps:$4 sm:$0xff]  }
 0x369   :  { %4342 = vmatpush1.bf16.msra.mxu1 %v12878_v49  ;;  %4200 = vmatprep.subr.bf16.mxu0 %v12879_v48  ;;  %v12901_v49 = vld [vmem:[#allocation10 + $0x220] ss:$24 sps:$4 sm:$0xff]   ;;  %v12902_v48 = vld [vmem:[#allocation12 + $0x210] ss:$24 sps:$4 sm:$0xff]  }
 0x36a   :  { %4343 = vmatprep.subr.bf16.mxu1 %v12880_v12  ;;  %v12903_v12 = vld [vmem:[#allocation10 + $0x254] ss:$24 sps:$4 sm:$0xff]  }
 0x36c   :  { %4201 = vmatpush1.bf16.msra.mxu0 %v12881_v28  ;;  %v12904_v28 = vld [vmem:[#allocation12 + $0x244] ss:$24 sps:$4 sm:$0xff]  }
 0x36d   :  { %4344 = vmatpush1.bf16.msra.mxu1 %v12882_v22  ;;  %4202 = vmatprep.subr.bf16.mxu0 %v12883_v37  ;;  %v12905_v22 = vld [vmem:[#allocation10 + $0x250] ss:$24 sps:$4 sm:$0xff]   ;;  %v12906_v37 = vld [vmem:[#allocation12 + $0x240] ss:$24 sps:$4 sm:$0xff]  }
 0x36e   :  { %4345 = vmatprep.subr.bf16.mxu1 %v12884_v2  ;;  %v12907_v2 = vld [vmem:[#allocation10 + $0x284] ss:$24 sps:$4 sm:$0xff]  }
 0x370   :  { %4203 = vmatpush1.bf16.msra.mxu0 %v12885_v20  ;;  %v12908_v20 = vld [vmem:[#allocation12 + $0x274] ss:$24 sps:$4 sm:$0xff]  }
 0x371   :  { %4346 = vmatpush1.bf16.msra.mxu1 %v12886_v23  ;;  %4204 = vmatprep.subr.bf16.mxu0 %v12887_v59  ;;  %v12909_v23 = vld [vmem:[#allocation10 + $0x280] ss:$24 sps:$4 sm:$0xff]   ;;  %v12910_v59 = vld [vmem:[#allocation12 + $0x270] ss:$24 sps:$4 sm:$0xff]  }
 0x372   :  { %4347 = vmatprep.subr.bf16.mxu1 %v12888_v45  ;;  %v12911_v45 = vld [vmem:[#allocation10 + $0x2b4] ss:$24 sps:$4 sm:$0xff]  }
 0x374   :  { %4205 = vmatpush1.bf16.msra.mxu0 %v12889_v35  ;;  %v12912_v35 = vld [vmem:[#allocation12 + $0x2a4] ss:$24 sps:$4 sm:$0xff]  }
 0x375   :  { %4348 = vmatpush1.bf16.msra.mxu1 %v12890_v61  ;;  %4206 = vmatprep.subr.bf16.mxu0 %v12891_v4  ;;  %v12913_v61 = vld [vmem:[#allocation10 + $0x2b0] ss:$24 sps:$4 sm:$0xff]   ;;  %v12914_v4 = vld [vmem:[#allocation12 + $0x2a0] ss:$24 sps:$4 sm:$0xff]  }
 0x376   :  { %4349 = vmatprep.subr.bf16.mxu1 %v12892_v44  ;;  %v12915_v44 = vld [vmem:[#allocation10 + $0x2e4] ss:$24 sps:$4 sm:$0xff]  }
 0x378   :  { %4207 = vmatpush1.bf16.msra.mxu0 %v12893_v24  ;;  %v12916_v24 = vld [vmem:[#allocation12 + $0x2d4] ss:$24 sps:$4 sm:$0xff]  }
 0x379   :  { %4350 = vmatpush1.bf16.msra.mxu1 %v12894_v21  ;;  %4208 = vmatprep.subr.bf16.mxu0 %v12895_v53  ;;  %v12917_v21 = vld [vmem:[#allocation10 + $0x2e0] ss:$24 sps:$4 sm:$0xff]   ;;  %v12918_v53 = vld [vmem:[#allocation12 + $0x2d0] ss:$24 sps:$4 sm:$0xff]  }
 0x37a   :  { %4351 = vmatprep.subr.bf16.mxu1 %v12896_v25  ;;  %v12919_v25 = vld [vmem:[#allocation12 + $0xc] ss:$24 sps:$4 sm:$0xff]  }
 0x37c   :  { %4209 = vmatpush1.bf16.msra.mxu0 %v12897_v16  ;;  %v12920_v16 = vld [vmem:[#allocation12 + $0x14] ss:$24 sps:$4 sm:$0xff]  }
 0x37d   :  { %4352 = vmatpush1.bf16.msra.mxu1 %v12898_v32  ;;  %4210 = vmatprep.subr.bf16.mxu0 %v12899_v17  ;;  %v12921_v32 = vld [vmem:[#allocation12 + $0x8] ss:$24 sps:$4 sm:$0xff]  }
 0x37e   :  { %4353 = vmatprep.subr.bf16.mxu1 %v12900_v50  ;;  %v12922_v17 = vld [vmem:[#allocation12 + $0x10] ss:$24 sps:$4 sm:$0xff]   ;;  %v12923_v50 = vld [vmem:[#allocation12 + $0x3c] ss:$24 sps:$4 sm:$0xff]  }
 0x380   :  { %4211 = vmatpush1.bf16.msra.mxu0 %v12901_v49  ;;  %v12924_v49 = vld [vmem:[#allocation12 + $0x44] ss:$24 sps:$4 sm:$0xff]  }
 0x381   :  { %4354 = vmatpush1.bf16.msra.mxu1 %v12902_v48  ;;  %4212 = vmatprep.subr.bf16.mxu0 %v12903_v12  ;;  %v12925_v48 = vld [vmem:[#allocation12 + $0x38] ss:$24 sps:$4 sm:$0xff]  }
 0x382   :  { %4355 = vmatprep.subr.bf16.mxu1 %v12904_v28  ;;  %v12926_v12 = vld [vmem:[#allocation12 + $0x40] ss:$24 sps:$4 sm:$0xff]   ;;  %v12927_v28 = vld [vmem:[#allocation12 + $0x6c] ss:$24 sps:$4 sm:$0xff]  }
 0x384   :  { %4213 = vmatpush1.bf16.msra.mxu0 %v12905_v22  ;;  %v12929_v22 = vld [vmem:[#allocation12 + $0x68] ss:$24 sps:$4 sm:$0xff]  }
 0x385   :  { %4356 = vmatpush1.bf16.msra.mxu1 %v12906_v37  ;;  %4214 = vmatprep.subr.bf16.mxu0 %v12907_v2  ;;  %v12930_v37 = vld [vmem:[#allocation12 + $0x70] ss:$24 sps:$4 sm:$0xff]   ;;  %v12931_v2 = vld [vmem:[#allocation12 + $0x9c] ss:$24 sps:$4 sm:$0xff]  }
 0x386   :  { %4357 = vmatprep.subr.bf16.mxu1 %v12908_v20  ;;  %v12932_v20 = vld [vmem:[#allocation12 + $0xa4] ss:$24 sps:$4 sm:$0xff]  }
 0x388   :  { %4215 = vmatpush1.bf16.msra.mxu0 %v12909_v23  ;;  %v12934_v23 = vld [vmem:[#allocation12 + $0xa0] ss:$24 sps:$4 sm:$0xff]  }
 0x389   :  { %4358 = vmatpush1.bf16.msra.mxu1 %v12910_v59  ;;  %4216 = vmatprep.subr.bf16.mxu0 %v12911_v45  ;;  %v12935_v59 = vld [vmem:[#allocation12 + $0xcc] ss:$24 sps:$4 sm:$0xff]  }
 0x38a   :  { %4359 = vmatprep.subr.bf16.mxu1 %v12912_v35  ;;  %v12936_v45 = vld [vmem:[#allocation12 + $0xd4] ss:$24 sps:$4 sm:$0xff]   ;;  %v12937_v35 = vld [vmem:[#allocation12 + $0xc8] ss:$24 sps:$4 sm:$0xff]  }
 0x38c   :  { %4217 = vmatpush1.bf16.msra.mxu0 %v12913_v61  ;;  %v12938_v61 = vld [vmem:[#allocation12 + $0xd0] ss:$24 sps:$4 sm:$0xff]  }
 0x38d   :  { %4360 = vmatpush1.bf16.msra.mxu1 %v12914_v4  ;;  %4218 = vmatprep.subr.bf16.mxu0 %v12915_v44  ;;  %v12939_v4 = vld [vmem:[#allocation12 + $0xfc] ss:$24 sps:$4 sm:$0xff]  }
 0x38e   :  { %4361 = vmatprep.subr.bf16.mxu1 %v12916_v24  ;;  %v12940_v44 = vld [vmem:[#allocation12 + $0x104] ss:$24 sps:$4 sm:$0xff]   ;;  %v12941_v24 = vld [vmem:[#allocation12 + $0xf8] ss:$24 sps:$4 sm:$0xff]  }
 0x390   :  { %4219 = vmatpush1.bf16.msra.mxu0 %v12917_v21  ;;  %v12942_v21 = vld [vmem:[#allocation12 + $0x100] ss:$24 sps:$4 sm:$0xff]  }
 0x391   :  { %4362 = vmatpush1.bf16.msra.mxu1 %v12918_v53  ;;  %4374 = vmatprep.subr.bf16.mxu0 %v12919_v25  ;;  %v12943_v53 = vld [vmem:[#allocation12 + $0x12c] ss:$24 sps:$4 sm:$0xff]  }
 0x392   :  { %4417 = vmatprep.subr.bf16.mxu1 %v12920_v16  ;;  %v12944_v25 = vld [vmem:[#allocation12 + $0x134] ss:$24 sps:$4 sm:$0xff]   ;;  %v12945_v16 = vld [vmem:[#allocation12 + $0x128] ss:$24 sps:$4 sm:$0xff]  }
 0x393   :  { %4221 = vmatmul.mubr.bf16.vlgmr.msra.gmra.mrb[80].mxu0 %v14466_v57  ;;  %v12928_v57 = vld [vmem:[#allocation12 + $0x74] ss:$24 sps:$4 sm:$0xff]  }
 0x394   :  { %4364 = vmatmul.mubr.bf16.vlgmr.msra.gmra.mrb[80].mxu1 %v14452_v31  ;;  %4375 = vmatpush1.bf16.msra.mxu0 %v12921_v32  ;;  %v12946_v32 = vld [vmem:[#allocation12 + $0x130] ss:$24 sps:$4 sm:$0xff]  }
 0x395   :  { %4406 = vmatprep.mubr.bf16.mxu0 %v14448_v3  ;;  %4418 = vmatpush1.bf16.msra.mxu1 %v12922_v17  ;;  %v12947_v17 = vld [vmem:[#allocation12 + $0x15c] ss:$24 sps:$4 sm:$0xff]  }
 0x396   :  { %4449 = vmatprep.mubr.bf16.mxu1 %v14448_v3  ;;  %4376 = vmatprep.subr.bf16.mxu0 %v12923_v50  ;;  %v12933_v3 = vld [vmem:[#allocation12 + $0x98] ss:$24 sps:$4 sm:$0xff]   ;;  %v12948_v50 = vld [vmem:[#allocation12 + $0x164] ss:$24 sps:$4 sm:$0xff]  }
 0x397   :  { %4419 = vmatprep.subr.bf16.mxu1 %v12924_v49  ;;  %v12949_v49 = vld [vmem:[#allocation12 + $0x158] ss:$24 sps:$4 sm:$0xff]  }
 0x398   :  { %4377 = vmatpush1.bf16.msra.mxu0 %v12925_v48  ;;  %v12950_v48 = vld [vmem:[#allocation12 + $0x160] ss:$24 sps:$4 sm:$0xff]  }
 0x399   :  { %4420 = vmatpush1.bf16.msra.mxu1 %v12926_v12  ;;  %4378 = vmatprep.subr.bf16.mxu0 %v12927_v28  ;;  %v12951_v12 = vld [vmem:[#allocation12 + $0x18c] ss:$24 sps:$4 sm:$0xff]  }
 0x39a   :  { %4421 = vmatprep.subr.bf16.mxu1 %v12928_v57  ;;  %v12952_v28 = vld [vmem:[#allocation12 + $0x194] ss:$24 sps:$4 sm:$0xff]   ;;  %v12953_v57 = vld [vmem:[#allocation12 + $0x188] ss:$24 sps:$4 sm:$0xff]  }
 0x39c   :  { %4379 = vmatpush1.bf16.msra.mxu0 %v12929_v22  ;;  %v12954_v22 = vld [vmem:[#allocation12 + $0x190] ss:$24 sps:$4 sm:$0xff]  }
 0x39d   :  { %4422 = vmatpush1.bf16.msra.mxu1 %v12930_v37  ;;  %4380 = vmatprep.subr.bf16.mxu0 %v12931_v2  ;;  %v12955_v37 = vld [vmem:[#allocation12 + $0x1bc] ss:$24 sps:$4 sm:$0xff]  }
 0x39e   :  { %4423 = vmatprep.subr.bf16.mxu1 %v12932_v20  ;;  %v12956_v2 = vld [vmem:[#allocation12 + $0x1c4] ss:$24 sps:$4 sm:$0xff]   ;;  %v12957_v20 = vld [vmem:[#allocation12 + $0x1b8] ss:$24 sps:$4 sm:$0xff]  }
 0x3a0   :  { %4381 = vmatpush1.bf16.msra.mxu0 %v12933_v3  ;;  %v12958_v3 = vld [vmem:[#allocation12 + $0x1c0] ss:$24 sps:$4 sm:$0xff]  }
 0x3a1   :  { %4424 = vmatpush1.bf16.msra.mxu1 %v12934_v23  ;;  %4382 = vmatprep.subr.bf16.mxu0 %v12935_v59  ;;  %v12959_v23 = vld [vmem:[#allocation12 + $0x1ec] ss:$24 sps:$4 sm:$0xff]  }
 0x3a2   :  { %4425 = vmatprep.subr.bf16.mxu1 %v12936_v45  ;;  %v12960_v59 = vld [vmem:[#allocation12 + $0x1f4] ss:$24 sps:$4 sm:$0xff]   ;;  %v12961_v45 = vld [vmem:[#allocation12 + $0x1e8] ss:$24 sps:$4 sm:$0xff]  }
 0x3a4   :  { %4383 = vmatpush1.bf16.msra.mxu0 %v12937_v35  ;;  %v12962_v35 = vld [vmem:[#allocation12 + $0x1f0] ss:$24 sps:$4 sm:$0xff]  }
 0x3a5   :  { %4426 = vmatpush1.bf16.msra.mxu1 %v12938_v61  ;;  %4384 = vmatprep.subr.bf16.mxu0 %v12939_v4  ;;  %v12963_v61 = vld [vmem:[#allocation12 + $0x21c] ss:$24 sps:$4 sm:$0xff]  }
 0x3a6   :  { %4427 = vmatprep.subr.bf16.mxu1 %v12940_v44  ;;  %v12964_v4 = vld [vmem:[#allocation12 + $0x224] ss:$24 sps:$4 sm:$0xff]   ;;  %v12965_v44 = vld [vmem:[#allocation12 + $0x218] ss:$24 sps:$4 sm:$0xff]  }
 0x3a8   :  { %4385 = vmatpush1.bf16.msra.mxu0 %v12941_v24  ;;  %v12966_v24 = vld [vmem:[#allocation12 + $0x220] ss:$24 sps:$4 sm:$0xff]  }
 0x3a9   :  { %4428 = vmatpush1.bf16.msra.mxu1 %v12942_v21  ;;  %4386 = vmatprep.subr.bf16.mxu0 %v12943_v53  ;;  %v12967_v21 = vld [vmem:[#allocation12 + $0x24c] ss:$24 sps:$4 sm:$0xff]  }
 0x3aa   :  { %4429 = vmatprep.subr.bf16.mxu1 %v12944_v25  ;;  %v12968_v53 = vld [vmem:[#allocation12 + $0x254] ss:$24 sps:$4 sm:$0xff]   ;;  %v12969_v25 = vld [vmem:[#allocation12 + $0x248] ss:$24 sps:$4 sm:$0xff]  }
 0x3ac   :  { %4387 = vmatpush1.bf16.msra.mxu0 %v12945_v16  ;;  %v12970_v16 = vld [vmem:[#allocation12 + $0x250] ss:$24 sps:$4 sm:$0xff]  }
 0x3ad   :  { %4430 = vmatpush1.bf16.msra.mxu1 %v12946_v32  ;;  %4388 = vmatprep.subr.bf16.mxu0 %v12947_v17  ;;  %v12971_v32 = vld [vmem:[#allocation12 + $0x27c] ss:$24 sps:$4 sm:$0xff]  }
 0x3ae   :  { %4431 = vmatprep.subr.bf16.mxu1 %v12948_v50  ;;  %v12972_v17 = vld [vmem:[#allocation12 + $0x284] ss:$24 sps:$4 sm:$0xff]   ;;  %v12973_v50 = vld [vmem:[#allocation12 + $0x278] ss:$24 sps:$4 sm:$0xff]  }
 0x3b0   :  { %4389 = vmatpush1.bf16.msra.mxu0 %v12949_v49  ;;  %v12974_v49 = vld [vmem:[#allocation12 + $0x280] ss:$24 sps:$4 sm:$0xff]  }
 0x3b1   :  { %4432 = vmatpush1.bf16.msra.mxu1 %v12950_v48  ;;  %4390 = vmatprep.subr.bf16.mxu0 %v12951_v12  ;;  %v12975_v48 = vld [vmem:[#allocation12 + $0x2ac] ss:$24 sps:$4 sm:$0xff]  }
 0x3b2   :  { %4433 = vmatprep.subr.bf16.mxu1 %v12952_v28  ;;  %v12976_v12 = vld [vmem:[#allocation12 + $0x2b4] ss:$24 sps:$4 sm:$0xff]   ;;  %v12977_v28 = vld [vmem:[#allocation12 + $0x2a8] ss:$24 sps:$4 sm:$0xff]  }
 0x3b4   :  { %4391 = vmatpush1.bf16.msra.mxu0 %v12953_v57  ;;  %v12978_v57 = vld [vmem:[#allocation12 + $0x2b0] ss:$24 sps:$4 sm:$0xff]  }
 0x3b5   :  { %4434 = vmatpush1.bf16.msra.mxu1 %v12954_v22  ;;  %4392 = vmatprep.subr.bf16.mxu0 %v12955_v37  ;;  %v12979_v22 = vld [vmem:[#allocation12 + $0x2dc] ss:$24 sps:$4 sm:$0xff]  }
 0x3b6   :  { %4435 = vmatprep.subr.bf16.mxu1 %v12956_v2  ;;  %v12980_v37 = vld [vmem:[#allocation12 + $0x2e4] ss:$24 sps:$4 sm:$0xff]   ;;  %v12981_v2 = vld [vmem:[#allocation12 + $0x2d8] ss:$24 sps:$4 sm:$0xff]  }
 0x3b8   :  { %4393 = vmatpush1.bf16.msra.mxu0 %v12957_v20  ;;  %v12982_v20 = vld [vmem:[#allocation12 + $0x2e0] ss:$24 sps:$4 sm:$0xff]  }
 0x3b9   :  { %4436 = vmatpush1.bf16.msra.mxu1 %v12958_v3  ;;  %4394 = vmatprep.subr.bf16.mxu0 %v12959_v23  ;;  %v11622_v3 = vld [vmem:[#allocation16 + $0xe00] ss:$16 sps:$4 sm:$0xff]   ;;  %v11624_v23 = vld [vmem:[#allocation16 + $0xe04] ss:$16 sps:$4 sm:$0xff]  }
 0x3ba   :  { %4437 = vmatprep.subr.bf16.mxu1 %v12960_v59  ;;  %v11625_v59 = vld [vmem:[#allocation16 + $0xe08] ss:$16 sps:$4 sm:$0xff]  }
 0x3bc   :  { %4395 = vmatpush1.bf16.msra.mxu0 %v12961_v45  ;;  %v11627_v45 = vld [vmem:[#allocation16 + $0xe0c] ss:$16 sps:$4 sm:$0xff]  }
 0x3bd   :  { %4438 = vmatpush1.bf16.msra.mxu1 %v12962_v35  ;;  %4396 = vmatprep.subr.bf16.mxu0 %v12963_v61  ;;  %v11630_v35 = vld [vmem:[#allocation16 + $0xe24] ss:$16 sps:$4 sm:$0xff]   ;;  %v11633_v61 = vld [vmem:[#allocation16 + $0xe2c] ss:$16 sps:$4 sm:$0xff]  }
 0x3be   :  { %4439 = vmatprep.subr.bf16.mxu1 %v12964_v4  ;;  %v11628_v4 = vld [vmem:[#allocation16 + $0xe20] ss:$16 sps:$4 sm:$0xff]  }
 0x3c0   :  { %4397 = vmatpush1.bf16.msra.mxu0 %v12965_v44  ;;  %v11631_v44 = vld [vmem:[#allocation16 + $0xe28] ss:$16 sps:$4 sm:$0xff]  }
 0x3c1   :  { %4440 = vmatpush1.bf16.msra.mxu1 %v12966_v24  ;;  %4398 = vmatprep.subr.bf16.mxu0 %v12967_v21  ;;  %v11636_v24 = vld [vmem:[#allocation16 + $0xe44] ss:$16 sps:$4 sm:$0xff]   ;;  %v11639_v21 = vld [vmem:[#allocation16 + $0xe4c] ss:$16 sps:$4 sm:$0xff]  }
 0x3c2   :  { %4441 = vmatprep.subr.bf16.mxu1 %v12968_v53  ;;  %v11634_v53 = vld [vmem:[#allocation16 + $0xe40] ss:$16 sps:$4 sm:$0xff]  }
 0x3c4   :  { %4399 = vmatpush1.bf16.msra.mxu0 %v12969_v25  ;;  %v11642_v25 = vld [vmem:[#allocation16 + $0xe64] ss:$16 sps:$4 sm:$0xff]  }
 0x3c5   :  { %4442 = vmatpush1.bf16.msra.mxu1 %v12970_v16  ;;  %4400 = vmatprep.subr.bf16.mxu0 %v12971_v32  ;;  %v11645_v16 = vld [vmem:[#allocation16 + $0xe6c] ss:$16 sps:$4 sm:$0xff]   ;;  %v11640_v32 = vld [vmem:[#allocation16 + $0xe60] ss:$16 sps:$4 sm:$0xff]  }
 0x3c6   :  { %4443 = vmatprep.subr.bf16.mxu1 %v12972_v17  ;;  %v11643_v17 = vld [vmem:[#allocation16 + $0xe68] ss:$16 sps:$4 sm:$0xff]  }
 0x3c8   :  { %4401 = vmatpush1.bf16.msra.mxu0 %v12973_v50  ;;  %v11648_v50 = vld [vmem:[#allocation16 + $0xe84] ss:$16 sps:$4 sm:$0xff]  }
 0x3c9   :  { %4444 = vmatpush1.bf16.msra.mxu1 %v12974_v49  ;;  %4402 = vmatprep.subr.bf16.mxu0 %v12975_v48  ;;  %v11651_v49 = vld [vmem:[#allocation16 + $0xe8c] ss:$16 sps:$4 sm:$0xff]   ;;  %v11646_v48 = vld [vmem:[#allocation16 + $0xe80] ss:$16 sps:$4 sm:$0xff]  }
 0x3ca   :  { %4445 = vmatprep.subr.bf16.mxu1 %v12976_v12  ;;  %v11649_v12 = vld [vmem:[#allocation16 + $0xe88] ss:$16 sps:$4 sm:$0xff]  }
 0x3cc   :  { %4403 = vmatpush1.bf16.msra.mxu0 %v12977_v28  ;;  %v11654_v28 = vld [vmem:[#allocation16 + $0xea4] ss:$16 sps:$4 sm:$0xff]  }
 0x3cd   :  { %4446 = vmatpush1.bf16.msra.mxu1 %v12978_v57  ;;  %4404 = vmatprep.subr.bf16.mxu0 %v12979_v22  ;;  %v11657_v57 = vld [vmem:[#allocation16 + $0xeac] ss:$16 sps:$4 sm:$0xff]   ;;  %v11652_v22 = vld [vmem:[#allocation16 + $0xea0] ss:$16 sps:$4 sm:$0xff]  }
 0x3ce   :  { %4447 = vmatprep.subr.bf16.mxu1 %v12980_v37  ;;  %v11655_v37 = vld [vmem:[#allocation16 + $0xea8] ss:$16 sps:$4 sm:$0xff]  }
 0x3d0   :  { %4405 = vmatpush1.bf16.msra.mxu0 %v12981_v2  ;;  %v4231_v2 = vunpack.c.l.bf16 %v14123_v43 }
 0x3d1   :  { %4448 = vmatpush1.bf16.msra.mxu1 %v12982_v20  ;;  %5012 = vmatprep.subr.bf16.mxu0 %v11624_v23  ;;  %v4232_v23 = vunpack.c.l.bf16 %v14127_v51 }
 0x3d2   :  { %5055 = vmatprep.subr.bf16.mxu1 %v11627_v45 }
 0x3d3   :  { %4407 = vmatmul.mubr.bf16.vlgmr.msra.gmra.mrb[84].mxu0 %v14452_v31 }
 0x3d4   :  { %4450 = vmatmul.mubr.bf16.vlgmr.msra.gmra.mrb[84].mxu1 %v14452_v31  ;;  %5013 = vmatpush1.bf16.msra.mxu0 %v11622_v3  ;;  %v11637_v31 = vld [vmem:[#allocation16 + $0xe48] ss:$16 sps:$4 sm:$0xff]   ;;  %v4233_v3 = vunpack.c.l.bf16 %v14125_v5 }
 0x3d5   :  { %5056 = vmatpush1.bf16.msra.mxu1 %v11625_v59  ;;  %5014 = vmatprep.subr.bf16.mxu0 %v11630_v35 }
 0x3d6   :  { %5057 = vmatprep.subr.bf16.mxu1 %v11633_v61  ;;  %v4234_v61 = vunpack.c.l.bf16 %v14129_v8 }
 0x3d8   :  { %5015 = vmatpush1.bf16.msra.mxu0 %v11628_v4  ;;  %v4235_v4 = vunpack.c.h.bf16 %v14123_v43 }
 0x3d9   :  { %5058 = vmatpush1.bf16.msra.mxu1 %v11631_v44  ;;  %5016 = vmatprep.subr.bf16.mxu0 %v11636_v24 }
 0x3da   :  { %5059 = vmatprep.subr.bf16.mxu1 %v11639_v21 }
 0x3dc   :  { %5017 = vmatpush1.bf16.msra.mxu0 %v11634_v53 }
 0x3dd   :  { %5060 = vmatpush1.bf16.msra.mxu1 %v11637_v31  ;;  %5018 = vmatprep.subr.bf16.mxu0 %v11642_v25  ;;  %v4237_v31 = vunpack.c.h.bf16 %v14125_v5  ;;  %v4236_v25 = vunpack.c.h.bf16 %v14127_v51  ;;  %v11661_v5 = vld [vmem:[#allocation16 + $0xec8] ss:$16 sps:$4 sm:$0xff]   ;;  %v11663_v51 = vld [vmem:[#allocation16 + $0xecc] ss:$16 sps:$4 sm:$0xff]  }
 0x3de   :  { %5061 = vmatprep.subr.bf16.mxu1 %v11645_v16 }
 0x3e0   :  { %5019 = vmatpush1.bf16.msra.mxu0 %v11640_v32 }
 0x3e1   :  { %5062 = vmatpush1.bf16.msra.mxu1 %v11643_v17  ;;  %5020 = vmatprep.subr.bf16.mxu0 %v11648_v50 }
 0x3e2   :  { %5063 = vmatprep.subr.bf16.mxu1 %v11651_v49  ;;  %v4238_v49 = vunpack.c.h.bf16 %v14129_v8  ;;  %v11667_v8 = vld [vmem:[#allocation16 + $0xee8] ss:$16 sps:$4 sm:$0xff]  }
 0x3e4   :  { %5021 = vmatpush1.bf16.msra.mxu0 %v11646_v48  ;;  %v11660_v48 = vld [vmem:[#allocation16 + $0xec4] ss:$16 sps:$4 sm:$0xff]  }
 0x3e5   :  { %5064 = vmatpush1.bf16.msra.mxu1 %v11649_v12  ;;  %5022 = vmatprep.subr.bf16.mxu0 %v11654_v28 }
 0x3e6   :  { %5065 = vmatprep.subr.bf16.mxu1 %v11657_v57 }
 0x3e8   :  { %5023 = vmatpush1.bf16.msra.mxu0 %v11652_v22  ;;  %v11658_v22 = vld [vmem:[#allocation16 + $0xec0] ss:$16 sps:$4 sm:$0xff]  }
 0x3e9   :  { %5066 = vmatpush1.bf16.msra.mxu1 %v11655_v37  ;;  %5024 = vmatprep.subr.bf16.mxu0 %v11660_v48  ;;  %v11666_v37 = vld [vmem:[#allocation16 + $0xee4] ss:$16 sps:$4 sm:$0xff]   ;;  %v11693_v48 = vld [vmem:[#allocation16 + $0xf6c] ss:$16 sps:$4 sm:$0xff]  }
 0x3ea   :  { %5067 = vmatprep.subr.bf16.mxu1 %v11663_v51  ;;  %v11699_v51 = vld [vmem:[#allocation16 + $0xf8c] ss:$16 sps:$4 sm:$0xff]  }
 0x3ec   :  { %5025 = vmatpush1.bf16.msra.mxu0 %v11658_v22  ;;  %v11691_v22 = vld [vmem:[#allocation16 + $0xf68] ss:$16 sps:$4 sm:$0xff]  }
 0x3ed   :  { %5026 = vmatprep.subr.bf16.mxu0 %v11666_v37  ;;  %5068 = vmatpush1.bf16.msra.mxu1 %v11661_v5  ;;  %v11696_v5 = vld [vmem:[#allocation16 + $0xf84] ss:$16 sps:$4 sm:$0xff]   ;;  %v11694_v37 = vld [vmem:[#allocation16 + $0xf80] ss:$16 sps:$4 sm:$0xff]  }
 0x426   :  { %v4136_v20 = vpop.f32.mrb[76].mxu0 }
 0x427   :  { %v14485_v59 = vadd.f32 %v4231_v2, %v4136_v20  ;;  %v4179_v45 = vpop.f32.mrb[76].mxu1  ;;  %v4138_v35 = vpop.f32.mrb[77].mxu0  ;;  %v11664_v2 = vld [vmem:[#allocation16 + $0xee0] ss:$16 sps:$4 sm:$0xff]   ;;  %v11669_v20 = vld [vmem:[#allocation16 + $0xeec] ss:$16 sps:$4 sm:$0xff]  }
 0x428   :  { %v14489_v44 = vadd.f32 %v4233_v3, %v4179_v45  ;;  %v14491_v24 = vadd.f32 %v4232_v23, %v4138_v35  ;;  %v4181_v21 = vpop.f32.mrb[77].mxu1  ;;  %v4140_v53 = vpop.f32.mrb[78].mxu0  ;;  %5069 = vmatprep.subr.bf16.mxu1 %v11669_v20  ;;  %5027 = vmatpush1.bf16.msra.mxu0 %v11664_v2  ;;  %v11672_v3 = vld [vmem:[#allocation16 + $0xf04] ss:$16 sps:$4 sm:$0xff]   ;;  %v11675_v23 = vld [vmem:[#allocation16 + $0xf0c] ss:$16 sps:$4 sm:$0xff]  }
 0x429   :  { %v14495_v16 = vadd.f32 %v4234_v61, %v4181_v21  ;;  %v14497_v32 = vadd.f32 %v4235_v4, %v4140_v53  ;;  %v4183_v17 = vpop.f32.mrb[78].mxu1  ;;  %v4142_v50 = vpop.f32.mrb[79].mxu0  ;;  %v11670_v45 = vld [vmem:[#allocation16 + $0xf00] ss:$16 sps:$4 sm:$0xff]   ;;  %5028 = vmatprep.subr.bf16.mxu0 %v11672_v3  ;;  %5070 = vmatpush1.bf16.msra.mxu1 %v11667_v8  ;;  %v11673_v35 = vld [vmem:[#allocation16 + $0xf08] ss:$16 sps:$4 sm:$0xff]  }
 0x42a   :  { %v14500_v43 = vadd.f32 %v4237_v31, %v4183_v17  ;;  %v14502_v12 = vadd.f32 %v4236_v25, %v4142_v50  ;;  %v4185_v28 = vpop.f32.mrb[79].mxu1  ;;  %5071 = vmatprep.subr.bf16.mxu1 %v11675_v23  ;;  %v11678_v61 = vld [vmem:[#allocation16 + $0xf24] ss:$16 sps:$4 sm:$0xff]   ;;  %v11681_v4 = vld [vmem:[#allocation16 + $0xf2c] ss:$16 sps:$4 sm:$0xff]  }
 0x42b   :  { %v14504_v57 = vadd.f32 %v4238_v49, %v4185_v28  ;;  %v11676_v21 = vld [vmem:[#allocation16 + $0xf20] ss:$16 sps:$4 sm:$0xff]   ;;  %v11679_v53 = vld [vmem:[#allocation16 + $0xf28] ss:$16 sps:$4 sm:$0xff]   ;;  %v11684_v31 = vld [vmem:[#allocation16 + $0xf44] ss:$16 sps:$4 sm:$0xff]  }
 0x42c   :  { %5029 = vmatpush1.bf16.msra.mxu0 %v11670_v45  ;;  %v11687_v25 = vld [vmem:[#allocation16 + $0xf4c] ss:$16 sps:$4 sm:$0xff]   ;;  %v11682_v17 = vld [vmem:[#allocation16 + $0xf40] ss:$16 sps:$4 sm:$0xff]   ;;  %v11685_v50 = vld [vmem:[#allocation16 + $0xf48] ss:$16 sps:$4 sm:$0xff]  }
 0x42d   :  { %5030 = vmatprep.subr.bf16.mxu0 %v11678_v61  ;;  %5072 = vmatpush1.bf16.msra.mxu1 %v11673_v35  ;;  %v11690_v49 = vld [vmem:[#allocation16 + $0xf64] ss:$16 sps:$4 sm:$0xff]   ;;  %v11688_v28 = vld [vmem:[#allocation16 + $0xf60] ss:$16 sps:$4 sm:$0xff]   ;;  %v11697_v2 = vld [vmem:[#allocation16 + $0xf88] ss:$16 sps:$4 sm:$0xff]  }
 0x42e   :  { %5073 = vmatprep.subr.bf16.mxu1 %v11681_v4  ;;  %v11702_v20 = vld [vmem:[#allocation16 + $0xfa4] ss:$16 sps:$4 sm:$0xff]   ;;  %v11705_v8 = vld [vmem:[#allocation16 + $0xfac] ss:$16 sps:$4 sm:$0xff]   ;;  %v11700_v3 = vld [vmem:[#allocation16 + $0xfa0] ss:$16 sps:$4 sm:$0xff]  }
 0x42f   :  { %v11703_v23 = vld [vmem:[#allocation16 + $0xfa8] ss:$16 sps:$4 sm:$0xff]   ;;  %v10316_v45 = vmul.f32 -1.442695, %v14485_v59  ;;  %v11706_v35 = vld [vmem:[#allocation16 + $0xfc0] ss:$16 sps:$4 sm:$0xff]  }
 0x430   :  { %5031 = vmatpush1.bf16.msra.mxu0 %v11676_v21  ;;  %v11708_v61 = vld [vmem:[#allocation16 + $0xfc4] ss:$16 sps:$4 sm:$0xff]   ;;  %v10317_v4 = vmul.f32 -1.442695, %v14491_v24  ;;  %v11711_v21 = vld [vmem:[#allocation16 + $0xfcc] ss:$16 sps:$4 sm:$0xff]  }
 0x431   :  { %5032 = vmatprep.subr.bf16.mxu0 %v11684_v31  ;;  %5074 = vmatpush1.bf16.msra.mxu1 %v11679_v53  ;;  %v10320_v53 = vmul.f32 -1.442695, %v14497_v32  ;;  %v11714_v31 = vld [vmem:[#allocation16 + $0xfe4] ss:$16 sps:$4 sm:$0xff]   ;;  %12470 = vpow2.f32 %v10316_v45  ;;  %v11717_v59 = vld [vmem:[#allocation16 + $0xfec] ss:$16 sps:$4 sm:$0xff]  }
 0x432   :  { %5075 = vmatprep.subr.bf16.mxu1 %v11687_v25  ;;  %v10321_v25 = vmul.f32 -1.442695, %v14502_v12  ;;  %12472 = vpow2.f32 %v10317_v4  ;;  %v11715_v24 = vld [vmem:[#allocation16 + $0xfe8] ss:$16 sps:$4 sm:$0xff]   ;;  %v11720_v32 = vld [vmem:[#allocation16 + $0x404] ss:$16 sps:$4 sm:$0xff]   ;;  %v4304_v4 = vunpack.c.l.bf16 %v14216_v34 }
 0x433   :  { %12474 = vpow2.f32 %v10320_v53  ;;  %v10318_v12 = vmul.f32 -1.442695, %v14489_v44 }
 0x434   :  { %5033 = vmatpush1.bf16.msra.mxu0 %v11682_v17  ;;  %v11709_v17 = vld [vmem:[#allocation16 + $0xfc8] ss:$16 sps:$4 sm:$0xff]   ;;  %12476 = vpow2.f32 %v10321_v25 }
 0x435   :  { %5034 = vmatprep.subr.bf16.mxu0 %v11690_v49  ;;  %5076 = vmatpush1.bf16.msra.mxu1 %v11685_v50  ;;  %v11712_v50 = vld [vmem:[#allocation16 + $0xfe0] ss:$16 sps:$4 sm:$0xff]   ;;  %v11723_v49 = vld [vmem:[#allocation16 + $0x40c] ss:$16 sps:$4 sm:$0xff]   ;;  %12478 = vpow2.f32 %v10318_v12 }
 0x436   :  { %5077 = vmatprep.subr.bf16.mxu1 %v11693_v48  ;;  %v10319_v48 = vmul.f32 -1.442695, %v14495_v16 }
 0x438   :  { %5035 = vmatpush1.bf16.msra.mxu0 %v11688_v28  ;;  %v10322_v28 = vmul.f32 -1.442695, %v14500_v43  ;;  %12480 = vpow2.f32 %v10319_v48 }
 0x439   :  { %5036 = vmatprep.subr.bf16.mxu0 %v11696_v5  ;;  %5078 = vmatpush1.bf16.msra.mxu1 %v11691_v22  ;;  %v10323_v5 = vmul.f32 -1.442695, %v14504_v57  ;;  %v4303_v57 = vunpack.c.l.bf16 %v14212_v27 }
 0x43a   :  { %5079 = vmatprep.subr.bf16.mxu1 %v11699_v51  ;;  %12482 = vpow2.f32 %v10322_v28 }
 0x43b   :  { %v12471_v22 = vpop.eup %12470  ;;  %12484 = vpow2.f32 %v10323_v5  ;;  %v4465_v5 = vunpack.c.h.bf16 %v14252_v63 }
 0x43c   :  { %5037 = vmatpush1.bf16.msra.mxu0 %v11694_v37  ;;  %v12473_v51 = vpop.eup %12472 }
 0x43d   :  { %5038 = vmatprep.subr.bf16.mxu0 %v11702_v20  ;;  %5080 = vmatpush1.bf16.msra.mxu1 %v11697_v2  ;;  %v12475_v37 = vpop.eup %12474  ;;  %v4271_v20 = vadd.f32 1.0, %v12471_v22 }
 0x43e   :  { %5081 = vmatprep.subr.bf16.mxu1 %v11705_v8  ;;  %v12477_v2 = vpop.eup %12476  ;;  %v4272_v8 = vadd.f32 1.0, %v12473_v51 }
 0x43f   :  { %v4276_v44 = vadd.f32 1.0, %v12477_v2  ;;  %12486 = vrcp.f32 %v4271_v20  ;;  %v12479_v16 = vpop.eup %12478 }
 0x440   :  { %5039 = vmatpush1.bf16.msra.mxu0 %v11700_v3  ;;  %v4275_v3 = vadd.f32 1.0, %v12475_v37  ;;  %12488 = vrcp.f32 %v4272_v8 }
 0x441   :  { %5040 = vmatprep.subr.bf16.mxu0 %v11708_v61  ;;  %5082 = vmatpush1.bf16.msra.mxu1 %v11703_v23  ;;  %v4305_v61 = vunpack.c.h.bf16 %v14212_v27 }
 0x442   :  { %5083 = vmatprep.subr.bf16.mxu1 %v11711_v21  ;;  %12490 = vrcp.f32 %v4275_v3  ;;  %v12481_v43 = vpop.eup %12480 }
 0x443   :  { %12492 = vrcp.f32 %v4276_v44  ;;  %v4274_v21 = vadd.f32 1.0, %v12481_v43 }
 0x444   :  { %5041 = vmatpush1.bf16.msra.mxu0 %v11706_v35  ;;  %v12483_v23 = vpop.eup %12482  ;;  %v4273_v35 = vadd.f32 1.0, %v12479_v16 }
 0x445   :  { %5042 = vmatprep.subr.bf16.mxu0 %v11714_v31  ;;  %5084 = vmatpush1.bf16.msra.mxu1 %v11709_v17  ;;  %v12485_v45 = vpop.eup %12484  ;;  %v4460_v31 = vunpack.c.l.bf16 %v14248_v54  ;;  %v4277_v25 = vadd.f32 1.0, %v12483_v23 }
 0x446   :  { %5085 = vmatprep.subr.bf16.mxu1 %v11717_v59  ;;  %v4278_v12 = vadd.f32 1.0, %v12485_v45  ;;  %12494 = vrcp.f32 %v4273_v35  ;;  %v4306_v35 = vunpack.c.h.bf16 %v14216_v34 }
 0x447   :  { %12496 = vrcp.f32 %v4274_v21 }
 0x448   :  { %5043 = vmatpush1.bf16.msra.mxu0 %v11712_v50  ;;  %12498 = vrcp.f32 %v4277_v25 }
 0x449   :  { %5426 = vmatprep.subr.bf16.mxu0 %v11720_v32  ;;  %5086 = vmatpush1.bf16.msra.mxu1 %v11715_v24  ;;  %v4461_v24 = vunpack.c.l.bf16 %v14252_v63  ;;  %v4464_v32 = vunpack.c.h.bf16 %v14248_v54  ;;  %12500 = vrcp.f32 %v4278_v12 }
 0x44a   :  { %5469 = vmatprep.subr.bf16.mxu1 %v11723_v49  ;;  %v12487_v49 = vpop.eup %12486 }
 0x44b   :  { %v12489_v51 = vpop.eup %12488 }
 0x44c   :  { %v12491_v44 = vpop.eup %12490 }
 0x44d   :  { %v12493_v45 = vpop.eup %12492 }
 0x450   :  { %v12495_v21 = vpop.eup %12494 }
 0x466   :  { %v4222_v53 = vpop.f32.mrb[80].mxu0 }
 0x467   :  { %v4295_v17 = vadd.f32 %v4222_v53, %v14395_v30  ;;  %v4365_v50 = vpop.f32.mrb[80].mxu1  ;;  %v4224_v59 = vpop.f32.mrb[81].mxu0 }
 0x468   :  { %v4468_v48 = vadd.f32 %v4460_v31, %v4365_v50  ;;  %v4296_v27 = vadd.f32 %v4224_v59, %v14398_v13  ;;  %v4367_v28 = vpop.f32.mrb[81].mxu1  ;;  %v4226_v22 = vpop.f32.mrb[82].mxu0 }
 0x469   :  { %v4299_v37 = vmul.f32 %v12487_v49, %v4295_v17  ;;  %v4469_v2 = vadd.f32 %v4461_v24, %v4367_v28  ;;  %v4297_v20 = vadd.f32 %v4226_v22, %v14395_v30  ;;  %v4369_v8 = vpop.f32.mrb[82].mxu1  ;;  %v4228_v3 = vpop.f32.mrb[83].mxu0  ;;  %v4315_v28 = vsub.f32 1.0, %v12495_v21 }
 0x46a   :  { %v4300_v54 = vmul.f32 %v12489_v51, %v4296_v27  ;;  %v4472_v16 = vadd.f32 %v4464_v32, %v4369_v8  ;;  %v4298_v43 = vadd.f32 %v4228_v3, %v14398_v13  ;;  %v4371_v23 = vpop.f32.mrb[83].mxu1  ;;  %v12497_v32 = vpop.eup %12496 }
 0x46b   :  { %v4307_v53 = vadd.f32 %v4303_v57, %v4299_v37  ;;  %v4301_v31 = vmul.f32 %v12491_v44, %v4297_v20  ;;  %v4473_v63 = vadd.f32 %v4465_v5, %v4371_v23  ;;  %v12499_v49 = vpop.eup %12498  ;;  %v4316_v57 = vsub.f32 1.0, %v12497_v32 }
 0x46c   :  { %v4308_v17 = vadd.f32 %v4304_v4, %v4300_v54  ;;  %v4302_v50 = vmul.f32 %v12493_v45, %v4298_v43  ;;  %v12501_v27 = vpop.eup %12500  ;;  %v4323_v5 = vmul.f32 %v12495_v21, %v14412_v7  ;;  %v4324_v4 = vmul.f32 %v12497_v32, %v14414_v62 }
 0x46d   :  { %12502 = vtanh.f32 %v4307_v53  ;;  %v4309_v59 = vadd.f32 %v4305_v61, %v4301_v31  ;;  %v4317_v12 = vsub.f32 1.0, %v12499_v49  ;;  %v4325_v20 = vmul.f32 %v12499_v49, %v14416_v1 }
 0x46e   :  { %12504 = vtanh.f32 %v4308_v17  ;;  %v4310_v24 = vadd.f32 %v4306_v35, %v4302_v50  ;;  %v4318_v8 = vsub.f32 1.0, %v12501_v27  ;;  %v4326_v43 = vmul.f32 %v12501_v27, %v14418_v26 }
 0x46f   :  { %12506 = vtanh.f32 %v4309_v59  ;;  %v10324_v62 = vmul.f32 -1.442695, %v4468_v48  ;;  %v10325_v53 = vmul.f32 -1.442695, %v4469_v2  ;;  %v10328_v31 = vmul.f32 -1.442695, %v4472_v16 }
 0x470   :  { %12508 = vtanh.f32 %v4310_v24  ;;  %v10329_v35 = vmul.f32 -1.442695, %v4473_v63  ;;  %v4462_v48 = vunpack.c.l.bf16 %v14338_v9  ;;  %v4463_v16 = vunpack.c.l.bf16 %v14342_v0 }
 0x471   :  { %12510 = vpow2.f32 %v10324_v62  ;;  %v4532_v63 = vunpack.c.l.bf16 %v14340_v38 }
 0x472   :  { %12512 = vpow2.f32 %v10325_v53 }
 0x473   :  { %12514 = vpow2.f32 %v10328_v31 }
 0x474   :  { %12516 = vpow2.f32 %v10329_v35 }
 0x477   :  { %v12503_v25 = vpop.eup %12502 }
 0x478   :  { %v12505_v22 = vpop.eup %12504  ;;  %v4319_v34 = vmul.f32 %v12503_v25, %v4315_v28  ;;  %v4466_v25 = vunpack.c.h.bf16 %v14338_v9 }
 0x479   :  { %v4320_v51 = vmul.f32 %v12505_v22, %v4316_v57  ;;  %v12507_v61 = vpop.eup %12506  ;;  %v4534_v57 = vunpack.c.h.bf16 %v14340_v38 }
 0x47a   :  { %v14528_v37 = vadd.f32 %v4323_v5, %v4319_v34  ;;  %v4321_v44 = vmul.f32 %v12507_v61, %v4317_v12  ;;  %v12509_v54 = vpop.eup %12508  ;;  %v4467_v12 = vunpack.c.h.bf16 %v14342_v0  ;;  %v4533_v61 = vunpack.c.l.bf16 %v14344_v42 }
 0x47b   :  { %v14531_v3 = vadd.f32 %v4324_v4, %v4320_v51  ;;  %v4322_v23 = vmul.f32 %v12509_v54, %v4318_v8  ;;  %v12511_v1 = vpop.eup %12510 }
 0x47c   :  { %v14534_v45 = vadd.f32 %v4325_v20, %v4321_v44  ;;  %v12513_v17 = vpop.eup %12512  ;;  %v4500_v24 = vadd.f32 1.0, %v12511_v1 }
 0x47d   :  { %v14536_v7 = vadd.f32 %v4326_v43, %v4322_v23  ;;  %v12515_v50 = vpop.eup %12514  ;;  %v4501_v21 = vadd.f32 1.0, %v12513_v17 }
 0x47e   :  { %v12517_v59 = vpop.eup %12516  ;;  %v4504_v26 = vadd.f32 1.0, %v12515_v50  ;;  %12518 = vrcp.f32 %v4500_v24 }
 0x47f   :  { %v4505_v32 = vadd.f32 1.0, %v12517_v59  ;;  %12520 = vrcp.f32 %v4501_v21  ;;  %v4535_v59 = vunpack.c.h.bf16 %v14344_v42 }
 0x480   :  { %12522 = vrcp.f32 %v4504_v26 }
 0x481   :  { %12524 = vrcp.f32 %v4505_v32 }
 0x488   :  { %v12519_v51 = vpop.eup %12518 }
 0x489   :  { %v12521_v23 = vpop.eup %12520 }
 0x48a   :  { %v12523_v35 = vpop.eup %12522 }
 0x48b   :  { %v12525_v50 = vpop.eup %12524 }
 0x4a6   :  { %v4408_v2 = vpop.f32.mrb[84].mxu0 }
 0x4a7   :  { %v4470_v49 = vadd.f32 %v4462_v48, %v4408_v2  ;;  %v4451_v27 = vpop.f32.mrb[84].mxu1  ;;  %v4410_v28 = vpop.f32.mrb[85].mxu0 }
 0x4a8   :  { %v4524_v22 = vadd.f32 %v4451_v27, %v14421_v56  ;;  %v4471_v5 = vadd.f32 %v4463_v16, %v4410_v28  ;;  %v4453_v34 = vpop.f32.mrb[85].mxu1  ;;  %v4412_v4 = vpop.f32.mrb[86].mxu0 }
 0x4a9   :  { %v10326_v20 = vmul.f32 -1.442695, %v4470_v49  ;;  %v4525_v8 = vadd.f32 %v4453_v34, %v14424_v29  ;;  %v4474_v44 = vadd.f32 %v4466_v25, %v4412_v4  ;;  %v4455_v54 = vpop.f32.mrb[86].mxu1  ;;  %v4414_v43 = vpop.f32.mrb[87].mxu0 }
 0x4aa   :  { %v4528_v9 = vmul.f32 %v12519_v51, %v4524_v22  ;;  %v10327_v62 = vmul.f32 -1.442695, %v4471_v5  ;;  %v4526_v38 = vadd.f32 %v4455_v54, %v14421_v56  ;;  %v4475_v53 = vadd.f32 %v4467_v12, %v4414_v43  ;;  %v4457_v31 = vpop.f32.mrb[87].mxu1 }
 0x4ab   :  { %12526 = vpow2.f32 %v10326_v20  ;;  %v4529_v1 = vmul.f32 %v12521_v23, %v4525_v8  ;;  %v10330_v0 = vmul.f32 -1.442695, %v4474_v44  ;;  %v4527_v17 = vadd.f32 %v4457_v31, %v14424_v29 }
 0x4ac   :  { %v4536_v24 = vadd.f32 %v4532_v63, %v4528_v9  ;;  %12528 = vpow2.f32 %v10327_v62  ;;  %v4530_v21 = vmul.f32 %v12523_v35, %v4526_v38  ;;  %v10331_v32 = vmul.f32 -1.442695, %v4475_v53 }
 0x4ad   :  { %v4537_v26 = vadd.f32 %v4533_v61, %v4529_v1  ;;  %12530 = vpow2.f32 %v10330_v0  ;;  %v4531_v48 = vmul.f32 %v12525_v50, %v4527_v17 }
 0x4ae   :  { %v4538_v2 = vadd.f32 %v4534_v57, %v4530_v21  ;;  %12532 = vpow2.f32 %v10331_v32  ;;  %v11729_v32 = vld [vmem:[#allocation16 + $0x42c] ss:$16 sps:$4 sm:$0xff]  }
 0x4af   :  { %v4539_v16 = vadd.f32 %v4535_v59, %v4531_v48  ;;  %12534 = vtanh.f32 %v4536_v24  ;;  %v11721_v24 = vld [vmem:[#allocation16 + $0x408] ss:$16 sps:$4 sm:$0xff]   ;;  %v11724_v48 = vld [vmem:[#allocation16 + $0x420] ss:$16 sps:$4 sm:$0xff]  }
 0x4b5   :  { %v12527_v49 = vpop.eup %12526 }
 0x4b6   :  { %v12529_v27 = vpop.eup %12528  ;;  %v4502_v28 = vadd.f32 1.0, %v12527_v49  ;;  %v11735_v49 = vld [vmem:[#allocation16 + $0x44c] ss:$16 sps:$4 sm:$0xff]  }
 0x4b7   :  { %v12531_v25 = vpop.eup %12530  ;;  %v4503_v22 = vadd.f32 1.0, %v12529_v27  ;;  %v11730_v27 = vld [vmem:[#allocation16 + $0x440] ss:$16 sps:$4 sm:$0xff]  }
 0x4b8   :  { %12536 = vrcp.f32 %v4502_v28  ;;  %v4506_v5 = vadd.f32 1.0, %v12531_v25  ;;  %v12533_v42 = vpop.eup %12532  ;;  %v11733_v28 = vld [vmem:[#allocation16 + $0x448] ss:$16 sps:$4 sm:$0xff]   ;;  %v11738_v25 = vld [vmem:[#allocation16 + $0x464] ss:$16 sps:$4 sm:$0xff]  }
 0x4b9   :  { %12538 = vrcp.f32 %v4503_v22  ;;  %v4507_v63 = vadd.f32 1.0, %v12533_v42  ;;  %v12535_v34 = vpop.eup %12534  ;;  %v11741_v22 = vld [vmem:[#allocation16 + $0x46c] ss:$16 sps:$4 sm:$0xff]   ;;  %v11739_v42 = vld [vmem:[#allocation16 + $0x468] ss:$16 sps:$4 sm:$0xff]  }
 0x4ba   :  { %12540 = vrcp.f32 %v4506_v5  ;;  %v11736_v5 = vld [vmem:[#allocation16 + $0x460] ss:$16 sps:$4 sm:$0xff]  }
 0x4bb   :  { %12542 = vtanh.f32 %v4537_v26  ;;  %v11726_v26 = vld [vmem:[#allocation16 + $0x424] ss:$16 sps:$4 sm:$0xff]  }
 0x4bc   :  { %12544 = vtanh.f32 %v4538_v2  ;;  %v11727_v2 = vld [vmem:[#allocation16 + $0x428] ss:$16 sps:$4 sm:$0xff]  }
 0x4bd   :  { %12546 = vrcp.f32 %v4507_v63  ;;  %v11744_v63 = vld [vmem:[#allocation16 + $0x484] ss:$16 sps:$4 sm:$0xff]  }
 0x4be   :  { %12548 = vtanh.f32 %v4539_v16  ;;  %v11732_v16 = vld [vmem:[#allocation16 + $0x444] ss:$16 sps:$4 sm:$0xff]  }
 0x4c2   :  { %v12537_v57 = vpop.eup %12536 }
 0x4c3   :  { %v12539_v4 = vpop.eup %12538  ;;  %v4544_v12 = vsub.f32 1.0, %v12537_v57  ;;  %v4552_v8 = vmul.f32 %v12537_v57, %v14438_v19  ;;  %v11742_v57 = vld [vmem:[#allocation16 + $0x480] ss:$16 sps:$4 sm:$0xff]  }
 0x4c4   :  { %v12541_v51 = vpop.eup %12540  ;;  %v4545_v61 = vsub.f32 1.0, %v12539_v4  ;;  %v4553_v23 = vmul.f32 %v12539_v4, %v14440_v33  ;;  %v11745_v4 = vld [vmem:[#allocation16 + $0x488] ss:$16 sps:$4 sm:$0xff]  }
 0x4c5   :  { %v12543_v20 = vpop.eup %12542  ;;  %v4546_v44 = vsub.f32 1.0, %v12541_v51  ;;  %v4548_v54 = vmul.f32 %v12535_v34, %v4544_v12  ;;  %v4554_v62 = vmul.f32 %v12541_v51, %v14442_v58  ;;  %v11718_v58 = vld [vmem:[#allocation16 + $0x400] ss:$16 sps:$4 sm:$0xff]   ;;  %v11747_v34 = vld [vmem:[#allocation16 + $0x48c] ss:$16 sps:$4 sm:$0xff]  }
 0x4c6   :  { %v12545_v43 = vpop.eup %12544  ;;  %v4549_v9 = vmul.f32 %v12543_v20, %v4545_v61  ;;  %v11750_v12 = vld [vmem:[#allocation16 + $0x4a4] ss:$16 sps:$4 sm:$0xff]   ;;  %v11753_v51 = vld [vmem:[#allocation16 + $0x4ac] ss:$16 sps:$4 sm:$0xff]   ;;  %v11748_v61 = vld [vmem:[#allocation16 + $0x4a0] ss:$16 sps:$4 sm:$0xff]  }
 0x4c7   :  { %v4550_v38 = vmul.f32 %v12545_v43, %v4546_v44  ;;  %v14553_v53 = vadd.f32 %v4552_v8, %v4548_v54  ;;  %v12547_v31 = vpop.eup %12546  ;;  %v11751_v20 = vld [vmem:[#allocation16 + $0x4a8] ss:$16 sps:$4 sm:$0xff]   ;;  %v11756_v8 = vld [vmem:[#allocation16 + $0x4c4] ss:$16 sps:$4 sm:$0xff]   ;;  %v11759_v44 = vld [vmem:[#allocation16 + $0x4cc] ss:$16 sps:$4 sm:$0xff]  }
 0x4c8   :  { %v14555_v35 = vadd.f32 %v4553_v23, %v4549_v9  ;;  %v4547_v1 = vsub.f32 1.0, %v12547_v31  ;;  %v12549_v17 = vpop.eup %12548  ;;  %v4555_v19 = vmul.f32 %v12547_v31, %v14444_v47  ;;  %v14576_v47 = vpack.c.bf16 %v14536_v7, %v14531_v3  ;;  %v11754_v54 = vld [vmem:[#allocation16 + $0x4c0] ss:$16 sps:$4 sm:$0xff]   ;;  %v11757_v43 = vld [vmem:[#allocation16 + $0x4c8] ss:$16 sps:$4 sm:$0xff]  }
 0x4c9   :  { %v14557_v0 = vadd.f32 %v4554_v62, %v4550_v38  ;;  %v11762_v23 = vld [vmem:[#allocation16 + $0x4e4] ss:$16 sps:$4 sm:$0xff]   ;;  %v11765_v9 = vld [vmem:[#allocation16 + $0x4ec] ss:$16 sps:$4 sm:$0xff]   ;;  %v11760_v62 = vld [vmem:[#allocation16 + $0x4e0] ss:$16 sps:$4 sm:$0xff]  }
 0x4ca   :  { %v4551_v50 = vmul.f32 %v12549_v17, %v4547_v1  ;;  %v11763_v38 = vld [vmem:[#allocation16 + $0x4e8] ss:$16 sps:$4 sm:$0xff]   ;;  %v11768_v31 = vld [vmem:[#allocation16 + $0x504] ss:$16 sps:$4 sm:$0xff]   ;;  %v11771_v1 = vld [vmem:[#allocation16 + $0x50c] ss:$16 sps:$4 sm:$0xff]  }
 0x4cb   :  { %v14568_v21 = vpack.c.bf16 %v14557_v0, %v14553_v53  ;;  %v11766_v17 = vld [vmem:[#allocation16 + $0x500] ss:$16 sps:$4 sm:$0xff]  }
 0x4cc   :  { %v14560_v59 = vadd.f32 %v4555_v19, %v4551_v50  ;;  %v11769_v19 = vld [vmem:[#allocation16 + $0x508] ss:$16 sps:$4 sm:$0xff]   ;;  %v11774_v50 = vld [vmem:[#allocation16 + $0x524] ss:$16 sps:$4 sm:$0xff]  }
 0x4ce   :  { %v14564_v33 = vpack.c.bf16 %v14560_v59, %v14555_v35 }
 0x4d0   :  { %5044 = vmatprep.mubr.bf16.mxu0 %v14564_v33  ;;  %5087 = vmatprep.mubr.bf16.mxu1 %v14564_v33 }
 0x4d1   :  { %5045 = vmatmul.mubr.bf16.vlgmr.msra.gmra.mrb[72].mxu0 %v14568_v21  ;;  %5088 = vmatmul.mubr.bf16.vlgmr.msra.gmra.mrb[72].mxu1 %v14568_v21 }
 0x4d2   :  { %5427 = vmatpush1.bf16.msra.mxu0 %v11718_v58  ;;  %5470 = vmatpush1.bf16.msra.mxu1 %v11721_v24  ;;  %v11777_v58 = vld [vmem:[#allocation16 + $0x52c] ss:$16 sps:$4 sm:$0xff]   ;;  %v11772_v24 = vld [vmem:[#allocation16 + $0x520] ss:$16 sps:$4 sm:$0xff]  }
 0x4d3   :  { %5458 = vmatprep.mubr.bf16.mxu0 %v14576_v47  ;;  %5501 = vmatprep.mubr.bf16.mxu1 %v14576_v47 }
 0x4d4   :  { %5428 = vmatprep.subr.bf16.mxu0 %v11726_v26  ;;  %5471 = vmatprep.subr.bf16.mxu1 %v11729_v32  ;;  %v11775_v26 = vld [vmem:[#allocation16 + $0x528] ss:$16 sps:$4 sm:$0xff]   ;;  %v11780_v32 = vld [vmem:[#allocation16 + $0x544] ss:$16 sps:$4 sm:$0xff]  }
 0x4d6   :  { %5429 = vmatpush1.bf16.msra.mxu0 %v11724_v48  ;;  %5472 = vmatpush1.bf16.msra.mxu1 %v11727_v2  ;;  %v11783_v48 = vld [vmem:[#allocation16 + $0x54c] ss:$16 sps:$4 sm:$0xff]   ;;  %v11778_v2 = vld [vmem:[#allocation16 + $0x540] ss:$16 sps:$4 sm:$0xff]  }
 0x4d7   :  { %5430 = vmatprep.subr.bf16.mxu0 %v11732_v16  ;;  %5473 = vmatprep.subr.bf16.mxu1 %v11735_v49  ;;  %v11781_v16 = vld [vmem:[#allocation16 + $0x548] ss:$16 sps:$4 sm:$0xff]   ;;  %v11786_v49 = vld [vmem:[#allocation16 + $0x564] ss:$16 sps:$4 sm:$0xff]  }
 0x4da   :  { %5431 = vmatpush1.bf16.msra.mxu0 %v11730_v27  ;;  %5474 = vmatpush1.bf16.msra.mxu1 %v11733_v28  ;;  %v11789_v27 = vld [vmem:[#allocation16 + $0x56c] ss:$16 sps:$4 sm:$0xff]   ;;  %v11784_v28 = vld [vmem:[#allocation16 + $0x560] ss:$16 sps:$4 sm:$0xff]  }
 0x4db   :  { %5432 = vmatprep.subr.bf16.mxu0 %v11738_v25  ;;  %5475 = vmatprep.subr.bf16.mxu1 %v11741_v22  ;;  %v11787_v25 = vld [vmem:[#allocation16 + $0x568] ss:$16 sps:$4 sm:$0xff]   ;;  %v11792_v22 = vld [vmem:[#allocation16 + $0x584] ss:$16 sps:$4 sm:$0xff]  }
 0x4de   :  { %5433 = vmatpush1.bf16.msra.mxu0 %v11736_v5  ;;  %5476 = vmatpush1.bf16.msra.mxu1 %v11739_v42  ;;  %v11795_v5 = vld [vmem:[#allocation16 + $0x58c] ss:$16 sps:$4 sm:$0xff]   ;;  %v11790_v42 = vld [vmem:[#allocation16 + $0x580] ss:$16 sps:$4 sm:$0xff]  }
 0x4df   :  { %5434 = vmatprep.subr.bf16.mxu0 %v11744_v63  ;;  %5477 = vmatprep.subr.bf16.mxu1 %v11747_v34  ;;  %v11793_v63 = vld [vmem:[#allocation16 + $0x588] ss:$16 sps:$4 sm:$0xff]   ;;  %v11798_v34 = vld [vmem:[#allocation16 + $0x5a4] ss:$16 sps:$4 sm:$0xff]  }
 0x4e2   :  { %5435 = vmatpush1.bf16.msra.mxu0 %v11742_v57  ;;  %5478 = vmatpush1.bf16.msra.mxu1 %v11745_v4  ;;  %v11801_v57 = vld [vmem:[#allocation16 + $0x5ac] ss:$16 sps:$4 sm:$0xff]   ;;  %v11796_v4 = vld [vmem:[#allocation16 + $0x5a0] ss:$16 sps:$4 sm:$0xff]  }
 0x4e3   :  { %5436 = vmatprep.subr.bf16.mxu0 %v11750_v12  ;;  %5479 = vmatprep.subr.bf16.mxu1 %v11753_v51  ;;  %v11799_v12 = vld [vmem:[#allocation16 + $0x5a8] ss:$16 sps:$4 sm:$0xff]   ;;  %v11804_v51 = vld [vmem:[#allocation16 + $0x5c4] ss:$16 sps:$4 sm:$0xff]  }
 0x4e6   :  { %5437 = vmatpush1.bf16.msra.mxu0 %v11748_v61  ;;  %5480 = vmatpush1.bf16.msra.mxu1 %v11751_v20  ;;  %v11807_v61 = vld [vmem:[#allocation16 + $0x5cc] ss:$16 sps:$4 sm:$0xff]   ;;  %v11802_v20 = vld [vmem:[#allocation16 + $0x5c0] ss:$16 sps:$4 sm:$0xff]  }
 0x4e7   :  { %5438 = vmatprep.subr.bf16.mxu0 %v11756_v8  ;;  %5481 = vmatprep.subr.bf16.mxu1 %v11759_v44  ;;  %v11805_v8 = vld [vmem:[#allocation16 + $0x5c8] ss:$16 sps:$4 sm:$0xff]   ;;  %v11810_v44 = vld [vmem:[#allocation16 + $0x5e4] ss:$16 sps:$4 sm:$0xff]  }
 0x4ea   :  { %5439 = vmatpush1.bf16.msra.mxu0 %v11754_v54  ;;  %5482 = vmatpush1.bf16.msra.mxu1 %v11757_v43  ;;  %v11813_v54 = vld [vmem:[#allocation16 + $0x5ec] ss:$16 sps:$4 sm:$0xff]   ;;  %v11808_v43 = vld [vmem:[#allocation16 + $0x5e0] ss:$16 sps:$4 sm:$0xff]  }
 0x4eb   :  { %5440 = vmatprep.subr.bf16.mxu0 %v11762_v23  ;;  %5483 = vmatprep.subr.bf16.mxu1 %v11765_v9  ;;  %v11811_v23 = vld [vmem:[#allocation16 + $0x5e8] ss:$16 sps:$4 sm:$0xff]   ;;  %v14582_v9 = vpack.c.bf16 %v14534_v45, %v14528_v37 }
 0x4ee   :  { %5441 = vmatpush1.bf16.msra.mxu0 %v11760_v62  ;;  %5484 = vmatpush1.bf16.msra.mxu1 %v11763_v38  ;;  %v12983_v62 = vld [vmem:[#allocation10 + $0x4] ss:$24 sps:$4 sm:$0xff]  }
 0x4ef   :  { %5442 = vmatprep.subr.bf16.mxu0 %v11768_v31  ;;  %5485 = vmatprep.subr.bf16.mxu1 %v11771_v1  ;;  %v12984_v38 = vld [vmem:[#allocation10 + $0xc] ss:$24 sps:$4 sm:$0xff]   ;;  %v12985_v31 = vld [vmem:[#allocation10] ss:$24 sps:$4 sm:$0xff]  }
 0x4f0   :  { %v12986_v1 = vld [vmem:[#allocation10 + $0x8] ss:$24 sps:$4 sm:$0xff]  }
 0x4f2   :  { %5443 = vmatpush1.bf16.msra.mxu0 %v11766_v17  ;;  %5486 = vmatpush1.bf16.msra.mxu1 %v11769_v19  ;;  %v12987_v17 = vld [vmem:[#allocation10 + $0x34] ss:$24 sps:$4 sm:$0xff]  }
 0x4f3   :  { %5444 = vmatprep.subr.bf16.mxu0 %v11774_v50  ;;  %5487 = vmatprep.subr.bf16.mxu1 %v11777_v58  ;;  %v12988_v19 = vld [vmem:[#allocation10 + $0x3c] ss:$24 sps:$4 sm:$0xff]   ;;  %v12989_v50 = vld [vmem:[#allocation10 + $0x30] ss:$24 sps:$4 sm:$0xff]  }
 0x4f4   :  { %v12990_v58 = vld [vmem:[#allocation10 + $0x38] ss:$24 sps:$4 sm:$0xff]  }
 0x4f6   :  { %5445 = vmatpush1.bf16.msra.mxu0 %v11772_v24  ;;  %5488 = vmatpush1.bf16.msra.mxu1 %v11775_v26  ;;  %v12991_v24 = vld [vmem:[#allocation10 + $0x64] ss:$24 sps:$4 sm:$0xff]  }
 0x4f7   :  { %5446 = vmatprep.subr.bf16.mxu0 %v11780_v32  ;;  %5489 = vmatprep.subr.bf16.mxu1 %v11783_v48  ;;  %v12992_v26 = vld [vmem:[#allocation10 + $0x6c] ss:$24 sps:$4 sm:$0xff]   ;;  %v12993_v32 = vld [vmem:[#allocation10 + $0x60] ss:$24 sps:$4 sm:$0xff]  }
 0x4f8   :  { %v12994_v48 = vld [vmem:[#allocation10 + $0x68] ss:$24 sps:$4 sm:$0xff]  }
 0x4fa   :  { %5447 = vmatpush1.bf16.msra.mxu0 %v11778_v2  ;;  %5490 = vmatpush1.bf16.msra.mxu1 %v11781_v16  ;;  %v12995_v2 = vld [vmem:[#allocation10 + $0x94] ss:$24 sps:$4 sm:$0xff]  }
 0x4fb   :  { %5448 = vmatprep.subr.bf16.mxu0 %v11786_v49  ;;  %5491 = vmatprep.subr.bf16.mxu1 %v11789_v27  ;;  %v12996_v16 = vld [vmem:[#allocation10 + $0x9c] ss:$24 sps:$4 sm:$0xff]   ;;  %v12997_v49 = vld [vmem:[#allocation10 + $0x90] ss:$24 sps:$4 sm:$0xff]  }
 0x4fc   :  { %v12998_v27 = vld [vmem:[#allocation10 + $0x98] ss:$24 sps:$4 sm:$0xff]  }
 0x4fe   :  { %5449 = vmatpush1.bf16.msra.mxu0 %v11784_v28  ;;  %5492 = vmatpush1.bf16.msra.mxu1 %v11787_v25  ;;  %v12999_v28 = vld [vmem:[#allocation10 + $0xc4] ss:$24 sps:$4 sm:$0xff]  }
 0x4ff   :  { %5450 = vmatprep.subr.bf16.mxu0 %v11792_v22  ;;  %5493 = vmatprep.subr.bf16.mxu1 %v11795_v5  ;;  %v13000_v25 = vld [vmem:[#allocation10 + $0xcc] ss:$24 sps:$4 sm:$0xff]   ;;  %v13001_v22 = vld [vmem:[#allocation10 + $0xc0] ss:$24 sps:$4 sm:$0xff]  }
 0x500   :  { %v13002_v5 = vld [vmem:[#allocation10 + $0xc8] ss:$24 sps:$4 sm:$0xff]  }
 0x502   :  { %5451 = vmatpush1.bf16.msra.mxu0 %v11790_v42  ;;  %5494 = vmatpush1.bf16.msra.mxu1 %v11793_v63  ;;  %v13003_v42 = vld [vmem:[#allocation10 + $0xf4] ss:$24 sps:$4 sm:$0xff]  }
 0x503   :  { %5452 = vmatprep.subr.bf16.mxu0 %v11798_v34  ;;  %5495 = vmatprep.subr.bf16.mxu1 %v11801_v57  ;;  %v13004_v63 = vld [vmem:[#allocation10 + $0xfc] ss:$24 sps:$4 sm:$0xff]   ;;  %v13005_v34 = vld [vmem:[#allocation10 + $0xf0] ss:$24 sps:$4 sm:$0xff]  }
 0x504   :  { %v13006_v57 = vld [vmem:[#allocation10 + $0xf8] ss:$24 sps:$4 sm:$0xff]  }
 0x506   :  { %5453 = vmatpush1.bf16.msra.mxu0 %v11796_v4  ;;  %5496 = vmatpush1.bf16.msra.mxu1 %v11799_v12  ;;  %v13007_v4 = vld [vmem:[#allocation10 + $0x124] ss:$24 sps:$4 sm:$0xff]  }
 0x507   :  { %5454 = vmatprep.subr.bf16.mxu0 %v11804_v51  ;;  %5497 = vmatprep.subr.bf16.mxu1 %v11807_v61  ;;  %v13008_v12 = vld [vmem:[#allocation10 + $0x12c] ss:$24 sps:$4 sm:$0xff]   ;;  %v13009_v51 = vld [vmem:[#allocation10 + $0x120] ss:$24 sps:$4 sm:$0xff]  }
 0x508   :  { %v13010_v61 = vld [vmem:[#allocation10 + $0x128] ss:$24 sps:$4 sm:$0xff]  }
 0x50a   :  { %5455 = vmatpush1.bf16.msra.mxu0 %v11802_v20  ;;  %5498 = vmatpush1.bf16.msra.mxu1 %v11805_v8  ;;  %v13011_v20 = vld [vmem:[#allocation10 + $0x154] ss:$24 sps:$4 sm:$0xff]  }
 0x50b   :  { %5456 = vmatprep.subr.bf16.mxu0 %v11810_v44  ;;  %5499 = vmatprep.subr.bf16.mxu1 %v11813_v54  ;;  %v13012_v8 = vld [vmem:[#allocation10 + $0x15c] ss:$24 sps:$4 sm:$0xff]   ;;  %v13013_v44 = vld [vmem:[#allocation10 + $0x150] ss:$24 sps:$4 sm:$0xff]  }
 0x50c   :  { %v13014_v54 = vld [vmem:[#allocation10 + $0x158] ss:$24 sps:$4 sm:$0xff]  }
 0x50e   :  { %5457 = vmatpush1.bf16.msra.mxu0 %v11808_v43  ;;  %5500 = vmatpush1.bf16.msra.mxu1 %v11811_v23  ;;  %v13015_v43 = vld [vmem:[#allocation10 + $0x184] ss:$24 sps:$4 sm:$0xff]  }
 0x50f   :  { %5540 = vmatprep.subr.bf16.mxu0 %v12983_v62  ;;  %5583 = vmatprep.subr.bf16.mxu1 %v12984_v38  ;;  %v13016_v23 = vld [vmem:[#allocation10 + $0x18c] ss:$24 sps:$4 sm:$0xff]   ;;  %v13017_v62 = vld [vmem:[#allocation10 + $0x180] ss:$24 sps:$4 sm:$0xff]  }
 0x510   :  { %v13018_v38 = vld [vmem:[#allocation10 + $0x188] ss:$24 sps:$4 sm:$0xff]  }
 0x511   :  { %5459 = vmatmul.mubr.bf16.vlgmr.msra.gmra.mrb[72].mxu0 %v14582_v9  ;;  %5502 = vmatmul.mubr.bf16.vlgmr.msra.gmra.mrb[72].mxu1 %v14582_v9 }
 0x512   :  { %5541 = vmatpush1.bf16.msra.mxu0 %v12985_v31  ;;  %5572 = vmatprep.mubr.bf16.mxu0 %v14576_v47  ;;  %v13019_v31 = vld [vmem:[#allocation10 + $0x1b4] ss:$24 sps:$4 sm:$0xff]  }
 0x513   :  { %5584 = vmatpush1.bf16.msra.mxu1 %v12986_v1  ;;  %5615 = vmatprep.mubr.bf16.mxu1 %v14576_v47  ;;  %v13020_v1 = vld [vmem:[#allocation10 + $0x1bc] ss:$24 sps:$4 sm:$0xff]  }
 0x514   :  { %5542 = vmatprep.subr.bf16.mxu0 %v12987_v17  ;;  %5585 = vmatprep.subr.bf16.mxu1 %v12988_v19  ;;  %v13021_v17 = vld [vmem:[#allocation10 + $0x1b0] ss:$24 sps:$4 sm:$0xff]  }
 0x515   :  { %v13022_v19 = vld [vmem:[#allocation10 + $0x1b8] ss:$24 sps:$4 sm:$0xff]  }
 0x516   :  { %5543 = vmatpush1.bf16.msra.mxu0 %v12989_v50  ;;  %v13023_v50 = vld [vmem:[#allocation10 + $0x1e4] ss:$24 sps:$4 sm:$0xff]  }
 0x517   :  { %5586 = vmatpush1.bf16.msra.mxu1 %v12990_v58  ;;  %5544 = vmatprep.subr.bf16.mxu0 %v12991_v24  ;;  %v13024_v58 = vld [vmem:[#allocation10 + $0x1ec] ss:$24 sps:$4 sm:$0xff]   ;;  %v13025_v24 = vld [vmem:[#allocation10 + $0x1e0] ss:$24 sps:$4 sm:$0xff]  }
 0x518   :  { %5587 = vmatprep.subr.bf16.mxu1 %v12992_v26  ;;  %v13026_v26 = vld [vmem:[#allocation10 + $0x1e8] ss:$24 sps:$4 sm:$0xff]  }
 0x51a   :  { %5545 = vmatpush1.bf16.msra.mxu0 %v12993_v32  ;;  %v13027_v32 = vld [vmem:[#allocation10 + $0x214] ss:$24 sps:$4 sm:$0xff]  }
 0x51b   :  { %5588 = vmatpush1.bf16.msra.mxu1 %v12994_v48  ;;  %5546 = vmatprep.subr.bf16.mxu0 %v12995_v2  ;;  %v13028_v48 = vld [vmem:[#allocation10 + $0x21c] ss:$24 sps:$4 sm:$0xff]   ;;  %v13029_v2 = vld [vmem:[#allocation10 + $0x210] ss:$24 sps:$4 sm:$0xff]  }
 0x51c   :  { %5589 = vmatprep.subr.bf16.mxu1 %v12996_v16  ;;  %v13030_v16 = vld [vmem:[#allocation10 + $0x218] ss:$24 sps:$4 sm:$0xff]  }
 0x51e   :  { %5547 = vmatpush1.bf16.msra.mxu0 %v12997_v49  ;;  %v13031_v49 = vld [vmem:[#allocation10 + $0x244] ss:$24 sps:$4 sm:$0xff]  }
 0x51f   :  { %5590 = vmatpush1.bf16.msra.mxu1 %v12998_v27  ;;  %5548 = vmatprep.subr.bf16.mxu0 %v12999_v28  ;;  %v13032_v27 = vld [vmem:[#allocation10 + $0x24c] ss:$24 sps:$4 sm:$0xff]   ;;  %v13033_v28 = vld [vmem:[#allocation10 + $0x240] ss:$24 sps:$4 sm:$0xff]  }
 0x520   :  { %5591 = vmatprep.subr.bf16.mxu1 %v13000_v25  ;;  %v13034_v25 = vld [vmem:[#allocation10 + $0x248] ss:$24 sps:$4 sm:$0xff]  }
 0x522   :  { %5549 = vmatpush1.bf16.msra.mxu0 %v13001_v22  ;;  %v13035_v22 = vld [vmem:[#allocation10 + $0x274] ss:$24 sps:$4 sm:$0xff]  }
 0x523   :  { %5592 = vmatpush1.bf16.msra.mxu1 %v13002_v5  ;;  %5550 = vmatprep.subr.bf16.mxu0 %v13003_v42  ;;  %v13036_v5 = vld [vmem:[#allocation10 + $0x27c] ss:$24 sps:$4 sm:$0xff]   ;;  %v13037_v42 = vld [vmem:[#allocation10 + $0x270] ss:$24 sps:$4 sm:$0xff]  }
 0x524   :  { %5593 = vmatprep.subr.bf16.mxu1 %v13004_v63  ;;  %v13038_v63 = vld [vmem:[#allocation10 + $0x278] ss:$24 sps:$4 sm:$0xff]  }
 0x526   :  { %5551 = vmatpush1.bf16.msra.mxu0 %v13005_v34  ;;  %v13039_v34 = vld [vmem:[#allocation10 + $0x2a4] ss:$24 sps:$4 sm:$0xff]  }
 0x527   :  { %5594 = vmatpush1.bf16.msra.mxu1 %v13006_v57  ;;  %5552 = vmatprep.subr.bf16.mxu0 %v13007_v4  ;;  %v13040_v57 = vld [vmem:[#allocation10 + $0x2ac] ss:$24 sps:$4 sm:$0xff]   ;;  %v13041_v4 = vld [vmem:[#allocation10 + $0x2a0] ss:$24 sps:$4 sm:$0xff]  }
 0x528   :  { %5595 = vmatprep.subr.bf16.mxu1 %v13008_v12  ;;  %v13042_v12 = vld [vmem:[#allocation10 + $0x2a8] ss:$24 sps:$4 sm:$0xff]  }
 0x52a   :  { %5553 = vmatpush1.bf16.msra.mxu0 %v13009_v51  ;;  %v13043_v51 = vld [vmem:[#allocation10 + $0x2d4] ss:$24 sps:$4 sm:$0xff]  }
 0x52b   :  { %5596 = vmatpush1.bf16.msra.mxu1 %v13010_v61  ;;  %5554 = vmatprep.subr.bf16.mxu0 %v13011_v20  ;;  %v13044_v61 = vld [vmem:[#allocation10 + $0x2dc] ss:$24 sps:$4 sm:$0xff]   ;;  %v13045_v20 = vld [vmem:[#allocation10 + $0x2d0] ss:$24 sps:$4 sm:$0xff]  }
 0x52c   :  { %5597 = vmatprep.subr.bf16.mxu1 %v13012_v8  ;;  %v13046_v8 = vld [vmem:[#allocation10 + $0x2d8] ss:$24 sps:$4 sm:$0xff]  }
 0x52e   :  { %5555 = vmatpush1.bf16.msra.mxu0 %v13013_v44  ;;  %v13047_v44 = vld [vmem:[#allocation10 + $0x14] ss:$24 sps:$4 sm:$0xff]  }
 0x52f   :  { %5598 = vmatpush1.bf16.msra.mxu1 %v13014_v54  ;;  %5556 = vmatprep.subr.bf16.mxu0 %v13015_v43  ;;  %v13048_v54 = vld [vmem:[#allocation12 + $0x4] ss:$24 sps:$4 sm:$0xff]   ;;  %v13049_v43 = vld [vmem:[#allocation10 + $0x10] ss:$24 sps:$4 sm:$0xff]  }
 0x530   :  { %5599 = vmatprep.subr.bf16.mxu1 %v13016_v23  ;;  %v13050_v23 = vld [vmem:[#allocation12] ss:$24 sps:$4 sm:$0xff]  }
 0x532   :  { %5557 = vmatpush1.bf16.msra.mxu0 %v13017_v62  ;;  %v13051_v62 = vld [vmem:[#allocation10 + $0x44] ss:$24 sps:$4 sm:$0xff]  }
 0x533   :  { %5600 = vmatpush1.bf16.msra.mxu1 %v13018_v38  ;;  %5558 = vmatprep.subr.bf16.mxu0 %v13019_v31  ;;  %v13052_v38 = vld [vmem:[#allocation12 + $0x34] ss:$24 sps:$4 sm:$0xff]   ;;  %v13053_v31 = vld [vmem:[#allocation10 + $0x40] ss:$24 sps:$4 sm:$0xff]  }
 0x534   :  { %5601 = vmatprep.subr.bf16.mxu1 %v13020_v1  ;;  %v13054_v1 = vld [vmem:[#allocation12 + $0x30] ss:$24 sps:$4 sm:$0xff]  }
 0x536   :  { %5559 = vmatpush1.bf16.msra.mxu0 %v13021_v17  ;;  %v13055_v17 = vld [vmem:[#allocation10 + $0x74] ss:$24 sps:$4 sm:$0xff]  }
 0x537   :  { %5602 = vmatpush1.bf16.msra.mxu1 %v13022_v19  ;;  %5560 = vmatprep.subr.bf16.mxu0 %v13023_v50  ;;  %v13056_v19 = vld [vmem:[#allocation12 + $0x64] ss:$24 sps:$4 sm:$0xff]   ;;  %v13057_v50 = vld [vmem:[#allocation10 + $0x70] ss:$24 sps:$4 sm:$0xff]  }
 0x538   :  { %5603 = vmatprep.subr.bf16.mxu1 %v13024_v58  ;;  %v13058_v58 = vld [vmem:[#allocation12 + $0x60] ss:$24 sps:$4 sm:$0xff]  }
 0x53a   :  { %5561 = vmatpush1.bf16.msra.mxu0 %v13025_v24  ;;  %v13060_v24 = vld [vmem:[#allocation12 + $0x94] ss:$24 sps:$4 sm:$0xff]  }
 0x53b   :  { %5604 = vmatpush1.bf16.msra.mxu1 %v13026_v26  ;;  %5562 = vmatprep.subr.bf16.mxu0 %v13027_v32  ;;  %v13061_v26 = vld [vmem:[#allocation10 + $0xa0] ss:$24 sps:$4 sm:$0xff]   ;;  %v13062_v32 = vld [vmem:[#allocation12 + $0x90] ss:$24 sps:$4 sm:$0xff]  }
 0x53c   :  { %5605 = vmatprep.subr.bf16.mxu1 %v13028_v48  ;;  %v13063_v48 = vld [vmem:[#allocation10 + $0xd4] ss:$24 sps:$4 sm:$0xff]  }
 0x53e   :  { %5563 = vmatpush1.bf16.msra.mxu0 %v13029_v2  ;;  %v13064_v2 = vld [vmem:[#allocation12 + $0xc4] ss:$24 sps:$4 sm:$0xff]  }
 0x53f   :  { %5606 = vmatpush1.bf16.msra.mxu1 %v13030_v16  ;;  %5564 = vmatprep.subr.bf16.mxu0 %v13031_v49  ;;  %v13065_v16 = vld [vmem:[#allocation10 + $0xd0] ss:$24 sps:$4 sm:$0xff]   ;;  %v13066_v49 = vld [vmem:[#allocation12 + $0xc0] ss:$24 sps:$4 sm:$0xff]  }
 0x540   :  { %5607 = vmatprep.subr.bf16.mxu1 %v13032_v27  ;;  %v13067_v27 = vld [vmem:[#allocation10 + $0x104] ss:$24 sps:$4 sm:$0xff]  }
 0x542   :  { %5565 = vmatpush1.bf16.msra.mxu0 %v13033_v28  ;;  %v13068_v28 = vld [vmem:[#allocation12 + $0xf4] ss:$24 sps:$4 sm:$0xff]  }
 0x543   :  { %5608 = vmatpush1.bf16.msra.mxu1 %v13034_v25  ;;  %5566 = vmatprep.subr.bf16.mxu0 %v13035_v22  ;;  %v13069_v25 = vld [vmem:[#allocation10 + $0x100] ss:$24 sps:$4 sm:$0xff]   ;;  %v13070_v22 = vld [vmem:[#allocation12 + $0xf0] ss:$24 sps:$4 sm:$0xff]  }
 0x544   :  { %5609 = vmatprep.subr.bf16.mxu1 %v13036_v5  ;;  %v13071_v5 = vld [vmem:[#allocation10 + $0x134] ss:$24 sps:$4 sm:$0xff]  }
 0x546   :  { %5567 = vmatpush1.bf16.msra.mxu0 %v13037_v42  ;;  %v13072_v42 = vld [vmem:[#allocation12 + $0x124] ss:$24 sps:$4 sm:$0xff]  }
 0x547   :  { %5610 = vmatpush1.bf16.msra.mxu1 %v13038_v63  ;;  %5568 = vmatprep.subr.bf16.mxu0 %v13039_v34  ;;  %v13073_v63 = vld [vmem:[#allocation10 + $0x130] ss:$24 sps:$4 sm:$0xff]   ;;  %v13074_v34 = vld [vmem:[#allocation12 + $0x120] ss:$24 sps:$4 sm:$0xff]  }
 0x548   :  { %5611 = vmatprep.subr.bf16.mxu1 %v13040_v57  ;;  %v13075_v57 = vld [vmem:[#allocation10 + $0x164] ss:$24 sps:$4 sm:$0xff]  }
 0x54a   :  { %5569 = vmatpush1.bf16.msra.mxu0 %v13041_v4  ;;  %v13076_v4 = vld [vmem:[#allocation12 + $0x154] ss:$24 sps:$4 sm:$0xff]  }
 0x54b   :  { %5612 = vmatpush1.bf16.msra.mxu1 %v13042_v12  ;;  %5570 = vmatprep.subr.bf16.mxu0 %v13043_v51  ;;  %v13077_v12 = vld [vmem:[#allocation10 + $0x160] ss:$24 sps:$4 sm:$0xff]   ;;  %v13078_v51 = vld [vmem:[#allocation12 + $0x150] ss:$24 sps:$4 sm:$0xff]  }
 0x54c   :  { %5613 = vmatprep.subr.bf16.mxu1 %v13044_v61  ;;  %v13079_v61 = vld [vmem:[#allocation10 + $0x194] ss:$24 sps:$4 sm:$0xff]  }
 0x54e   :  { %5571 = vmatpush1.bf16.msra.mxu0 %v13045_v20  ;;  %v13080_v20 = vld [vmem:[#allocation12 + $0x184] ss:$24 sps:$4 sm:$0xff]  }
 0x54f   :  { %5614 = vmatpush1.bf16.msra.mxu1 %v13046_v8  ;;  %5626 = vmatprep.subr.bf16.mxu0 %v13047_v44  ;;  %v13081_v8 = vld [vmem:[#allocation10 + $0x190] ss:$24 sps:$4 sm:$0xff]   ;;  %v13082_v44 = vld [vmem:[#allocation12 + $0x180] ss:$24 sps:$4 sm:$0xff]  }
 0x550   :  { %5769 = vmatprep.subr.bf16.mxu1 %v13048_v54  ;;  %v13083_v54 = vld [vmem:[#allocation10 + $0x1c4] ss:$24 sps:$4 sm:$0xff]  }
 0x551   :  { %5573 = vmatmul.mubr.bf16.vlgmr.msra.gmra.mrb[88].mxu0 %v14582_v9 }
 0x552   :  { %5616 = vmatmul.mubr.bf16.vlgmr.msra.gmra.mrb[88].mxu1 %v14582_v9  ;;  %5627 = vmatpush1.bf16.msra.mxu0 %v13049_v43  ;;  %v13084_v43 = vld [vmem:[#allocation12 + $0x1b4] ss:$24 sps:$4 sm:$0xff]  }
 0x553   :  { %5658 = vmatprep.mubr.bf16.mxu0 %v14576_v47  ;;  %5770 = vmatpush1.bf16.msra.mxu1 %v13050_v23  ;;  %v13059_v47 = vld [vmem:[#allocation10 + $0xa4] ss:$24 sps:$4 sm:$0xff]   ;;  %v13085_v23 = vld [vmem:[#allocation10 + $0x1c0] ss:$24 sps:$4 sm:$0xff]  }
 0x554   :  { %5801 = vmatprep.mubr.bf16.mxu1 %v14564_v33  ;;  %5628 = vmatprep.subr.bf16.mxu0 %v13051_v62  ;;  %v13086_v62 = vld [vmem:[#allocation12 + $0x1b0] ss:$24 sps:$4 sm:$0xff]  }
 0x555   :  { %5771 = vmatprep.subr.bf16.mxu1 %v13052_v38  ;;  %v13087_v38 = vld [vmem:[#allocation10 + $0x1f4] ss:$24 sps:$4 sm:$0xff]  }
 0x556   :  { %5629 = vmatpush1.bf16.msra.mxu0 %v13053_v31  ;;  %v13088_v31 = vld [vmem:[#allocation12 + $0x1e4] ss:$24 sps:$4 sm:$0xff]  }
 0x557   :  { %5772 = vmatpush1.bf16.msra.mxu1 %v13054_v1  ;;  %5630 = vmatprep.subr.bf16.mxu0 %v13055_v17  ;;  %v13089_v1 = vld [vmem:[#allocation10 + $0x1f0] ss:$24 sps:$4 sm:$0xff]   ;;  %v13090_v17 = vld [vmem:[#allocation12 + $0x1e0] ss:$24 sps:$4 sm:$0xff]  }
 0x558   :  { %5773 = vmatprep.subr.bf16.mxu1 %v13056_v19  ;;  %v13091_v19 = vld [vmem:[#allocation10 + $0x224] ss:$24 sps:$4 sm:$0xff]  }
 0x55a   :  { %5631 = vmatpush1.bf16.msra.mxu0 %v13057_v50  ;;  %v13092_v50 = vld [vmem:[#allocation12 + $0x214] ss:$24 sps:$4 sm:$0xff]  }
 0x55b   :  { %5774 = vmatpush1.bf16.msra.mxu1 %v13058_v58  ;;  %5632 = vmatprep.subr.bf16.mxu0 %v13059_v47  ;;  %v13093_v58 = vld [vmem:[#allocation10 + $0x220] ss:$24 sps:$4 sm:$0xff]   ;;  %v13094_v47 = vld [vmem:[#allocation12 + $0x210] ss:$24 sps:$4 sm:$0xff]  }
 0x55c   :  { %5775 = vmatprep.subr.bf16.mxu1 %v13060_v24  ;;  %v13095_v24 = vld [vmem:[#allocation10 + $0x254] ss:$24 sps:$4 sm:$0xff]  }
 0x55e   :  { %5633 = vmatpush1.bf16.msra.mxu0 %v13061_v26  ;;  %v13096_v26 = vld [vmem:[#allocation12 + $0x244] ss:$24 sps:$4 sm:$0xff]  }
 0x55f   :  { %5776 = vmatpush1.bf16.msra.mxu1 %v13062_v32  ;;  %5634 = vmatprep.subr.bf16.mxu0 %v13063_v48  ;;  %v13097_v32 = vld [vmem:[#allocation10 + $0x250] ss:$24 sps:$4 sm:$0xff]   ;;  %v13098_v48 = vld [vmem:[#allocation12 + $0x240] ss:$24 sps:$4 sm:$0xff]  }
 0x560   :  { %5777 = vmatprep.subr.bf16.mxu1 %v13064_v2  ;;  %v13099_v2 = vld [vmem:[#allocation10 + $0x284] ss:$24 sps:$4 sm:$0xff]  }
 0x562   :  { %5635 = vmatpush1.bf16.msra.mxu0 %v13065_v16  ;;  %v13100_v16 = vld [vmem:[#allocation12 + $0x274] ss:$24 sps:$4 sm:$0xff]  }
 0x563   :  { %5778 = vmatpush1.bf16.msra.mxu1 %v13066_v49  ;;  %5636 = vmatprep.subr.bf16.mxu0 %v13067_v27  ;;  %v13101_v49 = vld [vmem:[#allocation10 + $0x280] ss:$24 sps:$4 sm:$0xff]   ;;  %v13102_v27 = vld [vmem:[#allocation12 + $0x270] ss:$24 sps:$4 sm:$0xff]  }
 0x564   :  { %5779 = vmatprep.subr.bf16.mxu1 %v13068_v28  ;;  %v13103_v28 = vld [vmem:[#allocation10 + $0x2b4] ss:$24 sps:$4 sm:$0xff]  }
 0x566   :  { %5637 = vmatpush1.bf16.msra.mxu0 %v13069_v25  ;;  %v13104_v25 = vld [vmem:[#allocation12 + $0x2a4] ss:$24 sps:$4 sm:$0xff]  }
 0x567   :  { %5780 = vmatpush1.bf16.msra.mxu1 %v13070_v22  ;;  %5638 = vmatprep.subr.bf16.mxu0 %v13071_v5  ;;  %v13105_v22 = vld [vmem:[#allocation10 + $0x2b0] ss:$24 sps:$4 sm:$0xff]   ;;  %v13106_v5 = vld [vmem:[#allocation12 + $0x2a0] ss:$24 sps:$4 sm:$0xff]  }
 0x568   :  { %5781 = vmatprep.subr.bf16.mxu1 %v13072_v42  ;;  %v13107_v42 = vld [vmem:[#allocation10 + $0x2e4] ss:$24 sps:$4 sm:$0xff]  }
 0x56a   :  { %5639 = vmatpush1.bf16.msra.mxu0 %v13073_v63  ;;  %v13108_v63 = vld [vmem:[#allocation12 + $0x2d4] ss:$24 sps:$4 sm:$0xff]  }
 0x56b   :  { %5782 = vmatpush1.bf16.msra.mxu1 %v13074_v34  ;;  %5640 = vmatprep.subr.bf16.mxu0 %v13075_v57  ;;  %v13109_v34 = vld [vmem:[#allocation10 + $0x2e0] ss:$24 sps:$4 sm:$0xff]   ;;  %v13110_v57 = vld [vmem:[#allocation12 + $0x2d0] ss:$24 sps:$4 sm:$0xff]  }
 0x56c   :  { %5783 = vmatprep.subr.bf16.mxu1 %v13076_v4  ;;  %v13111_v4 = vld [vmem:[#allocation12 + $0xc] ss:$24 sps:$4 sm:$0xff]  }
 0x56e   :  { %5641 = vmatpush1.bf16.msra.mxu0 %v13077_v12  ;;  %v13112_v12 = vld [vmem:[#allocation12 + $0x14] ss:$24 sps:$4 sm:$0xff]  }
 0x56f   :  { %5784 = vmatpush1.bf16.msra.mxu1 %v13078_v51  ;;  %5642 = vmatprep.subr.bf16.mxu0 %v13079_v61  ;;  %v13113_v51 = vld [vmem:[#allocation12 + $0x8] ss:$24 sps:$4 sm:$0xff]  }
 0x570   :  { %5785 = vmatprep.subr.bf16.mxu1 %v13080_v20  ;;  %v13114_v61 = vld [vmem:[#allocation12 + $0x10] ss:$24 sps:$4 sm:$0xff]   ;;  %v13115_v20 = vld [vmem:[#allocation12 + $0x3c] ss:$24 sps:$4 sm:$0xff]  }
 0x572   :  { %5643 = vmatpush1.bf16.msra.mxu0 %v13081_v8  ;;  %v13116_v8 = vld [vmem:[#allocation12 + $0x44] ss:$24 sps:$4 sm:$0xff]  }
 0x573   :  { %5786 = vmatpush1.bf16.msra.mxu1 %v13082_v44  ;;  %5644 = vmatprep.subr.bf16.mxu0 %v13083_v54  ;;  %v13117_v44 = vld [vmem:[#allocation12 + $0x38] ss:$24 sps:$4 sm:$0xff]  }
 0x574   :  { %5787 = vmatprep.subr.bf16.mxu1 %v13084_v43  ;;  %v13118_v54 = vld [vmem:[#allocation12 + $0x40] ss:$24 sps:$4 sm:$0xff]   ;;  %v13119_v43 = vld [vmem:[#allocation12 + $0x6c] ss:$24 sps:$4 sm:$0xff]  }
 0x576   :  { %5645 = vmatpush1.bf16.msra.mxu0 %v13085_v23  ;;  %v13121_v23 = vld [vmem:[#allocation12 + $0x68] ss:$24 sps:$4 sm:$0xff]  }
 0x577   :  { %5788 = vmatpush1.bf16.msra.mxu1 %v13086_v62  ;;  %5646 = vmatprep.subr.bf16.mxu0 %v13087_v38  ;;  %v13122_v62 = vld [vmem:[#allocation12 + $0x70] ss:$24 sps:$4 sm:$0xff]   ;;  %v13123_v38 = vld [vmem:[#allocation12 + $0x9c] ss:$24 sps:$4 sm:$0xff]  }
 0x578   :  { %5789 = vmatprep.subr.bf16.mxu1 %v13088_v31  ;;  %v13124_v31 = vld [vmem:[#allocation12 + $0xa4] ss:$24 sps:$4 sm:$0xff]  }
 0x57a   :  { %5647 = vmatpush1.bf16.msra.mxu0 %v13089_v1  ;;  %v13126_v1 = vld [vmem:[#allocation12 + $0xa0] ss:$24 sps:$4 sm:$0xff]  }
 0x57b   :  { %5790 = vmatpush1.bf16.msra.mxu1 %v13090_v17  ;;  %5648 = vmatprep.subr.bf16.mxu0 %v13091_v19  ;;  %v13127_v17 = vld [vmem:[#allocation12 + $0xcc] ss:$24 sps:$4 sm:$0xff]  }
 0x57c   :  { %5791 = vmatprep.subr.bf16.mxu1 %v13092_v50  ;;  %v13128_v19 = vld [vmem:[#allocation12 + $0xd4] ss:$24 sps:$4 sm:$0xff]   ;;  %v13129_v50 = vld [vmem:[#allocation12 + $0xc8] ss:$24 sps:$4 sm:$0xff]  }
 0x57e   :  { %5649 = vmatpush1.bf16.msra.mxu0 %v13093_v58  ;;  %v13130_v58 = vld [vmem:[#allocation12 + $0xd0] ss:$24 sps:$4 sm:$0xff]  }
 0x57f   :  { %5792 = vmatpush1.bf16.msra.mxu1 %v13094_v47  ;;  %5650 = vmatprep.subr.bf16.mxu0 %v13095_v24  ;;  %v13131_v47 = vld [vmem:[#allocation12 + $0xfc] ss:$24 sps:$4 sm:$0xff]  }
 0x580   :  { %5793 = vmatprep.subr.bf16.mxu1 %v13096_v26  ;;  %v13132_v24 = vld [vmem:[#allocation12 + $0x104] ss:$24 sps:$4 sm:$0xff]   ;;  %v13133_v26 = vld [vmem:[#allocation12 + $0xf8] ss:$24 sps:$4 sm:$0xff]  }
 0x582   :  { %5651 = vmatpush1.bf16.msra.mxu0 %v13097_v32  ;;  %v13134_v32 = vld [vmem:[#allocation12 + $0x100] ss:$24 sps:$4 sm:$0xff]  }
 0x583   :  { %5794 = vmatpush1.bf16.msra.mxu1 %v13098_v48  ;;  %5652 = vmatprep.subr.bf16.mxu0 %v13099_v2  ;;  %v13135_v48 = vld [vmem:[#allocation12 + $0x12c] ss:$24 sps:$4 sm:$0xff]  }
 0x584   :  { %5795 = vmatprep.subr.bf16.mxu1 %v13100_v16  ;;  %v13136_v2 = vld [vmem:[#allocation12 + $0x134] ss:$24 sps:$4 sm:$0xff]   ;;  %v13137_v16 = vld [vmem:[#allocation12 + $0x128] ss:$24 sps:$4 sm:$0xff]  }
 0x586   :  { %5653 = vmatpush1.bf16.msra.mxu0 %v13101_v49  ;;  %v13138_v49 = vld [vmem:[#allocation12 + $0x130] ss:$24 sps:$4 sm:$0xff]  }
 0x587   :  { %5796 = vmatpush1.bf16.msra.mxu1 %v13102_v27  ;;  %5654 = vmatprep.subr.bf16.mxu0 %v13103_v28  ;;  %v13139_v27 = vld [vmem:[#allocation12 + $0x15c] ss:$24 sps:$4 sm:$0xff]  }
 0x588   :  { %5797 = vmatprep.subr.bf16.mxu1 %v13104_v25  ;;  %v13140_v28 = vld [vmem:[#allocation12 + $0x164] ss:$24 sps:$4 sm:$0xff]   ;;  %v13141_v25 = vld [vmem:[#allocation12 + $0x158] ss:$24 sps:$4 sm:$0xff]  }
 0x58a   :  { %5655 = vmatpush1.bf16.msra.mxu0 %v13105_v22  ;;  %v13142_v22 = vld [vmem:[#allocation12 + $0x160] ss:$24 sps:$4 sm:$0xff]  }
 0x58b   :  { %5798 = vmatpush1.bf16.msra.mxu1 %v13106_v5  ;;  %5656 = vmatprep.subr.bf16.mxu0 %v13107_v42  ;;  %v13143_v5 = vld [vmem:[#allocation12 + $0x18c] ss:$24 sps:$4 sm:$0xff]  }
 0x58c   :  { %5799 = vmatprep.subr.bf16.mxu1 %v13108_v63  ;;  %v13144_v42 = vld [vmem:[#allocation12 + $0x194] ss:$24 sps:$4 sm:$0xff]   ;;  %v13145_v63 = vld [vmem:[#allocation12 + $0x188] ss:$24 sps:$4 sm:$0xff]  }
 0x58e   :  { %5657 = vmatpush1.bf16.msra.mxu0 %v13109_v34  ;;  %v13146_v34 = vld [vmem:[#allocation12 + $0x190] ss:$24 sps:$4 sm:$0xff]  }
 0x58f   :  { %5800 = vmatpush1.bf16.msra.mxu1 %v13110_v57  ;;  %5812 = vmatprep.subr.bf16.mxu0 %v13111_v4  ;;  %v13147_v57 = vld [vmem:[#allocation12 + $0x1bc] ss:$24 sps:$4 sm:$0xff]  }
 0x590   :  { %5855 = vmatprep.subr.bf16.mxu1 %v13112_v12  ;;  %v13148_v4 = vld [vmem:[#allocation12 + $0x1c4] ss:$24 sps:$4 sm:$0xff]   ;;  %v13149_v12 = vld [vmem:[#allocation12 + $0x1b8] ss:$24 sps:$4 sm:$0xff]  }
 0x591   :  { %5659 = vmatmul.mubr.bf16.vlgmr.msra.gmra.mrb[92].mxu0 %v14582_v9  ;;  %v13120_v9 = vld [vmem:[#allocation12 + $0x74] ss:$24 sps:$4 sm:$0xff]  }
 0x592   :  { %5802 = vmatmul.mubr.bf16.vlgmr.msra.gmra.mrb[92].mxu1 %v14568_v21  ;;  %5813 = vmatpush1.bf16.msra.mxu0 %v13113_v51  ;;  %v13150_v51 = vld [vmem:[#allocation12 + $0x1c0] ss:$24 sps:$4 sm:$0xff]  }
 0x593   :  { %5844 = vmatprep.mubr.bf16.mxu0 %v14564_v33  ;;  %5856 = vmatpush1.bf16.msra.mxu1 %v13114_v61  ;;  %v13151_v61 = vld [vmem:[#allocation12 + $0x1ec] ss:$24 sps:$4 sm:$0xff]  }
 0x594   :  { %5887 = vmatprep.mubr.bf16.mxu1 %v14564_v33  ;;  %5814 = vmatprep.subr.bf16.mxu0 %v13115_v20  ;;  %v13125_v33 = vld [vmem:[#allocation12 + $0x98] ss:$24 sps:$4 sm:$0xff]   ;;  %v13152_v20 = vld [vmem:[#allocation12 + $0x1f4] ss:$24 sps:$4 sm:$0xff]  }
 0x595   :  { %5857 = vmatprep.subr.bf16.mxu1 %v13116_v8  ;;  %v13153_v8 = vld [vmem:[#allocation12 + $0x1e8] ss:$24 sps:$4 sm:$0xff]  }
 0x596   :  { %5815 = vmatpush1.bf16.msra.mxu0 %v13117_v44  ;;  %v13154_v44 = vld [vmem:[#allocation12 + $0x1f0] ss:$24 sps:$4 sm:$0xff]  }
 0x597   :  { %5858 = vmatpush1.bf16.msra.mxu1 %v13118_v54  ;;  %5816 = vmatprep.subr.bf16.mxu0 %v13119_v43  ;;  %v13155_v54 = vld [vmem:[#allocation12 + $0x21c] ss:$24 sps:$4 sm:$0xff]  }
 0x598   :  { %5859 = vmatprep.subr.bf16.mxu1 %v13120_v9  ;;  %v13156_v43 = vld [vmem:[#allocation12 + $0x224] ss:$24 sps:$4 sm:$0xff]   ;;  %v13157_v9 = vld [vmem:[#allocation12 + $0x218] ss:$24 sps:$4 sm:$0xff]  }
 0x59a   :  { %5817 = vmatpush1.bf16.msra.mxu0 %v13121_v23  ;;  %v13158_v23 = vld [vmem:[#allocation12 + $0x220] ss:$24 sps:$4 sm:$0xff]  }
 0x59b   :  { %5860 = vmatpush1.bf16.msra.mxu1 %v13122_v62  ;;  %5818 = vmatprep.subr.bf16.mxu0 %v13123_v38  ;;  %v13159_v62 = vld [vmem:[#allocation12 + $0x24c] ss:$24 sps:$4 sm:$0xff]  }
 0x59c   :  { %5861 = vmatprep.subr.bf16.mxu1 %v13124_v31  ;;  %v13160_v38 = vld [vmem:[#allocation12 + $0x254] ss:$24 sps:$4 sm:$0xff]   ;;  %v13161_v31 = vld [vmem:[#allocation12 + $0x248] ss:$24 sps:$4 sm:$0xff]  }
 0x59e   :  { %5819 = vmatpush1.bf16.msra.mxu0 %v13125_v33  ;;  %v13162_v33 = vld [vmem:[#allocation12 + $0x250] ss:$24 sps:$4 sm:$0xff]  }
 0x59f   :  { %5862 = vmatpush1.bf16.msra.mxu1 %v13126_v1  ;;  %5820 = vmatprep.subr.bf16.mxu0 %v13127_v17  ;;  %v13163_v1 = vld [vmem:[#allocation12 + $0x27c] ss:$24 sps:$4 sm:$0xff]  }
 0x5a0   :  { %5863 = vmatprep.subr.bf16.mxu1 %v13128_v19  ;;  %v13164_v17 = vld [vmem:[#allocation12 + $0x284] ss:$24 sps:$4 sm:$0xff]   ;;  %v13165_v19 = vld [vmem:[#allocation12 + $0x278] ss:$24 sps:$4 sm:$0xff]  }
 0x5a2   :  { %5821 = vmatpush1.bf16.msra.mxu0 %v13129_v50  ;;  %v13166_v50 = vld [vmem:[#allocation12 + $0x280] ss:$24 sps:$4 sm:$0xff]  }
 0x5a3   :  { %5864 = vmatpush1.bf16.msra.mxu1 %v13130_v58  ;;  %5822 = vmatprep.subr.bf16.mxu0 %v13131_v47  ;;  %v13167_v58 = vld [vmem:[#allocation12 + $0x2ac] ss:$24 sps:$4 sm:$0xff]  }
 0x5a4   :  { %5865 = vmatprep.subr.bf16.mxu1 %v13132_v24  ;;  %v13168_v47 = vld [vmem:[#allocation12 + $0x2b4] ss:$24 sps:$4 sm:$0xff]   ;;  %v13169_v24 = vld [vmem:[#allocation12 + $0x2a8] ss:$24 sps:$4 sm:$0xff]  }
 0x5a6   :  { %5823 = vmatpush1.bf16.msra.mxu0 %v13133_v26  ;;  %v13170_v26 = vld [vmem:[#allocation12 + $0x2b0] ss:$24 sps:$4 sm:$0xff]  }
 0x5a7   :  { %5866 = vmatpush1.bf16.msra.mxu1 %v13134_v32  ;;  %5824 = vmatprep.subr.bf16.mxu0 %v13135_v48  ;;  %v13171_v32 = vld [vmem:[#allocation12 + $0x2dc] ss:$24 sps:$4 sm:$0xff]  }
 0x5a8   :  { %5867 = vmatprep.subr.bf16.mxu1 %v13136_v2  ;;  %v13172_v48 = vld [vmem:[#allocation12 + $0x2e4] ss:$24 sps:$4 sm:$0xff]   ;;  %v13173_v2 = vld [vmem:[#allocation12 + $0x2d8] ss:$24 sps:$4 sm:$0xff]  }
 0x5aa   :  { %5825 = vmatpush1.bf16.msra.mxu0 %v13137_v16  ;;  %v13174_v16 = vld [vmem:[#allocation12 + $0x2e0] ss:$24 sps:$4 sm:$0xff]  }
 0x5ab   :  { %5868 = vmatpush1.bf16.msra.mxu1 %v13138_v49  ;;  %5826 = vmatprep.subr.bf16.mxu0 %v13139_v27  ;;  %v11814_v49 = vld [vmem:[#allocation16 + $0xa00] ss:$16 sps:$4 sm:$0xff]   ;;  %v11816_v27 = vld [vmem:[#allocation16 + $0xa04] ss:$16 sps:$4 sm:$0xff]  }
 0x5ac   :  { %5869 = vmatprep.subr.bf16.mxu1 %v13140_v28  ;;  %v11817_v28 = vld [vmem:[#allocation16 + $0xa08] ss:$16 sps:$4 sm:$0xff]  }
 0x5ae   :  { %5827 = vmatpush1.bf16.msra.mxu0 %v13141_v25  ;;  %v11819_v25 = vld [vmem:[#allocation16 + $0xa0c] ss:$16 sps:$4 sm:$0xff]  }
 0x5af   :  { %5870 = vmatpush1.bf16.msra.mxu1 %v13142_v22  ;;  %5828 = vmatprep.subr.bf16.mxu0 %v13143_v5  ;;  %v11822_v22 = vld [vmem:[#allocation16 + $0xa24] ss:$16 sps:$4 sm:$0xff]   ;;  %v11825_v5 = vld [vmem:[#allocation16 + $0xa2c] ss:$16 sps:$4 sm:$0xff]  }
 0x5b0   :  { %5871 = vmatprep.subr.bf16.mxu1 %v13144_v42  ;;  %v11820_v42 = vld [vmem:[#allocation16 + $0xa20] ss:$16 sps:$4 sm:$0xff]  }
 0x5b2   :  { %5829 = vmatpush1.bf16.msra.mxu0 %v13145_v63  ;;  %v11823_v63 = vld [vmem:[#allocation16 + $0xa28] ss:$16 sps:$4 sm:$0xff]  }
 0x5b3   :  { %5872 = vmatpush1.bf16.msra.mxu1 %v13146_v34  ;;  %5830 = vmatprep.subr.bf16.mxu0 %v13147_v57  ;;  %v11828_v34 = vld [vmem:[#allocation16 + $0xa44] ss:$16 sps:$4 sm:$0xff]   ;;  %v11831_v57 = vld [vmem:[#allocation16 + $0xa4c] ss:$16 sps:$4 sm:$0xff]  }
 0x5b4   :  { %5873 = vmatprep.subr.bf16.mxu1 %v13148_v4  ;;  %v11826_v4 = vld [vmem:[#allocation16 + $0xa40] ss:$16 sps:$4 sm:$0xff]  }
 0x5b6   :  { %5831 = vmatpush1.bf16.msra.mxu0 %v13149_v12  ;;  %v11834_v12 = vld [vmem:[#allocation16 + $0xa64] ss:$16 sps:$4 sm:$0xff]  }
 0x5b7   :  { %5874 = vmatpush1.bf16.msra.mxu1 %v13150_v51  ;;  %5832 = vmatprep.subr.bf16.mxu0 %v13151_v61  ;;  %v11837_v51 = vld [vmem:[#allocation16 + $0xa6c] ss:$16 sps:$4 sm:$0xff]   ;;  %v11832_v61 = vld [vmem:[#allocation16 + $0xa60] ss:$16 sps:$4 sm:$0xff]  }
 0x5b8   :  { %5875 = vmatprep.subr.bf16.mxu1 %v13152_v20  ;;  %v11835_v20 = vld [vmem:[#allocation16 + $0xa68] ss:$16 sps:$4 sm:$0xff]  }
 0x5ba   :  { %5833 = vmatpush1.bf16.msra.mxu0 %v13153_v8  ;;  %v11840_v8 = vld [vmem:[#allocation16 + $0xa84] ss:$16 sps:$4 sm:$0xff]  }
 0x5bb   :  { %5876 = vmatpush1.bf16.msra.mxu1 %v13154_v44  ;;  %5834 = vmatprep.subr.bf16.mxu0 %v13155_v54  ;;  %v11843_v44 = vld [vmem:[#allocation16 + $0xa8c] ss:$16 sps:$4 sm:$0xff]   ;;  %v11838_v54 = vld [vmem:[#allocation16 + $0xa80] ss:$16 sps:$4 sm:$0xff]  }
 0x5bc   :  { %5877 = vmatprep.subr.bf16.mxu1 %v13156_v43  ;;  %v11841_v43 = vld [vmem:[#allocation16 + $0xa88] ss:$16 sps:$4 sm:$0xff]  }
 0x5be   :  { %5835 = vmatpush1.bf16.msra.mxu0 %v13157_v9  ;;  %v11846_v9 = vld [vmem:[#allocation16 + $0xaa4] ss:$16 sps:$4 sm:$0xff]  }
 0x5bf   :  { %5878 = vmatpush1.bf16.msra.mxu1 %v13158_v23  ;;  %5836 = vmatprep.subr.bf16.mxu0 %v13159_v62  ;;  %v11849_v23 = vld [vmem:[#allocation16 + $0xaac] ss:$16 sps:$4 sm:$0xff]   ;;  %v11844_v62 = vld [vmem:[#allocation16 + $0xaa0] ss:$16 sps:$4 sm:$0xff]  }
 0x5c0   :  { %5879 = vmatprep.subr.bf16.mxu1 %v13160_v38  ;;  %v11847_v38 = vld [vmem:[#allocation16 + $0xaa8] ss:$16 sps:$4 sm:$0xff]  }
 0x5c2   :  { %5837 = vmatpush1.bf16.msra.mxu0 %v13161_v31  ;;  %v5669_v31 = vunpack.c.l.bf16 %v14139_v36 }
 0x5c3   :  { %5880 = vmatpush1.bf16.msra.mxu1 %v13162_v33  ;;  %5838 = vmatprep.subr.bf16.mxu0 %v13163_v1  ;;  %v5671_v1 = vunpack.c.l.bf16 %v14141_v39 }
 0x5c4   :  { %5881 = vmatprep.subr.bf16.mxu1 %v13164_v17  ;;  %v5670_v17 = vunpack.c.l.bf16 %v14143_v40 }
 0x5c6   :  { %5839 = vmatpush1.bf16.msra.mxu0 %v13165_v19 }
 0x5c7   :  { %5882 = vmatpush1.bf16.msra.mxu1 %v13166_v50  ;;  %5840 = vmatprep.subr.bf16.mxu0 %v13167_v58 }
 0x5c8   :  { %5883 = vmatprep.subr.bf16.mxu1 %v13168_v47  ;;  %v5672_v47 = vunpack.c.l.bf16 %v14145_v41 }
 0x5ca   :  { %5841 = vmatpush1.bf16.msra.mxu0 %v13169_v24  ;;  %v5673_v24 = vunpack.c.h.bf16 %v14139_v36 }
 0x5cb   :  { %5884 = vmatpush1.bf16.msra.mxu1 %v13170_v26  ;;  %5842 = vmatprep.subr.bf16.mxu0 %v13171_v32 }
 0x5cc   :  { %5885 = vmatprep.subr.bf16.mxu1 %v13172_v48 }
 0x5ce   :  { %5843 = vmatpush1.bf16.msra.mxu0 %v13173_v2 }
 0x5cf   :  { %5886 = vmatpush1.bf16.msra.mxu1 %v13174_v16  ;;  %6450 = vmatprep.subr.bf16.mxu0 %v11816_v27  ;;  %v5675_v16 = vunpack.c.h.bf16 %v14141_v39  ;;  %v11853_v39 = vld [vmem:[#allocation16 + $0xac8] ss:$16 sps:$4 sm:$0xff]  }
 0x5d0   :  { %6493 = vmatprep.subr.bf16.mxu1 %v11819_v25 }
 0x5d1   :  { %5845 = vmatmul.mubr.bf16.vlgmr.msra.gmra.mrb[96].mxu0 %v14568_v21 }
 0x5d2   :  { %5888 = vmatmul.mubr.bf16.vlgmr.msra.gmra.mrb[96].mxu1 %v14568_v21  ;;  %6451 = vmatpush1.bf16.msra.mxu0 %v11814_v49  ;;  %v11829_v21 = vld [vmem:[#allocation16 + $0xa48] ss:$16 sps:$4 sm:$0xff]   ;;  %v5674_v49 = vunpack.c.h.bf16 %v14143_v40  ;;  %v11855_v40 = vld [vmem:[#allocation16 + $0xacc] ss:$16 sps:$4 sm:$0xff]  }
 0x5d3   :  { %6494 = vmatpush1.bf16.msra.mxu1 %v11817_v28  ;;  %6452 = vmatprep.subr.bf16.mxu0 %v11822_v22 }
 0x5d4   :  { %6495 = vmatprep.subr.bf16.mxu1 %v11825_v5  ;;  %v5676_v5 = vunpack.c.h.bf16 %v14145_v41  ;;  %v11859_v41 = vld [vmem:[#allocation16 + $0xae8] ss:$16 sps:$4 sm:$0xff]  }
 0x5d6   :  { %6453 = vmatpush1.bf16.msra.mxu0 %v11820_v42  ;;  %v11852_v42 = vld [vmem:[#allocation16 + $0xac4] ss:$16 sps:$4 sm:$0xff]  }
 0x5d7   :  { %6496 = vmatpush1.bf16.msra.mxu1 %v11823_v63  ;;  %6454 = vmatprep.subr.bf16.mxu0 %v11828_v34 }
 0x5d8   :  { %6497 = vmatprep.subr.bf16.mxu1 %v11831_v57 }
 0x5da   :  { %6455 = vmatpush1.bf16.msra.mxu0 %v11826_v4  ;;  %v11850_v4 = vld [vmem:[#allocation16 + $0xac0] ss:$16 sps:$4 sm:$0xff]  }
 0x5db   :  { %6498 = vmatpush1.bf16.msra.mxu1 %v11829_v21  ;;  %6456 = vmatprep.subr.bf16.mxu0 %v11834_v12  ;;  %v11858_v21 = vld [vmem:[#allocation16 + $0xae4] ss:$16 sps:$4 sm:$0xff]   ;;  %v11856_v12 = vld [vmem:[#allocation16 + $0xae0] ss:$16 sps:$4 sm:$0xff]  }
 0x5dc   :  { %6499 = vmatprep.subr.bf16.mxu1 %v11837_v51  ;;  %v11861_v51 = vld [vmem:[#allocation16 + $0xaec] ss:$16 sps:$4 sm:$0xff]  }
 0x5de   :  { %6457 = vmatpush1.bf16.msra.mxu0 %v11832_v61  ;;  %v11864_v61 = vld [vmem:[#allocation16 + $0xb04] ss:$16 sps:$4 sm:$0xff]  }
 0x5df   :  { %6500 = vmatpush1.bf16.msra.mxu1 %v11835_v20  ;;  %6458 = vmatprep.subr.bf16.mxu0 %v11840_v8  ;;  %v11867_v20 = vld [vmem:[#allocation16 + $0xb0c] ss:$16 sps:$4 sm:$0xff]   ;;  %v11862_v8 = vld [vmem:[#allocation16 + $0xb00] ss:$16 sps:$4 sm:$0xff]  }
 0x5e0   :  { %6501 = vmatprep.subr.bf16.mxu1 %v11843_v44  ;;  %v11865_v44 = vld [vmem:[#allocation16 + $0xb08] ss:$16 sps:$4 sm:$0xff]  }
 0x5e2   :  { %6459 = vmatpush1.bf16.msra.mxu0 %v11838_v54  ;;  %v11870_v54 = vld [vmem:[#allocation16 + $0xb24] ss:$16 sps:$4 sm:$0xff]  }
 0x5e3   :  { %6502 = vmatpush1.bf16.msra.mxu1 %v11841_v43  ;;  %6460 = vmatprep.subr.bf16.mxu0 %v11846_v9  ;;  %v11873_v43 = vld [vmem:[#allocation16 + $0xb2c] ss:$16 sps:$4 sm:$0xff]   ;;  %v11868_v9 = vld [vmem:[#allocation16 + $0xb20] ss:$16 sps:$4 sm:$0xff]  }
 0x5e4   :  { %6503 = vmatprep.subr.bf16.mxu1 %v11849_v23  ;;  %v11871_v23 = vld [vmem:[#allocation16 + $0xb28] ss:$16 sps:$4 sm:$0xff]  }
 0x5e6   :  { %6461 = vmatpush1.bf16.msra.mxu0 %v11844_v62  ;;  %v11876_v62 = vld [vmem:[#allocation16 + $0xb44] ss:$16 sps:$4 sm:$0xff]  }
 0x5e7   :  { %6504 = vmatpush1.bf16.msra.mxu1 %v11847_v38  ;;  %6462 = vmatprep.subr.bf16.mxu0 %v11852_v42  ;;  %v11879_v38 = vld [vmem:[#allocation16 + $0xb4c] ss:$16 sps:$4 sm:$0xff]   ;;  %v11898_v42 = vld [vmem:[#allocation16 + $0xbc0] ss:$16 sps:$4 sm:$0xff]  }
 0x5e8   :  { %6505 = vmatprep.subr.bf16.mxu1 %v11855_v40 }
 0x5ea   :  { %6463 = vmatpush1.bf16.msra.mxu0 %v11850_v4 }
 0x5eb   :  { %6464 = vmatprep.subr.bf16.mxu0 %v11858_v21  ;;  %6506 = vmatpush1.bf16.msra.mxu1 %v11853_v39  ;;  %v11903_v39 = vld [vmem:[#allocation16 + $0xbcc] ss:$16 sps:$4 sm:$0xff]   ;;  %v11906_v21 = vld [vmem:[#allocation16 + $0xbe4] ss:$16 sps:$4 sm:$0xff]  }
 0x5ec   :  { %6507 = vmatprep.subr.bf16.mxu1 %v11861_v51  ;;  %v11901_v51 = vld [vmem:[#allocation16 + $0xbc8] ss:$16 sps:$4 sm:$0xff]  }
 0x5ee   :  { %6465 = vmatpush1.bf16.msra.mxu0 %v11856_v12 }
 0x5ef   :  { %6466 = vmatprep.subr.bf16.mxu0 %v11864_v61  ;;  %6508 = vmatpush1.bf16.msra.mxu1 %v11859_v41  ;;  %v11904_v41 = vld [vmem:[#allocation16 + $0xbe0] ss:$16 sps:$4 sm:$0xff]   ;;  %v11915_v61 = vld [vmem:[#allocation16 + $0x80c] ss:$16 sps:$4 sm:$0xff]  }
 0x5f0   :  { %6509 = vmatprep.subr.bf16.mxu1 %v11867_v20 }
 0x5f2   :  { %6467 = vmatpush1.bf16.msra.mxu0 %v11862_v8 }
 0x5f3   :  { %6468 = vmatprep.subr.bf16.mxu0 %v11870_v54  ;;  %6510 = vmatpush1.bf16.msra.mxu1 %v11865_v44 }
 0x5f4   :  { %6511 = vmatprep.subr.bf16.mxu1 %v11873_v43 }
 0x5f6   :  { %6469 = vmatpush1.bf16.msra.mxu0 %v11868_v9 }
 0x5f7   :  { %6470 = vmatprep.subr.bf16.mxu0 %v11876_v62  ;;  %6512 = vmatpush1.bf16.msra.mxu1 %v11871_v23 }
 0x5f8   :  { %6513 = vmatprep.subr.bf16.mxu1 %v11879_v38 }
 0x624   :  { %v5574_v33 = vpop.f32.mrb[88].mxu0 }
 0x625   :  { %v14601_v19 = vadd.f32 %v5669_v31, %v5574_v33  ;;  %v5617_v50 = vpop.f32.mrb[88].mxu1  ;;  %v5576_v58 = vpop.f32.mrb[89].mxu0  ;;  %v11874_v31 = vld [vmem:[#allocation16 + $0xb40] ss:$16 sps:$4 sm:$0xff]   ;;  %v11877_v33 = vld [vmem:[#allocation16 + $0xb48] ss:$16 sps:$4 sm:$0xff]  }
 0x626   :  { %v14605_v26 = vadd.f32 %v5671_v1, %v5617_v50  ;;  %v14607_v32 = vadd.f32 %v5670_v17, %v5576_v58  ;;  %v5619_v48 = vpop.f32.mrb[89].mxu1  ;;  %v5578_v2 = vpop.f32.mrb[90].mxu0  ;;  %6471 = vmatpush1.bf16.msra.mxu0 %v11874_v31  ;;  %v11882_v1 = vld [vmem:[#allocation16 + $0xb64] ss:$16 sps:$4 sm:$0xff]   ;;  %v11885_v17 = vld [vmem:[#allocation16 + $0xb6c] ss:$16 sps:$4 sm:$0xff]   ;;  %6514 = vmatpush1.bf16.msra.mxu1 %v11877_v33 }
 0x627   :  { %v14611_v27 = vadd.f32 %v5672_v47, %v5619_v48  ;;  %v14613_v28 = vadd.f32 %v5673_v24, %v5578_v2  ;;  %v5621_v25 = vpop.f32.mrb[90].mxu1  ;;  %v5580_v22 = vpop.f32.mrb[91].mxu0  ;;  %v11880_v50 = vld [vmem:[#allocation16 + $0xb60] ss:$16 sps:$4 sm:$0xff]   ;;  %6472 = vmatprep.subr.bf16.mxu0 %v11882_v1  ;;  %v11883_v58 = vld [vmem:[#allocation16 + $0xb68] ss:$16 sps:$4 sm:$0xff]   ;;  %6515 = vmatprep.subr.bf16.mxu1 %v11885_v17 }
 0x628   :  { %v14616_v36 = vadd.f32 %v5675_v16, %v5621_v25  ;;  %v14618_v63 = vadd.f32 %v5674_v49, %v5580_v22  ;;  %v5623_v34 = vpop.f32.mrb[91].mxu1  ;;  %v11888_v47 = vld [vmem:[#allocation16 + $0xb84] ss:$16 sps:$4 sm:$0xff]   ;;  %v11891_v24 = vld [vmem:[#allocation16 + $0xb8c] ss:$16 sps:$4 sm:$0xff]  }
 0x629   :  { %v14620_v57 = vadd.f32 %v5676_v5, %v5623_v34  ;;  %v11886_v48 = vld [vmem:[#allocation16 + $0xb80] ss:$16 sps:$4 sm:$0xff]   ;;  %v11889_v2 = vld [vmem:[#allocation16 + $0xb88] ss:$16 sps:$4 sm:$0xff]   ;;  %v11894_v16 = vld [vmem:[#allocation16 + $0xba4] ss:$16 sps:$4 sm:$0xff]  }
 0x62a   :  { %6473 = vmatpush1.bf16.msra.mxu0 %v11880_v50  ;;  %6516 = vmatpush1.bf16.msra.mxu1 %v11883_v58  ;;  %v11897_v49 = vld [vmem:[#allocation16 + $0xbac] ss:$16 sps:$4 sm:$0xff]   ;;  %v11892_v25 = vld [vmem:[#allocation16 + $0xba0] ss:$16 sps:$4 sm:$0xff]   ;;  %v11895_v22 = vld [vmem:[#allocation16 + $0xba8] ss:$16 sps:$4 sm:$0xff]   ;;  %v5743_v50 = vunpack.c.h.bf16 %v14228_v10 }
 0x62b   :  { %6474 = vmatprep.subr.bf16.mxu0 %v11888_v47  ;;  %6517 = vmatprep.subr.bf16.mxu1 %v11891_v24  ;;  %v10460_v5 = vmul.f32 -1.442695, %v14601_v19  ;;  %v11900_v34 = vld [vmem:[#allocation16 + $0xbc4] ss:$16 sps:$4 sm:$0xff]   ;;  %v10461_v4 = vmul.f32 -1.442695, %v14607_v32  ;;  %v5898_v24 = vunpack.c.l.bf16 %v14232_v11 }
 0x62c   :  { %v10464_v40 = vmul.f32 -1.442695, %v14613_v28  ;;  %v10465_v12 = vmul.f32 -1.442695, %v14618_v63  ;;  %v11909_v19 = vld [vmem:[#allocation16 + $0xbec] ss:$16 sps:$4 sm:$0xff]  }
 0x62d   :  { %12550 = vpow2.f32 %v10460_v5  ;;  %v11907_v32 = vld [vmem:[#allocation16 + $0xbe8] ss:$16 sps:$4 sm:$0xff]   ;;  %v11912_v28 = vld [vmem:[#allocation16 + $0x804] ss:$16 sps:$4 sm:$0xff]   ;;  %v10462_v63 = vmul.f32 -1.442695, %v14605_v26  ;;  %v5899_v5 = vunpack.c.l.bf16 %v14236_v18 }
 0x62e   :  { %6475 = vmatpush1.bf16.msra.mxu0 %v11886_v48  ;;  %6518 = vmatpush1.bf16.msra.mxu1 %v11889_v2  ;;  %12552 = vpow2.f32 %v10461_v4  ;;  %v10463_v20 = vmul.f32 -1.442695, %v14611_v27  ;;  %v10466_v8 = vmul.f32 -1.442695, %v14616_v36  ;;  %v10467_v54 = vmul.f32 -1.442695, %v14620_v57 }
 0x62f   :  { %6476 = vmatprep.subr.bf16.mxu0 %v11894_v16  ;;  %6519 = vmatprep.subr.bf16.mxu1 %v11897_v49  ;;  %12554 = vpow2.f32 %v10464_v40  ;;  %v5741_v57 = vunpack.c.l.bf16 %v14228_v10  ;;  %v5902_v48 = vunpack.c.h.bf16 %v14232_v11  ;;  %v5742_v2 = vunpack.c.l.bf16 %v14234_v15 }
 0x630   :  { %12556 = vpow2.f32 %v10465_v12 }
 0x631   :  { %12558 = vpow2.f32 %v10462_v63 }
 0x632   :  { %6477 = vmatpush1.bf16.msra.mxu0 %v11892_v25  ;;  %6520 = vmatpush1.bf16.msra.mxu1 %v11895_v22  ;;  %12560 = vpow2.f32 %v10463_v20 }
 0x633   :  { %6478 = vmatprep.subr.bf16.mxu0 %v11900_v34  ;;  %6521 = vmatprep.subr.bf16.mxu1 %v11903_v39  ;;  %12562 = vpow2.f32 %v10466_v8 }
 0x634   :  { %12564 = vpow2.f32 %v10467_v54 }
 0x636   :  { %6479 = vmatpush1.bf16.msra.mxu0 %v11898_v42  ;;  %6522 = vmatpush1.bf16.msra.mxu1 %v11901_v51 }
 0x637   :  { %6480 = vmatprep.subr.bf16.mxu0 %v11906_v21  ;;  %6523 = vmatprep.subr.bf16.mxu1 %v11909_v19  ;;  %v12551_v44 = vpop.eup %12550  ;;  %v5903_v21 = vunpack.c.h.bf16 %v14236_v18 }
 0x638   :  { %v12553_v43 = vpop.eup %12552  ;;  %v5709_v62 = vadd.f32 1.0, %v12551_v44 }
 0x639   :  { %v12555_v9 = vpop.eup %12554  ;;  %v5710_v38 = vadd.f32 1.0, %v12553_v43 }
 0x63a   :  { %6481 = vmatpush1.bf16.msra.mxu0 %v11904_v41  ;;  %6524 = vmatpush1.bf16.msra.mxu1 %v11907_v32  ;;  %v12557_v23 = vpop.eup %12556  ;;  %v5713_v31 = vadd.f32 1.0, %v12555_v9  ;;  %12566 = vrcp.f32 %v5709_v62  ;;  %v5744_v9 = vunpack.c.h.bf16 %v14234_v15 }
 0x63b   :  { %6864 = vmatprep.subr.bf16.mxu0 %v11912_v28  ;;  %6907 = vmatprep.subr.bf16.mxu1 %v11915_v61  ;;  %v5714_v26 = vadd.f32 1.0, %v12557_v23  ;;  %12568 = vrcp.f32 %v5710_v38  ;;  %v12559_v27 = vpop.eup %12558 }
 0x63c   :  { %12570 = vrcp.f32 %v5713_v31  ;;  %v12561_v36 = vpop.eup %12560  ;;  %v5711_v17 = vadd.f32 1.0, %v12559_v27 }
 0x63d   :  { %12572 = vrcp.f32 %v5714_v26  ;;  %v12563_v33 = vpop.eup %12562  ;;  %v5712_v58 = vadd.f32 1.0, %v12561_v36 }
 0x63e   :  { %v12565_v1 = vpop.eup %12564  ;;  %v5715_v16 = vadd.f32 1.0, %v12563_v33  ;;  %12574 = vrcp.f32 %v5711_v17 }
 0x63f   :  { %v5716_v34 = vadd.f32 1.0, %v12565_v1  ;;  %12576 = vrcp.f32 %v5712_v58 }
 0x640   :  { %12578 = vrcp.f32 %v5715_v16 }
 0x641   :  { %12580 = vrcp.f32 %v5716_v34 }
 0x644   :  { %v12567_v42 = vpop.eup %12566 }
 0x645   :  { %v12569_v12 = vpop.eup %12568 }
 0x646   :  { %v12571_v28 = vpop.eup %12570 }
 0x647   :  { %v12573_v44 = vpop.eup %12572 }
 0x648   :  { %v12575_v26 = vpop.eup %12574 }
 0x649   :  { %v12577_v27 = vpop.eup %12576  ;;  %v5753_v1 = vsub.f32 1.0, %v12575_v26 }
 0x64a   :  { %v12579_v36 = vpop.eup %12578 }
 0x64b   :  { %v12581_v33 = vpop.eup %12580 }
 0x64c   :  { %v5764_v34 = vmul.f32 %v12581_v33, %v14536_v7 }
 0x664   :  { %v5660_v47 = vpop.f32.mrb[92].mxu0 }
 0x665   :  { %v5733_v49 = vadd.f32 %v5660_v47, %v14395_v30  ;;  %v5803_v25 = vpop.f32.mrb[92].mxu1  ;;  %v5662_v22 = vpop.f32.mrb[93].mxu0  ;;  %v5761_v47 = vmul.f32 %v12575_v26, %v14528_v37 }
 0x666   :  { %v5906_v4 = vadd.f32 %v5898_v24, %v5803_v25  ;;  %v5734_v10 = vadd.f32 %v5662_v22, %v14398_v13  ;;  %v5805_v39 = vpop.f32.mrb[93].mxu1  ;;  %v5664_v40 = vpop.f32.mrb[94].mxu0  ;;  %v5762_v24 = vmul.f32 %v12577_v27, %v14531_v3  ;;  %v5756_v25 = vsub.f32 1.0, %v12581_v33 }
 0x667   :  { %v5737_v11 = vmul.f32 %v12567_v42, %v5733_v49  ;;  %v5907_v51 = vadd.f32 %v5899_v5, %v5805_v39  ;;  %v5735_v41 = vadd.f32 %v5664_v40, %v14395_v30  ;;  %v5807_v19 = vpop.f32.mrb[94].mxu1  ;;  %v5666_v32 = vpop.f32.mrb[95].mxu0  ;;  %v5763_v49 = vmul.f32 %v12579_v36, %v14534_v45 }
 0x668   :  { %v5738_v61 = vmul.f32 %v12569_v12, %v5734_v10  ;;  %v5910_v63 = vadd.f32 %v5902_v48, %v5807_v19  ;;  %v5736_v20 = vadd.f32 %v5666_v32, %v14398_v13  ;;  %v5809_v8 = vpop.f32.mrb[95].mxu1  ;;  %v5755_v48 = vsub.f32 1.0, %v12579_v36 }
 0x669   :  { %v5745_v54 = vadd.f32 %v5741_v57, %v5737_v11  ;;  %v5739_v43 = vmul.f32 %v12571_v28, %v5735_v41  ;;  %v5911_v18 = vadd.f32 %v5903_v21, %v5809_v8  ;;  %v5754_v57 = vsub.f32 1.0, %v12577_v27 }
 0x66a   :  { %v5746_v23 = vadd.f32 %v5742_v2, %v5738_v61  ;;  %v5740_v62 = vmul.f32 %v12573_v44, %v5736_v20  ;;  %v10468_v3 = vmul.f32 -1.442695, %v5906_v4  ;;  %v10469_v40 = vmul.f32 -1.442695, %v5907_v51 }
 0x66b   :  { %12582 = vtanh.f32 %v5745_v54  ;;  %v5747_v38 = vadd.f32 %v5743_v50, %v5739_v43  ;;  %v10472_v21 = vmul.f32 -1.442695, %v5910_v63  ;;  %v10473_v12 = vmul.f32 -1.442695, %v5911_v18 }
 0x66c   :  { %12584 = vtanh.f32 %v5746_v23  ;;  %v5748_v31 = vadd.f32 %v5744_v9, %v5740_v62  ;;  %v5900_v4 = vunpack.c.l.bf16 %v14322_v46  ;;  %v5901_v63 = vunpack.c.l.bf16 %v14326_v52 }
 0x66d   :  { %12586 = vtanh.f32 %v5747_v38  ;;  %v5970_v20 = vunpack.c.l.bf16 %v14324_v6  ;;  %v5904_v43 = vunpack.c.h.bf16 %v14322_v46  ;;  %v5972_v18 = vunpack.c.h.bf16 %v14324_v6 }
 0x66e   :  { %12588 = vtanh.f32 %v5748_v31  ;;  %v5905_v31 = vunpack.c.h.bf16 %v14326_v52  ;;  %v5971_v27 = vunpack.c.l.bf16 %v14328_v60 }
 0x66f   :  { %12590 = vpow2.f32 %v10468_v3 }
 0x670   :  { %12592 = vpow2.f32 %v10469_v40 }
 0x671   :  { %12594 = vpow2.f32 %v10472_v21 }
 0x672   :  { %12596 = vpow2.f32 %v10473_v12 }
 0x675   :  { %v12583_v17 = vpop.eup %12582 }
 0x676   :  { %v12585_v58 = vpop.eup %12584  ;;  %v5757_v15 = vmul.f32 %v12583_v17, %v5753_v1 }
 0x677   :  { %v5758_v2 = vmul.f32 %v12585_v58, %v5754_v57  ;;  %v12587_v50 = vpop.eup %12586 }
 0x678   :  { %v14644_v16 = vadd.f32 %v5761_v47, %v5757_v15  ;;  %v5759_v5 = vmul.f32 %v12587_v50, %v5755_v48  ;;  %v12589_v42 = vpop.eup %12588 }
 0x679   :  { %v14647_v22 = vadd.f32 %v5762_v24, %v5758_v2  ;;  %v5760_v10 = vmul.f32 %v12589_v42, %v5756_v25  ;;  %v12591_v45 = vpop.eup %12590  ;;  %v5973_v25 = vunpack.c.h.bf16 %v14328_v60 }
 0x67a   :  { %v14650_v39 = vadd.f32 %v5763_v49, %v5759_v5  ;;  %v12593_v11 = vpop.eup %12592  ;;  %v5938_v32 = vadd.f32 1.0, %v12591_v45 }
 0x67b   :  { %v14652_v37 = vadd.f32 %v5764_v34, %v5760_v10  ;;  %v12595_v41 = vpop.eup %12594  ;;  %v5939_v28 = vadd.f32 1.0, %v12593_v11 }
 0x67c   :  { %v12597_v19 = vpop.eup %12596  ;;  %v5942_v7 = vadd.f32 1.0, %v12595_v41  ;;  %12598 = vrcp.f32 %v5938_v32 }
 0x67d   :  { %v5943_v61 = vadd.f32 1.0, %v12597_v19  ;;  %12600 = vrcp.f32 %v5939_v28 }
 0x67e   :  { %12602 = vrcp.f32 %v5942_v7 }
 0x67f   :  { %12604 = vrcp.f32 %v5943_v61 }
 0x686   :  { %v12599_v26 = vpop.eup %12598 }
 0x687   :  { %v12601_v58 = vpop.eup %12600 }
 0x688   :  { %v12603_v48 = vpop.eup %12602 }
 0x689   :  { %v12605_v49 = vpop.eup %12604 }
 0x6a4   :  { %v5846_v51 = vpop.f32.mrb[96].mxu0 }
 0x6a5   :  { %v5908_v8 = vadd.f32 %v5900_v4, %v5846_v51  ;;  %v5889_v44 = vpop.f32.mrb[96].mxu1  ;;  %v5848_v54 = vpop.f32.mrb[97].mxu0 }
 0x6a6   :  { %v5962_v9 = vadd.f32 %v5889_v44, %v14421_v56  ;;  %v5909_v23 = vadd.f32 %v5901_v63, %v5848_v54  ;;  %v5891_v62 = vpop.f32.mrb[97].mxu1  ;;  %v5850_v38 = vpop.f32.mrb[98].mxu0 }
 0x6a7   :  { %v10470_v36 = vmul.f32 -1.442695, %v5908_v8  ;;  %v5963_v33 = vadd.f32 %v5891_v62, %v14424_v29  ;;  %v5912_v1 = vadd.f32 %v5904_v43, %v5850_v38  ;;  %v5893_v17 = vpop.f32.mrb[98].mxu1  ;;  %v5852_v57 = vpop.f32.mrb[99].mxu0 }
 0x6a8   :  { %v5966_v46 = vmul.f32 %v12599_v26, %v5962_v9  ;;  %v10471_v47 = vmul.f32 -1.442695, %v5909_v23  ;;  %v5964_v6 = vadd.f32 %v5893_v17, %v14421_v56  ;;  %v5913_v15 = vadd.f32 %v5905_v31, %v5852_v57  ;;  %v5895_v24 = vpop.f32.mrb[99].mxu1 }
 0x6a9   :  { %12606 = vpow2.f32 %v10470_v36  ;;  %v5967_v2 = vmul.f32 %v12601_v58, %v5963_v33  ;;  %v10474_v52 = vmul.f32 -1.442695, %v5912_v1  ;;  %v5965_v50 = vadd.f32 %v5895_v24, %v14424_v29  ;;  %v11913_v58 = vld [vmem:[#allocation16 + $0x808] ss:$16 sps:$4 sm:$0xff]  }
 0x6aa   :  { %v5974_v5 = vadd.f32 %v5970_v20, %v5966_v46  ;;  %12608 = vpow2.f32 %v10471_v47  ;;  %v5968_v42 = vmul.f32 %v12603_v48, %v5964_v6  ;;  %v10475_v10 = vmul.f32 -1.442695, %v5913_v15  ;;  %v11918_v47 = vld [vmem:[#allocation16 + $0x824] ss:$16 sps:$4 sm:$0xff]   ;;  %v11921_v6 = vld [vmem:[#allocation16 + $0x82c] ss:$16 sps:$4 sm:$0xff]  }
 0x6ab   :  { %v5975_v34 = vadd.f32 %v5971_v27, %v5967_v2  ;;  %12610 = vpow2.f32 %v10474_v52  ;;  %v5969_v3 = vmul.f32 %v12605_v49, %v5965_v50  ;;  %v11916_v15 = vld [vmem:[#allocation16 + $0x820] ss:$16 sps:$4 sm:$0xff]   ;;  %v11919_v24 = vld [vmem:[#allocation16 + $0x828] ss:$16 sps:$4 sm:$0xff]   ;;  %v11924_v48 = vld [vmem:[#allocation16 + $0x844] ss:$16 sps:$4 sm:$0xff]  }
 0x6ac   :  { %v5976_v40 = vadd.f32 %v5972_v18, %v5968_v42  ;;  %12612 = vpow2.f32 %v10475_v10  ;;  %v11927_v2 = vld [vmem:[#allocation16 + $0x84c] ss:$16 sps:$4 sm:$0xff]   ;;  %v11922_v52 = vld [vmem:[#allocation16 + $0x840] ss:$16 sps:$4 sm:$0xff]   ;;  %v11925_v50 = vld [vmem:[#allocation16 + $0x848] ss:$16 sps:$4 sm:$0xff]  }
 0x6ad   :  { %v5977_v21 = vadd.f32 %v5973_v25, %v5969_v3  ;;  %12614 = vtanh.f32 %v5974_v5  ;;  %v11930_v49 = vld [vmem:[#allocation16 + $0x864] ss:$16 sps:$4 sm:$0xff]   ;;  %v11933_v25 = vld [vmem:[#allocation16 + $0x86c] ss:$16 sps:$4 sm:$0xff]   ;;  %v11928_v5 = vld [vmem:[#allocation16 + $0x860] ss:$16 sps:$4 sm:$0xff]  }
 0x6ae   :  { %v11931_v42 = vld [vmem:[#allocation16 + $0x868] ss:$16 sps:$4 sm:$0xff]   ;;  %v11939_v10 = vld [vmem:[#allocation16 + $0x88c] ss:$16 sps:$4 sm:$0xff]   ;;  %v11934_v3 = vld [vmem:[#allocation16 + $0x880] ss:$16 sps:$4 sm:$0xff]  }
 0x6b3   :  { %v12607_v12 = vpop.eup %12606 }
 0x6b4   :  { %v12609_v45 = vpop.eup %12608  ;;  %v5940_v11 = vadd.f32 1.0, %v12607_v12  ;;  %v11945_v12 = vld [vmem:[#allocation16 + $0x8ac] ss:$16 sps:$4 sm:$0xff]  }
 0x6b5   :  { %v12611_v41 = vpop.eup %12610  ;;  %v5941_v19 = vadd.f32 1.0, %v12609_v45  ;;  %v11940_v45 = vld [vmem:[#allocation16 + $0x8a0] ss:$16 sps:$4 sm:$0xff]  }
 0x6b6   :  { %12616 = vrcp.f32 %v5940_v11  ;;  %v5944_v32 = vadd.f32 1.0, %v12611_v41  ;;  %v12613_v60 = vpop.eup %12612  ;;  %v11943_v11 = vld [vmem:[#allocation16 + $0x8a8] ss:$16 sps:$4 sm:$0xff]   ;;  %v11948_v41 = vld [vmem:[#allocation16 + $0x8c4] ss:$16 sps:$4 sm:$0xff]  }
 0x6b7   :  { %12618 = vrcp.f32 %v5941_v19  ;;  %v5945_v28 = vadd.f32 1.0, %v12613_v60  ;;  %v12615_v7 = vpop.eup %12614  ;;  %v11951_v19 = vld [vmem:[#allocation16 + $0x8cc] ss:$16 sps:$4 sm:$0xff]   ;;  %v11949_v60 = vld [vmem:[#allocation16 + $0x8c8] ss:$16 sps:$4 sm:$0xff]  }
 0x6b8   :  { %12620 = vrcp.f32 %v5944_v32  ;;  %v11946_v32 = vld [vmem:[#allocation16 + $0x8c0] ss:$16 sps:$4 sm:$0xff]  }
 0x6b9   :  { %12622 = vtanh.f32 %v5975_v34  ;;  %v11936_v34 = vld [vmem:[#allocation16 + $0x884] ss:$16 sps:$4 sm:$0xff]  }
 0x6ba   :  { %12624 = vtanh.f32 %v5976_v40  ;;  %v11937_v40 = vld [vmem:[#allocation16 + $0x888] ss:$16 sps:$4 sm:$0xff]  }
 0x6bb   :  { %12626 = vrcp.f32 %v5945_v28  ;;  %v11954_v28 = vld [vmem:[#allocation16 + $0x8e4] ss:$16 sps:$4 sm:$0xff]  }
 0x6bc   :  { %12628 = vtanh.f32 %v5977_v21  ;;  %v11942_v21 = vld [vmem:[#allocation16 + $0x8a4] ss:$16 sps:$4 sm:$0xff]  }
 0x6c0   :  { %v12617_v61 = vpop.eup %12616 }
 0x6c1   :  { %v12619_v4 = vpop.eup %12618  ;;  %v5982_v51 = vsub.f32 1.0, %v12617_v61  ;;  %v5990_v44 = vmul.f32 %v12617_v61, %v14553_v53  ;;  %v11952_v61 = vld [vmem:[#allocation16 + $0x8e0] ss:$16 sps:$4 sm:$0xff]  }
 0x6c2   :  { %v12621_v63 = vpop.eup %12620  ;;  %v5983_v20 = vsub.f32 1.0, %v12619_v4  ;;  %v5991_v9 = vmul.f32 %v12619_v4, %v14555_v35  ;;  %v11955_v4 = vld [vmem:[#allocation16 + $0x8e8] ss:$16 sps:$4 sm:$0xff]  }
 0x6c3   :  { %v12623_v8 = vpop.eup %12622  ;;  %v5984_v54 = vsub.f32 1.0, %v12621_v63  ;;  %v5986_v43 = vmul.f32 %v12615_v7, %v5982_v51  ;;  %v5992_v62 = vmul.f32 %v12621_v63, %v14557_v0  ;;  %v11910_v0 = vld [vmem:[#allocation16 + $0x800] ss:$16 sps:$4 sm:$0xff]   ;;  %v11957_v7 = vld [vmem:[#allocation16 + $0x8ec] ss:$16 sps:$4 sm:$0xff]  }
 0x6c4   :  { %v12625_v18 = vpop.eup %12624  ;;  %v5987_v23 = vmul.f32 %v12623_v8, %v5983_v20  ;;  %v11960_v51 = vld [vmem:[#allocation16 + $0x904] ss:$16 sps:$4 sm:$0xff]   ;;  %v11963_v63 = vld [vmem:[#allocation16 + $0x90c] ss:$16 sps:$4 sm:$0xff]   ;;  %v11958_v20 = vld [vmem:[#allocation16 + $0x900] ss:$16 sps:$4 sm:$0xff]  }
 0x6c5   :  { %v5988_v38 = vmul.f32 %v12625_v18, %v5984_v54  ;;  %v14669_v31 = vadd.f32 %v5990_v44, %v5986_v43  ;;  %v12627_v26 = vpop.eup %12626  ;;  %v11961_v8 = vld [vmem:[#allocation16 + $0x908] ss:$16 sps:$4 sm:$0xff]   ;;  %v11966_v44 = vld [vmem:[#allocation16 + $0x924] ss:$16 sps:$4 sm:$0xff]   ;;  %v11969_v54 = vld [vmem:[#allocation16 + $0x92c] ss:$16 sps:$4 sm:$0xff]  }
 0x6c6   :  { %v14671_v27 = vadd.f32 %v5991_v9, %v5987_v23  ;;  %v5985_v36 = vsub.f32 1.0, %v12627_v26  ;;  %v12629_v1 = vpop.eup %12628  ;;  %v5993_v53 = vmul.f32 %v12627_v26, %v14560_v59  ;;  %v14692_v59 = vpack.c.bf16 %v14652_v37, %v14647_v22  ;;  %v11964_v43 = vld [vmem:[#allocation16 + $0x920] ss:$16 sps:$4 sm:$0xff]   ;;  %v11967_v18 = vld [vmem:[#allocation16 + $0x928] ss:$16 sps:$4 sm:$0xff]  }
 0x6c7   :  { %v14673_v33 = vadd.f32 %v5992_v62, %v5988_v38  ;;  %v11972_v9 = vld [vmem:[#allocation16 + $0x944] ss:$16 sps:$4 sm:$0xff]   ;;  %v11975_v23 = vld [vmem:[#allocation16 + $0x94c] ss:$16 sps:$4 sm:$0xff]   ;;  %v11970_v62 = vld [vmem:[#allocation16 + $0x940] ss:$16 sps:$4 sm:$0xff]  }
 0x6c8   :  { %v5989_v17 = vmul.f32 %v12629_v1, %v5985_v36  ;;  %v11973_v38 = vld [vmem:[#allocation16 + $0x948] ss:$16 sps:$4 sm:$0xff]   ;;  %v11978_v26 = vld [vmem:[#allocation16 + $0x964] ss:$16 sps:$4 sm:$0xff]   ;;  %v11981_v36 = vld [vmem:[#allocation16 + $0x96c] ss:$16 sps:$4 sm:$0xff]  }
 0x6c9   :  { %v14684_v46 = vpack.c.bf16 %v14673_v33, %v14669_v31  ;;  %v11976_v1 = vld [vmem:[#allocation16 + $0x960] ss:$16 sps:$4 sm:$0xff]  }
 0x6ca   :  { %v14676_v57 = vadd.f32 %v5993_v53, %v5989_v17  ;;  %v11979_v53 = vld [vmem:[#allocation16 + $0x968] ss:$16 sps:$4 sm:$0xff]   ;;  %v11984_v17 = vld [vmem:[#allocation16 + $0x984] ss:$16 sps:$4 sm:$0xff]  }
 0x6cc   :  { %v14680_v35 = vpack.c.bf16 %v14676_v57, %v14671_v27 }
 0x6ce   :  { %6482 = vmatprep.mubr.bf16.mxu0 %v14680_v35  ;;  %6525 = vmatprep.mubr.bf16.mxu1 %v14680_v35 }
 0x6cf   :  { %6483 = vmatmul.mubr.bf16.vlgmr.msra.gmra.mrb[72].mxu0 %v14684_v46  ;;  %6526 = vmatmul.mubr.bf16.vlgmr.msra.gmra.mrb[72].mxu1 %v14684_v46 }
 0x6d0   :  { %6865 = vmatpush1.bf16.msra.mxu0 %v11910_v0  ;;  %6908 = vmatpush1.bf16.msra.mxu1 %v11913_v58  ;;  %v11987_v0 = vld [vmem:[#allocation16 + $0x98c] ss:$16 sps:$4 sm:$0xff]   ;;  %v11982_v58 = vld [vmem:[#allocation16 + $0x980] ss:$16 sps:$4 sm:$0xff]  }
 0x6d1   :  { %6896 = vmatprep.mubr.bf16.mxu0 %v14692_v59  ;;  %6939 = vmatprep.mubr.bf16.mxu1 %v14692_v59 }
 0x6d2   :  { %6866 = vmatprep.subr.bf16.mxu0 %v11918_v47  ;;  %6909 = vmatprep.subr.bf16.mxu1 %v11921_v6  ;;  %v11985_v47 = vld [vmem:[#allocation16 + $0x988] ss:$16 sps:$4 sm:$0xff]   ;;  %v11990_v6 = vld [vmem:[#allocation16 + $0x9a4] ss:$16 sps:$4 sm:$0xff]  }
 0x6d4   :  { %6867 = vmatpush1.bf16.msra.mxu0 %v11916_v15  ;;  %6910 = vmatpush1.bf16.msra.mxu1 %v11919_v24  ;;  %v11993_v15 = vld [vmem:[#allocation16 + $0x9ac] ss:$16 sps:$4 sm:$0xff]   ;;  %v11988_v24 = vld [vmem:[#allocation16 + $0x9a0] ss:$16 sps:$4 sm:$0xff]  }
 0x6d5   :  { %6868 = vmatprep.subr.bf16.mxu0 %v11924_v48  ;;  %6911 = vmatprep.subr.bf16.mxu1 %v11927_v2  ;;  %v11991_v48 = vld [vmem:[#allocation16 + $0x9a8] ss:$16 sps:$4 sm:$0xff]   ;;  %v11996_v2 = vld [vmem:[#allocation16 + $0x9c4] ss:$16 sps:$4 sm:$0xff]  }
 0x6d8   :  { %6869 = vmatpush1.bf16.msra.mxu0 %v11922_v52  ;;  %6912 = vmatpush1.bf16.msra.mxu1 %v11925_v50  ;;  %v11999_v52 = vld [vmem:[#allocation16 + $0x9cc] ss:$16 sps:$4 sm:$0xff]   ;;  %v11994_v50 = vld [vmem:[#allocation16 + $0x9c0] ss:$16 sps:$4 sm:$0xff]  }
 0x6d9   :  { %6870 = vmatprep.subr.bf16.mxu0 %v11930_v49  ;;  %6913 = vmatprep.subr.bf16.mxu1 %v11933_v25  ;;  %v11997_v49 = vld [vmem:[#allocation16 + $0x9c8] ss:$16 sps:$4 sm:$0xff]   ;;  %v12002_v25 = vld [vmem:[#allocation16 + $0x9e4] ss:$16 sps:$4 sm:$0xff]  }
 0x6dc   :  { %6871 = vmatpush1.bf16.msra.mxu0 %v11928_v5  ;;  %6914 = vmatpush1.bf16.msra.mxu1 %v11931_v42  ;;  %v12005_v5 = vld [vmem:[#allocation16 + $0x9ec] ss:$16 sps:$4 sm:$0xff]   ;;  %v12000_v42 = vld [vmem:[#allocation16 + $0x9e0] ss:$16 sps:$4 sm:$0xff]  }
 0x6dd   :  { %6872 = vmatprep.subr.bf16.mxu0 %v11936_v34  ;;  %6915 = vmatprep.subr.bf16.mxu1 %v11939_v10  ;;  %v12003_v34 = vld [vmem:[#allocation16 + $0x9e8] ss:$16 sps:$4 sm:$0xff]   ;;  %v14698_v10 = vpack.c.bf16 %v14650_v39, %v14644_v16 }
 0x6e0   :  { %6873 = vmatpush1.bf16.msra.mxu0 %v11934_v3  ;;  %6916 = vmatpush1.bf16.msra.mxu1 %v11937_v40  ;;  %v13175_v3 = vld [vmem:[#allocation10 + $0x4] ss:$24 sps:$4 sm:$0xff]  }
 0x6e1   :  { %6874 = vmatprep.subr.bf16.mxu0 %v11942_v21  ;;  %6917 = vmatprep.subr.bf16.mxu1 %v11945_v12  ;;  %v13176_v40 = vld [vmem:[#allocation10 + $0xc] ss:$24 sps:$4 sm:$0xff]   ;;  %v13177_v21 = vld [vmem:[#allocation10] ss:$24 sps:$4 sm:$0xff]  }
 0x6e2   :  { %v13178_v12 = vld [vmem:[#allocation10 + $0x8] ss:$24 sps:$4 sm:$0xff]  }
 0x6e4   :  { %6875 = vmatpush1.bf16.msra.mxu0 %v11940_v45  ;;  %6918 = vmatpush1.bf16.msra.mxu1 %v11943_v11  ;;  %v13179_v45 = vld [vmem:[#allocation10 + $0x34] ss:$24 sps:$4 sm:$0xff]  }
 0x6e5   :  { %6876 = vmatprep.subr.bf16.mxu0 %v11948_v41  ;;  %6919 = vmatprep.subr.bf16.mxu1 %v11951_v19  ;;  %v13180_v11 = vld [vmem:[#allocation10 + $0x3c] ss:$24 sps:$4 sm:$0xff]   ;;  %v13181_v41 = vld [vmem:[#allocation10 + $0x30] ss:$24 sps:$4 sm:$0xff]  }
 0x6e6   :  { %v13182_v19 = vld [vmem:[#allocation10 + $0x38] ss:$24 sps:$4 sm:$0xff]  }
 0x6e8   :  { %6877 = vmatpush1.bf16.msra.mxu0 %v11946_v32  ;;  %6920 = vmatpush1.bf16.msra.mxu1 %v11949_v60  ;;  %v13183_v32 = vld [vmem:[#allocation10 + $0x64] ss:$24 sps:$4 sm:$0xff]  }
 0x6e9   :  { %6878 = vmatprep.subr.bf16.mxu0 %v11954_v28  ;;  %6921 = vmatprep.subr.bf16.mxu1 %v11957_v7  ;;  %v13184_v60 = vld [vmem:[#allocation10 + $0x6c] ss:$24 sps:$4 sm:$0xff]   ;;  %v13185_v28 = vld [vmem:[#allocation10 + $0x60] ss:$24 sps:$4 sm:$0xff]  }
 0x6ea   :  { %v13186_v7 = vld [vmem:[#allocation10 + $0x68] ss:$24 sps:$4 sm:$0xff]  }
 0x6ec   :  { %6879 = vmatpush1.bf16.msra.mxu0 %v11952_v61  ;;  %6922 = vmatpush1.bf16.msra.mxu1 %v11955_v4  ;;  %v13187_v61 = vld [vmem:[#allocation10 + $0x94] ss:$24 sps:$4 sm:$0xff]  }
 0x6ed   :  { %6880 = vmatprep.subr.bf16.mxu0 %v11960_v51  ;;  %6923 = vmatprep.subr.bf16.mxu1 %v11963_v63  ;;  %v13188_v4 = vld [vmem:[#allocation10 + $0x9c] ss:$24 sps:$4 sm:$0xff]   ;;  %v13189_v51 = vld [vmem:[#allocation10 + $0x90] ss:$24 sps:$4 sm:$0xff]  }
 0x6ee   :  { %v13190_v63 = vld [vmem:[#allocation10 + $0x98] ss:$24 sps:$4 sm:$0xff]  }
 0x6f0   :  { %6881 = vmatpush1.bf16.msra.mxu0 %v11958_v20  ;;  %6924 = vmatpush1.bf16.msra.mxu1 %v11961_v8  ;;  %v13191_v20 = vld [vmem:[#allocation10 + $0xc4] ss:$24 sps:$4 sm:$0xff]  }
 0x6f1   :  { %6882 = vmatprep.subr.bf16.mxu0 %v11966_v44  ;;  %6925 = vmatprep.subr.bf16.mxu1 %v11969_v54  ;;  %v13192_v8 = vld [vmem:[#allocation10 + $0xcc] ss:$24 sps:$4 sm:$0xff]   ;;  %v13193_v44 = vld [vmem:[#allocation10 + $0xc0] ss:$24 sps:$4 sm:$0xff]  }
 0x6f2   :  { %v13194_v54 = vld [vmem:[#allocation10 + $0xc8] ss:$24 sps:$4 sm:$0xff]  }
 0x6f4   :  { %6883 = vmatpush1.bf16.msra.mxu0 %v11964_v43  ;;  %6926 = vmatpush1.bf16.msra.mxu1 %v11967_v18  ;;  %v13195_v43 = vld [vmem:[#allocation10 + $0xf4] ss:$24 sps:$4 sm:$0xff]  }
 0x6f5   :  { %6884 = vmatprep.subr.bf16.mxu0 %v11972_v9  ;;  %6927 = vmatprep.subr.bf16.mxu1 %v11975_v23  ;;  %v13196_v18 = vld [vmem:[#allocation10 + $0xfc] ss:$24 sps:$4 sm:$0xff]   ;;  %v13197_v9 = vld [vmem:[#allocation10 + $0xf0] ss:$24 sps:$4 sm:$0xff]  }
 0x6f6   :  { %v13198_v23 = vld [vmem:[#allocation10 + $0xf8] ss:$24 sps:$4 sm:$0xff]  }
 0x6f8   :  { %6885 = vmatpush1.bf16.msra.mxu0 %v11970_v62  ;;  %6928 = vmatpush1.bf16.msra.mxu1 %v11973_v38  ;;  %v13199_v62 = vld [vmem:[#allocation10 + $0x124] ss:$24 sps:$4 sm:$0xff]  }
 0x6f9   :  { %6886 = vmatprep.subr.bf16.mxu0 %v11978_v26  ;;  %6929 = vmatprep.subr.bf16.mxu1 %v11981_v36  ;;  %v13200_v38 = vld [vmem:[#allocation10 + $0x12c] ss:$24 sps:$4 sm:$0xff]   ;;  %v13201_v26 = vld [vmem:[#allocation10 + $0x120] ss:$24 sps:$4 sm:$0xff]  }
 0x6fa   :  { %v13202_v36 = vld [vmem:[#allocation10 + $0x128] ss:$24 sps:$4 sm:$0xff]  }
 0x6fc   :  { %6887 = vmatpush1.bf16.msra.mxu0 %v11976_v1  ;;  %6930 = vmatpush1.bf16.msra.mxu1 %v11979_v53  ;;  %v13203_v1 = vld [vmem:[#allocation10 + $0x154] ss:$24 sps:$4 sm:$0xff]  }
 0x6fd   :  { %6888 = vmatprep.subr.bf16.mxu0 %v11984_v17  ;;  %6931 = vmatprep.subr.bf16.mxu1 %v11987_v0  ;;  %v13204_v53 = vld [vmem:[#allocation10 + $0x15c] ss:$24 sps:$4 sm:$0xff]   ;;  %v13205_v17 = vld [vmem:[#allocation10 + $0x150] ss:$24 sps:$4 sm:$0xff]  }
 0x6fe   :  { %v13206_v0 = vld [vmem:[#allocation10 + $0x158] ss:$24 sps:$4 sm:$0xff]  }
 0x700   :  { %6889 = vmatpush1.bf16.msra.mxu0 %v11982_v58  ;;  %6932 = vmatpush1.bf16.msra.mxu1 %v11985_v47  ;;  %v13207_v58 = vld [vmem:[#allocation10 + $0x184] ss:$24 sps:$4 sm:$0xff]  }
 0x701   :  { %6890 = vmatprep.subr.bf16.mxu0 %v11990_v6  ;;  %6933 = vmatprep.subr.bf16.mxu1 %v11993_v15  ;;  %v13208_v47 = vld [vmem:[#allocation10 + $0x18c] ss:$24 sps:$4 sm:$0xff]   ;;  %v13209_v6 = vld [vmem:[#allocation10 + $0x180] ss:$24 sps:$4 sm:$0xff]  }
 0x702   :  { %v13210_v15 = vld [vmem:[#allocation10 + $0x188] ss:$24 sps:$4 sm:$0xff]  }
 0x704   :  { %6891 = vmatpush1.bf16.msra.mxu0 %v11988_v24  ;;  %6934 = vmatpush1.bf16.msra.mxu1 %v11991_v48  ;;  %v13211_v24 = vld [vmem:[#allocation10 + $0x1b4] ss:$24 sps:$4 sm:$0xff]  }
 0x705   :  { %6892 = vmatprep.subr.bf16.mxu0 %v11996_v2  ;;  %6935 = vmatprep.subr.bf16.mxu1 %v11999_v52  ;;  %v13212_v48 = vld [vmem:[#allocation10 + $0x1bc] ss:$24 sps:$4 sm:$0xff]   ;;  %v13213_v2 = vld [vmem:[#allocation10 + $0x1b0] ss:$24 sps:$4 sm:$0xff]  }
 0x706   :  { %v13214_v52 = vld [vmem:[#allocation10 + $0x1b8] ss:$24 sps:$4 sm:$0xff]  }
 0x708   :  { %6893 = vmatpush1.bf16.msra.mxu0 %v11994_v50  ;;  %6936 = vmatpush1.bf16.msra.mxu1 %v11997_v49  ;;  %v13215_v50 = vld [vmem:[#allocation10 + $0x1e4] ss:$24 sps:$4 sm:$0xff]  }
 0x709   :  { %6894 = vmatprep.subr.bf16.mxu0 %v12002_v25  ;;  %6937 = vmatprep.subr.bf16.mxu1 %v12005_v5  ;;  %v13216_v49 = vld [vmem:[#allocation10 + $0x1ec] ss:$24 sps:$4 sm:$0xff]   ;;  %v13217_v25 = vld [vmem:[#allocation10 + $0x1e0] ss:$24 sps:$4 sm:$0xff]  }
 0x70a   :  { %v13218_v5 = vld [vmem:[#allocation10 + $0x1e8] ss:$24 sps:$4 sm:$0xff]  }
 0x70c   :  { %6895 = vmatpush1.bf16.msra.mxu0 %v12000_v42  ;;  %6938 = vmatpush1.bf16.msra.mxu1 %v12003_v34  ;;  %v13219_v42 = vld [vmem:[#allocation10 + $0x214] ss:$24 sps:$4 sm:$0xff]  }
 0x70d   :  { %6978 = vmatprep.subr.bf16.mxu0 %v13175_v3  ;;  %7021 = vmatprep.subr.bf16.mxu1 %v13176_v40  ;;  %v13220_v34 = vld [vmem:[#allocation10 + $0x21c] ss:$24 sps:$4 sm:$0xff]   ;;  %v13221_v3 = vld [vmem:[#allocation10 + $0x210] ss:$24 sps:$4 sm:$0xff]  }
 0x70e   :  { %v13222_v40 = vld [vmem:[#allocation10 + $0x218] ss:$24 sps:$4 sm:$0xff]  }
 0x70f   :  { %6897 = vmatmul.mubr.bf16.vlgmr.msra.gmra.mrb[72].mxu0 %v14698_v10  ;;  %6940 = vmatmul.mubr.bf16.vlgmr.msra.gmra.mrb[72].mxu1 %v14698_v10 }
 0x710   :  { %6979 = vmatpush1.bf16.msra.mxu0 %v13177_v21  ;;  %7010 = vmatprep.mubr.bf16.mxu0 %v14692_v59  ;;  %v13223_v21 = vld [vmem:[#allocation10 + $0x244] ss:$24 sps:$4 sm:$0xff]  }
 0x711   :  { %7022 = vmatpush1.bf16.msra.mxu1 %v13178_v12  ;;  %7053 = vmatprep.mubr.bf16.mxu1 %v14692_v59  ;;  %v13224_v12 = vld [vmem:[#allocation10 + $0x24c] ss:$24 sps:$4 sm:$0xff]  }
 0x712   :  { %6980 = vmatprep.subr.bf16.mxu0 %v13179_v45  ;;  %7023 = vmatprep.subr.bf16.mxu1 %v13180_v11  ;;  %v13225_v45 = vld [vmem:[#allocation10 + $0x240] ss:$24 sps:$4 sm:$0xff]  }
 0x713   :  { %v13226_v11 = vld [vmem:[#allocation10 + $0x248] ss:$24 sps:$4 sm:$0xff]  }
 0x714   :  { %6981 = vmatpush1.bf16.msra.mxu0 %v13181_v41  ;;  %v13227_v41 = vld [vmem:[#allocation10 + $0x274] ss:$24 sps:$4 sm:$0xff]  }
 0x715   :  { %7024 = vmatpush1.bf16.msra.mxu1 %v13182_v19  ;;  %6982 = vmatprep.subr.bf16.mxu0 %v13183_v32  ;;  %v13228_v19 = vld [vmem:[#allocation10 + $0x27c] ss:$24 sps:$4 sm:$0xff]   ;;  %v13229_v32 = vld [vmem:[#allocation10 + $0x270] ss:$24 sps:$4 sm:$0xff]  }
 0x716   :  { %7025 = vmatprep.subr.bf16.mxu1 %v13184_v60  ;;  %v13230_v60 = vld [vmem:[#allocation10 + $0x278] ss:$24 sps:$4 sm:$0xff]  }
 0x718   :  { %6983 = vmatpush1.bf16.msra.mxu0 %v13185_v28  ;;  %v13231_v28 = vld [vmem:[#allocation10 + $0x2a4] ss:$24 sps:$4 sm:$0xff]  }
 0x719   :  { %7026 = vmatpush1.bf16.msra.mxu1 %v13186_v7  ;;  %6984 = vmatprep.subr.bf16.mxu0 %v13187_v61  ;;  %v13232_v7 = vld [vmem:[#allocation10 + $0x2ac] ss:$24 sps:$4 sm:$0xff]   ;;  %v13233_v61 = vld [vmem:[#allocation10 + $0x2a0] ss:$24 sps:$4 sm:$0xff]  }
 0x71a   :  { %7027 = vmatprep.subr.bf16.mxu1 %v13188_v4  ;;  %v13234_v4 = vld [vmem:[#allocation10 + $0x2a8] ss:$24 sps:$4 sm:$0xff]  }
 0x71c   :  { %6985 = vmatpush1.bf16.msra.mxu0 %v13189_v51  ;;  %v13235_v51 = vld [vmem:[#allocation10 + $0x2d4] ss:$24 sps:$4 sm:$0xff]  }
 0x71d   :  { %7028 = vmatpush1.bf16.msra.mxu1 %v13190_v63  ;;  %6986 = vmatprep.subr.bf16.mxu0 %v13191_v20  ;;  %v13236_v63 = vld [vmem:[#allocation10 + $0x2dc] ss:$24 sps:$4 sm:$0xff]   ;;  %v13237_v20 = vld [vmem:[#allocation10 + $0x2d0] ss:$24 sps:$4 sm:$0xff]  }
 0x71e   :  { %7029 = vmatprep.subr.bf16.mxu1 %v13192_v8  ;;  %v13238_v8 = vld [vmem:[#allocation10 + $0x2d8] ss:$24 sps:$4 sm:$0xff]  }
 0x720   :  { %6987 = vmatpush1.bf16.msra.mxu0 %v13193_v44  ;;  %v13239_v44 = vld [vmem:[#allocation10 + $0x14] ss:$24 sps:$4 sm:$0xff]  }
 0x721   :  { %7030 = vmatpush1.bf16.msra.mxu1 %v13194_v54  ;;  %6988 = vmatprep.subr.bf16.mxu0 %v13195_v43  ;;  %v13240_v54 = vld [vmem:[#allocation12 + $0x4] ss:$24 sps:$4 sm:$0xff]   ;;  %v13241_v43 = vld [vmem:[#allocation10 + $0x10] ss:$24 sps:$4 sm:$0xff]  }
 0x722   :  { %7031 = vmatprep.subr.bf16.mxu1 %v13196_v18  ;;  %v13242_v18 = vld [vmem:[#allocation12] ss:$24 sps:$4 sm:$0xff]  }
 0x724   :  { %6989 = vmatpush1.bf16.msra.mxu0 %v13197_v9  ;;  %v13243_v9 = vld [vmem:[#allocation10 + $0x44] ss:$24 sps:$4 sm:$0xff]  }
 0x725   :  { %7032 = vmatpush1.bf16.msra.mxu1 %v13198_v23  ;;  %6990 = vmatprep.subr.bf16.mxu0 %v13199_v62  ;;  %v13244_v23 = vld [vmem:[#allocation12 + $0x34] ss:$24 sps:$4 sm:$0xff]   ;;  %v13245_v62 = vld [vmem:[#allocation10 + $0x40] ss:$24 sps:$4 sm:$0xff]  }
 0x726   :  { %7033 = vmatprep.subr.bf16.mxu1 %v13200_v38  ;;  %v13246_v38 = vld [vmem:[#allocation12 + $0x30] ss:$24 sps:$4 sm:$0xff]  }
 0x728   :  { %6991 = vmatpush1.bf16.msra.mxu0 %v13201_v26  ;;  %v13247_v26 = vld [vmem:[#allocation10 + $0x74] ss:$24 sps:$4 sm:$0xff]  }
 0x729   :  { %7034 = vmatpush1.bf16.msra.mxu1 %v13202_v36  ;;  %6992 = vmatprep.subr.bf16.mxu0 %v13203_v1  ;;  %v13248_v36 = vld [vmem:[#allocation12 + $0x64] ss:$24 sps:$4 sm:$0xff]   ;;  %v13249_v1 = vld [vmem:[#allocation10 + $0x70] ss:$24 sps:$4 sm:$0xff]  }
 0x72a   :  { %7035 = vmatprep.subr.bf16.mxu1 %v13204_v53  ;;  %v13250_v53 = vld [vmem:[#allocation12 + $0x60] ss:$24 sps:$4 sm:$0xff]  }
 0x72c   :  { %6993 = vmatpush1.bf16.msra.mxu0 %v13205_v17  ;;  %v13252_v17 = vld [vmem:[#allocation12 + $0x94] ss:$24 sps:$4 sm:$0xff]  }
 0x72d   :  { %7036 = vmatpush1.bf16.msra.mxu1 %v13206_v0  ;;  %6994 = vmatprep.subr.bf16.mxu0 %v13207_v58  ;;  %v13253_v0 = vld [vmem:[#allocation10 + $0xa0] ss:$24 sps:$4 sm:$0xff]   ;;  %v13254_v58 = vld [vmem:[#allocation12 + $0x90] ss:$24 sps:$4 sm:$0xff]  }
 0x72e   :  { %7037 = vmatprep.subr.bf16.mxu1 %v13208_v47  ;;  %v13255_v47 = vld [vmem:[#allocation10 + $0xd4] ss:$24 sps:$4 sm:$0xff]  }
 0x730   :  { %6995 = vmatpush1.bf16.msra.mxu0 %v13209_v6  ;;  %v13256_v6 = vld [vmem:[#allocation12 + $0xc4] ss:$24 sps:$4 sm:$0xff]  }
 0x731   :  { %7038 = vmatpush1.bf16.msra.mxu1 %v13210_v15  ;;  %6996 = vmatprep.subr.bf16.mxu0 %v13211_v24  ;;  %v13257_v15 = vld [vmem:[#allocation10 + $0xd0] ss:$24 sps:$4 sm:$0xff]   ;;  %v13258_v24 = vld [vmem:[#allocation12 + $0xc0] ss:$24 sps:$4 sm:$0xff]  }
 0x732   :  { %7039 = vmatprep.subr.bf16.mxu1 %v13212_v48  ;;  %v13259_v48 = vld [vmem:[#allocation10 + $0x104] ss:$24 sps:$4 sm:$0xff]  }
 0x734   :  { %6997 = vmatpush1.bf16.msra.mxu0 %v13213_v2  ;;  %v13260_v2 = vld [vmem:[#allocation12 + $0xf4] ss:$24 sps:$4 sm:$0xff]  }
 0x735   :  { %7040 = vmatpush1.bf16.msra.mxu1 %v13214_v52  ;;  %6998 = vmatprep.subr.bf16.mxu0 %v13215_v50  ;;  %v13261_v52 = vld [vmem:[#allocation10 + $0x100] ss:$24 sps:$4 sm:$0xff]   ;;  %v13262_v50 = vld [vmem:[#allocation12 + $0xf0] ss:$24 sps:$4 sm:$0xff]  }
 0x736   :  { %7041 = vmatprep.subr.bf16.mxu1 %v13216_v49  ;;  %v13263_v49 = vld [vmem:[#allocation10 + $0x134] ss:$24 sps:$4 sm:$0xff]  }
 0x738   :  { %6999 = vmatpush1.bf16.msra.mxu0 %v13217_v25  ;;  %v13264_v25 = vld [vmem:[#allocation12 + $0x124] ss:$24 sps:$4 sm:$0xff]  }
 0x739   :  { %7042 = vmatpush1.bf16.msra.mxu1 %v13218_v5  ;;  %7000 = vmatprep.subr.bf16.mxu0 %v13219_v42  ;;  %v13265_v5 = vld [vmem:[#allocation10 + $0x130] ss:$24 sps:$4 sm:$0xff]   ;;  %v13266_v42 = vld [vmem:[#allocation12 + $0x120] ss:$24 sps:$4 sm:$0xff]  }
 0x73a   :  { %7043 = vmatprep.subr.bf16.mxu1 %v13220_v34  ;;  %v13267_v34 = vld [vmem:[#allocation10 + $0x164] ss:$24 sps:$4 sm:$0xff]  }
 0x73c   :  { %7001 = vmatpush1.bf16.msra.mxu0 %v13221_v3  ;;  %v13268_v3 = vld [vmem:[#allocation12 + $0x154] ss:$24 sps:$4 sm:$0xff]  }
 0x73d   :  { %7044 = vmatpush1.bf16.msra.mxu1 %v13222_v40  ;;  %7002 = vmatprep.subr.bf16.mxu0 %v13223_v21  ;;  %v13269_v40 = vld [vmem:[#allocation10 + $0x160] ss:$24 sps:$4 sm:$0xff]   ;;  %v13270_v21 = vld [vmem:[#allocation12 + $0x150] ss:$24 sps:$4 sm:$0xff]  }
 0x73e   :  { %7045 = vmatprep.subr.bf16.mxu1 %v13224_v12  ;;  %v13271_v12 = vld [vmem:[#allocation10 + $0x194] ss:$24 sps:$4 sm:$0xff]  }
 0x740   :  { %7003 = vmatpush1.bf16.msra.mxu0 %v13225_v45  ;;  %v13272_v45 = vld [vmem:[#allocation12 + $0x184] ss:$24 sps:$4 sm:$0xff]  }
 0x741   :  { %7046 = vmatpush1.bf16.msra.mxu1 %v13226_v11  ;;  %7004 = vmatprep.subr.bf16.mxu0 %v13227_v41  ;;  %v13273_v11 = vld [vmem:[#allocation10 + $0x190] ss:$24 sps:$4 sm:$0xff]   ;;  %v13274_v41 = vld [vmem:[#allocation12 + $0x180] ss:$24 sps:$4 sm:$0xff]  }
 0x742   :  { %7047 = vmatprep.subr.bf16.mxu1 %v13228_v19  ;;  %v13275_v19 = vld [vmem:[#allocation10 + $0x1c4] ss:$24 sps:$4 sm:$0xff]  }
 0x744   :  { %7005 = vmatpush1.bf16.msra.mxu0 %v13229_v32  ;;  %v13276_v32 = vld [vmem:[#allocation12 + $0x1b4] ss:$24 sps:$4 sm:$0xff]  }
 0x745   :  { %7048 = vmatpush1.bf16.msra.mxu1 %v13230_v60  ;;  %7006 = vmatprep.subr.bf16.mxu0 %v13231_v28  ;;  %v13277_v60 = vld [vmem:[#allocation10 + $0x1c0] ss:$24 sps:$4 sm:$0xff]   ;;  %v13278_v28 = vld [vmem:[#allocation12 + $0x1b0] ss:$24 sps:$4 sm:$0xff]  }
 0x746   :  { %7049 = vmatprep.subr.bf16.mxu1 %v13232_v7  ;;  %v13279_v7 = vld [vmem:[#allocation10 + $0x1f4] ss:$24 sps:$4 sm:$0xff]  }
 0x748   :  { %7007 = vmatpush1.bf16.msra.mxu0 %v13233_v61  ;;  %v13280_v61 = vld [vmem:[#allocation12 + $0x1e4] ss:$24 sps:$4 sm:$0xff]  }
 0x749   :  { %7050 = vmatpush1.bf16.msra.mxu1 %v13234_v4  ;;  %7008 = vmatprep.subr.bf16.mxu0 %v13235_v51  ;;  %v13281_v4 = vld [vmem:[#allocation10 + $0x1f0] ss:$24 sps:$4 sm:$0xff]   ;;  %v13282_v51 = vld [vmem:[#allocation12 + $0x1e0] ss:$24 sps:$4 sm:$0xff]  }
 0x74a   :  { %7051 = vmatprep.subr.bf16.mxu1 %v13236_v63  ;;  %v13283_v63 = vld [vmem:[#allocation10 + $0x224] ss:$24 sps:$4 sm:$0xff]  }
 0x74c   :  { %7009 = vmatpush1.bf16.msra.mxu0 %v13237_v20  ;;  %v13284_v20 = vld [vmem:[#allocation12 + $0x214] ss:$24 sps:$4 sm:$0xff]  }
 0x74d   :  { %7052 = vmatpush1.bf16.msra.mxu1 %v13238_v8  ;;  %7064 = vmatprep.subr.bf16.mxu0 %v13239_v44  ;;  %v13285_v8 = vld [vmem:[#allocation10 + $0x220] ss:$24 sps:$4 sm:$0xff]   ;;  %v13286_v44 = vld [vmem:[#allocation12 + $0x210] ss:$24 sps:$4 sm:$0xff]  }
 0x74e   :  { %7207 = vmatprep.subr.bf16.mxu1 %v13240_v54  ;;  %v13287_v54 = vld [vmem:[#allocation10 + $0x254] ss:$24 sps:$4 sm:$0xff]  }
 0x74f   :  { %7011 = vmatmul.mubr.bf16.vlgmr.msra.gmra.mrb[100].mxu0 %v14698_v10 }
 0x750   :  { %7054 = vmatmul.mubr.bf16.vlgmr.msra.gmra.mrb[100].mxu1 %v14698_v10  ;;  %7065 = vmatpush1.bf16.msra.mxu0 %v13241_v43  ;;  %v13288_v43 = vld [vmem:[#allocation12 + $0x244] ss:$24 sps:$4 sm:$0xff]  }
 0x751   :  { %7096 = vmatprep.mubr.bf16.mxu0 %v14692_v59  ;;  %7208 = vmatpush1.bf16.msra.mxu1 %v13242_v18  ;;  %v13251_v59 = vld [vmem:[#allocation10 + $0xa4] ss:$24 sps:$4 sm:$0xff]   ;;  %v13289_v18 = vld [vmem:[#allocation10 + $0x250] ss:$24 sps:$4 sm:$0xff]  }
 0x752   :  { %7239 = vmatprep.mubr.bf16.mxu1 %v14680_v35  ;;  %7066 = vmatprep.subr.bf16.mxu0 %v13243_v9  ;;  %v13290_v9 = vld [vmem:[#allocation12 + $0x240] ss:$24 sps:$4 sm:$0xff]  }
 0x753   :  { %7209 = vmatprep.subr.bf16.mxu1 %v13244_v23  ;;  %v13291_v23 = vld [vmem:[#allocation10 + $0x284] ss:$24 sps:$4 sm:$0xff]  }
 0x754   :  { %7067 = vmatpush1.bf16.msra.mxu0 %v13245_v62  ;;  %v13292_v62 = vld [vmem:[#allocation12 + $0x274] ss:$24 sps:$4 sm:$0xff]  }
 0x755   :  { %7210 = vmatpush1.bf16.msra.mxu1 %v13246_v38  ;;  %7068 = vmatprep.subr.bf16.mxu0 %v13247_v26  ;;  %v13293_v38 = vld [vmem:[#allocation10 + $0x280] ss:$24 sps:$4 sm:$0xff]   ;;  %v13294_v26 = vld [vmem:[#allocation12 + $0x270] ss:$24 sps:$4 sm:$0xff]  }
 0x756   :  { %7211 = vmatprep.subr.bf16.mxu1 %v13248_v36  ;;  %v13295_v36 = vld [vmem:[#allocation10 + $0x2b4] ss:$24 sps:$4 sm:$0xff]  }
 0x758   :  { %7069 = vmatpush1.bf16.msra.mxu0 %v13249_v1  ;;  %v13296_v1 = vld [vmem:[#allocation12 + $0x2a4] ss:$24 sps:$4 sm:$0xff]  }
 0x759   :  { %7212 = vmatpush1.bf16.msra.mxu1 %v13250_v53  ;;  %7070 = vmatprep.subr.bf16.mxu0 %v13251_v59  ;;  %v13297_v53 = vld [vmem:[#allocation10 + $0x2b0] ss:$24 sps:$4 sm:$0xff]   ;;  %v13298_v59 = vld [vmem:[#allocation12 + $0x2a0] ss:$24 sps:$4 sm:$0xff]  }
 0x75a   :  { %7213 = vmatprep.subr.bf16.mxu1 %v13252_v17  ;;  %v13299_v17 = vld [vmem:[#allocation10 + $0x2e4] ss:$24 sps:$4 sm:$0xff]  }
 0x75c   :  { %7071 = vmatpush1.bf16.msra.mxu0 %v13253_v0  ;;  %v13300_v0 = vld [vmem:[#allocation12 + $0x2d4] ss:$24 sps:$4 sm:$0xff]  }
 0x75d   :  { %7214 = vmatpush1.bf16.msra.mxu1 %v13254_v58  ;;  %7072 = vmatprep.subr.bf16.mxu0 %v13255_v47  ;;  %v13301_v58 = vld [vmem:[#allocation10 + $0x2e0] ss:$24 sps:$4 sm:$0xff]   ;;  %v13302_v47 = vld [vmem:[#allocation12 + $0x2d0] ss:$24 sps:$4 sm:$0xff]  }
 0x75e   :  { %7215 = vmatprep.subr.bf16.mxu1 %v13256_v6  ;;  %v13303_v6 = vld [vmem:[#allocation12 + $0xc] ss:$24 sps:$4 sm:$0xff]  }
 0x760   :  { %7073 = vmatpush1.bf16.msra.mxu0 %v13257_v15  ;;  %v13304_v15 = vld [vmem:[#allocation12 + $0x14] ss:$24 sps:$4 sm:$0xff]  }
 0x761   :  { %7216 = vmatpush1.bf16.msra.mxu1 %v13258_v24  ;;  %7074 = vmatprep.subr.bf16.mxu0 %v13259_v48  ;;  %v13305_v24 = vld [vmem:[#allocation12 + $0x8] ss:$24 sps:$4 sm:$0xff]  }
 0x762   :  { %7217 = vmatprep.subr.bf16.mxu1 %v13260_v2  ;;  %v13306_v48 = vld [vmem:[#allocation12 + $0x10] ss:$24 sps:$4 sm:$0xff]   ;;  %v13307_v2 = vld [vmem:[#allocation12 + $0x3c] ss:$24 sps:$4 sm:$0xff]  }
 0x764   :  { %7075 = vmatpush1.bf16.msra.mxu0 %v13261_v52  ;;  %v13308_v52 = vld [vmem:[#allocation12 + $0x44] ss:$24 sps:$4 sm:$0xff]  }
 0x765   :  { %7218 = vmatpush1.bf16.msra.mxu1 %v13262_v50  ;;  %7076 = vmatprep.subr.bf16.mxu0 %v13263_v49  ;;  %v13309_v50 = vld [vmem:[#allocation12 + $0x38] ss:$24 sps:$4 sm:$0xff]  }
 0x766   :  { %7219 = vmatprep.subr.bf16.mxu1 %v13264_v25  ;;  %v13310_v49 = vld [vmem:[#allocation12 + $0x40] ss:$24 sps:$4 sm:$0xff]   ;;  %v13311_v25 = vld [vmem:[#allocation12 + $0x6c] ss:$24 sps:$4 sm:$0xff]  }
 0x768   :  { %7077 = vmatpush1.bf16.msra.mxu0 %v13265_v5  ;;  %v13313_v5 = vld [vmem:[#allocation12 + $0x68] ss:$24 sps:$4 sm:$0xff]  }
 0x769   :  { %7220 = vmatpush1.bf16.msra.mxu1 %v13266_v42  ;;  %7078 = vmatprep.subr.bf16.mxu0 %v13267_v34  ;;  %v13314_v42 = vld [vmem:[#allocation12 + $0x70] ss:$24 sps:$4 sm:$0xff]   ;;  %v13315_v34 = vld [vmem:[#allocation12 + $0x9c] ss:$24 sps:$4 sm:$0xff]  }
 0x76a   :  { %7221 = vmatprep.subr.bf16.mxu1 %v13268_v3  ;;  %v13316_v3 = vld [vmem:[#allocation12 + $0xa4] ss:$24 sps:$4 sm:$0xff]  }
 0x76c   :  { %7079 = vmatpush1.bf16.msra.mxu0 %v13269_v40  ;;  %v13318_v40 = vld [vmem:[#allocation12 + $0xa0] ss:$24 sps:$4 sm:$0xff]  }
 0x76d   :  { %7222 = vmatpush1.bf16.msra.mxu1 %v13270_v21  ;;  %7080 = vmatprep.subr.bf16.mxu0 %v13271_v12  ;;  %v13319_v21 = vld [vmem:[#allocation12 + $0xcc] ss:$24 sps:$4 sm:$0xff]  }
 0x76e   :  { %7223 = vmatprep.subr.bf16.mxu1 %v13272_v45  ;;  %v13320_v12 = vld [vmem:[#allocation12 + $0xd4] ss:$24 sps:$4 sm:$0xff]   ;;  %v13321_v45 = vld [vmem:[#allocation12 + $0xc8] ss:$24 sps:$4 sm:$0xff]  }
 0x770   :  { %7081 = vmatpush1.bf16.msra.mxu0 %v13273_v11  ;;  %v13322_v11 = vld [vmem:[#allocation12 + $0xd0] ss:$24 sps:$4 sm:$0xff]  }
 0x771   :  { %7224 = vmatpush1.bf16.msra.mxu1 %v13274_v41  ;;  %7082 = vmatprep.subr.bf16.mxu0 %v13275_v19  ;;  %v13323_v41 = vld [vmem:[#allocation12 + $0xfc] ss:$24 sps:$4 sm:$0xff]  }
 0x772   :  { %7225 = vmatprep.subr.bf16.mxu1 %v13276_v32  ;;  %v13324_v19 = vld [vmem:[#allocation12 + $0x104] ss:$24 sps:$4 sm:$0xff]   ;;  %v13325_v32 = vld [vmem:[#allocation12 + $0xf8] ss:$24 sps:$4 sm:$0xff]  }
 0x774   :  { %7083 = vmatpush1.bf16.msra.mxu0 %v13277_v60  ;;  %v13326_v60 = vld [vmem:[#allocation12 + $0x100] ss:$24 sps:$4 sm:$0xff]  }
 0x775   :  { %7226 = vmatpush1.bf16.msra.mxu1 %v13278_v28  ;;  %7084 = vmatprep.subr.bf16.mxu0 %v13279_v7  ;;  %v13327_v28 = vld [vmem:[#allocation12 + $0x12c] ss:$24 sps:$4 sm:$0xff]  }
 0x776   :  { %7227 = vmatprep.subr.bf16.mxu1 %v13280_v61  ;;  %v13328_v7 = vld [vmem:[#allocation12 + $0x134] ss:$24 sps:$4 sm:$0xff]   ;;  %v13329_v61 = vld [vmem:[#allocation12 + $0x128] ss:$24 sps:$4 sm:$0xff]  }
 0x778   :  { %7085 = vmatpush1.bf16.msra.mxu0 %v13281_v4  ;;  %v13330_v4 = vld [vmem:[#allocation12 + $0x130] ss:$24 sps:$4 sm:$0xff]  }
 0x779   :  { %7228 = vmatpush1.bf16.msra.mxu1 %v13282_v51  ;;  %7086 = vmatprep.subr.bf16.mxu0 %v13283_v63  ;;  %v13331_v51 = vld [vmem:[#allocation12 + $0x15c] ss:$24 sps:$4 sm:$0xff]  }
 0x77a   :  { %7229 = vmatprep.subr.bf16.mxu1 %v13284_v20  ;;  %v13332_v63 = vld [vmem:[#allocation12 + $0x164] ss:$24 sps:$4 sm:$0xff]   ;;  %v13333_v20 = vld [vmem:[#allocation12 + $0x158] ss:$24 sps:$4 sm:$0xff]  }
 0x77c   :  { %7087 = vmatpush1.bf16.msra.mxu0 %v13285_v8  ;;  %v13334_v8 = vld [vmem:[#allocation12 + $0x160] ss:$24 sps:$4 sm:$0xff]  }
 0x77d   :  { %7230 = vmatpush1.bf16.msra.mxu1 %v13286_v44  ;;  %7088 = vmatprep.subr.bf16.mxu0 %v13287_v54  ;;  %v13335_v44 = vld [vmem:[#allocation12 + $0x18c] ss:$24 sps:$4 sm:$0xff]  }
 0x77e   :  { %7231 = vmatprep.subr.bf16.mxu1 %v13288_v43  ;;  %v13336_v54 = vld [vmem:[#allocation12 + $0x194] ss:$24 sps:$4 sm:$0xff]   ;;  %v13337_v43 = vld [vmem:[#allocation12 + $0x188] ss:$24 sps:$4 sm:$0xff]  }
 0x780   :  { %7089 = vmatpush1.bf16.msra.mxu0 %v13289_v18  ;;  %v13338_v18 = vld [vmem:[#allocation12 + $0x190] ss:$24 sps:$4 sm:$0xff]  }
 0x781   :  { %7232 = vmatpush1.bf16.msra.mxu1 %v13290_v9  ;;  %7090 = vmatprep.subr.bf16.mxu0 %v13291_v23  ;;  %v13339_v9 = vld [vmem:[#allocation12 + $0x1bc] ss:$24 sps:$4 sm:$0xff]  }
 0x782   :  { %7233 = vmatprep.subr.bf16.mxu1 %v13292_v62  ;;  %v13340_v23 = vld [vmem:[#allocation12 + $0x1c4] ss:$24 sps:$4 sm:$0xff]   ;;  %v13341_v62 = vld [vmem:[#allocation12 + $0x1b8] ss:$24 sps:$4 sm:$0xff]  }
 0x784   :  { %7091 = vmatpush1.bf16.msra.mxu0 %v13293_v38  ;;  %v13342_v38 = vld [vmem:[#allocation12 + $0x1c0] ss:$24 sps:$4 sm:$0xff]  }
 0x785   :  { %7234 = vmatpush1.bf16.msra.mxu1 %v13294_v26  ;;  %7092 = vmatprep.subr.bf16.mxu0 %v13295_v36  ;;  %v13343_v26 = vld [vmem:[#allocation12 + $0x1ec] ss:$24 sps:$4 sm:$0xff]  }
 0x786   :  { %7235 = vmatprep.subr.bf16.mxu1 %v13296_v1  ;;  %v13344_v36 = vld [vmem:[#allocation12 + $0x1f4] ss:$24 sps:$4 sm:$0xff]   ;;  %v13345_v1 = vld [vmem:[#allocation12 + $0x1e8] ss:$24 sps:$4 sm:$0xff]  }
 0x788   :  { %7093 = vmatpush1.bf16.msra.mxu0 %v13297_v53  ;;  %v13346_v53 = vld [vmem:[#allocation12 + $0x1f0] ss:$24 sps:$4 sm:$0xff]  }
 0x789   :  { %7236 = vmatpush1.bf16.msra.mxu1 %v13298_v59  ;;  %7094 = vmatprep.subr.bf16.mxu0 %v13299_v17  ;;  %v13347_v59 = vld [vmem:[#allocation12 + $0x21c] ss:$24 sps:$4 sm:$0xff]  }
 0x78a   :  { %7237 = vmatprep.subr.bf16.mxu1 %v13300_v0  ;;  %v13348_v17 = vld [vmem:[#allocation12 + $0x224] ss:$24 sps:$4 sm:$0xff]   ;;  %v13349_v0 = vld [vmem:[#allocation12 + $0x218] ss:$24 sps:$4 sm:$0xff]  }
 0x78c   :  { %7095 = vmatpush1.bf16.msra.mxu0 %v13301_v58  ;;  %v13350_v58 = vld [vmem:[#allocation12 + $0x220] ss:$24 sps:$4 sm:$0xff]  }
 0x78d   :  { %7238 = vmatpush1.bf16.msra.mxu1 %v13302_v47  ;;  %7250 = vmatprep.subr.bf16.mxu0 %v13303_v6  ;;  %v13351_v47 = vld [vmem:[#allocation12 + $0x24c] ss:$24 sps:$4 sm:$0xff]  }
 0x78e   :  { %7293 = vmatprep.subr.bf16.mxu1 %v13304_v15  ;;  %v13352_v6 = vld [vmem:[#allocation12 + $0x254] ss:$24 sps:$4 sm:$0xff]   ;;  %v13353_v15 = vld [vmem:[#allocation12 + $0x248] ss:$24 sps:$4 sm:$0xff]  }
 0x78f   :  { %7097 = vmatmul.mubr.bf16.vlgmr.msra.gmra.mrb[104].mxu0 %v14698_v10  ;;  %v13312_v10 = vld [vmem:[#allocation12 + $0x74] ss:$24 sps:$4 sm:$0xff]  }
 0x790   :  { %7240 = vmatmul.mubr.bf16.vlgmr.msra.gmra.mrb[104].mxu1 %v14684_v46  ;;  %7251 = vmatpush1.bf16.msra.mxu0 %v13305_v24  ;;  %v13354_v24 = vld [vmem:[#allocation12 + $0x250] ss:$24 sps:$4 sm:$0xff]  }
 0x791   :  { %7282 = vmatprep.mubr.bf16.mxu0 %v14680_v35  ;;  %7294 = vmatpush1.bf16.msra.mxu1 %v13306_v48  ;;  %v13355_v48 = vld [vmem:[#allocation12 + $0x27c] ss:$24 sps:$4 sm:$0xff]  }
 0x792   :  { %7325 = vmatprep.mubr.bf16.mxu1 %v14680_v35  ;;  %7252 = vmatprep.subr.bf16.mxu0 %v13307_v2  ;;  %v13317_v35 = vld [vmem:[#allocation12 + $0x98] ss:$24 sps:$4 sm:$0xff]   ;;  %v13356_v2 = vld [vmem:[#allocation12 + $0x284] ss:$24 sps:$4 sm:$0xff]  }
 0x793   :  { %7295 = vmatprep.subr.bf16.mxu1 %v13308_v52  ;;  %v13357_v52 = vld [vmem:[#allocation12 + $0x278] ss:$24 sps:$4 sm:$0xff]  }
 0x794   :  { %7253 = vmatpush1.bf16.msra.mxu0 %v13309_v50  ;;  %v13358_v50 = vld [vmem:[#allocation12 + $0x280] ss:$24 sps:$4 sm:$0xff]  }
 0x795   :  { %7296 = vmatpush1.bf16.msra.mxu1 %v13310_v49  ;;  %7254 = vmatprep.subr.bf16.mxu0 %v13311_v25  ;;  %v13359_v49 = vld [vmem:[#allocation12 + $0x2ac] ss:$24 sps:$4 sm:$0xff]  }
 0x796   :  { %7297 = vmatprep.subr.bf16.mxu1 %v13312_v10  ;;  %v13360_v25 = vld [vmem:[#allocation12 + $0x2b4] ss:$24 sps:$4 sm:$0xff]   ;;  %v13361_v10 = vld [vmem:[#allocation12 + $0x2a8] ss:$24 sps:$4 sm:$0xff]  }
 0x798   :  { %7255 = vmatpush1.bf16.msra.mxu0 %v13313_v5  ;;  %v13362_v5 = vld [vmem:[#allocation12 + $0x2b0] ss:$24 sps:$4 sm:$0xff]  }
 0x799   :  { %7298 = vmatpush1.bf16.msra.mxu1 %v13314_v42  ;;  %7256 = vmatprep.subr.bf16.mxu0 %v13315_v34  ;;  %v13363_v42 = vld [vmem:[#allocation12 + $0x2dc] ss:$24 sps:$4 sm:$0xff]  }
 0x79a   :  { %7299 = vmatprep.subr.bf16.mxu1 %v13316_v3  ;;  %v13364_v34 = vld [vmem:[#allocation12 + $0x2e4] ss:$24 sps:$4 sm:$0xff]   ;;  %v13365_v3 = vld [vmem:[#allocation12 + $0x2d8] ss:$24 sps:$4 sm:$0xff]  }
 0x79c   :  { %7257 = vmatpush1.bf16.msra.mxu0 %v13317_v35  ;;  %v13366_v35 = vld [vmem:[#allocation12 + $0x2e0] ss:$24 sps:$4 sm:$0xff]  }
 0x79d   :  { %7300 = vmatpush1.bf16.msra.mxu1 %v13318_v40  ;;  %7258 = vmatprep.subr.bf16.mxu0 %v13319_v21  ;;  %v12006_v40 = vld [vmem:[#allocation16 + $0x600] ss:$16 sps:$4 sm:$0xff]   ;;  %v12008_v21 = vld [vmem:[#allocation16 + $0x604] ss:$16 sps:$4 sm:$0xff]  }
 0x79e   :  { %7301 = vmatprep.subr.bf16.mxu1 %v13320_v12  ;;  %v12009_v12 = vld [vmem:[#allocation16 + $0x608] ss:$16 sps:$4 sm:$0xff]  }
 0x7a0   :  { %7259 = vmatpush1.bf16.msra.mxu0 %v13321_v45  ;;  %v12011_v45 = vld [vmem:[#allocation16 + $0x60c] ss:$16 sps:$4 sm:$0xff]  }
 0x7a1   :  { %7302 = vmatpush1.bf16.msra.mxu1 %v13322_v11  ;;  %7260 = vmatprep.subr.bf16.mxu0 %v13323_v41  ;;  %v12014_v11 = vld [vmem:[#allocation16 + $0x624] ss:$16 sps:$4 sm:$0xff]   ;;  %v12017_v41 = vld [vmem:[#allocation16 + $0x62c] ss:$16 sps:$4 sm:$0xff]  }
 0x7a2   :  { %7303 = vmatprep.subr.bf16.mxu1 %v13324_v19  ;;  %v12012_v19 = vld [vmem:[#allocation16 + $0x620] ss:$16 sps:$4 sm:$0xff]  }
 0x7a4   :  { %7261 = vmatpush1.bf16.msra.mxu0 %v13325_v32  ;;  %v12015_v32 = vld [vmem:[#allocation16 + $0x628] ss:$16 sps:$4 sm:$0xff]  }
 0x7a5   :  { %7304 = vmatpush1.bf16.msra.mxu1 %v13326_v60  ;;  %7262 = vmatprep.subr.bf16.mxu0 %v13327_v28  ;;  %v12020_v60 = vld [vmem:[#allocation16 + $0x644] ss:$16 sps:$4 sm:$0xff]   ;;  %v12023_v28 = vld [vmem:[#allocation16 + $0x64c] ss:$16 sps:$4 sm:$0xff]  }
 0x7a6   :  { %7305 = vmatprep.subr.bf16.mxu1 %v13328_v7  ;;  %v12018_v7 = vld [vmem:[#allocation16 + $0x640] ss:$16 sps:$4 sm:$0xff]  }
 0x7a8   :  { %7263 = vmatpush1.bf16.msra.mxu0 %v13329_v61  ;;  %v12026_v61 = vld [vmem:[#allocation16 + $0x664] ss:$16 sps:$4 sm:$0xff]  }
 0x7a9   :  { %7306 = vmatpush1.bf16.msra.mxu1 %v13330_v4  ;;  %7264 = vmatprep.subr.bf16.mxu0 %v13331_v51  ;;  %v12029_v4 = vld [vmem:[#allocation16 + $0x66c] ss:$16 sps:$4 sm:$0xff]   ;;  %v12024_v51 = vld [vmem:[#allocation16 + $0x660] ss:$16 sps:$4 sm:$0xff]  }
 0x7aa   :  { %7307 = vmatprep.subr.bf16.mxu1 %v13332_v63  ;;  %v12027_v63 = vld [vmem:[#allocation16 + $0x668] ss:$16 sps:$4 sm:$0xff]  }
 0x7ac   :  { %7265 = vmatpush1.bf16.msra.mxu0 %v13333_v20  ;;  %v12032_v20 = vld [vmem:[#allocation16 + $0x684] ss:$16 sps:$4 sm:$0xff]  }
 0x7ad   :  { %7308 = vmatpush1.bf16.msra.mxu1 %v13334_v8  ;;  %7266 = vmatprep.subr.bf16.mxu0 %v13335_v44  ;;  %v12035_v8 = vld [vmem:[#allocation16 + $0x68c] ss:$16 sps:$4 sm:$0xff]   ;;  %v12030_v44 = vld [vmem:[#allocation16 + $0x680] ss:$16 sps:$4 sm:$0xff]  }
 0x7ae   :  { %7309 = vmatprep.subr.bf16.mxu1 %v13336_v54  ;;  %v12033_v54 = vld [vmem:[#allocation16 + $0x688] ss:$16 sps:$4 sm:$0xff]  }
 0x7b0   :  { %7267 = vmatpush1.bf16.msra.mxu0 %v13337_v43  ;;  %v12038_v43 = vld [vmem:[#allocation16 + $0x6a4] ss:$16 sps:$4 sm:$0xff]  }
 0x7b1   :  { %7310 = vmatpush1.bf16.msra.mxu1 %v13338_v18  ;;  %7268 = vmatprep.subr.bf16.mxu0 %v13339_v9  ;;  %v12041_v18 = vld [vmem:[#allocation16 + $0x6ac] ss:$16 sps:$4 sm:$0xff]   ;;  %v12036_v9 = vld [vmem:[#allocation16 + $0x6a0] ss:$16 sps:$4 sm:$0xff]  }
 0x7b2   :  { %7311 = vmatprep.subr.bf16.mxu1 %v13340_v23  ;;  %v12039_v23 = vld [vmem:[#allocation16 + $0x6a8] ss:$16 sps:$4 sm:$0xff]  }
 0x7b4   :  { %7269 = vmatpush1.bf16.msra.mxu0 %v13341_v62  ;;  %v7107_v62 = vunpack.c.l.bf16 %v14155_v14 }
 0x7b5   :  { %7312 = vmatpush1.bf16.msra.mxu1 %v13342_v38  ;;  %7270 = vmatprep.subr.bf16.mxu0 %v13343_v26  ;;  %v14980_v26 = vld [vmem:[#allocation29_spill] sm:$0xff] }
 0x7b6   :  { %7313 = vmatprep.subr.bf16.mxu1 %v13344_v36  ;;  %v7109_v36 = vunpack.c.l.bf16 %v14980_v26 }
 0x7b8   :  { %7271 = vmatpush1.bf16.msra.mxu0 %v13345_v1  ;;  %v14981_v1 = vld [vmem:[#allocation30_spill] sm:$0xff] }
 0x7b9   :  { %7314 = vmatpush1.bf16.msra.mxu1 %v13346_v53  ;;  %7272 = vmatprep.subr.bf16.mxu0 %v13347_v59  ;;  %v7108_v53 = vunpack.c.l.bf16 %v14981_v1 }
 0x7ba   :  { %7315 = vmatprep.subr.bf16.mxu1 %v13348_v17 }
 0x7bc   :  { %7273 = vmatpush1.bf16.msra.mxu0 %v13349_v0 }
 0x7bd   :  { %7316 = vmatpush1.bf16.msra.mxu1 %v13350_v58  ;;  %7274 = vmatprep.subr.bf16.mxu0 %v13351_v47  ;;  %v14982_v58 = vld [vmem:[#allocation31_spill] sm:$0xff] }
 0x7be   :  { %7317 = vmatprep.subr.bf16.mxu1 %v13352_v6  ;;  %v7110_v47 = vunpack.c.l.bf16 %v14982_v58  ;;  %v7111_v6 = vunpack.c.h.bf16 %v14155_v14 }
 0x7c0   :  { %7275 = vmatpush1.bf16.msra.mxu0 %v13353_v15 }
 0x7c1   :  { %7318 = vmatpush1.bf16.msra.mxu1 %v13354_v24  ;;  %7276 = vmatprep.subr.bf16.mxu0 %v13355_v48 }
 0x7c2   :  { %7319 = vmatprep.subr.bf16.mxu1 %v13356_v2 }
 0x7c4   :  { %7277 = vmatpush1.bf16.msra.mxu0 %v13357_v52  ;;  %v7113_v52 = vunpack.c.h.bf16 %v14980_v26  ;;  %v12078_v26 = vld [vmem:[#allocation16 + $0x780] ss:$16 sps:$4 sm:$0xff]  }
 0x7c5   :  { %7320 = vmatpush1.bf16.msra.mxu1 %v13358_v50  ;;  %7278 = vmatprep.subr.bf16.mxu0 %v13359_v49  ;;  %v7112_v50 = vunpack.c.h.bf16 %v14981_v1  ;;  %v12086_v1 = vld [vmem:[#allocation16 + $0x7a4] ss:$16 sps:$4 sm:$0xff]  }
 0x7c6   :  { %7321 = vmatprep.subr.bf16.mxu1 %v13360_v25 }
 0x7c8   :  { %7279 = vmatpush1.bf16.msra.mxu0 %v13361_v10 }
 0x7c9   :  { %7322 = vmatpush1.bf16.msra.mxu1 %v13362_v5  ;;  %7280 = vmatprep.subr.bf16.mxu0 %v13363_v42  ;;  %v7114_v42 = vunpack.c.h.bf16 %v14982_v58 }
 0x7ca   :  { %7323 = vmatprep.subr.bf16.mxu1 %v13364_v34  ;;  %v12044_v34 = vld [vmem:[#allocation16 + $0x6c4] ss:$16 sps:$4 sm:$0xff]  }
 0x7cc   :  { %7281 = vmatpush1.bf16.msra.mxu0 %v13365_v3 }
 0x7cd   :  { %7324 = vmatpush1.bf16.msra.mxu1 %v13366_v35  ;;  %7888 = vmatprep.subr.bf16.mxu0 %v12008_v21  ;;  %v12042_v21 = vld [vmem:[#allocation16 + $0x6c0] ss:$16 sps:$4 sm:$0xff]  }
 0x7ce   :  { %7931 = vmatprep.subr.bf16.mxu1 %v12011_v45  ;;  %v12047_v45 = vld [vmem:[#allocation16 + $0x6cc] ss:$16 sps:$4 sm:$0xff]  }
 0x7cf   :  { %7283 = vmatmul.mubr.bf16.vlgmr.msra.gmra.mrb[108].mxu0 %v14684_v46 }
 0x7d0   :  { %7326 = vmatmul.mubr.bf16.vlgmr.msra.gmra.mrb[108].mxu1 %v14684_v46  ;;  %7889 = vmatpush1.bf16.msra.mxu0 %v12006_v40  ;;  %v12021_v46 = vld [vmem:[#allocation16 + $0x648] ss:$16 sps:$4 sm:$0xff]  }
 0x7d1   :  { %7932 = vmatpush1.bf16.msra.mxu1 %v12009_v12  ;;  %7890 = vmatprep.subr.bf16.mxu0 %v12014_v11  ;;  %v12045_v12 = vld [vmem:[#allocation16 + $0x6c8] ss:$16 sps:$4 sm:$0xff]   ;;  %v12050_v11 = vld [vmem:[#allocation16 + $0x6e4] ss:$16 sps:$4 sm:$0xff]  }
 0x7d2   :  { %7933 = vmatprep.subr.bf16.mxu1 %v12017_v41  ;;  %v12048_v41 = vld [vmem:[#allocation16 + $0x6e0] ss:$16 sps:$4 sm:$0xff]  }
 0x7d4   :  { %7891 = vmatpush1.bf16.msra.mxu0 %v12012_v19  ;;  %v12053_v19 = vld [vmem:[#allocation16 + $0x6ec] ss:$16 sps:$4 sm:$0xff]  }
 0x7d5   :  { %7934 = vmatpush1.bf16.msra.mxu1 %v12015_v32  ;;  %7892 = vmatprep.subr.bf16.mxu0 %v12020_v60  ;;  %v12051_v32 = vld [vmem:[#allocation16 + $0x6e8] ss:$16 sps:$4 sm:$0xff]   ;;  %v12056_v60 = vld [vmem:[#allocation16 + $0x704] ss:$16 sps:$4 sm:$0xff]  }
 0x7d6   :  { %7935 = vmatprep.subr.bf16.mxu1 %v12023_v28  ;;  %v12059_v28 = vld [vmem:[#allocation16 + $0x70c] ss:$16 sps:$4 sm:$0xff]  }
 0x7d8   :  { %7893 = vmatpush1.bf16.msra.mxu0 %v12018_v7  ;;  %v12054_v7 = vld [vmem:[#allocation16 + $0x700] ss:$16 sps:$4 sm:$0xff]  }
 0x7d9   :  { %7936 = vmatpush1.bf16.msra.mxu1 %v12021_v46  ;;  %7894 = vmatprep.subr.bf16.mxu0 %v12026_v61  ;;  %v12057_v46 = vld [vmem:[#allocation16 + $0x708] ss:$16 sps:$4 sm:$0xff]   ;;  %v12062_v61 = vld [vmem:[#allocation16 + $0x724] ss:$16 sps:$4 sm:$0xff]  }
 0x7da   :  { %7937 = vmatprep.subr.bf16.mxu1 %v12029_v4  ;;  %v12065_v4 = vld [vmem:[#allocation16 + $0x72c] ss:$16 sps:$4 sm:$0xff]  }
 0x7dc   :  { %7895 = vmatpush1.bf16.msra.mxu0 %v12024_v51  ;;  %v12060_v51 = vld [vmem:[#allocation16 + $0x720] ss:$16 sps:$4 sm:$0xff]  }
 0x7dd   :  { %7938 = vmatpush1.bf16.msra.mxu1 %v12027_v63  ;;  %7896 = vmatprep.subr.bf16.mxu0 %v12032_v20  ;;  %v12063_v63 = vld [vmem:[#allocation16 + $0x728] ss:$16 sps:$4 sm:$0xff]   ;;  %v12068_v20 = vld [vmem:[#allocation16 + $0x744] ss:$16 sps:$4 sm:$0xff]  }
 0x7de   :  { %7939 = vmatprep.subr.bf16.mxu1 %v12035_v8  ;;  %v12071_v8 = vld [vmem:[#allocation16 + $0x74c] ss:$16 sps:$4 sm:$0xff]  }
 0x7e0   :  { %7897 = vmatpush1.bf16.msra.mxu0 %v12030_v44  ;;  %v12066_v44 = vld [vmem:[#allocation16 + $0x740] ss:$16 sps:$4 sm:$0xff]  }
 0x7e1   :  { %7940 = vmatpush1.bf16.msra.mxu1 %v12033_v54  ;;  %7898 = vmatprep.subr.bf16.mxu0 %v12038_v43  ;;  %v12069_v54 = vld [vmem:[#allocation16 + $0x748] ss:$16 sps:$4 sm:$0xff]   ;;  %v12074_v43 = vld [vmem:[#allocation16 + $0x764] ss:$16 sps:$4 sm:$0xff]  }
 0x7e2   :  { %7941 = vmatprep.subr.bf16.mxu1 %v12041_v18  ;;  %v12077_v18 = vld [vmem:[#allocation16 + $0x76c] ss:$16 sps:$4 sm:$0xff]  }
 0x7e4   :  { %7899 = vmatpush1.bf16.msra.mxu0 %v12036_v9  ;;  %v12072_v9 = vld [vmem:[#allocation16 + $0x760] ss:$16 sps:$4 sm:$0xff]  }
 0x7e5   :  { %7942 = vmatpush1.bf16.msra.mxu1 %v12039_v23  ;;  %7900 = vmatprep.subr.bf16.mxu0 %v12044_v34  ;;  %v12075_v23 = vld [vmem:[#allocation16 + $0x768] ss:$16 sps:$4 sm:$0xff]   ;;  %v12107_v34 = vld [vmem:[#allocation16 + $0xc0c] ss:$16 sps:$4 sm:$0xff]  }
 0x7e6   :  { %7943 = vmatprep.subr.bf16.mxu1 %v12047_v45 }
 0x7e8   :  { %7901 = vmatpush1.bf16.msra.mxu0 %v12042_v21 }
 0x7e9   :  { %7902 = vmatprep.subr.bf16.mxu0 %v12050_v11  ;;  %7944 = vmatpush1.bf16.msra.mxu1 %v12045_v12 }
 0x7ea   :  { %7945 = vmatprep.subr.bf16.mxu1 %v12053_v19 }
 0x7ec   :  { %7903 = vmatpush1.bf16.msra.mxu0 %v12048_v41 }
 0x7ed   :  { %7904 = vmatprep.subr.bf16.mxu0 %v12056_v60  ;;  %7946 = vmatpush1.bf16.msra.mxu1 %v12051_v32 }
 0x7ee   :  { %7947 = vmatprep.subr.bf16.mxu1 %v12059_v28 }
 0x7f0   :  { %7905 = vmatpush1.bf16.msra.mxu0 %v12054_v7 }
 0x7f1   :  { %7906 = vmatprep.subr.bf16.mxu0 %v12062_v61  ;;  %7948 = vmatpush1.bf16.msra.mxu1 %v12057_v46  ;;  %v14983_v61 = vld [vmem:[#allocation38_spill] sm:$0xff] }
 0x7f2   :  { %7949 = vmatprep.subr.bf16.mxu1 %v12065_v4  ;;  %v7336_v4 = vunpack.c.l.bf16 %v14983_v61 }
 0x7f4   :  { %7907 = vmatpush1.bf16.msra.mxu0 %v12060_v51 }
 0x7f5   :  { %7908 = vmatprep.subr.bf16.mxu0 %v12068_v20  ;;  %7950 = vmatpush1.bf16.msra.mxu1 %v12063_v63  ;;  %v14984_v20 = vld [vmem:[#allocation39_spill] sm:$0xff] }
 0x7f6   :  { %7951 = vmatprep.subr.bf16.mxu1 %v12071_v8  ;;  %v7337_v8 = vunpack.c.l.bf16 %v14984_v20 }
 0x7f8   :  { %7909 = vmatpush1.bf16.msra.mxu0 %v12066_v44  ;;  %v7340_v44 = vunpack.c.h.bf16 %v14983_v61 }
 0x7f9   :  { %7910 = vmatprep.subr.bf16.mxu0 %v12074_v43  ;;  %7952 = vmatpush1.bf16.msra.mxu1 %v12069_v54  ;;  %v7341_v54 = vunpack.c.h.bf16 %v14984_v20  ;;  %v14985_v43 = vld [vmem:[#allocation40_spill] sm:$0xff] }
 0x7fa   :  { %7953 = vmatprep.subr.bf16.mxu1 %v12077_v18  ;;  %v7179_v18 = vunpack.c.l.bf16 %v14985_v43 }
 0x7fc   :  { %7911 = vmatpush1.bf16.msra.mxu0 %v12072_v9  ;;  %v7181_v9 = vunpack.c.h.bf16 %v14985_v43 }
 0x7fd   :  { %7954 = vmatpush1.bf16.msra.mxu1 %v12075_v23 }
 0x822   :  { %v7012_v38 = vpop.f32.mrb[100].mxu0 }
 0x823   :  { %v14717_v59 = vadd.f32 %v7107_v62, %v7012_v38  ;;  %v7055_v17 = vpop.f32.mrb[100].mxu1  ;;  %v7014_v0 = vpop.f32.mrb[101].mxu0  ;;  %v12080_v62 = vld [vmem:[#allocation16 + $0x784] ss:$16 sps:$4 sm:$0xff]   ;;  %v12083_v38 = vld [vmem:[#allocation16 + $0x78c] ss:$16 sps:$4 sm:$0xff]  }
 0x824   :  { %v14721_v15 = vadd.f32 %v7109_v36, %v7055_v17  ;;  %v14723_v24 = vadd.f32 %v7108_v53, %v7014_v0  ;;  %v7057_v48 = vpop.f32.mrb[101].mxu1  ;;  %v7016_v2 = vpop.f32.mrb[102].mxu0  ;;  %7912 = vmatprep.subr.bf16.mxu0 %v12080_v62  ;;  %v12081_v36 = vld [vmem:[#allocation16 + $0x788] ss:$16 sps:$4 sm:$0xff]   ;;  %7955 = vmatprep.subr.bf16.mxu1 %v12083_v38  ;;  %v12089_v53 = vld [vmem:[#allocation16 + $0x7ac] ss:$16 sps:$4 sm:$0xff]  }
 0x825   :  { %v14727_v49 = vadd.f32 %v7110_v47, %v7057_v48  ;;  %v14729_v25 = vadd.f32 %v7111_v6, %v7016_v2  ;;  %v7059_v10 = vpop.f32.mrb[102].mxu1  ;;  %v7018_v5 = vpop.f32.mrb[103].mxu0  ;;  %7913 = vmatpush1.bf16.msra.mxu0 %v12078_v26  ;;  %v12084_v17 = vld [vmem:[#allocation16 + $0x7a0] ss:$16 sps:$4 sm:$0xff]   ;;  %7956 = vmatpush1.bf16.msra.mxu1 %v12081_v36  ;;  %v12087_v0 = vld [vmem:[#allocation16 + $0x7a8] ss:$16 sps:$4 sm:$0xff]  }
 0x826   :  { %v14732_v14 = vadd.f32 %v7113_v52, %v7059_v10  ;;  %v14734_v3 = vadd.f32 %v7112_v50, %v7018_v5  ;;  %v7061_v35 = vpop.f32.mrb[103].mxu1  ;;  %7914 = vmatprep.subr.bf16.mxu0 %v12086_v1  ;;  %v10604_v58 = vmul.f32 -1.442695, %v14717_v59  ;;  %7957 = vmatprep.subr.bf16.mxu1 %v12089_v53  ;;  %v12090_v47 = vld [vmem:[#allocation16 + $0x7c0] ss:$16 sps:$4 sm:$0xff]  }
 0x827   :  { %v14736_v40 = vadd.f32 %v7114_v42, %v7061_v35  ;;  %v12092_v6 = vld [vmem:[#allocation16 + $0x7c4] ss:$16 sps:$4 sm:$0xff]   ;;  %v10605_v48 = vmul.f32 -1.442695, %v14723_v24  ;;  %v12095_v2 = vld [vmem:[#allocation16 + $0x7cc] ss:$16 sps:$4 sm:$0xff]  }
 0x828   :  { %v10608_v52 = vmul.f32 -1.442695, %v14729_v25  ;;  %v12098_v50 = vld [vmem:[#allocation16 + $0x7e4] ss:$16 sps:$4 sm:$0xff]   ;;  %v10609_v10 = vmul.f32 -1.442695, %v14734_v3  ;;  %12630 = vpow2.f32 %v10604_v58 }
 0x829   :  { %7915 = vmatpush1.bf16.msra.mxu0 %v12084_v17  ;;  %7958 = vmatpush1.bf16.msra.mxu1 %v12087_v0  ;;  %v12093_v5 = vld [vmem:[#allocation16 + $0x7c8] ss:$16 sps:$4 sm:$0xff]   ;;  %v12096_v42 = vld [vmem:[#allocation16 + $0x7e0] ss:$16 sps:$4 sm:$0xff]   ;;  %v12101_v59 = vld [vmem:[#allocation16 + $0x7ec] ss:$16 sps:$4 sm:$0xff]   ;;  %12632 = vpow2.f32 %v10605_v48 }
 0x82a   :  { %7916 = vmatprep.subr.bf16.mxu0 %v12092_v6  ;;  %7959 = vmatprep.subr.bf16.mxu1 %v12095_v2  ;;  %12634 = vpow2.f32 %v10608_v52  ;;  %v12099_v24 = vld [vmem:[#allocation16 + $0x7e8] ss:$16 sps:$4 sm:$0xff]   ;;  %v12104_v25 = vld [vmem:[#allocation16 + $0xc04] ss:$16 sps:$4 sm:$0xff]   ;;  %v10606_v3 = vmul.f32 -1.442695, %v14721_v15 }
 0x82b   :  { %12636 = vpow2.f32 %v10609_v10  ;;  %v10607_v35 = vmul.f32 -1.442695, %v14727_v49  ;;  %v10610_v21 = vmul.f32 -1.442695, %v14732_v14  ;;  %v10611_v45 = vmul.f32 -1.442695, %v14736_v40 }
 0x82c   :  { %12638 = vpow2.f32 %v10606_v3  ;;  %v14986_v1 = vld [vmem:[#allocation41_spill] sm:$0xff] }
 0x82d   :  { %7917 = vmatpush1.bf16.msra.mxu0 %v12090_v47  ;;  %7960 = vmatpush1.bf16.msra.mxu1 %v12093_v5  ;;  %12640 = vpow2.f32 %v10607_v35  ;;  %v7180_v53 = vunpack.c.l.bf16 %v14986_v1 }
 0x82e   :  { %7918 = vmatprep.subr.bf16.mxu0 %v12098_v50  ;;  %7961 = vmatprep.subr.bf16.mxu1 %v12101_v59  ;;  %12642 = vpow2.f32 %v10610_v21 }
 0x82f   :  { %12644 = vpow2.f32 %v10611_v45  ;;  %v7182_v45 = vunpack.c.h.bf16 %v14986_v1 }
 0x831   :  { %7919 = vmatpush1.bf16.msra.mxu0 %v12096_v42  ;;  %7962 = vmatpush1.bf16.msra.mxu1 %v12099_v24 }
 0x832   :  { %8302 = vmatprep.subr.bf16.mxu0 %v12104_v25  ;;  %8345 = vmatprep.subr.bf16.mxu1 %v12107_v34  ;;  %v12631_v12 = vpop.eup %12630 }
 0x833   :  { %v12633_v11 = vpop.eup %12632  ;;  %v7147_v32 = vadd.f32 1.0, %v12631_v12 }
 0x834   :  { %v12635_v41 = vpop.eup %12634  ;;  %v7148_v60 = vadd.f32 1.0, %v12633_v11 }
 0x835   :  { %v12637_v19 = vpop.eup %12636  ;;  %v7151_v28 = vadd.f32 1.0, %v12635_v41  ;;  %12646 = vrcp.f32 %v7147_v32 }
 0x836   :  { %v7152_v15 = vadd.f32 1.0, %v12637_v19  ;;  %12648 = vrcp.f32 %v7148_v60  ;;  %v12639_v49 = vpop.eup %12638 }
 0x837   :  { %12650 = vrcp.f32 %v7151_v28  ;;  %v12641_v14 = vpop.eup %12640  ;;  %v7149_v40 = vadd.f32 1.0, %v12639_v49 }
 0x838   :  { %12652 = vrcp.f32 %v7152_v15  ;;  %v12643_v7 = vpop.eup %12642  ;;  %v7150_v51 = vadd.f32 1.0, %v12641_v14 }
 0x839   :  { %v12645_v46 = vpop.eup %12644  ;;  %v7153_v23 = vadd.f32 1.0, %v12643_v7  ;;  %12654 = vrcp.f32 %v7149_v40 }
 0x83a   :  { %v7154_v17 = vadd.f32 1.0, %v12645_v46  ;;  %12656 = vrcp.f32 %v7150_v51 }
 0x83b   :  { %12658 = vrcp.f32 %v7153_v23 }
 0x83c   :  { %12660 = vrcp.f32 %v7154_v17 }
 0x83f   :  { %v12647_v36 = vpop.eup %12646 }
 0x840   :  { %v12649_v48 = vpop.eup %12648 }
 0x841   :  { %v12651_v42 = vpop.eup %12650 }
 0x842   :  { %v12653_v3 = vpop.eup %12652 }
 0x843   :  { %v12655_v60 = vpop.eup %12654 }
 0x844   :  { %v12657_v28 = vpop.eup %12656  ;;  %v7191_v14 = vsub.f32 1.0, %v12655_v60  ;;  %v7199_v61 = vmul.f32 %v12655_v60, %v14644_v16 }
 0x845   :  { %v12659_v15 = vpop.eup %12658  ;;  %v7192_v46 = vsub.f32 1.0, %v12657_v28  ;;  %v7200_v51 = vmul.f32 %v12657_v28, %v14647_v22 }
 0x846   :  { %v12661_v49 = vpop.eup %12660 }
 0x847   :  { %v7194_v43 = vsub.f32 1.0, %v12661_v49 }
 0x862   :  { %v7098_v63 = vpop.f32.mrb[104].mxu0 }
 0x863   :  { %v7171_v62 = vadd.f32 %v7098_v63, %v14395_v30  ;;  %v7241_v38 = vpop.f32.mrb[104].mxu1  ;;  %v7100_v26 = vpop.f32.mrb[105].mxu0  ;;  %v7193_v63 = vsub.f32 1.0, %v12659_v15 }
 0x864   :  { %v7344_v0 = vadd.f32 %v7336_v4, %v7241_v38  ;;  %v7172_v58 = vadd.f32 %v7100_v26, %v14398_v13  ;;  %v7243_v47 = vpop.f32.mrb[105].mxu1  ;;  %v7102_v6 = vpop.f32.mrb[106].mxu0 }
 0x865   :  { %v7175_v2 = vmul.f32 %v12647_v36, %v7171_v62  ;;  %v7345_v52 = vadd.f32 %v7337_v8, %v7243_v47  ;;  %v7173_v50 = vadd.f32 %v7102_v6, %v14395_v30  ;;  %v7245_v10 = vpop.f32.mrb[106].mxu1  ;;  %v7104_v5 = vpop.f32.mrb[107].mxu0  ;;  %v7202_v62 = vmul.f32 %v12661_v49, %v14652_v37 }
 0x866   :  { %v7176_v59 = vmul.f32 %v12649_v48, %v7172_v58  ;;  %v7348_v24 = vadd.f32 %v7340_v44, %v7245_v10  ;;  %v7174_v25 = vadd.f32 %v7104_v5, %v14398_v13  ;;  %v7247_v34 = vpop.f32.mrb[107].mxu1  ;;  %v10612_v22 = vmul.f32 -1.442695, %v7344_v0  ;;  %v14987_v0 = vld [vmem:[#allocation48_spill] sm:$0xff]  ;;  %v14988_v10 = vld [vmem:[#allocation50_spill] sm:$0xff] }
 0x867   :  { %v7183_v35 = vadd.f32 %v7179_v18, %v7175_v2  ;;  %v7177_v21 = vmul.f32 %v12651_v42, %v7173_v50  ;;  %v7349_v12 = vadd.f32 %v7341_v54, %v7247_v34  ;;  %v7201_v54 = vmul.f32 %v12659_v15, %v14650_v39  ;;  %v14989_v42 = vld [vmem:[#allocation49_spill] sm:$0xff] }
 0x868   :  { %v7184_v11 = vadd.f32 %v7180_v53, %v7176_v59  ;;  %v7178_v41 = vmul.f32 %v12653_v3, %v7174_v25  ;;  %v10613_v36 = vmul.f32 -1.442695, %v7345_v52  ;;  %v10616_v1 = vmul.f32 -1.442695, %v7348_v24 }
 0x869   :  { %12662 = vtanh.f32 %v7183_v35  ;;  %v7185_v19 = vadd.f32 %v7181_v9, %v7177_v21  ;;  %v10617_v53 = vmul.f32 -1.442695, %v7349_v12  ;;  %v7338_v52 = vunpack.c.l.bf16 %v14987_v0 }
 0x86a   :  { %12664 = vtanh.f32 %v7184_v11  ;;  %v7186_v32 = vadd.f32 %v7182_v45, %v7178_v41  ;;  %v7339_v5 = vunpack.c.l.bf16 %v14988_v10  ;;  %v7408_v59 = vunpack.c.l.bf16 %v14989_v42 }
 0x86b   :  { %12666 = vtanh.f32 %v7185_v19  ;;  %v7342_v3 = vunpack.c.h.bf16 %v14987_v0  ;;  %v7410_v35 = vunpack.c.h.bf16 %v14989_v42  ;;  %v7343_v41 = vunpack.c.h.bf16 %v14988_v10 }
 0x86c   :  { %12668 = vtanh.f32 %v7186_v32  ;;  %v14990_v32 = vld [vmem:[#allocation51_spill] sm:$0xff] }
 0x86d   :  { %12670 = vpow2.f32 %v10612_v22  ;;  %v7409_v60 = vunpack.c.l.bf16 %v14990_v32 }
 0x86e   :  { %12672 = vpow2.f32 %v10613_v36 }
 0x86f   :  { %12674 = vpow2.f32 %v10616_v1 }
 0x870   :  { %12676 = vpow2.f32 %v10617_v53 }
 0x873   :  { %v12663_v7 = vpop.eup %12662 }
 0x874   :  { %v12665_v40 = vpop.eup %12664  ;;  %v7195_v4 = vmul.f32 %v12663_v7, %v7191_v14 }
 0x875   :  { %v7196_v20 = vmul.f32 %v12665_v40, %v7192_v46  ;;  %v12667_v8 = vpop.eup %12666 }
 0x876   :  { %v14760_v44 = vadd.f32 %v7199_v61, %v7195_v4  ;;  %v7197_v9 = vmul.f32 %v12667_v8, %v7193_v63  ;;  %v12669_v23 = vpop.eup %12668 }
 0x877   :  { %v14763_v18 = vadd.f32 %v7200_v51, %v7196_v20  ;;  %v7198_v38 = vmul.f32 %v12669_v23, %v7194_v43  ;;  %v12671_v39 = vpop.eup %12670  ;;  %v7411_v23 = vunpack.c.h.bf16 %v14990_v32 }
 0x878   :  { %v14766_v26 = vadd.f32 %v7201_v54, %v7197_v9  ;;  %v12673_v17 = vpop.eup %12672  ;;  %v7376_v6 = vadd.f32 1.0, %v12671_v39 }
 0x879   :  { %v14768_v16 = vadd.f32 %v7202_v62, %v7198_v38  ;;  %v12675_v58 = vpop.eup %12674  ;;  %v7377_v48 = vadd.f32 1.0, %v12673_v17 }
 0x87a   :  { %v12677_v47 = vpop.eup %12676  ;;  %v7380_v37 = vadd.f32 1.0, %v12675_v58  ;;  %12678 = vrcp.f32 %v7376_v6 }
 0x87b   :  { %v7381_v2 = vadd.f32 1.0, %v12677_v47  ;;  %12680 = vrcp.f32 %v7377_v48 }
 0x87c   :  { %12682 = vrcp.f32 %v7380_v37 }
 0x87d   :  { %12684 = vrcp.f32 %v7381_v2 }
 0x884   :  { %v12679_v19 = vpop.eup %12678 }
 0x885   :  { %v12681_v46 = vpop.eup %12680 }
 0x886   :  { %v12683_v20 = vpop.eup %12682 }
 0x887   :  { %v12685_v9 = vpop.eup %12684 }
 0x8a2   :  { %v7284_v50 = vpop.f32.mrb[108].mxu0 }
 0x8a3   :  { %v7346_v24 = vadd.f32 %v7338_v52, %v7284_v50  ;;  %v7327_v25 = vpop.f32.mrb[108].mxu1  ;;  %v7286_v34 = vpop.f32.mrb[109].mxu0 }
 0x8a4   :  { %v7400_v21 = vadd.f32 %v7327_v25, %v14421_v56  ;;  %v7347_v12 = vadd.f32 %v7339_v5, %v7286_v34  ;;  %v7329_v45 = vpop.f32.mrb[109].mxu1  ;;  %v7288_v11 = vpop.f32.mrb[110].mxu0 }
 0x8a5   :  { %v10614_v28 = vmul.f32 -1.442695, %v7346_v24  ;;  %v7401_v15 = vadd.f32 %v7329_v45, %v14424_v29  ;;  %v7350_v49 = vadd.f32 %v7342_v3, %v7288_v11  ;;  %v7331_v14 = vpop.f32.mrb[110].mxu1  ;;  %v7290_v7 = vpop.f32.mrb[111].mxu0 }
 0x8a6   :  { %v7404_v40 = vmul.f32 %v12679_v19, %v7400_v21  ;;  %v10615_v61 = vmul.f32 -1.442695, %v7347_v12  ;;  %v7402_v4 = vadd.f32 %v7331_v14, %v14421_v56  ;;  %v7351_v51 = vadd.f32 %v7343_v41, %v7290_v7  ;;  %v7333_v63 = vpop.f32.mrb[111].mxu1  ;;  %v12105_v7 = vld [vmem:[#allocation16 + $0xc08] ss:$16 sps:$4 sm:$0xff]  }
 0x8a7   :  { %12686 = vpow2.f32 %v10614_v28  ;;  %v7405_v8 = vmul.f32 %v12681_v46, %v7401_v15  ;;  %v10618_v54 = vmul.f32 -1.442695, %v7350_v49  ;;  %v7403_v43 = vadd.f32 %v7333_v63, %v14424_v29  ;;  %v12116_v63 = vld [vmem:[#allocation16 + $0xc44] ss:$16 sps:$4 sm:$0xff]  }
 0x8a8   :  { %v7412_v62 = vadd.f32 %v7408_v59, %v7404_v40  ;;  %12688 = vpow2.f32 %v10615_v61  ;;  %v7406_v38 = vmul.f32 %v12683_v20, %v7402_v4  ;;  %v10619_v36 = vmul.f32 -1.442695, %v7351_v51  ;;  %v12110_v40 = vld [vmem:[#allocation16 + $0xc24] ss:$16 sps:$4 sm:$0xff]   ;;  %v12113_v61 = vld [vmem:[#allocation16 + $0xc2c] ss:$16 sps:$4 sm:$0xff]  }
 0x8a9   :  { %v7413_v22 = vadd.f32 %v7409_v60, %v7405_v8  ;;  %12690 = vpow2.f32 %v10618_v54  ;;  %v7407_v1 = vmul.f32 %v12685_v9, %v7403_v43  ;;  %v12108_v4 = vld [vmem:[#allocation16 + $0xc20] ss:$16 sps:$4 sm:$0xff]   ;;  %v12111_v51 = vld [vmem:[#allocation16 + $0xc28] ss:$16 sps:$4 sm:$0xff]   ;;  %v12119_v20 = vld [vmem:[#allocation16 + $0xc4c] ss:$16 sps:$4 sm:$0xff]  }
 0x8aa   :  { %v7414_v53 = vadd.f32 %v7410_v35, %v7406_v38  ;;  %12692 = vpow2.f32 %v10619_v36  ;;  %v12114_v8 = vld [vmem:[#allocation16 + $0xc40] ss:$16 sps:$4 sm:$0xff]   ;;  %v12117_v54 = vld [vmem:[#allocation16 + $0xc48] ss:$16 sps:$4 sm:$0xff]   ;;  %v12122_v43 = vld [vmem:[#allocation16 + $0xc64] ss:$16 sps:$4 sm:$0xff]  }
 0x8ab   :  { %v7415_v39 = vadd.f32 %v7411_v23, %v7407_v1  ;;  %12694 = vtanh.f32 %v7412_v62  ;;  %v12125_v9 = vld [vmem:[#allocation16 + $0xc6c] ss:$16 sps:$4 sm:$0xff]   ;;  %v12120_v23 = vld [vmem:[#allocation16 + $0xc60] ss:$16 sps:$4 sm:$0xff]   ;;  %v12123_v62 = vld [vmem:[#allocation16 + $0xc68] ss:$16 sps:$4 sm:$0xff]  }
 0x8ac   :  { %v12128_v38 = vld [vmem:[#allocation16 + $0xc84] ss:$16 sps:$4 sm:$0xff]   ;;  %v12126_v36 = vld [vmem:[#allocation16 + $0xc80] ss:$16 sps:$4 sm:$0xff]   ;;  %v12129_v1 = vld [vmem:[#allocation16 + $0xc88] ss:$16 sps:$4 sm:$0xff]  }
 0x8b1   :  { %v12687_v17 = vpop.eup %12686 }
 0x8b2   :  { %v12689_v58 = vpop.eup %12688  ;;  %v7378_v47 = vadd.f32 1.0, %v12687_v17  ;;  %v12132_v17 = vld [vmem:[#allocation16 + $0xca0] ss:$16 sps:$4 sm:$0xff]  }
 0x8b3   :  { %v12691_v6 = vpop.eup %12690  ;;  %v7379_v48 = vadd.f32 1.0, %v12689_v58  ;;  %v12135_v58 = vld [vmem:[#allocation16 + $0xca8] ss:$16 sps:$4 sm:$0xff]  }
 0x8b4   :  { %12696 = vrcp.f32 %v7378_v47  ;;  %v7382_v37 = vadd.f32 1.0, %v12691_v6  ;;  %v12693_v2 = vpop.eup %12692  ;;  %v12140_v47 = vld [vmem:[#allocation16 + $0xcc4] ss:$16 sps:$4 sm:$0xff]   ;;  %v12143_v6 = vld [vmem:[#allocation16 + $0xccc] ss:$16 sps:$4 sm:$0xff]  }
 0x8b5   :  { %12698 = vrcp.f32 %v7379_v48  ;;  %v7383_v0 = vadd.f32 1.0, %v12693_v2  ;;  %v12695_v52 = vpop.eup %12694  ;;  %v12138_v48 = vld [vmem:[#allocation16 + $0xcc0] ss:$16 sps:$4 sm:$0xff]   ;;  %v12146_v2 = vld [vmem:[#allocation16 + $0xce4] ss:$16 sps:$4 sm:$0xff]  }
 0x8b6   :  { %12700 = vrcp.f32 %v7382_v37  ;;  %v12141_v37 = vld [vmem:[#allocation16 + $0xcc8] ss:$16 sps:$4 sm:$0xff]  }
 0x8b7   :  { %12702 = vtanh.f32 %v7413_v22  ;;  %v12131_v22 = vld [vmem:[#allocation16 + $0xc8c] ss:$16 sps:$4 sm:$0xff]  }
 0x8b8   :  { %12704 = vtanh.f32 %v7414_v53  ;;  %v12134_v53 = vld [vmem:[#allocation16 + $0xca4] ss:$16 sps:$4 sm:$0xff]  }
 0x8b9   :  { %12706 = vrcp.f32 %v7383_v0  ;;  %v12149_v0 = vld [vmem:[#allocation16 + $0xcec] ss:$16 sps:$4 sm:$0xff]  }
 0x8ba   :  { %12708 = vtanh.f32 %v7415_v39  ;;  %v12137_v39 = vld [vmem:[#allocation16 + $0xcac] ss:$16 sps:$4 sm:$0xff]  }
 0x8be   :  { %v12697_v50 = vpop.eup %12696 }
 0x8bf   :  { %v12699_v10 = vpop.eup %12698  ;;  %v7420_v5 = vsub.f32 1.0, %v12697_v50  ;;  %v7428_v25 = vmul.f32 %v12697_v50, %v14669_v31  ;;  %v12147_v50 = vld [vmem:[#allocation16 + $0xce8] ss:$16 sps:$4 sm:$0xff]  }
 0x8c0   :  { %v12701_v42 = vpop.eup %12700  ;;  %v7421_v59 = vsub.f32 1.0, %v12699_v10  ;;  %v7429_v21 = vmul.f32 %v12699_v10, %v14671_v27  ;;  %v12152_v10 = vld [vmem:[#allocation16 + $0xd04] ss:$16 sps:$4 sm:$0xff]  }
 0x8c1   :  { %v12703_v24 = vpop.eup %12702  ;;  %v7422_v34 = vsub.f32 1.0, %v12701_v42  ;;  %v7424_v3 = vmul.f32 %v12695_v52, %v7420_v5  ;;  %v7430_v45 = vmul.f32 %v12701_v42, %v14673_v33  ;;  %v12102_v33 = vld [vmem:[#allocation16 + $0xc00] ss:$16 sps:$4 sm:$0xff]   ;;  %v12155_v5 = vld [vmem:[#allocation16 + $0xd0c] ss:$16 sps:$4 sm:$0xff]  }
 0x8c2   :  { %v12705_v35 = vpop.eup %12704  ;;  %v7425_v12 = vmul.f32 %v12703_v24, %v7421_v59  ;;  %v12144_v52 = vld [vmem:[#allocation16 + $0xce0] ss:$16 sps:$4 sm:$0xff]   ;;  %v12153_v59 = vld [vmem:[#allocation16 + $0xd08] ss:$16 sps:$4 sm:$0xff]   ;;  %v12158_v24 = vld [vmem:[#allocation16 + $0xd24] ss:$16 sps:$4 sm:$0xff]  }
 0x8c3   :  { %v7426_v11 = vmul.f32 %v12705_v35, %v7422_v34  ;;  %v14785_v41 = vadd.f32 %v7428_v25, %v7424_v3  ;;  %v12707_v19 = vpop.eup %12706  ;;  %v12150_v42 = vld [vmem:[#allocation16 + $0xd00] ss:$16 sps:$4 sm:$0xff]   ;;  %v12161_v25 = vld [vmem:[#allocation16 + $0xd2c] ss:$16 sps:$4 sm:$0xff]   ;;  %v12159_v3 = vld [vmem:[#allocation16 + $0xd28] ss:$16 sps:$4 sm:$0xff]  }
 0x8c4   :  { %v14787_v32 = vadd.f32 %v7429_v21, %v7425_v12  ;;  %v7423_v60 = vsub.f32 1.0, %v12707_v19  ;;  %v12709_v15 = vpop.eup %12708  ;;  %v7431_v31 = vmul.f32 %v12707_v19, %v14676_v57  ;;  %v14808_v57 = vpack.c.bf16 %v14768_v16, %v14763_v18  ;;  %v12156_v34 = vld [vmem:[#allocation16 + $0xd20] ss:$16 sps:$4 sm:$0xff]   ;;  %v12164_v35 = vld [vmem:[#allocation16 + $0xd44] ss:$16 sps:$4 sm:$0xff]  }
 0x8c5   :  { %v14789_v28 = vadd.f32 %v7430_v45, %v7426_v11  ;;  %v12167_v21 = vld [vmem:[#allocation16 + $0xd4c] ss:$16 sps:$4 sm:$0xff]   ;;  %v12162_v12 = vld [vmem:[#allocation16 + $0xd40] ss:$16 sps:$4 sm:$0xff]   ;;  %v12165_v45 = vld [vmem:[#allocation16 + $0xd48] ss:$16 sps:$4 sm:$0xff]  }
 0x8c6   :  { %v7427_v49 = vmul.f32 %v12709_v15, %v7423_v60  ;;  %v12170_v11 = vld [vmem:[#allocation16 + $0xd64] ss:$16 sps:$4 sm:$0xff]   ;;  %v12173_v19 = vld [vmem:[#allocation16 + $0xd6c] ss:$16 sps:$4 sm:$0xff]   ;;  %v12168_v60 = vld [vmem:[#allocation16 + $0xd60] ss:$16 sps:$4 sm:$0xff]  }
 0x8c7   :  { %v14800_v46 = vpack.c.bf16 %v14789_v28, %v14785_v41  ;;  %v12171_v15 = vld [vmem:[#allocation16 + $0xd68] ss:$16 sps:$4 sm:$0xff]  }
 0x8c8   :  { %v14792_v14 = vadd.f32 %v7431_v31, %v7427_v49  ;;  %v12176_v31 = vld [vmem:[#allocation16 + $0xd84] ss:$16 sps:$4 sm:$0xff]   ;;  %v12179_v49 = vld [vmem:[#allocation16 + $0xd8c] ss:$16 sps:$4 sm:$0xff]  }
 0x8ca   :  { %v14796_v27 = vpack.c.bf16 %v14792_v14, %v14787_v32 }
 0x8cc   :  { %7920 = vmatprep.mubr.bf16.mxu0 %v14796_v27  ;;  %7963 = vmatprep.mubr.bf16.mxu1 %v14796_v27 }
 0x8cd   :  { %7921 = vmatmul.mubr.bf16.vlgmr.msra.gmra.mrb[72].mxu0 %v14800_v46  ;;  %7964 = vmatmul.mubr.bf16.vlgmr.msra.gmra.mrb[72].mxu1 %v14800_v46 }
 0x8ce   :  { %8303 = vmatpush1.bf16.msra.mxu0 %v12102_v33  ;;  %8346 = vmatpush1.bf16.msra.mxu1 %v12105_v7  ;;  %v12174_v33 = vld [vmem:[#allocation16 + $0xd80] ss:$16 sps:$4 sm:$0xff]   ;;  %v12177_v7 = vld [vmem:[#allocation16 + $0xd88] ss:$16 sps:$4 sm:$0xff]  }
 0x8cf   :  { %8334 = vmatprep.mubr.bf16.mxu0 %v14808_v57  ;;  %8377 = vmatprep.mubr.bf16.mxu1 %v14808_v57 }
 0x8d0   :  { %8304 = vmatprep.subr.bf16.mxu0 %v12110_v40  ;;  %8347 = vmatprep.subr.bf16.mxu1 %v12113_v61  ;;  %v12182_v40 = vld [vmem:[#allocation16 + $0xda4] ss:$16 sps:$4 sm:$0xff]   ;;  %v12185_v61 = vld [vmem:[#allocation16 + $0xdac] ss:$16 sps:$4 sm:$0xff]  }
 0x8d2   :  { %8305 = vmatpush1.bf16.msra.mxu0 %v12108_v4  ;;  %8348 = vmatpush1.bf16.msra.mxu1 %v12111_v51  ;;  %v12180_v4 = vld [vmem:[#allocation16 + $0xda0] ss:$16 sps:$4 sm:$0xff]   ;;  %v12183_v51 = vld [vmem:[#allocation16 + $0xda8] ss:$16 sps:$4 sm:$0xff]  }
 0x8d3   :  { %8306 = vmatprep.subr.bf16.mxu0 %v12116_v63  ;;  %8349 = vmatprep.subr.bf16.mxu1 %v12119_v20  ;;  %v12188_v63 = vld [vmem:[#allocation16 + $0xdc4] ss:$16 sps:$4 sm:$0xff]   ;;  %v12191_v20 = vld [vmem:[#allocation16 + $0xdcc] ss:$16 sps:$4 sm:$0xff]  }
 0x8d6   :  { %8307 = vmatpush1.bf16.msra.mxu0 %v12114_v8  ;;  %8350 = vmatpush1.bf16.msra.mxu1 %v12117_v54  ;;  %v12186_v8 = vld [vmem:[#allocation16 + $0xdc0] ss:$16 sps:$4 sm:$0xff]   ;;  %v12189_v54 = vld [vmem:[#allocation16 + $0xdc8] ss:$16 sps:$4 sm:$0xff]  }
 0x8d7   :  { %8308 = vmatprep.subr.bf16.mxu0 %v12122_v43  ;;  %8351 = vmatprep.subr.bf16.mxu1 %v12125_v9  ;;  %v12194_v43 = vld [vmem:[#allocation16 + $0xde4] ss:$16 sps:$4 sm:$0xff]   ;;  %v12197_v9 = vld [vmem:[#allocation16 + $0xdec] ss:$16 sps:$4 sm:$0xff]  }
 0x8da   :  { %8309 = vmatpush1.bf16.msra.mxu0 %v12120_v23  ;;  %8352 = vmatpush1.bf16.msra.mxu1 %v12123_v62  ;;  %v12192_v23 = vld [vmem:[#allocation16 + $0xde0] ss:$16 sps:$4 sm:$0xff]   ;;  %v12195_v62 = vld [vmem:[#allocation16 + $0xde8] ss:$16 sps:$4 sm:$0xff]  }
 0x8db   :  { %8310 = vmatprep.subr.bf16.mxu0 %v12128_v38  ;;  %8353 = vmatprep.subr.bf16.mxu1 %v12131_v22  ;;  %v14814_v38 = vpack.c.bf16 %v14766_v26, %v14760_v44  ;;  %v13367_v22 = vld [vmem:[#allocation10 + $0x4] ss:$24 sps:$4 sm:$0xff]  }
 0x8de   :  { %8311 = vmatpush1.bf16.msra.mxu0 %v12126_v36  ;;  %8354 = vmatpush1.bf16.msra.mxu1 %v12129_v1  ;;  %v13368_v36 = vld [vmem:[#allocation10 + $0xc] ss:$24 sps:$4 sm:$0xff]   ;;  %v13369_v1 = vld [vmem:[#allocation10] ss:$24 sps:$4 sm:$0xff]  }
 0x8df   :  { %8312 = vmatprep.subr.bf16.mxu0 %v12134_v53  ;;  %8355 = vmatprep.subr.bf16.mxu1 %v12137_v39  ;;  %v13370_v53 = vld [vmem:[#allocation10 + $0x8] ss:$24 sps:$4 sm:$0xff]   ;;  %v13371_v39 = vld [vmem:[#allocation10 + $0x34] ss:$24 sps:$4 sm:$0xff]  }
 0x8e2   :  { %8313 = vmatpush1.bf16.msra.mxu0 %v12132_v17  ;;  %8356 = vmatpush1.bf16.msra.mxu1 %v12135_v58  ;;  %v13372_v17 = vld [vmem:[#allocation10 + $0x3c] ss:$24 sps:$4 sm:$0xff]   ;;  %v13373_v58 = vld [vmem:[#allocation10 + $0x30] ss:$24 sps:$4 sm:$0xff]  }
 0x8e3   :  { %8314 = vmatprep.subr.bf16.mxu0 %v12140_v47  ;;  %8357 = vmatprep.subr.bf16.mxu1 %v12143_v6  ;;  %v13374_v47 = vld [vmem:[#allocation10 + $0x38] ss:$24 sps:$4 sm:$0xff]   ;;  %v13375_v6 = vld [vmem:[#allocation10 + $0x64] ss:$24 sps:$4 sm:$0xff]  }
 0x8e6   :  { %8315 = vmatpush1.bf16.msra.mxu0 %v12138_v48  ;;  %8358 = vmatpush1.bf16.msra.mxu1 %v12141_v37  ;;  %v13376_v48 = vld [vmem:[#allocation10 + $0x6c] ss:$24 sps:$4 sm:$0xff]   ;;  %v13377_v37 = vld [vmem:[#allocation10 + $0x60] ss:$24 sps:$4 sm:$0xff]  }
 0x8e7   :  { %8316 = vmatprep.subr.bf16.mxu0 %v12146_v2  ;;  %8359 = vmatprep.subr.bf16.mxu1 %v12149_v0  ;;  %v13378_v2 = vld [vmem:[#allocation10 + $0x68] ss:$24 sps:$4 sm:$0xff]   ;;  %v13379_v0 = vld [vmem:[#allocation10 + $0x94] ss:$24 sps:$4 sm:$0xff]  }
 0x8ea   :  { %8317 = vmatpush1.bf16.msra.mxu0 %v12144_v52  ;;  %8360 = vmatpush1.bf16.msra.mxu1 %v12147_v50  ;;  %v13380_v52 = vld [vmem:[#allocation10 + $0x9c] ss:$24 sps:$4 sm:$0xff]   ;;  %v13381_v50 = vld [vmem:[#allocation10 + $0x90] ss:$24 sps:$4 sm:$0xff]  }
 0x8eb   :  { %8318 = vmatprep.subr.bf16.mxu0 %v12152_v10  ;;  %8361 = vmatprep.subr.bf16.mxu1 %v12155_v5  ;;  %v13382_v10 = vld [vmem:[#allocation10 + $0x98] ss:$24 sps:$4 sm:$0xff]   ;;  %v13383_v5 = vld [vmem:[#allocation10 + $0xc4] ss:$24 sps:$4 sm:$0xff]  }
 0x8ee   :  { %8319 = vmatpush1.bf16.msra.mxu0 %v12150_v42  ;;  %8362 = vmatpush1.bf16.msra.mxu1 %v12153_v59  ;;  %v13384_v42 = vld [vmem:[#allocation10 + $0xcc] ss:$24 sps:$4 sm:$0xff]   ;;  %v13385_v59 = vld [vmem:[#allocation10 + $0xc0] ss:$24 sps:$4 sm:$0xff]  }
 0x8ef   :  { %8320 = vmatprep.subr.bf16.mxu0 %v12158_v24  ;;  %8363 = vmatprep.subr.bf16.mxu1 %v12161_v25  ;;  %v13386_v24 = vld [vmem:[#allocation10 + $0xc8] ss:$24 sps:$4 sm:$0xff]   ;;  %v13387_v25 = vld [vmem:[#allocation10 + $0xf4] ss:$24 sps:$4 sm:$0xff]  }
 0x8f2   :  { %8321 = vmatpush1.bf16.msra.mxu0 %v12156_v34  ;;  %8364 = vmatpush1.bf16.msra.mxu1 %v12159_v3  ;;  %v13388_v34 = vld [vmem:[#allocation10 + $0xfc] ss:$24 sps:$4 sm:$0xff]   ;;  %v13389_v3 = vld [vmem:[#allocation10 + $0xf0] ss:$24 sps:$4 sm:$0xff]  }
 0x8f3   :  { %8322 = vmatprep.subr.bf16.mxu0 %v12164_v35  ;;  %8365 = vmatprep.subr.bf16.mxu1 %v12167_v21  ;;  %v13390_v35 = vld [vmem:[#allocation10 + $0xf8] ss:$24 sps:$4 sm:$0xff]   ;;  %v13391_v21 = vld [vmem:[#allocation10 + $0x124] ss:$24 sps:$4 sm:$0xff]  }
 0x8f6   :  { %8323 = vmatpush1.bf16.msra.mxu0 %v12162_v12  ;;  %8366 = vmatpush1.bf16.msra.mxu1 %v12165_v45  ;;  %v13392_v12 = vld [vmem:[#allocation10 + $0x12c] ss:$24 sps:$4 sm:$0xff]   ;;  %v13393_v45 = vld [vmem:[#allocation10 + $0x120] ss:$24 sps:$4 sm:$0xff]  }
 0x8f7   :  { %8324 = vmatprep.subr.bf16.mxu0 %v12170_v11  ;;  %8367 = vmatprep.subr.bf16.mxu1 %v12173_v19  ;;  %v13394_v11 = vld [vmem:[#allocation10 + $0x128] ss:$24 sps:$4 sm:$0xff]   ;;  %v13395_v19 = vld [vmem:[#allocation10 + $0x154] ss:$24 sps:$4 sm:$0xff]  }
 0x8fa   :  { %8325 = vmatpush1.bf16.msra.mxu0 %v12168_v60  ;;  %8368 = vmatpush1.bf16.msra.mxu1 %v12171_v15  ;;  %v13396_v60 = vld [vmem:[#allocation10 + $0x15c] ss:$24 sps:$4 sm:$0xff]   ;;  %v13397_v15 = vld [vmem:[#allocation10 + $0x150] ss:$24 sps:$4 sm:$0xff]  }
 0x8fb   :  { %8326 = vmatprep.subr.bf16.mxu0 %v12176_v31  ;;  %8369 = vmatprep.subr.bf16.mxu1 %v12179_v49  ;;  %v13398_v31 = vld [vmem:[#allocation10 + $0x158] ss:$24 sps:$4 sm:$0xff]   ;;  %v13399_v49 = vld [vmem:[#allocation10 + $0x184] ss:$24 sps:$4 sm:$0xff]  }
 0x8fe   :  { %8327 = vmatpush1.bf16.msra.mxu0 %v12174_v33  ;;  %8370 = vmatpush1.bf16.msra.mxu1 %v12177_v7  ;;  %v13400_v33 = vld [vmem:[#allocation10 + $0x18c] ss:$24 sps:$4 sm:$0xff]   ;;  %v13401_v7 = vld [vmem:[#allocation10 + $0x180] ss:$24 sps:$4 sm:$0xff]  }
 0x8ff   :  { %8328 = vmatprep.subr.bf16.mxu0 %v12182_v40  ;;  %8371 = vmatprep.subr.bf16.mxu1 %v12185_v61  ;;  %v13402_v40 = vld [vmem:[#allocation10 + $0x188] ss:$24 sps:$4 sm:$0xff]   ;;  %v13403_v61 = vld [vmem:[#allocation10 + $0x1b4] ss:$24 sps:$4 sm:$0xff]  }
 0x902   :  { %8329 = vmatpush1.bf16.msra.mxu0 %v12180_v4  ;;  %8372 = vmatpush1.bf16.msra.mxu1 %v12183_v51  ;;  %v13404_v4 = vld [vmem:[#allocation10 + $0x1bc] ss:$24 sps:$4 sm:$0xff]   ;;  %v13405_v51 = vld [vmem:[#allocation10 + $0x1b0] ss:$24 sps:$4 sm:$0xff]  }
 0x903   :  { %8330 = vmatprep.subr.bf16.mxu0 %v12188_v63  ;;  %8373 = vmatprep.subr.bf16.mxu1 %v12191_v20  ;;  %v13406_v63 = vld [vmem:[#allocation10 + $0x1b8] ss:$24 sps:$4 sm:$0xff]   ;;  %v13407_v20 = vld [vmem:[#allocation10 + $0x1e4] ss:$24 sps:$4 sm:$0xff]  }
 0x906   :  { %8331 = vmatpush1.bf16.msra.mxu0 %v12186_v8  ;;  %8374 = vmatpush1.bf16.msra.mxu1 %v12189_v54  ;;  %v13408_v8 = vld [vmem:[#allocation10 + $0x1ec] ss:$24 sps:$4 sm:$0xff]   ;;  %v13409_v54 = vld [vmem:[#allocation10 + $0x1e0] ss:$24 sps:$4 sm:$0xff]  }
 0x907   :  { %8332 = vmatprep.subr.bf16.mxu0 %v12194_v43  ;;  %8375 = vmatprep.subr.bf16.mxu1 %v12197_v9  ;;  %v13410_v43 = vld [vmem:[#allocation10 + $0x1e8] ss:$24 sps:$4 sm:$0xff]   ;;  %v13411_v9 = vld [vmem:[#allocation10 + $0x214] ss:$24 sps:$4 sm:$0xff]  }
 0x90a   :  { %8333 = vmatpush1.bf16.msra.mxu0 %v12192_v23  ;;  %8376 = vmatpush1.bf16.msra.mxu1 %v12195_v62  ;;  %v13412_v23 = vld [vmem:[#allocation10 + $0x21c] ss:$24 sps:$4 sm:$0xff]   ;;  %v13413_v62 = vld [vmem:[#allocation10 + $0x210] ss:$24 sps:$4 sm:$0xff]  }
 0x90b   :  { %8416 = vmatprep.subr.bf16.mxu0 %v13367_v22  ;;  %8459 = vmatprep.subr.bf16.mxu1 %v13368_v36  ;;  %v13414_v22 = vld [vmem:[#allocation10 + $0x218] ss:$24 sps:$4 sm:$0xff]   ;;  %v13415_v36 = vld [vmem:[#allocation10 + $0x244] ss:$24 sps:$4 sm:$0xff]  }
 0x90d   :  { %8335 = vmatmul.mubr.bf16.vlgmr.msra.gmra.mrb[72].mxu0 %v14814_v38  ;;  %8378 = vmatmul.mubr.bf16.vlgmr.msra.gmra.mrb[72].mxu1 %v14814_v38 }
 0x90e   :  { %8417 = vmatpush1.bf16.msra.mxu0 %v13369_v1  ;;  %8448 = vmatprep.mubr.bf16.mxu0 %v14808_v57  ;;  %v13416_v1 = vld [vmem:[#allocation10 + $0x24c] ss:$24 sps:$4 sm:$0xff]  }
 0x90f   :  { %8460 = vmatpush1.bf16.msra.mxu1 %v13370_v53  ;;  %8491 = vmatprep.mubr.bf16.mxu1 %v14808_v57  ;;  %v13417_v53 = vld [vmem:[#allocation10 + $0x240] ss:$24 sps:$4 sm:$0xff]  }
 0x910   :  { %8418 = vmatprep.subr.bf16.mxu0 %v13371_v39  ;;  %8461 = vmatprep.subr.bf16.mxu1 %v13372_v17  ;;  %v13418_v39 = vld [vmem:[#allocation10 + $0x248] ss:$24 sps:$4 sm:$0xff]   ;;  %v13419_v17 = vld [vmem:[#allocation10 + $0x274] ss:$24 sps:$4 sm:$0xff]  }
 0x912   :  { %8419 = vmatpush1.bf16.msra.mxu0 %v13373_v58  ;;  %v13420_v58 = vld [vmem:[#allocation10 + $0x27c] ss:$24 sps:$4 sm:$0xff]  }
 0x913   :  { %8462 = vmatpush1.bf16.msra.mxu1 %v13374_v47  ;;  %8420 = vmatprep.subr.bf16.mxu0 %v13375_v6  ;;  %v13421_v47 = vld [vmem:[#allocation10 + $0x270] ss:$24 sps:$4 sm:$0xff]  }
 0x914   :  { %8463 = vmatprep.subr.bf16.mxu1 %v13376_v48  ;;  %v13422_v6 = vld [vmem:[#allocation10 + $0x278] ss:$24 sps:$4 sm:$0xff]   ;;  %v13423_v48 = vld [vmem:[#allocation10 + $0x2a4] ss:$24 sps:$4 sm:$0xff]  }
 0x916   :  { %8421 = vmatpush1.bf16.msra.mxu0 %v13377_v37  ;;  %v13424_v37 = vld [vmem:[#allocation10 + $0x2ac] ss:$24 sps:$4 sm:$0xff]  }
 0x917   :  { %8464 = vmatpush1.bf16.msra.mxu1 %v13378_v2  ;;  %8422 = vmatprep.subr.bf16.mxu0 %v13379_v0  ;;  %v13425_v2 = vld [vmem:[#allocation10 + $0x2a0] ss:$24 sps:$4 sm:$0xff]  }
 0x918   :  { %8465 = vmatprep.subr.bf16.mxu1 %v13380_v52  ;;  %v13426_v0 = vld [vmem:[#allocation10 + $0x2a8] ss:$24 sps:$4 sm:$0xff]   ;;  %v13427_v52 = vld [vmem:[#allocation10 + $0x2d4] ss:$24 sps:$4 sm:$0xff]  }
 0x91a   :  { %8423 = vmatpush1.bf16.msra.mxu0 %v13381_v50  ;;  %v13428_v50 = vld [vmem:[#allocation10 + $0x2dc] ss:$24 sps:$4 sm:$0xff]  }
 0x91b   :  { %8466 = vmatpush1.bf16.msra.mxu1 %v13382_v10  ;;  %8424 = vmatprep.subr.bf16.mxu0 %v13383_v5  ;;  %v13429_v10 = vld [vmem:[#allocation10 + $0x2d0] ss:$24 sps:$4 sm:$0xff]  }
 0x91c   :  { %8467 = vmatprep.subr.bf16.mxu1 %v13384_v42  ;;  %v13430_v5 = vld [vmem:[#allocation10 + $0x2d8] ss:$24 sps:$4 sm:$0xff]   ;;  %v13431_v42 = vld [vmem:[#allocation10 + $0x14] ss:$24 sps:$4 sm:$0xff]  }
 0x91e   :  { %8425 = vmatpush1.bf16.msra.mxu0 %v13385_v59  ;;  %v13432_v59 = vld [vmem:[#allocation12 + $0x4] ss:$24 sps:$4 sm:$0xff]  }
 0x91f   :  { %8468 = vmatpush1.bf16.msra.mxu1 %v13386_v24  ;;  %8426 = vmatprep.subr.bf16.mxu0 %v13387_v25  ;;  %v13433_v24 = vld [vmem:[#allocation10 + $0x10] ss:$24 sps:$4 sm:$0xff]   ;;  %v13434_v25 = vld [vmem:[#allocation12] ss:$24 sps:$4 sm:$0xff]  }
 0x920   :  { %8469 = vmatprep.subr.bf16.mxu1 %v13388_v34  ;;  %v13435_v34 = vld [vmem:[#allocation10 + $0x44] ss:$24 sps:$4 sm:$0xff]  }
 0x922   :  { %8427 = vmatpush1.bf16.msra.mxu0 %v13389_v3  ;;  %v13436_v3 = vld [vmem:[#allocation12 + $0x34] ss:$24 sps:$4 sm:$0xff]  }
 0x923   :  { %8470 = vmatpush1.bf16.msra.mxu1 %v13390_v35  ;;  %8428 = vmatprep.subr.bf16.mxu0 %v13391_v21  ;;  %v13437_v35 = vld [vmem:[#allocation10 + $0x40] ss:$24 sps:$4 sm:$0xff]   ;;  %v13438_v21 = vld [vmem:[#allocation12 + $0x30] ss:$24 sps:$4 sm:$0xff]  }
 0x924   :  { %8471 = vmatprep.subr.bf16.mxu1 %v13392_v12  ;;  %v13439_v12 = vld [vmem:[#allocation10 + $0x74] ss:$24 sps:$4 sm:$0xff]  }
 0x926   :  { %8429 = vmatpush1.bf16.msra.mxu0 %v13393_v45  ;;  %v13440_v45 = vld [vmem:[#allocation12 + $0x64] ss:$24 sps:$4 sm:$0xff]  }
 0x927   :  { %8472 = vmatpush1.bf16.msra.mxu1 %v13394_v11  ;;  %8430 = vmatprep.subr.bf16.mxu0 %v13395_v19  ;;  %v13441_v11 = vld [vmem:[#allocation10 + $0x70] ss:$24 sps:$4 sm:$0xff]   ;;  %v13442_v19 = vld [vmem:[#allocation12 + $0x60] ss:$24 sps:$4 sm:$0xff]  }
 0x928   :  { %8473 = vmatprep.subr.bf16.mxu1 %v13396_v60  ;;  %v13444_v60 = vld [vmem:[#allocation12 + $0x94] ss:$24 sps:$4 sm:$0xff]  }
 0x92a   :  { %8431 = vmatpush1.bf16.msra.mxu0 %v13397_v15  ;;  %v13445_v15 = vld [vmem:[#allocation10 + $0xa0] ss:$24 sps:$4 sm:$0xff]  }
 0x92b   :  { %8474 = vmatpush1.bf16.msra.mxu1 %v13398_v31  ;;  %8432 = vmatprep.subr.bf16.mxu0 %v13399_v49  ;;  %v13446_v31 = vld [vmem:[#allocation12 + $0x90] ss:$24 sps:$4 sm:$0xff]   ;;  %v13447_v49 = vld [vmem:[#allocation10 + $0xd4] ss:$24 sps:$4 sm:$0xff]  }
 0x92c   :  { %8475 = vmatprep.subr.bf16.mxu1 %v13400_v33  ;;  %v13448_v33 = vld [vmem:[#allocation12 + $0xc4] ss:$24 sps:$4 sm:$0xff]  }
 0x92e   :  { %8433 = vmatpush1.bf16.msra.mxu0 %v13401_v7  ;;  %v13449_v7 = vld [vmem:[#allocation10 + $0xd0] ss:$24 sps:$4 sm:$0xff]  }
 0x92f   :  { %8476 = vmatpush1.bf16.msra.mxu1 %v13402_v40  ;;  %8434 = vmatprep.subr.bf16.mxu0 %v13403_v61  ;;  %v13450_v40 = vld [vmem:[#allocation12 + $0xc0] ss:$24 sps:$4 sm:$0xff]   ;;  %v13451_v61 = vld [vmem:[#allocation10 + $0x104] ss:$24 sps:$4 sm:$0xff]  }
 0x930   :  { %8477 = vmatprep.subr.bf16.mxu1 %v13404_v4  ;;  %v13452_v4 = vld [vmem:[#allocation12 + $0xf4] ss:$24 sps:$4 sm:$0xff]  }
 0x932   :  { %8435 = vmatpush1.bf16.msra.mxu0 %v13405_v51  ;;  %v13453_v51 = vld [vmem:[#allocation10 + $0x100] ss:$24 sps:$4 sm:$0xff]  }
 0x933   :  { %8478 = vmatpush1.bf16.msra.mxu1 %v13406_v63  ;;  %8436 = vmatprep.subr.bf16.mxu0 %v13407_v20  ;;  %v13454_v63 = vld [vmem:[#allocation12 + $0xf0] ss:$24 sps:$4 sm:$0xff]   ;;  %v13455_v20 = vld [vmem:[#allocation10 + $0x134] ss:$24 sps:$4 sm:$0xff]  }
 0x934   :  { %8479 = vmatprep.subr.bf16.mxu1 %v13408_v8  ;;  %v13456_v8 = vld [vmem:[#allocation12 + $0x124] ss:$24 sps:$4 sm:$0xff]  }
 0x936   :  { %8437 = vmatpush1.bf16.msra.mxu0 %v13409_v54  ;;  %v13457_v54 = vld [vmem:[#allocation10 + $0x130] ss:$24 sps:$4 sm:$0xff]  }
 0x937   :  { %8480 = vmatpush1.bf16.msra.mxu1 %v13410_v43  ;;  %8438 = vmatprep.subr.bf16.mxu0 %v13411_v9  ;;  %v13458_v43 = vld [vmem:[#allocation12 + $0x120] ss:$24 sps:$4 sm:$0xff]   ;;  %v13459_v9 = vld [vmem:[#allocation10 + $0x164] ss:$24 sps:$4 sm:$0xff]  }
 0x938   :  { %8481 = vmatprep.subr.bf16.mxu1 %v13412_v23  ;;  %v13460_v23 = vld [vmem:[#allocation12 + $0x154] ss:$24 sps:$4 sm:$0xff]  }
 0x93a   :  { %8439 = vmatpush1.bf16.msra.mxu0 %v13413_v62  ;;  %v13461_v62 = vld [vmem:[#allocation10 + $0x160] ss:$24 sps:$4 sm:$0xff]  }
 0x93b   :  { %8482 = vmatpush1.bf16.msra.mxu1 %v13414_v22  ;;  %8440 = vmatprep.subr.bf16.mxu0 %v13415_v36  ;;  %v13462_v22 = vld [vmem:[#allocation12 + $0x150] ss:$24 sps:$4 sm:$0xff]   ;;  %v13463_v36 = vld [vmem:[#allocation10 + $0x194] ss:$24 sps:$4 sm:$0xff]  }
 0x93c   :  { %8483 = vmatprep.subr.bf16.mxu1 %v13416_v1  ;;  %v13464_v1 = vld [vmem:[#allocation12 + $0x184] ss:$24 sps:$4 sm:$0xff]  }
 0x93e   :  { %8441 = vmatpush1.bf16.msra.mxu0 %v13417_v53  ;;  %v13465_v53 = vld [vmem:[#allocation10 + $0x190] ss:$24 sps:$4 sm:$0xff]  }
 0x93f   :  { %8484 = vmatpush1.bf16.msra.mxu1 %v13418_v39  ;;  %8442 = vmatprep.subr.bf16.mxu0 %v13419_v17  ;;  %v13466_v39 = vld [vmem:[#allocation12 + $0x180] ss:$24 sps:$4 sm:$0xff]   ;;  %v13467_v17 = vld [vmem:[#allocation10 + $0x1c4] ss:$24 sps:$4 sm:$0xff]  }
 0x940   :  { %8485 = vmatprep.subr.bf16.mxu1 %v13420_v58  ;;  %v13468_v58 = vld [vmem:[#allocation12 + $0x1b4] ss:$24 sps:$4 sm:$0xff]  }
 0x942   :  { %8443 = vmatpush1.bf16.msra.mxu0 %v13421_v47  ;;  %v13469_v47 = vld [vmem:[#allocation10 + $0x1c0] ss:$24 sps:$4 sm:$0xff]  }
 0x943   :  { %8486 = vmatpush1.bf16.msra.mxu1 %v13422_v6  ;;  %8444 = vmatprep.subr.bf16.mxu0 %v13423_v48  ;;  %v13470_v6 = vld [vmem:[#allocation12 + $0x1b0] ss:$24 sps:$4 sm:$0xff]   ;;  %v13471_v48 = vld [vmem:[#allocation10 + $0x1f4] ss:$24 sps:$4 sm:$0xff]  }
 0x944   :  { %8487 = vmatprep.subr.bf16.mxu1 %v13424_v37  ;;  %v13472_v37 = vld [vmem:[#allocation12 + $0x1e4] ss:$24 sps:$4 sm:$0xff]  }
 0x946   :  { %8445 = vmatpush1.bf16.msra.mxu0 %v13425_v2  ;;  %v13473_v2 = vld [vmem:[#allocation10 + $0x1f0] ss:$24 sps:$4 sm:$0xff]  }
 0x947   :  { %8488 = vmatpush1.bf16.msra.mxu1 %v13426_v0  ;;  %8446 = vmatprep.subr.bf16.mxu0 %v13427_v52  ;;  %v13474_v0 = vld [vmem:[#allocation12 + $0x1e0] ss:$24 sps:$4 sm:$0xff]   ;;  %v13475_v52 = vld [vmem:[#allocation10 + $0x224] ss:$24 sps:$4 sm:$0xff]  }
 0x948   :  { %8489 = vmatprep.subr.bf16.mxu1 %v13428_v50  ;;  %v13476_v50 = vld [vmem:[#allocation12 + $0x214] ss:$24 sps:$4 sm:$0xff]  }
 0x94a   :  { %8447 = vmatpush1.bf16.msra.mxu0 %v13429_v10  ;;  %v13477_v10 = vld [vmem:[#allocation10 + $0x220] ss:$24 sps:$4 sm:$0xff]  }
 0x94b   :  { %8490 = vmatpush1.bf16.msra.mxu1 %v13430_v5  ;;  %8502 = vmatprep.subr.bf16.mxu0 %v13431_v42  ;;  %v13478_v5 = vld [vmem:[#allocation12 + $0x210] ss:$24 sps:$4 sm:$0xff]   ;;  %v13479_v42 = vld [vmem:[#allocation10 + $0x254] ss:$24 sps:$4 sm:$0xff]  }
 0x94c   :  { %8645 = vmatprep.subr.bf16.mxu1 %v13432_v59  ;;  %v13480_v59 = vld [vmem:[#allocation12 + $0x244] ss:$24 sps:$4 sm:$0xff]  }
 0x94d   :  { %8449 = vmatmul.mubr.bf16.vlgmr.msra.gmra.mrb[112].mxu0 %v14814_v38 }
 0x94e   :  { %8492 = vmatmul.mubr.bf16.vlgmr.msra.gmra.mrb[112].mxu1 %v14814_v38  ;;  %8503 = vmatpush1.bf16.msra.mxu0 %v13433_v24  ;;  %v13481_v24 = vld [vmem:[#allocation10 + $0x250] ss:$24 sps:$4 sm:$0xff]  }
 0x94f   :  { %8534 = vmatprep.mubr.bf16.mxu0 %v14808_v57  ;;  %8646 = vmatpush1.bf16.msra.mxu1 %v13434_v25  ;;  %v13443_v57 = vld [vmem:[#allocation10 + $0xa4] ss:$24 sps:$4 sm:$0xff]   ;;  %v13482_v25 = vld [vmem:[#allocation12 + $0x240] ss:$24 sps:$4 sm:$0xff]  }
 0x950   :  { %8677 = vmatprep.mubr.bf16.mxu1 %v14796_v27  ;;  %8504 = vmatprep.subr.bf16.mxu0 %v13435_v34  ;;  %v13483_v34 = vld [vmem:[#allocation10 + $0x284] ss:$24 sps:$4 sm:$0xff]  }
 0x951   :  { %8647 = vmatprep.subr.bf16.mxu1 %v13436_v3  ;;  %v13484_v3 = vld [vmem:[#allocation12 + $0x274] ss:$24 sps:$4 sm:$0xff]  }
 0x952   :  { %8505 = vmatpush1.bf16.msra.mxu0 %v13437_v35  ;;  %v13485_v35 = vld [vmem:[#allocation10 + $0x280] ss:$24 sps:$4 sm:$0xff]  }
 0x953   :  { %8648 = vmatpush1.bf16.msra.mxu1 %v13438_v21  ;;  %8506 = vmatprep.subr.bf16.mxu0 %v13439_v12  ;;  %v13486_v21 = vld [vmem:[#allocation12 + $0x270] ss:$24 sps:$4 sm:$0xff]   ;;  %v13487_v12 = vld [vmem:[#allocation10 + $0x2b4] ss:$24 sps:$4 sm:$0xff]  }
 0x954   :  { %8649 = vmatprep.subr.bf16.mxu1 %v13440_v45  ;;  %v13488_v45 = vld [vmem:[#allocation12 + $0x2a4] ss:$24 sps:$4 sm:$0xff]  }
 0x956   :  { %8507 = vmatpush1.bf16.msra.mxu0 %v13441_v11  ;;  %v13489_v11 = vld [vmem:[#allocation10 + $0x2b0] ss:$24 sps:$4 sm:$0xff]  }
 0x957   :  { %8650 = vmatpush1.bf16.msra.mxu1 %v13442_v19  ;;  %8508 = vmatprep.subr.bf16.mxu0 %v13443_v57  ;;  %v13490_v19 = vld [vmem:[#allocation12 + $0x2a0] ss:$24 sps:$4 sm:$0xff]   ;;  %v13491_v57 = vld [vmem:[#allocation10 + $0x2e4] ss:$24 sps:$4 sm:$0xff]  }
 0x958   :  { %8651 = vmatprep.subr.bf16.mxu1 %v13444_v60  ;;  %v13492_v60 = vld [vmem:[#allocation12 + $0x2d4] ss:$24 sps:$4 sm:$0xff]  }
 0x95a   :  { %8509 = vmatpush1.bf16.msra.mxu0 %v13445_v15  ;;  %v13493_v15 = vld [vmem:[#allocation10 + $0x2e0] ss:$24 sps:$4 sm:$0xff]  }
 0x95b   :  { %8652 = vmatpush1.bf16.msra.mxu1 %v13446_v31  ;;  %8510 = vmatprep.subr.bf16.mxu0 %v13447_v49  ;;  %v13494_v31 = vld [vmem:[#allocation12 + $0x2d0] ss:$24 sps:$4 sm:$0xff]   ;;  %v13495_v49 = vld [vmem:[#allocation12 + $0xc] ss:$24 sps:$4 sm:$0xff]  }
 0x95c   :  { %8653 = vmatprep.subr.bf16.mxu1 %v13448_v33  ;;  %v13496_v33 = vld [vmem:[#allocation12 + $0x14] ss:$24 sps:$4 sm:$0xff]  }
 0x95e   :  { %8511 = vmatpush1.bf16.msra.mxu0 %v13449_v7  ;;  %v13497_v7 = vld [vmem:[#allocation12 + $0x8] ss:$24 sps:$4 sm:$0xff]  }
 0x95f   :  { %8654 = vmatpush1.bf16.msra.mxu1 %v13450_v40  ;;  %8512 = vmatprep.subr.bf16.mxu0 %v13451_v61  ;;  %v13498_v40 = vld [vmem:[#allocation12 + $0x10] ss:$24 sps:$4 sm:$0xff]   ;;  %v13499_v61 = vld [vmem:[#allocation12 + $0x3c] ss:$24 sps:$4 sm:$0xff]  }
 0x960   :  { %8655 = vmatprep.subr.bf16.mxu1 %v13452_v4  ;;  %v13500_v4 = vld [vmem:[#allocation12 + $0x44] ss:$24 sps:$4 sm:$0xff]  }
 0x962   :  { %8513 = vmatpush1.bf16.msra.mxu0 %v13453_v51  ;;  %v13501_v51 = vld [vmem:[#allocation12 + $0x38] ss:$24 sps:$4 sm:$0xff]  }
 0x963   :  { %8656 = vmatpush1.bf16.msra.mxu1 %v13454_v63  ;;  %8514 = vmatprep.subr.bf16.mxu0 %v13455_v20  ;;  %v13502_v63 = vld [vmem:[#allocation12 + $0x40] ss:$24 sps:$4 sm:$0xff]   ;;  %v13503_v20 = vld [vmem:[#allocation12 + $0x6c] ss:$24 sps:$4 sm:$0xff]  }
 0x964   :  { %8657 = vmatprep.subr.bf16.mxu1 %v13456_v8  ;;  %v13505_v8 = vld [vmem:[#allocation12 + $0x68] ss:$24 sps:$4 sm:$0xff]  }
 0x966   :  { %8515 = vmatpush1.bf16.msra.mxu0 %v13457_v54  ;;  %v13506_v54 = vld [vmem:[#allocation12 + $0x70] ss:$24 sps:$4 sm:$0xff]  }
 0x967   :  { %8658 = vmatpush1.bf16.msra.mxu1 %v13458_v43  ;;  %8516 = vmatprep.subr.bf16.mxu0 %v13459_v9  ;;  %v13507_v43 = vld [vmem:[#allocation12 + $0x9c] ss:$24 sps:$4 sm:$0xff]  }
 0x968   :  { %8659 = vmatprep.subr.bf16.mxu1 %v13460_v23  ;;  %v13508_v9 = vld [vmem:[#allocation12 + $0xa4] ss:$24 sps:$4 sm:$0xff]   ;;  %v13510_v23 = vld [vmem:[#allocation12 + $0xa0] ss:$24 sps:$4 sm:$0xff]  }
 0x96a   :  { %8517 = vmatpush1.bf16.msra.mxu0 %v13461_v62  ;;  %v13511_v62 = vld [vmem:[#allocation12 + $0xcc] ss:$24 sps:$4 sm:$0xff]  }
 0x96b   :  { %8660 = vmatpush1.bf16.msra.mxu1 %v13462_v22  ;;  %8518 = vmatprep.subr.bf16.mxu0 %v13463_v36  ;;  %v13512_v22 = vld [vmem:[#allocation12 + $0xd4] ss:$24 sps:$4 sm:$0xff]   ;;  %v13513_v36 = vld [vmem:[#allocation12 + $0xc8] ss:$24 sps:$4 sm:$0xff]  }
 0x96c   :  { %8661 = vmatprep.subr.bf16.mxu1 %v13464_v1  ;;  %v13514_v1 = vld [vmem:[#allocation12 + $0xd0] ss:$24 sps:$4 sm:$0xff]  }
 0x96e   :  { %8519 = vmatpush1.bf16.msra.mxu0 %v13465_v53  ;;  %v13515_v53 = vld [vmem:[#allocation12 + $0xfc] ss:$24 sps:$4 sm:$0xff]  }
 0x96f   :  { %8662 = vmatpush1.bf16.msra.mxu1 %v13466_v39  ;;  %8520 = vmatprep.subr.bf16.mxu0 %v13467_v17  ;;  %v13516_v39 = vld [vmem:[#allocation12 + $0x104] ss:$24 sps:$4 sm:$0xff]   ;;  %v13517_v17 = vld [vmem:[#allocation12 + $0xf8] ss:$24 sps:$4 sm:$0xff]  }
 0x970   :  { %8663 = vmatprep.subr.bf16.mxu1 %v13468_v58  ;;  %v13518_v58 = vld [vmem:[#allocation12 + $0x100] ss:$24 sps:$4 sm:$0xff]  }
 0x972   :  { %8521 = vmatpush1.bf16.msra.mxu0 %v13469_v47  ;;  %v13519_v47 = vld [vmem:[#allocation12 + $0x12c] ss:$24 sps:$4 sm:$0xff]  }
 0x973   :  { %8664 = vmatpush1.bf16.msra.mxu1 %v13470_v6  ;;  %8522 = vmatprep.subr.bf16.mxu0 %v13471_v48  ;;  %v13520_v6 = vld [vmem:[#allocation12 + $0x134] ss:$24 sps:$4 sm:$0xff]   ;;  %v13521_v48 = vld [vmem:[#allocation12 + $0x128] ss:$24 sps:$4 sm:$0xff]  }
 0x974   :  { %8665 = vmatprep.subr.bf16.mxu1 %v13472_v37  ;;  %v13522_v37 = vld [vmem:[#allocation12 + $0x130] ss:$24 sps:$4 sm:$0xff]  }
 0x976   :  { %8523 = vmatpush1.bf16.msra.mxu0 %v13473_v2  ;;  %v13523_v2 = vld [vmem:[#allocation12 + $0x15c] ss:$24 sps:$4 sm:$0xff]  }
 0x977   :  { %8666 = vmatpush1.bf16.msra.mxu1 %v13474_v0  ;;  %8524 = vmatprep.subr.bf16.mxu0 %v13475_v52  ;;  %v13524_v0 = vld [vmem:[#allocation12 + $0x164] ss:$24 sps:$4 sm:$0xff]   ;;  %v13525_v52 = vld [vmem:[#allocation12 + $0x158] ss:$24 sps:$4 sm:$0xff]  }
 0x978   :  { %8667 = vmatprep.subr.bf16.mxu1 %v13476_v50  ;;  %v13526_v50 = vld [vmem:[#allocation12 + $0x160] ss:$24 sps:$4 sm:$0xff]  }
 0x97a   :  { %8525 = vmatpush1.bf16.msra.mxu0 %v13477_v10  ;;  %v13527_v10 = vld [vmem:[#allocation12 + $0x18c] ss:$24 sps:$4 sm:$0xff]  }
 0x97b   :  { %8668 = vmatpush1.bf16.msra.mxu1 %v13478_v5  ;;  %8526 = vmatprep.subr.bf16.mxu0 %v13479_v42  ;;  %v13528_v5 = vld [vmem:[#allocation12 + $0x194] ss:$24 sps:$4 sm:$0xff]   ;;  %v13529_v42 = vld [vmem:[#allocation12 + $0x188] ss:$24 sps:$4 sm:$0xff]  }
 0x97c   :  { %8669 = vmatprep.subr.bf16.mxu1 %v13480_v59  ;;  %v13530_v59 = vld [vmem:[#allocation12 + $0x190] ss:$24 sps:$4 sm:$0xff]  }
 0x97e   :  { %8527 = vmatpush1.bf16.msra.mxu0 %v13481_v24  ;;  %v13531_v24 = vld [vmem:[#allocation12 + $0x1bc] ss:$24 sps:$4 sm:$0xff]  }
 0x97f   :  { %8670 = vmatpush1.bf16.msra.mxu1 %v13482_v25  ;;  %8528 = vmatprep.subr.bf16.mxu0 %v13483_v34  ;;  %v13532_v25 = vld [vmem:[#allocation12 + $0x1c4] ss:$24 sps:$4 sm:$0xff]   ;;  %v13533_v34 = vld [vmem:[#allocation12 + $0x1b8] ss:$24 sps:$4 sm:$0xff]  }
 0x980   :  { %8671 = vmatprep.subr.bf16.mxu1 %v13484_v3  ;;  %v13534_v3 = vld [vmem:[#allocation12 + $0x1c0] ss:$24 sps:$4 sm:$0xff]  }
 0x982   :  { %8529 = vmatpush1.bf16.msra.mxu0 %v13485_v35  ;;  %v13535_v35 = vld [vmem:[#allocation12 + $0x1ec] ss:$24 sps:$4 sm:$0xff]  }
 0x983   :  { %8672 = vmatpush1.bf16.msra.mxu1 %v13486_v21  ;;  %8530 = vmatprep.subr.bf16.mxu0 %v13487_v12  ;;  %v13536_v21 = vld [vmem:[#allocation12 + $0x1f4] ss:$24 sps:$4 sm:$0xff]   ;;  %v13537_v12 = vld [vmem:[#allocation12 + $0x1e8] ss:$24 sps:$4 sm:$0xff]  }
 0x984   :  { %8673 = vmatprep.subr.bf16.mxu1 %v13488_v45  ;;  %v13538_v45 = vld [vmem:[#allocation12 + $0x1f0] ss:$24 sps:$4 sm:$0xff]  }
 0x986   :  { %8531 = vmatpush1.bf16.msra.mxu0 %v13489_v11  ;;  %v13539_v11 = vld [vmem:[#allocation12 + $0x21c] ss:$24 sps:$4 sm:$0xff]  }
 0x987   :  { %8674 = vmatpush1.bf16.msra.mxu1 %v13490_v19  ;;  %8532 = vmatprep.subr.bf16.mxu0 %v13491_v57  ;;  %v13540_v19 = vld [vmem:[#allocation12 + $0x224] ss:$24 sps:$4 sm:$0xff]   ;;  %v13541_v57 = vld [vmem:[#allocation12 + $0x218] ss:$24 sps:$4 sm:$0xff]  }
 0x988   :  { %8675 = vmatprep.subr.bf16.mxu1 %v13492_v60  ;;  %v13542_v60 = vld [vmem:[#allocation12 + $0x220] ss:$24 sps:$4 sm:$0xff]  }
 0x98a   :  { %8533 = vmatpush1.bf16.msra.mxu0 %v13493_v15  ;;  %v13543_v15 = vld [vmem:[#allocation12 + $0x24c] ss:$24 sps:$4 sm:$0xff]  }
 0x98b   :  { %8676 = vmatpush1.bf16.msra.mxu1 %v13494_v31  ;;  %8688 = vmatprep.subr.bf16.mxu0 %v13495_v49  ;;  %v13544_v31 = vld [vmem:[#allocation12 + $0x254] ss:$24 sps:$4 sm:$0xff]   ;;  %v13545_v49 = vld [vmem:[#allocation12 + $0x248] ss:$24 sps:$4 sm:$0xff]  }
 0x98c   :  { %8731 = vmatprep.subr.bf16.mxu1 %v13496_v33  ;;  %v13546_v33 = vld [vmem:[#allocation12 + $0x250] ss:$24 sps:$4 sm:$0xff]  }
 0x98d   :  { %8535 = vmatmul.mubr.bf16.vlgmr.msra.gmra.mrb[116].mxu0 %v14814_v38  ;;  %v13504_v38 = vld [vmem:[#allocation12 + $0x74] ss:$24 sps:$4 sm:$0xff]  }
 0x98e   :  { %8678 = vmatmul.mubr.bf16.vlgmr.msra.gmra.mrb[116].mxu1 %v14800_v46  ;;  %8689 = vmatpush1.bf16.msra.mxu0 %v13497_v7  ;;  %v13547_v7 = vld [vmem:[#allocation12 + $0x27c] ss:$24 sps:$4 sm:$0xff]  }
 0x98f   :  { %8720 = vmatprep.mubr.bf16.mxu0 %v14796_v27  ;;  %8732 = vmatpush1.bf16.msra.mxu1 %v13498_v40  ;;  %v13548_v40 = vld [vmem:[#allocation12 + $0x284] ss:$24 sps:$4 sm:$0xff]  }
 0x990   :  { %8763 = vmatprep.mubr.bf16.mxu1 %v14796_v27  ;;  %8690 = vmatprep.subr.bf16.mxu0 %v13499_v61  ;;  %v13509_v27 = vld [vmem:[#allocation12 + $0x98] ss:$24 sps:$4 sm:$0xff]  }
 0x991   :  { %8733 = vmatprep.subr.bf16.mxu1 %v13500_v4  ;;  %v13549_v61 = vld [vmem:[#allocation12 + $0x278] ss:$24 sps:$4 sm:$0xff]  }
 0x992   :  { %8691 = vmatpush1.bf16.msra.mxu0 %v13501_v51  ;;  %v13550_v4 = vld [vmem:[#allocation12 + $0x280] ss:$24 sps:$4 sm:$0xff]   ;;  %v13551_v51 = vld [vmem:[#allocation12 + $0x2ac] ss:$24 sps:$4 sm:$0xff]  }
 0x993   :  { %8734 = vmatpush1.bf16.msra.mxu1 %v13502_v63  ;;  %8692 = vmatprep.subr.bf16.mxu0 %v13503_v20  ;;  %v13552_v63 = vld [vmem:[#allocation12 + $0x2b4] ss:$24 sps:$4 sm:$0xff]   ;;  %v13553_v20 = vld [vmem:[#allocation12 + $0x2a8] ss:$24 sps:$4 sm:$0xff]  }
 0x994   :  { %8735 = vmatprep.subr.bf16.mxu1 %v13504_v38  ;;  %v13554_v38 = vld [vmem:[#allocation12 + $0x2b0] ss:$24 sps:$4 sm:$0xff]  }
 0x996   :  { %8693 = vmatpush1.bf16.msra.mxu0 %v13505_v8  ;;  %v13555_v8 = vld [vmem:[#allocation12 + $0x2dc] ss:$24 sps:$4 sm:$0xff]  }
 0x997   :  { %8736 = vmatpush1.bf16.msra.mxu1 %v13506_v54  ;;  %8694 = vmatprep.subr.bf16.mxu0 %v13507_v43  ;;  %v13556_v54 = vld [vmem:[#allocation12 + $0x2e4] ss:$24 sps:$4 sm:$0xff]   ;;  %v13557_v43 = vld [vmem:[#allocation12 + $0x2d8] ss:$24 sps:$4 sm:$0xff]  }
 0x998   :  { %8737 = vmatprep.subr.bf16.mxu1 %v13508_v9  ;;  %v13558_v9 = vld [vmem:[#allocation12 + $0x2e0] ss:$24 sps:$4 sm:$0xff]  }
 0x99a   :  { %8695 = vmatpush1.bf16.msra.mxu0 %v13509_v27  ;;  %v12198_v27 = vld [vmem:[#allocation16 + $0x200] ss:$16 sps:$4 sm:$0xff]  }
 0x99b   :  { %8738 = vmatpush1.bf16.msra.mxu1 %v13510_v23  ;;  %8696 = vmatprep.subr.bf16.mxu0 %v13511_v62  ;;  %v12200_v23 = vld [vmem:[#allocation16 + $0x204] ss:$16 sps:$4 sm:$0xff]   ;;  %v12201_v62 = vld [vmem:[#allocation16 + $0x208] ss:$16 sps:$4 sm:$0xff]  }
 0x99c   :  { %8739 = vmatprep.subr.bf16.mxu1 %v13512_v22  ;;  %v12203_v22 = vld [vmem:[#allocation16 + $0x20c] ss:$16 sps:$4 sm:$0xff]  }
 0x99e   :  { %8697 = vmatpush1.bf16.msra.mxu0 %v13513_v36  ;;  %v12206_v36 = vld [vmem:[#allocation16 + $0x224] ss:$16 sps:$4 sm:$0xff]  }
 0x99f   :  { %8740 = vmatpush1.bf16.msra.mxu1 %v13514_v1  ;;  %8698 = vmatprep.subr.bf16.mxu0 %v13515_v53  ;;  %v12209_v1 = vld [vmem:[#allocation16 + $0x22c] ss:$16 sps:$4 sm:$0xff]   ;;  %v12204_v53 = vld [vmem:[#allocation16 + $0x220] ss:$16 sps:$4 sm:$0xff]  }
 0x9a0   :  { %8741 = vmatprep.subr.bf16.mxu1 %v13516_v39  ;;  %v12207_v39 = vld [vmem:[#allocation16 + $0x228] ss:$16 sps:$4 sm:$0xff]  }
 0x9a2   :  { %8699 = vmatpush1.bf16.msra.mxu0 %v13517_v17  ;;  %v12212_v17 = vld [vmem:[#allocation16 + $0x244] ss:$16 sps:$4 sm:$0xff]  }
 0x9a3   :  { %8742 = vmatpush1.bf16.msra.mxu1 %v13518_v58  ;;  %8700 = vmatprep.subr.bf16.mxu0 %v13519_v47  ;;  %v12215_v58 = vld [vmem:[#allocation16 + $0x24c] ss:$16 sps:$4 sm:$0xff]   ;;  %v12210_v47 = vld [vmem:[#allocation16 + $0x240] ss:$16 sps:$4 sm:$0xff]  }
 0x9a4   :  { %8743 = vmatprep.subr.bf16.mxu1 %v13520_v6  ;;  %v12218_v6 = vld [vmem:[#allocation16 + $0x264] ss:$16 sps:$4 sm:$0xff]  }
 0x9a6   :  { %8701 = vmatpush1.bf16.msra.mxu0 %v13521_v48  ;;  %v12221_v48 = vld [vmem:[#allocation16 + $0x26c] ss:$16 sps:$4 sm:$0xff]  }
 0x9a7   :  { %8744 = vmatpush1.bf16.msra.mxu1 %v13522_v37  ;;  %8702 = vmatprep.subr.bf16.mxu0 %v13523_v2  ;;  %v12216_v37 = vld [vmem:[#allocation16 + $0x260] ss:$16 sps:$4 sm:$0xff]   ;;  %v12219_v2 = vld [vmem:[#allocation16 + $0x268] ss:$16 sps:$4 sm:$0xff]  }
 0x9a8   :  { %8745 = vmatprep.subr.bf16.mxu1 %v13524_v0  ;;  %v12224_v0 = vld [vmem:[#allocation16 + $0x284] ss:$16 sps:$4 sm:$0xff]  }
 0x9aa   :  { %8703 = vmatpush1.bf16.msra.mxu0 %v13525_v52  ;;  %v12227_v52 = vld [vmem:[#allocation16 + $0x28c] ss:$16 sps:$4 sm:$0xff]  }
 0x9ab   :  { %8746 = vmatpush1.bf16.msra.mxu1 %v13526_v50  ;;  %8704 = vmatprep.subr.bf16.mxu0 %v13527_v10  ;;  %v12222_v50 = vld [vmem:[#allocation16 + $0x280] ss:$16 sps:$4 sm:$0xff]   ;;  %v12225_v10 = vld [vmem:[#allocation16 + $0x288] ss:$16 sps:$4 sm:$0xff]  }
 0x9ac   :  { %8747 = vmatprep.subr.bf16.mxu1 %v13528_v5  ;;  %v12230_v5 = vld [vmem:[#allocation16 + $0x2a4] ss:$16 sps:$4 sm:$0xff]  }
 0x9ae   :  { %8705 = vmatpush1.bf16.msra.mxu0 %v13529_v42  ;;  %v12233_v42 = vld [vmem:[#allocation16 + $0x2ac] ss:$16 sps:$4 sm:$0xff]  }
 0x9af   :  { %8748 = vmatpush1.bf16.msra.mxu1 %v13530_v59  ;;  %8706 = vmatprep.subr.bf16.mxu0 %v13531_v24  ;;  %v12228_v59 = vld [vmem:[#allocation16 + $0x2a0] ss:$16 sps:$4 sm:$0xff]   ;;  %v12231_v24 = vld [vmem:[#allocation16 + $0x2a8] ss:$16 sps:$4 sm:$0xff]  }
 0x9b0   :  { %8749 = vmatprep.subr.bf16.mxu1 %v13532_v25  ;;  %v14991_v25 = vld [vmem:[#allocation32_spill] sm:$0xff] }
 0x9b2   :  { %8707 = vmatpush1.bf16.msra.mxu0 %v13533_v34  ;;  %v8545_v34 = vunpack.c.l.bf16 %v14991_v25 }
 0x9b3   :  { %8750 = vmatpush1.bf16.msra.mxu1 %v13534_v3  ;;  %8708 = vmatprep.subr.bf16.mxu0 %v13535_v35  ;;  %v14992_v35 = vld [vmem:[#allocation33_spill] sm:$0xff] }
 0x9b4   :  { %8751 = vmatprep.subr.bf16.mxu1 %v13536_v21  ;;  %v8547_v21 = vunpack.c.l.bf16 %v14992_v35 }
 0x9b6   :  { %8709 = vmatpush1.bf16.msra.mxu0 %v13537_v12  ;;  %v14993_v12 = vld [vmem:[#allocation34_spill] sm:$0xff] }
 0x9b7   :  { %8752 = vmatpush1.bf16.msra.mxu1 %v13538_v45  ;;  %8710 = vmatprep.subr.bf16.mxu0 %v13539_v11  ;;  %v8546_v45 = vunpack.c.l.bf16 %v14993_v12 }
 0x9b8   :  { %8753 = vmatprep.subr.bf16.mxu1 %v13540_v19 }
 0x9ba   :  { %8711 = vmatpush1.bf16.msra.mxu0 %v13541_v57 }
 0x9bb   :  { %8754 = vmatpush1.bf16.msra.mxu1 %v13542_v60  ;;  %8712 = vmatprep.subr.bf16.mxu0 %v13543_v15  ;;  %v14994_v60 = vld [vmem:[#allocation35_spill] sm:$0xff] }
 0x9bc   :  { %8755 = vmatprep.subr.bf16.mxu1 %v13544_v31  ;;  %v8548_v15 = vunpack.c.l.bf16 %v14994_v60  ;;  %v8549_v31 = vunpack.c.h.bf16 %v14991_v25  ;;  %v12272_v25 = vld [vmem:[#allocation16 + $0x384] ss:$16 sps:$4 sm:$0xff]  }
 0x9be   :  { %8713 = vmatpush1.bf16.msra.mxu0 %v13545_v49 }
 0x9bf   :  { %8756 = vmatpush1.bf16.msra.mxu1 %v13546_v33  ;;  %8714 = vmatprep.subr.bf16.mxu0 %v13547_v7 }
 0x9c0   :  { %8757 = vmatprep.subr.bf16.mxu1 %v13548_v40 }
 0x9c2   :  { %8715 = vmatpush1.bf16.msra.mxu0 %v13549_v61  ;;  %v8551_v61 = vunpack.c.h.bf16 %v14992_v35  ;;  %v12275_v35 = vld [vmem:[#allocation16 + $0x38c] ss:$16 sps:$4 sm:$0xff]  }
 0x9c3   :  { %8758 = vmatpush1.bf16.msra.mxu1 %v13550_v4  ;;  %8716 = vmatprep.subr.bf16.mxu0 %v13551_v51  ;;  %v8550_v4 = vunpack.c.h.bf16 %v14993_v12  ;;  %v12273_v12 = vld [vmem:[#allocation16 + $0x388] ss:$16 sps:$4 sm:$0xff]  }
 0x9c4   :  { %8759 = vmatprep.subr.bf16.mxu1 %v13552_v63 }
 0x9c6   :  { %8717 = vmatpush1.bf16.msra.mxu0 %v13553_v20 }
 0x9c7   :  { %8760 = vmatpush1.bf16.msra.mxu1 %v13554_v38  ;;  %8718 = vmatprep.subr.bf16.mxu0 %v13555_v8  ;;  %v8552_v8 = vunpack.c.h.bf16 %v14994_v60  ;;  %v12279_v60 = vld [vmem:[#allocation16 + $0x3a8] ss:$16 sps:$4 sm:$0xff]  }
 0x9c8   :  { %8761 = vmatprep.subr.bf16.mxu1 %v13556_v54  ;;  %v12236_v54 = vld [vmem:[#allocation16 + $0x2c4] ss:$16 sps:$4 sm:$0xff]  }
 0x9ca   :  { %8719 = vmatpush1.bf16.msra.mxu0 %v13557_v43 }
 0x9cb   :  { %8762 = vmatpush1.bf16.msra.mxu1 %v13558_v9  ;;  %9326 = vmatprep.subr.bf16.mxu0 %v12200_v23 }
 0x9cc   :  { %9369 = vmatprep.subr.bf16.mxu1 %v12203_v22  ;;  %v12237_v22 = vld [vmem:[#allocation16 + $0x2c8] ss:$16 sps:$4 sm:$0xff]  }
 0x9cd   :  { %8721 = vmatmul.mubr.bf16.vlgmr.msra.gmra.mrb[120].mxu0 %v14800_v46 }
 0x9ce   :  { %8764 = vmatmul.mubr.bf16.vlgmr.msra.gmra.mrb[120].mxu1 %v14800_v46  ;;  %9327 = vmatpush1.bf16.msra.mxu0 %v12198_v27  ;;  %v12213_v46 = vld [vmem:[#allocation16 + $0x248] ss:$16 sps:$4 sm:$0xff]  }
 0x9cf   :  { %9370 = vmatpush1.bf16.msra.mxu1 %v12201_v62  ;;  %9328 = vmatprep.subr.bf16.mxu0 %v12206_v36  ;;  %v12234_v62 = vld [vmem:[#allocation16 + $0x2c0] ss:$16 sps:$4 sm:$0xff]   ;;  %v12239_v36 = vld [vmem:[#allocation16 + $0x2cc] ss:$16 sps:$4 sm:$0xff]  }
 0x9d0   :  { %9371 = vmatprep.subr.bf16.mxu1 %v12209_v1  ;;  %v12242_v1 = vld [vmem:[#allocation16 + $0x2e4] ss:$16 sps:$4 sm:$0xff]  }
 0x9d2   :  { %9329 = vmatpush1.bf16.msra.mxu0 %v12204_v53  ;;  %v12240_v53 = vld [vmem:[#allocation16 + $0x2e0] ss:$16 sps:$4 sm:$0xff]  }
 0x9d3   :  { %9372 = vmatpush1.bf16.msra.mxu1 %v12207_v39  ;;  %9330 = vmatprep.subr.bf16.mxu0 %v12212_v17  ;;  %v12245_v39 = vld [vmem:[#allocation16 + $0x2ec] ss:$16 sps:$4 sm:$0xff]   ;;  %v12243_v17 = vld [vmem:[#allocation16 + $0x2e8] ss:$16 sps:$4 sm:$0xff]  }
 0x9d4   :  { %9373 = vmatprep.subr.bf16.mxu1 %v12215_v58  ;;  %v12248_v58 = vld [vmem:[#allocation16 + $0x304] ss:$16 sps:$4 sm:$0xff]  }
 0x9d6   :  { %9331 = vmatpush1.bf16.msra.mxu0 %v12210_v47  ;;  %v12251_v47 = vld [vmem:[#allocation16 + $0x30c] ss:$16 sps:$4 sm:$0xff]  }
 0x9d7   :  { %9374 = vmatpush1.bf16.msra.mxu1 %v12213_v46  ;;  %9332 = vmatprep.subr.bf16.mxu0 %v12218_v6  ;;  %v12246_v46 = vld [vmem:[#allocation16 + $0x300] ss:$16 sps:$4 sm:$0xff]   ;;  %v12249_v6 = vld [vmem:[#allocation16 + $0x308] ss:$16 sps:$4 sm:$0xff]  }
 0x9d8   :  { %9375 = vmatprep.subr.bf16.mxu1 %v12221_v48  ;;  %v12254_v48 = vld [vmem:[#allocation16 + $0x324] ss:$16 sps:$4 sm:$0xff]  }
 0x9da   :  { %9333 = vmatpush1.bf16.msra.mxu0 %v12216_v37  ;;  %v12257_v37 = vld [vmem:[#allocation16 + $0x32c] ss:$16 sps:$4 sm:$0xff]  }
 0x9db   :  { %9376 = vmatpush1.bf16.msra.mxu1 %v12219_v2  ;;  %9334 = vmatprep.subr.bf16.mxu0 %v12224_v0  ;;  %v12252_v2 = vld [vmem:[#allocation16 + $0x320] ss:$16 sps:$4 sm:$0xff]   ;;  %v12255_v0 = vld [vmem:[#allocation16 + $0x328] ss:$16 sps:$4 sm:$0xff]  }
 0x9dc   :  { %9377 = vmatprep.subr.bf16.mxu1 %v12227_v52  ;;  %v12260_v52 = vld [vmem:[#allocation16 + $0x344] ss:$16 sps:$4 sm:$0xff]  }
 0x9de   :  { %9335 = vmatpush1.bf16.msra.mxu0 %v12222_v50  ;;  %v12263_v50 = vld [vmem:[#allocation16 + $0x34c] ss:$16 sps:$4 sm:$0xff]  }
 0x9df   :  { %9378 = vmatpush1.bf16.msra.mxu1 %v12225_v10  ;;  %9336 = vmatprep.subr.bf16.mxu0 %v12230_v5  ;;  %v12258_v10 = vld [vmem:[#allocation16 + $0x340] ss:$16 sps:$4 sm:$0xff]   ;;  %v12261_v5 = vld [vmem:[#allocation16 + $0x348] ss:$16 sps:$4 sm:$0xff]  }
 0x9e0   :  { %9379 = vmatprep.subr.bf16.mxu1 %v12233_v42  ;;  %v12266_v42 = vld [vmem:[#allocation16 + $0x364] ss:$16 sps:$4 sm:$0xff]  }
 0x9e2   :  { %9337 = vmatpush1.bf16.msra.mxu0 %v12228_v59  ;;  %v12269_v59 = vld [vmem:[#allocation16 + $0x36c] ss:$16 sps:$4 sm:$0xff]  }
 0x9e3   :  { %9380 = vmatpush1.bf16.msra.mxu1 %v12231_v24  ;;  %9338 = vmatprep.subr.bf16.mxu0 %v12236_v54  ;;  %v12264_v24 = vld [vmem:[#allocation16 + $0x360] ss:$16 sps:$4 sm:$0xff]   ;;  %v12293_v54 = vld [vmem:[#allocation16 + $0x3ec] ss:$16 sps:$4 sm:$0xff]  }
 0x9e4   :  { %9381 = vmatprep.subr.bf16.mxu1 %v12239_v36 }
 0x9e6   :  { %9339 = vmatpush1.bf16.msra.mxu0 %v12234_v62 }
 0x9e7   :  { %9340 = vmatprep.subr.bf16.mxu0 %v12242_v1  ;;  %9382 = vmatpush1.bf16.msra.mxu1 %v12237_v22 }
 0x9e8   :  { %9383 = vmatprep.subr.bf16.mxu1 %v12245_v39 }
 0x9ea   :  { %9341 = vmatpush1.bf16.msra.mxu0 %v12240_v53 }
 0x9eb   :  { %9342 = vmatprep.subr.bf16.mxu0 %v12248_v58  ;;  %9384 = vmatpush1.bf16.msra.mxu1 %v12243_v17 }
 0x9ec   :  { %9385 = vmatprep.subr.bf16.mxu1 %v12251_v47 }
 0x9ee   :  { %9343 = vmatpush1.bf16.msra.mxu0 %v12246_v46 }
 0x9ef   :  { %9344 = vmatprep.subr.bf16.mxu0 %v12254_v48  ;;  %9386 = vmatpush1.bf16.msra.mxu1 %v12249_v6  ;;  %v14995_v48 = vld [vmem:[#allocation36_spill] sm:$0xff] }
 0x9f0   :  { %9387 = vmatprep.subr.bf16.mxu1 %v12257_v37  ;;  %v8774_v37 = vunpack.c.l.bf16 %v14995_v48 }
 0x9f2   :  { %9345 = vmatpush1.bf16.msra.mxu0 %v12252_v2 }
 0x9f3   :  { %9346 = vmatprep.subr.bf16.mxu0 %v12260_v52  ;;  %9388 = vmatpush1.bf16.msra.mxu1 %v12255_v0  ;;  %v14996_v52 = vld [vmem:[#allocation37_spill] sm:$0xff] }
 0x9f4   :  { %9389 = vmatprep.subr.bf16.mxu1 %v12263_v50  ;;  %v8775_v50 = vunpack.c.l.bf16 %v14996_v52 }
 0x9f6   :  { %9347 = vmatpush1.bf16.msra.mxu0 %v12258_v10  ;;  %v8778_v10 = vunpack.c.h.bf16 %v14995_v48 }
 0x9f7   :  { %9348 = vmatprep.subr.bf16.mxu0 %v12266_v42  ;;  %9390 = vmatpush1.bf16.msra.mxu1 %v12261_v5  ;;  %v8779_v5 = vunpack.c.h.bf16 %v14996_v52  ;;  %v14997_v42 = vld [vmem:[#allocation42_spill] sm:$0xff] }
 0x9f8   :  { %9391 = vmatprep.subr.bf16.mxu1 %v12269_v59  ;;  %v8617_v59 = vunpack.c.l.bf16 %v14997_v42 }
 0x9fa   :  { %9349 = vmatpush1.bf16.msra.mxu0 %v12264_v24  ;;  %v8619_v24 = vunpack.c.h.bf16 %v14997_v42 }
 0x9fb   :  { %9350 = vmatprep.subr.bf16.mxu0 %v12272_v25 }
 0xa20   :  { %v8450_v3 = vpop.f32.mrb[112].mxu0 }
 0xa21   :  { %v14833_v11 = vadd.f32 %v8545_v34, %v8450_v3  ;;  %v8493_v19 = vpop.f32.mrb[112].mxu1  ;;  %v8452_v57 = vpop.f32.mrb[113].mxu0  ;;  %v12267_v34 = vld [vmem:[#allocation16 + $0x368] ss:$16 sps:$4 sm:$0xff]   ;;  %v12270_v3 = vld [vmem:[#allocation16 + $0x380] ss:$16 sps:$4 sm:$0xff]  }
 0xa22   :  { %v14837_v49 = vadd.f32 %v8547_v21, %v8493_v19  ;;  %v14839_v33 = vadd.f32 %v8546_v45, %v8452_v57  ;;  %v8495_v7 = vpop.f32.mrb[113].mxu1  ;;  %v8454_v40 = vpop.f32.mrb[114].mxu0  ;;  %v12278_v21 = vld [vmem:[#allocation16 + $0x3a4] ss:$16 sps:$4 sm:$0xff]   ;;  %9392 = vmatpush1.bf16.msra.mxu1 %v12267_v34  ;;  %9351 = vmatpush1.bf16.msra.mxu0 %v12270_v3  ;;  %v12276_v45 = vld [vmem:[#allocation16 + $0x3a0] ss:$16 sps:$4 sm:$0xff]  }
 0xa23   :  { %v14843_v51 = vadd.f32 %v8548_v15, %v8495_v7  ;;  %v14845_v63 = vadd.f32 %v8549_v31, %v8454_v40  ;;  %v8497_v20 = vpop.f32.mrb[114].mxu1  ;;  %v8456_v38 = vpop.f32.mrb[115].mxu0  ;;  %9393 = vmatprep.subr.bf16.mxu1 %v12275_v35  ;;  %v12281_v19 = vld [vmem:[#allocation16 + $0x3ac] ss:$16 sps:$4 sm:$0xff]   ;;  %9352 = vmatprep.subr.bf16.mxu0 %v12278_v21  ;;  %v12284_v57 = vld [vmem:[#allocation16 + $0x3c4] ss:$16 sps:$4 sm:$0xff]  }
 0xa24   :  { %v14848_v43 = vadd.f32 %v8551_v61, %v8497_v20  ;;  %v14850_v9 = vadd.f32 %v8550_v4, %v8456_v38  ;;  %v8499_v27 = vpop.f32.mrb[115].mxu1  ;;  %v10748_v15 = vmul.f32 -1.442695, %v14833_v11  ;;  %v12282_v31 = vld [vmem:[#allocation16 + $0x3c0] ss:$16 sps:$4 sm:$0xff]  }
 0xa25   :  { %v14852_v23 = vadd.f32 %v8552_v8, %v8499_v27  ;;  %v12287_v7 = vld [vmem:[#allocation16 + $0x3cc] ss:$16 sps:$4 sm:$0xff]   ;;  %v10749_v40 = vmul.f32 -1.442695, %v14839_v33  ;;  %v12290_v61 = vld [vmem:[#allocation16 + $0x3e4] ss:$16 sps:$4 sm:$0xff]  }
 0xa26   :  { %9394 = vmatpush1.bf16.msra.mxu1 %v12273_v12  ;;  %9353 = vmatpush1.bf16.msra.mxu0 %v12276_v45  ;;  %v10752_v4 = vmul.f32 -1.442695, %v14845_v63  ;;  %v10753_v20 = vmul.f32 -1.442695, %v14850_v9  ;;  %v12285_v38 = vld [vmem:[#allocation16 + $0x3c8] ss:$16 sps:$4 sm:$0xff]   ;;  %12710 = vpow2.f32 %v10748_v15 }
 0xa27   :  { %9395 = vmatprep.subr.bf16.mxu1 %v12281_v19  ;;  %9354 = vmatprep.subr.bf16.mxu0 %v12284_v57  ;;  %v12288_v8 = vld [vmem:[#allocation16 + $0x3e0] ss:$16 sps:$4 sm:$0xff]   ;;  %12712 = vpow2.f32 %v10749_v40  ;;  %v12291_v11 = vld [vmem:[#allocation16 + $0x3e8] ss:$16 sps:$4 sm:$0xff]   ;;  %v12296_v33 = vld [vmem:[#allocation16 + $0x1004] ss:$16 sps:$4 sm:$0xff]  }
 0xa28   :  { %12714 = vpow2.f32 %v10752_v4  ;;  %v12299_v27 = vld [vmem:[#allocation16 + $0x100c] ss:$16 sps:$4 sm:$0xff]   ;;  %v10750_v63 = vmul.f32 -1.442695, %v14837_v49  ;;  %v10751_v9 = vmul.f32 -1.442695, %v14843_v51 }
 0xa29   :  { %12716 = vpow2.f32 %v10753_v20  ;;  %v10754_v62 = vmul.f32 -1.442695, %v14848_v43  ;;  %v10755_v36 = vmul.f32 -1.442695, %v14852_v23  ;;  %v14998_v12 = vld [vmem:[#allocation43_spill] sm:$0xff] }
 0xa2a   :  { %9396 = vmatpush1.bf16.msra.mxu1 %v12279_v60  ;;  %9355 = vmatpush1.bf16.msra.mxu0 %v12282_v31  ;;  %12718 = vpow2.f32 %v10750_v63  ;;  %v8618_v45 = vunpack.c.l.bf16 %v14998_v12 }
 0xa2b   :  { %9397 = vmatprep.subr.bf16.mxu1 %v12287_v7  ;;  %9356 = vmatprep.subr.bf16.mxu0 %v12290_v61  ;;  %12720 = vpow2.f32 %v10751_v9 }
 0xa2c   :  { %12722 = vpow2.f32 %v10754_v62 }
 0xa2d   :  { %12724 = vpow2.f32 %v10755_v36  ;;  %v8620_v36 = vunpack.c.h.bf16 %v14998_v12 }
 0xa2e   :  { %9398 = vmatpush1.bf16.msra.mxu1 %v12285_v38  ;;  %9357 = vmatpush1.bf16.msra.mxu0 %v12288_v8 }
 0xa2f   :  { %9399 = vmatprep.subr.bf16.mxu1 %v12293_v54  ;;  %9740 = vmatprep.subr.bf16.mxu0 %v12296_v33 }
 0xa30   :  { %v12711_v22 = vpop.eup %12710 }
 0xa31   :  { %v12713_v1 = vpop.eup %12712  ;;  %v8585_v17 = vadd.f32 1.0, %v12711_v22 }
 0xa32   :  { %9400 = vmatpush1.bf16.msra.mxu1 %v12291_v11  ;;  %v12715_v53 = vpop.eup %12714  ;;  %v8586_v58 = vadd.f32 1.0, %v12713_v1 }
 0xa33   :  { %9783 = vmatprep.subr.bf16.mxu1 %v12299_v27  ;;  %v12717_v39 = vpop.eup %12716  ;;  %v8589_v47 = vadd.f32 1.0, %v12715_v53  ;;  %12726 = vrcp.f32 %v8585_v17 }
 0xa34   :  { %v8590_v49 = vadd.f32 1.0, %v12717_v39  ;;  %12728 = vrcp.f32 %v8586_v58  ;;  %v12719_v51 = vpop.eup %12718 }
 0xa35   :  { %12730 = vrcp.f32 %v8589_v47  ;;  %v12721_v43 = vpop.eup %12720  ;;  %v8587_v23 = vadd.f32 1.0, %v12719_v51 }
 0xa36   :  { %12732 = vrcp.f32 %v8590_v49  ;;  %v12723_v46 = vpop.eup %12722  ;;  %v8588_v2 = vadd.f32 1.0, %v12721_v43 }
 0xa37   :  { %v12725_v6 = vpop.eup %12724  ;;  %v8591_v25 = vadd.f32 1.0, %v12723_v46  ;;  %12734 = vrcp.f32 %v8587_v23 }
 0xa38   :  { %v8592_v19 = vadd.f32 1.0, %v12725_v6  ;;  %12736 = vrcp.f32 %v8588_v2 }
 0xa39   :  { %12738 = vrcp.f32 %v8591_v25 }
 0xa3a   :  { %12740 = vrcp.f32 %v8592_v19 }
 0xa3d   :  { %v12727_v21 = vpop.eup %12726 }
 0xa3e   :  { %v12729_v7 = vpop.eup %12728 }
 0xa3f   :  { %v12731_v8 = vpop.eup %12730 }
 0xa40   :  { %v12733_v63 = vpop.eup %12732 }
 0xa41   :  { %v12735_v17 = vpop.eup %12734 }
 0xa42   :  { %v12737_v58 = vpop.eup %12736  ;;  %v8629_v49 = vsub.f32 1.0, %v12735_v17  ;;  %v8637_v23 = vmul.f32 %v12735_v17, %v14760_v44 }
 0xa43   :  { %v8630_v43 = vsub.f32 1.0, %v12737_v58 }
 0xa60   :  { %v8536_v0 = vpop.f32.mrb[116].mxu0 }
 0xa61   :  { %v8609_v34 = vadd.f32 %v8536_v0, %v14395_v30  ;;  %v8679_v3 = vpop.f32.mrb[116].mxu1  ;;  %v8538_v35 = vpop.f32.mrb[117].mxu0 }
 0xa62   :  { %v8782_v57 = vadd.f32 %v8774_v37, %v8679_v3  ;;  %v8610_v60 = vadd.f32 %v8538_v35, %v14398_v13  ;;  %v8681_v15 = vpop.f32.mrb[117].mxu1  ;;  %v8540_v31 = vpop.f32.mrb[118].mxu0  ;;  %v8638_v37 = vmul.f32 %v12737_v58, %v14763_v18 }
 0xa63   :  { %v8613_v40 = vmul.f32 %v12727_v21, %v8609_v34  ;;  %v8783_v61 = vadd.f32 %v8775_v50, %v8681_v15  ;;  %v8611_v4 = vadd.f32 %v8540_v31, %v14395_v30  ;;  %v8683_v20 = vpop.f32.mrb[118].mxu1  ;;  %v8542_v38 = vpop.f32.mrb[119].mxu0 }
 0xa64   :  { %v8614_v54 = vmul.f32 %v12729_v7, %v8610_v60  ;;  %v8786_v11 = vadd.f32 %v8778_v10, %v8683_v20  ;;  %v8612_v33 = vadd.f32 %v8542_v38, %v14398_v13  ;;  %v8685_v27 = vpop.f32.mrb[119].mxu1  ;;  %v12739_v13 = vpop.eup %12738  ;;  %v10756_v21 = vmul.f32 -1.442695, %v8782_v57  ;;  %v14999_v57 = vld [vmem:[#allocation44_spill] sm:$0xff]  ;;  %v15000_v20 = vld [vmem:[#allocation46_spill] sm:$0xff] }
 0xa65   :  { %v8621_v9 = vadd.f32 %v8617_v59, %v8613_v40  ;;  %v8615_v62 = vmul.f32 %v12731_v8, %v8611_v4  ;;  %v8787_v22 = vadd.f32 %v8779_v5, %v8685_v27  ;;  %v12741_v47 = vpop.eup %12740  ;;  %v8631_v2 = vsub.f32 1.0, %v12739_v13  ;;  %v15001_v8 = vld [vmem:[#allocation45_spill] sm:$0xff] }
 0xa66   :  { %v8622_v1 = vadd.f32 %v8618_v45, %v8614_v54  ;;  %v8616_v53 = vmul.f32 %v12733_v63, %v8612_v33  ;;  %v8632_v50 = vsub.f32 1.0, %v12741_v47  ;;  %v8639_v42 = vmul.f32 %v12739_v13, %v14766_v26 }
 0xa67   :  { %12742 = vtanh.f32 %v8621_v9  ;;  %v8623_v30 = vadd.f32 %v8619_v24, %v8615_v62  ;;  %v8640_v25 = vmul.f32 %v12741_v47, %v14768_v16  ;;  %v10757_v18 = vmul.f32 -1.442695, %v8783_v61 }
 0xa68   :  { %12744 = vtanh.f32 %v8622_v1  ;;  %v8624_v39 = vadd.f32 %v8620_v36, %v8616_v53  ;;  %v10760_v12 = vmul.f32 -1.442695, %v8786_v11  ;;  %v10761_v45 = vmul.f32 -1.442695, %v8787_v22 }
 0xa69   :  { %12746 = vtanh.f32 %v8623_v30  ;;  %v8776_v61 = vunpack.c.l.bf16 %v14999_v57  ;;  %v8777_v38 = vunpack.c.l.bf16 %v15000_v20  ;;  %v8846_v54 = vunpack.c.l.bf16 %v15001_v8 }
 0xa6a   :  { %12748 = vtanh.f32 %v8624_v39  ;;  %v8780_v63 = vunpack.c.h.bf16 %v14999_v57  ;;  %v8848_v9 = vunpack.c.h.bf16 %v15001_v8  ;;  %v8781_v53 = vunpack.c.h.bf16 %v15000_v20  ;;  %v15002_v39 = vld [vmem:[#allocation47_spill] sm:$0xff] }
 0xa6b   :  { %12750 = vpow2.f32 %v10756_v21  ;;  %v8847_v17 = vunpack.c.l.bf16 %v15002_v39 }
 0xa6c   :  { %12752 = vpow2.f32 %v10757_v18 }
 0xa6d   :  { %12754 = vpow2.f32 %v10760_v12 }
 0xa6e   :  { %12756 = vpow2.f32 %v10761_v45 }
 0xa71   :  { %v12743_v51 = vpop.eup %12742 }
 0xa72   :  { %v12745_v46 = vpop.eup %12744  ;;  %v8633_v6 = vmul.f32 %v12743_v51, %v8629_v49 }
 0xa73   :  { %v8634_v48 = vmul.f32 %v12745_v46, %v8630_v43  ;;  %v12747_v0 = vpop.eup %12746 }
 0xa74   :  { %v8641_v52 = vadd.f32 %v8637_v23, %v8633_v6  ;;  %v8635_v5 = vmul.f32 %v12747_v0, %v8631_v2  ;;  %v12749_v59 = vpop.eup %12748 }
 0xa75   :  { %v8642_v10 = vadd.f32 %v8638_v37, %v8634_v48  ;;  %v8636_v24 = vmul.f32 %v12749_v59, %v8632_v50  ;;  %v12751_v19 = vpop.eup %12750 }
 0xa76   :  { %v8643_v34 = vadd.f32 %v8639_v42, %v8635_v5  ;;  %v12753_v26 = vpop.eup %12752  ;;  %v8814_v31 = vadd.f32 1.0, %v12751_v19  ;;  %v8849_v5 = vunpack.c.h.bf16 %v15002_v39 }
 0xa77   :  { %v8644_v3 = vadd.f32 %v8640_v25, %v8636_v24  ;;  %v12755_v60 = vpop.eup %12754  ;;  %v8815_v16 = vadd.f32 1.0, %v12753_v26 }
 0xa78   :  { %v14878_v35 = vpack.c.bf16 %v8643_v34, %v8641_v52  ;;  %v12757_v15 = vpop.eup %12756  ;;  %v8818_v7 = vadd.f32 1.0, %v12755_v60  ;;  %12758 = vrcp.f32 %v8814_v31 }
 0xa79   :  { %v14880_v44 = vpack.c.bf16 %v8644_v3, %v8642_v10  ;;  %v8819_v40 = vadd.f32 1.0, %v12757_v15  ;;  %12760 = vrcp.f32 %v8815_v16 }
 0xa7a   :  { %12762 = vrcp.f32 %v8818_v7 }
 0xa7b   :  { %12764 = vrcp.f32 %v8819_v40 }
 0xa82   :  { %v12759_v30 = vpop.eup %12758 }
 0xa83   :  { %v12761_v43 = vpop.eup %12760 }
 0xa84   :  { %v12763_v2 = vpop.eup %12762 }
 0xa85   :  { %v12765_v10 = vpop.eup %12764 }
 0xaa0   :  { %v8722_v4 = vpop.f32.mrb[120].mxu0 }
 0xaa1   :  { %v8784_v11 = vadd.f32 %v8776_v61, %v8722_v4  ;;  %v8765_v33 = vpop.f32.mrb[120].mxu1  ;;  %v8724_v27 = vpop.f32.mrb[121].mxu0 }
 0xaa2   :  { %v8838_v62 = vadd.f32 %v8765_v33, %v14421_v56  ;;  %v8785_v22 = vadd.f32 %v8777_v38, %v8724_v27  ;;  %v8767_v36 = vpop.f32.mrb[121].mxu1  ;;  %v8726_v1 = vpop.f32.mrb[122].mxu0 }
 0xaa3   :  { %v10758_v58 = vmul.f32 -1.442695, %v8784_v11  ;;  %v8839_v13 = vadd.f32 %v8767_v36, %v14424_v29  ;;  %v8788_v47 = vadd.f32 %v8780_v63, %v8726_v1  ;;  %v8769_v49 = vpop.f32.mrb[122].mxu1  ;;  %v8728_v51 = vpop.f32.mrb[123].mxu0 }
 0xaa4   :  { %v8842_v46 = vmul.f32 %v12759_v30, %v8838_v62  ;;  %v10759_v6 = vmul.f32 -1.442695, %v8785_v22  ;;  %v8840_v23 = vadd.f32 %v8769_v49, %v14421_v56  ;;  %v8789_v48 = vadd.f32 %v8781_v53, %v8728_v51  ;;  %v8771_v37 = vpop.f32.mrb[123].mxu1  ;;  %v12303_v49 = vld [vmem:[#allocation16 + $0x1028] ss:$16 sps:$4 sm:$0xff]  }
 0xaa5   :  { %12766 = vpow2.f32 %v10758_v58  ;;  %v8843_v0 = vmul.f32 %v12761_v43, %v8839_v13  ;;  %v10762_v52 = vmul.f32 -1.442695, %v8788_v47  ;;  %v8841_v50 = vadd.f32 %v8771_v37, %v14424_v29  ;;  %v12297_v13 = vld [vmem:[#allocation16 + $0x1008] ss:$16 sps:$4 sm:$0xff]   ;;  %v12305_v47 = vld [vmem:[#allocation16 + $0x102c] ss:$16 sps:$4 sm:$0xff]  }
 0xaa6   :  { %v8850_v42 = vadd.f32 %v8846_v54, %v8842_v46  ;;  %12768 = vpow2.f32 %v10759_v6  ;;  %v8844_v59 = vmul.f32 %v12763_v2, %v8840_v23  ;;  %v10763_v25 = vmul.f32 -1.442695, %v8789_v48  ;;  %v12311_v51 = vld [vmem:[#allocation16 + $0x104c] ss:$16 sps:$4 sm:$0xff]   ;;  %v12306_v43 = vld [vmem:[#allocation16 + $0x1040] ss:$16 sps:$4 sm:$0xff]  }
 0xaa7   :  { %v8851_v24 = vadd.f32 %v8847_v17, %v8843_v0  ;;  %12770 = vpow2.f32 %v10762_v52  ;;  %v8845_v34 = vmul.f32 %v12765_v10, %v8841_v50  ;;  %v12309_v46 = vld [vmem:[#allocation16 + $0x1048] ss:$16 sps:$4 sm:$0xff]   ;;  %v12314_v6 = vld [vmem:[#allocation16 + $0x1064] ss:$16 sps:$4 sm:$0xff]   ;;  %v12317_v23 = vld [vmem:[#allocation16 + $0x106c] ss:$16 sps:$4 sm:$0xff]  }
 0xaa8   :  { %v8852_v3 = vadd.f32 %v8848_v9, %v8844_v59  ;;  %12772 = vpow2.f32 %v10763_v25  ;;  %v12312_v48 = vld [vmem:[#allocation16 + $0x1060] ss:$16 sps:$4 sm:$0xff]   ;;  %v12315_v37 = vld [vmem:[#allocation16 + $0x1068] ss:$16 sps:$4 sm:$0xff]   ;;  %v12320_v2 = vld [vmem:[#allocation16 + $0x1084] ss:$16 sps:$4 sm:$0xff]  }
 0xaa9   :  { %v8853_v56 = vadd.f32 %v8849_v5, %v8845_v34  ;;  %12774 = vtanh.f32 %v8850_v42  ;;  %v12318_v0 = vld [vmem:[#allocation16 + $0x1080] ss:$16 sps:$4 sm:$0xff]   ;;  %v12321_v52 = vld [vmem:[#allocation16 + $0x1088] ss:$16 sps:$4 sm:$0xff]   ;;  %v12326_v50 = vld [vmem:[#allocation16 + $0x10a4] ss:$16 sps:$4 sm:$0xff]  }
 0xaaa   :  { %v12329_v10 = vld [vmem:[#allocation16 + $0x10ac] ss:$16 sps:$4 sm:$0xff]   ;;  %v12324_v5 = vld [vmem:[#allocation16 + $0x10a0] ss:$16 sps:$4 sm:$0xff]   ;;  %v12327_v42 = vld [vmem:[#allocation16 + $0x10a8] ss:$16 sps:$4 sm:$0xff]  }
 0xaab   :  { %v12332_v59 = vld [vmem:[#allocation16 + $0x10c4] ss:$16 sps:$4 sm:$0xff]   ;;  %v12330_v25 = vld [vmem:[#allocation16 + $0x10c0] ss:$16 sps:$4 sm:$0xff]   ;;  %v12333_v34 = vld [vmem:[#allocation16 + $0x10c8] ss:$16 sps:$4 sm:$0xff]  }
 0xaaf   :  { %v12767_v21 = vpop.eup %12766 }
 0xab0   :  { %v12769_v18 = vpop.eup %12768  ;;  %v8816_v12 = vadd.f32 1.0, %v12767_v21  ;;  %v12336_v21 = vld [vmem:[#allocation16 + $0x10e0] ss:$16 sps:$4 sm:$0xff]  }
 0xab1   :  { %v12771_v45 = vpop.eup %12770  ;;  %v8817_v19 = vadd.f32 1.0, %v12769_v18  ;;  %v12339_v18 = vld [vmem:[#allocation16 + $0x10e8] ss:$16 sps:$4 sm:$0xff]  }
 0xab2   :  { %12776 = vrcp.f32 %v8816_v12  ;;  %v8820_v29 = vadd.f32 1.0, %v12771_v45  ;;  %v12773_v26 = vpop.eup %12772  ;;  %v12344_v12 = vld [vmem:[#allocation16 + $0x1104] ss:$16 sps:$4 sm:$0xff]   ;;  %v12347_v45 = vld [vmem:[#allocation16 + $0x110c] ss:$16 sps:$4 sm:$0xff]  }
 0xab3   :  { %12778 = vrcp.f32 %v8817_v19  ;;  %v8821_v60 = vadd.f32 1.0, %v12773_v26  ;;  %v12775_v15 = vpop.eup %12774  ;;  %v12342_v19 = vld [vmem:[#allocation16 + $0x1100] ss:$16 sps:$4 sm:$0xff]   ;;  %v12350_v26 = vld [vmem:[#allocation16 + $0x1124] ss:$16 sps:$4 sm:$0xff]  }
 0xab4   :  { %12780 = vrcp.f32 %v8820_v29  ;;  %v12345_v29 = vld [vmem:[#allocation16 + $0x1108] ss:$16 sps:$4 sm:$0xff]  }
 0xab5   :  { %12782 = vtanh.f32 %v8851_v24  ;;  %v12335_v24 = vld [vmem:[#allocation16 + $0x10cc] ss:$16 sps:$4 sm:$0xff]  }
 0xab6   :  { %12784 = vtanh.f32 %v8852_v3  ;;  %v12338_v3 = vld [vmem:[#allocation16 + $0x10e4] ss:$16 sps:$4 sm:$0xff]  }
 0xab7   :  { %12786 = vrcp.f32 %v8821_v60  ;;  %v12353_v60 = vld [vmem:[#allocation16 + $0x112c] ss:$16 sps:$4 sm:$0xff]  }
 0xab8   :  { %12788 = vtanh.f32 %v8853_v56  ;;  %v12341_v56 = vld [vmem:[#allocation16 + $0x10ec] ss:$16 sps:$4 sm:$0xff]  }
 0xabc   :  { %v12777_v31 = vpop.eup %12776 }
 0xabd   :  { %v12779_v16 = vpop.eup %12778  ;;  %v8858_v7 = vsub.f32 1.0, %v12777_v31  ;;  %v8866_v38 = vmul.f32 %v12777_v31, %v14785_v41  ;;  %v12294_v41 = vld [vmem:[#allocation16 + $0x1000] ss:$16 sps:$4 sm:$0xff]   ;;  %v12351_v31 = vld [vmem:[#allocation16 + $0x1128] ss:$16 sps:$4 sm:$0xff]  }
 0xabe   :  { %v12781_v40 = vpop.eup %12780  ;;  %v8859_v57 = vsub.f32 1.0, %v12779_v16  ;;  %v8867_v11 = vmul.f32 %v12779_v16, %v14787_v32  ;;  %v12302_v32 = vld [vmem:[#allocation16 + $0x1024] ss:$16 sps:$4 sm:$0xff]  }
 0xabf   :  { %v12783_v61 = vpop.eup %12782  ;;  %v8860_v4 = vsub.f32 1.0, %v12781_v40  ;;  %v8862_v20 = vmul.f32 %v12775_v15, %v8858_v7  ;;  %v8868_v27 = vmul.f32 %v12781_v40, %v14789_v28  ;;  %v12300_v28 = vld [vmem:[#allocation16 + $0x1020] ss:$16 sps:$4 sm:$0xff]   ;;  %v12356_v16 = vld [vmem:[#allocation16 + $0x1144] ss:$16 sps:$4 sm:$0xff]  }
 0xac0   :  { %v12785_v8 = vpop.eup %12784  ;;  %v8863_v54 = vmul.f32 %v12783_v61, %v8859_v57  ;;  %v12348_v15 = vld [vmem:[#allocation16 + $0x1120] ss:$16 sps:$4 sm:$0xff]   ;;  %v12359_v7 = vld [vmem:[#allocation16 + $0x114c] ss:$16 sps:$4 sm:$0xff]   ;;  %v12357_v57 = vld [vmem:[#allocation16 + $0x1148] ss:$16 sps:$4 sm:$0xff]  }
 0xac1   :  { %v8864_v33 = vmul.f32 %v12785_v8, %v8860_v4  ;;  %v8870_v63 = vadd.f32 %v8866_v38, %v8862_v20  ;;  %v12787_v9 = vpop.eup %12786  ;;  %v12354_v40 = vld [vmem:[#allocation16 + $0x1140] ss:$16 sps:$4 sm:$0xff]   ;;  %v12362_v61 = vld [vmem:[#allocation16 + $0x1164] ss:$16 sps:$4 sm:$0xff]   ;;  %v12365_v4 = vld [vmem:[#allocation16 + $0x116c] ss:$16 sps:$4 sm:$0xff]  }
 0xac2   :  { %v8871_v62 = vadd.f32 %v8867_v11, %v8863_v54  ;;  %v8861_v22 = vsub.f32 1.0, %v12787_v9  ;;  %v12789_v1 = vpop.eup %12788  ;;  %v8869_v30 = vmul.f32 %v12787_v9, %v14792_v14  ;;  %v12308_v14 = vld [vmem:[#allocation16 + $0x1044] ss:$16 sps:$4 sm:$0xff]   ;;  %v12360_v20 = vld [vmem:[#allocation16 + $0x1160] ss:$16 sps:$4 sm:$0xff]  }
 0xac3   :  { %v8872_v36 = vadd.f32 %v8868_v27, %v8864_v33  ;;  %v12363_v38 = vld [vmem:[#allocation16 + $0x1168] ss:$16 sps:$4 sm:$0xff]   ;;  %v12368_v8 = vld [vmem:[#allocation16 + $0x1184] ss:$16 sps:$4 sm:$0xff]   ;;  %v12371_v54 = vld [vmem:[#allocation16 + $0x118c] ss:$16 sps:$4 sm:$0xff]  }
 0xac4   :  { %v8865_v53 = vmul.f32 %v12789_v1, %v8861_v22  ;;  %v12366_v11 = vld [vmem:[#allocation16 + $0x1180] ss:$16 sps:$4 sm:$0xff]   ;;  %v12369_v33 = vld [vmem:[#allocation16 + $0x1188] ss:$16 sps:$4 sm:$0xff]   ;;  %v12374_v27 = vld [vmem:[#allocation16 + $0x11a4] ss:$16 sps:$4 sm:$0xff]  }
 0xac5   :  { %v8940_v39 = vpack.c.bf16 %v8872_v36, %v8870_v63  ;;  %v12377_v63 = vld [vmem:[#allocation16 + $0x11ac] ss:$16 sps:$4 sm:$0xff]   ;;  %v12372_v9 = vld [vmem:[#allocation16 + $0x11a0] ss:$16 sps:$4 sm:$0xff]   ;;  %v12380_v22 = vld [vmem:[#allocation16 + $0x11c4] ss:$16 sps:$4 sm:$0xff]  }
 0xac6   :  { %v8873_v17 = vadd.f32 %v8869_v30, %v8865_v53  ;;  %v12383_v36 = vld [vmem:[#allocation16 + $0x11cc] ss:$16 sps:$4 sm:$0xff]   ;;  %v12378_v1 = vld [vmem:[#allocation16 + $0x11c0] ss:$16 sps:$4 sm:$0xff]   ;;  %v12381_v53 = vld [vmem:[#allocation16 + $0x11c8] ss:$16 sps:$4 sm:$0xff]  }
 0xac7   :  { %v12386_v30 = vld [vmem:[#allocation16 + $0x11e4] ss:$16 sps:$4 sm:$0xff]  }
 0xac8   :  { %v8941_v58 = vpack.c.bf16 %v8873_v17, %v8871_v62  ;;  %v12375_v62 = vld [vmem:[#allocation16 + $0x11a8] ss:$16 sps:$4 sm:$0xff]   ;;  %v12384_v17 = vld [vmem:[#allocation16 + $0x11e0] ss:$16 sps:$4 sm:$0xff]  }
 0xaca   :  { %9358 = vmatprep.mubr.bf16.mxu0 %v8941_v58  ;;  %9401 = vmatprep.mubr.bf16.mxu1 %v8941_v58  ;;  %v12387_v58 = vld [vmem:[#allocation16 + $0x11e8] ss:$16 sps:$4 sm:$0xff]  }
 0xacb   :  { %9359 = vmatmul.mubr.bf16.vlgmr.msra.gmra.mrb[72].mxu0 %v8940_v39  ;;  %9402 = vmatmul.mubr.bf16.vlgmr.msra.gmra.mrb[72].mxu1 %v8940_v39  ;;  %v12389_v39 = vld [vmem:[#allocation16 + $0x11ec] ss:$16 sps:$4 sm:$0xff]  }
 0xacc   :  { %9741 = vmatpush1.bf16.msra.mxu0 %v12294_v41  ;;  %9784 = vmatpush1.bf16.msra.mxu1 %v12297_v13  ;;  %v1662_v41 = vld [vmem:[#allocation18] sm:$0xf] }
 0xacd   :  { %9772 = vmatprep.mubr.bf16.mxu0 %v14880_v44  ;;  %9815 = vmatprep.mubr.bf16.mxu1 %v14880_v44  ;;  %v12323_v44 = vld [vmem:[#allocation16 + $0x108c] ss:$16 sps:$4 sm:$0xff]   ;;  %v1667_v13 = vrot.slane %v1662_v41, %v14068_v55 }
 0xace   :  { %9742 = vmatprep.subr.bf16.mxu0 %v12302_v32  ;;  %9785 = vmatprep.subr.bf16.mxu1 %v12305_v47  ;;  %v15003_v32 = vld [vmem:[#allocation26_spill] sm:$0xff] }
 0xacf   :  { %v1675_v47 = vrot.slane %v1662_v41, %v15003_v32 }
 0xad0   :  { %9743 = vmatpush1.bf16.msra.mxu0 %v12300_v28  ;;  %9786 = vmatpush1.bf16.msra.mxu1 %v12303_v49  ;;  %v15004_v28 = vld [vmem:[#allocation28_spill] sm:$0xff] }
 0xad1   :  { %9744 = vmatprep.subr.bf16.mxu0 %v12308_v14  ;;  %9787 = vmatprep.subr.bf16.mxu1 %v12311_v51  ;;  %v1671_v49 = vrot.slane %v1662_v41, %v15004_v28  ;;  %v15005_v14 = vld [vmem:[#allocation27_spill] sm:$0xff] }
 0xad2   :  { %v1679_v51 = vrot.slane %v1662_v41, %v15005_v14 }
 0xad4   :  { %9745 = vmatpush1.bf16.msra.mxu0 %v12306_v43  ;;  %9788 = vmatpush1.bf16.msra.mxu1 %v12309_v46 }
 0xad5   :  { %9746 = vmatprep.subr.bf16.mxu0 %v12314_v6  ;;  %9789 = vmatprep.subr.bf16.mxu1 %v12317_v23 }
 0xad8   :  { %9747 = vmatpush1.bf16.msra.mxu0 %v12312_v48  ;;  %9790 = vmatpush1.bf16.msra.mxu1 %v12315_v37 }
 0xad9   :  { %9748 = vmatprep.subr.bf16.mxu0 %v12320_v2  ;;  %9791 = vmatprep.subr.bf16.mxu1 %v12323_v44 }
 0xadc   :  { %9749 = vmatpush1.bf16.msra.mxu0 %v12318_v0  ;;  %9792 = vmatpush1.bf16.msra.mxu1 %v12321_v52 }
 0xadd   :  { %9750 = vmatprep.subr.bf16.mxu0 %v12326_v50  ;;  %9793 = vmatprep.subr.bf16.mxu1 %v12329_v10 }
 0xae0   :  { %9751 = vmatpush1.bf16.msra.mxu0 %v12324_v5  ;;  %9794 = vmatpush1.bf16.msra.mxu1 %v12327_v42 }
 0xae1   :  { %9752 = vmatprep.subr.bf16.mxu0 %v12332_v59  ;;  %9795 = vmatprep.subr.bf16.mxu1 %v12335_v24 }
 0xae4   :  { %9753 = vmatpush1.bf16.msra.mxu0 %v12330_v25  ;;  %9796 = vmatpush1.bf16.msra.mxu1 %v12333_v34 }
 0xae5   :  { %9754 = vmatprep.subr.bf16.mxu0 %v12338_v3  ;;  %9797 = vmatprep.subr.bf16.mxu1 %v12341_v56 }
 0xae8   :  { %9755 = vmatpush1.bf16.msra.mxu0 %v12336_v21  ;;  %9798 = vmatpush1.bf16.msra.mxu1 %v12339_v18 }
 0xae9   :  { %9756 = vmatprep.subr.bf16.mxu0 %v12344_v12  ;;  %9799 = vmatprep.subr.bf16.mxu1 %v12347_v45 }
 0xaec   :  { %9757 = vmatpush1.bf16.msra.mxu0 %v12342_v19  ;;  %9800 = vmatpush1.bf16.msra.mxu1 %v12345_v29 }
 0xaed   :  { %9758 = vmatprep.subr.bf16.mxu0 %v12350_v26  ;;  %9801 = vmatprep.subr.bf16.mxu1 %v12353_v60 }
 0xaf0   :  { %9759 = vmatpush1.bf16.msra.mxu0 %v12348_v15  ;;  %9802 = vmatpush1.bf16.msra.mxu1 %v12351_v31 }
 0xaf1   :  { %9760 = vmatprep.subr.bf16.mxu0 %v12356_v16  ;;  %9803 = vmatprep.subr.bf16.mxu1 %v12359_v7 }
 0xaf4   :  { %9761 = vmatpush1.bf16.msra.mxu0 %v12354_v40  ;;  %9804 = vmatpush1.bf16.msra.mxu1 %v12357_v57 }
 0xaf5   :  { %9762 = vmatprep.subr.bf16.mxu0 %v12362_v61  ;;  %9805 = vmatprep.subr.bf16.mxu1 %v12365_v4 }
 0xaf8   :  { %9763 = vmatpush1.bf16.msra.mxu0 %v12360_v20  ;;  %9806 = vmatpush1.bf16.msra.mxu1 %v12363_v38 }
 0xaf9   :  { %9764 = vmatprep.subr.bf16.mxu0 %v12368_v8  ;;  %9807 = vmatprep.subr.bf16.mxu1 %v12371_v54 }
 0xafc   :  { %9765 = vmatpush1.bf16.msra.mxu0 %v12366_v11  ;;  %9808 = vmatpush1.bf16.msra.mxu1 %v12369_v33 }
 0xafd   :  { %9766 = vmatprep.subr.bf16.mxu0 %v12374_v27  ;;  %9809 = vmatprep.subr.bf16.mxu1 %v12377_v63 }
 0xb00   :  { %9767 = vmatpush1.bf16.msra.mxu0 %v12372_v9  ;;  %9810 = vmatpush1.bf16.msra.mxu1 %v12375_v62 }
 0xb01   :  { %9768 = vmatprep.subr.bf16.mxu0 %v12380_v22  ;;  %9811 = vmatprep.subr.bf16.mxu1 %v12383_v36 }
 0xb04   :  { %9769 = vmatpush1.bf16.msra.mxu0 %v12378_v1  ;;  %9812 = vmatpush1.bf16.msra.mxu1 %v12381_v53 }
 0xb05   :  { %9770 = vmatprep.subr.bf16.mxu0 %v12386_v30  ;;  %9813 = vmatprep.subr.bf16.mxu1 %v12389_v39 }
 0xb08   :  { %9771 = vmatpush1.bf16.msra.mxu0 %v12384_v17  ;;  %9814 = vmatpush1.bf16.msra.mxu1 %v12387_v58 }
 0xb0b   :  { %9773 = vmatmul.mubr.bf16.vlgmr.msra.gmra.mrb[72].mxu0 %v14878_v35  ;;  %9816 = vmatmul.mubr.bf16.vlgmr.msra.gmra.mrb[72].mxu1 %v14878_v35 }
 0xbde   :  { %v9774_v43 = vpop.f32.mrb[72].mxu0  ;;  %v9817_v46 = vpop.f32.mrb[72].mxu1 }
 0xbdf   :  { %v10892_v6 = vadd.f32 %v9774_v43, %v1667_v13  ;;  %v10896_v23 = vadd.f32 %v9817_v46, %v1675_v47  ;;  %v9776_v48 = vpop.f32.mrb[73].mxu0  ;;  %v9819_v37 = vpop.f32.mrb[73].mxu1 }
 0xbe0   :  { %v10893_v2 = vadd.f32 %v9776_v48, %v1671_v49  ;;  %v10897_v44 = vadd.f32 %v9819_v37, %v1679_v51  ;;  %v9778_v35 = vpop.f32.mrb[74].mxu0  ;;  %v9821_v0 = vpop.f32.mrb[74].mxu1 }
 0xbe1   :  { %9850 = vst [vmem:[#allocation19] sm:$0xff] %v10892_v6  ;;  %9852 = vst [vmem:[#allocation19 + $0x10] sm:$0xff] %v10896_v23  ;;  %v10894_v55 = vadd.f32 %v9778_v35, %v1667_v13  ;;  %v10898_v52 = vadd.f32 %v9821_v0, %v1675_v47  ;;  %v9780_v50 = vpop.f32.mrb[75].mxu0  ;;  %v9823_v10 = vpop.f32.mrb[75].mxu1 }
 0xbe2   :  { %9851 = vst [vmem:[#allocation19 + $0x8] sm:$0xff] %v10893_v2  ;;  %9853 = vst [vmem:[#allocation19 + $0x18] sm:$0xff] %v10897_v44  ;;  %v10895_v5 = vadd.f32 %v9780_v50, %v1671_v49  ;;  %v10899_v42 = vadd.f32 %v9823_v10, %v1679_v51 }
 0xbe3   :  { %9854 = vst [vmem:[#allocation19 + $0x20] sm:$0xff] %v10894_v55  ;;  %9856 = vst [vmem:[#allocation19 + $0x30] sm:$0xff] %v10898_v52 }
 0xbe4   :  { %9855 = vst [vmem:[#allocation19 + $0x28] sm:$0xff] %v10895_v5  ;;  %9857 = vst [vmem:[#allocation19 + $0x38] sm:$0xff] %v10899_v42 }
 0xbe5   :  { %13768 = shalt.err (!%p13765_p6)
}
 0xbe6   :  { %s13769_s29 = scalar_lea.hbm %s14927_s9, 1024 }
 0xbe7   :  { %p13770_p7 = scmp.ne.s32.totalorder %s14927_s9, %s13769_s29  ;;  %p13773_p8 = scmp.lt.u32.totalorder %s13769_s29, %s14927_s9 }
 0xbe9   :  { %p13775_p9 = pnand %p13773_p8, %p13770_p7 }
 0xbeb   :  { %13778 = shalt.err (!%p13775_p9)
}
 0xbec   :  { %s13810_s15 = smov 512   ;;  %s13811_s5 = smov 32  }
 0xbed   :  { %9869 = dma.vmem_to_hbm [thread:$0]  %s9864_s28, 1024, %s14927_s9, [#allocation6], %s13810_s15, %s13810_s15, %s13811_s5  }
 0xbee   :  { %13789 = dma.done.wait [#allocation6], 1024  }
 0xbef   :  { %13790 = vsyncadd [#allocation6], 4294966272 }
 0xbf0   :  { %9873 = vsyncpa [#allocation5], 1 }
 0xbf1   :  { %9874 = vsyncpa [#allocation8], 1 }
 0xbf2   :  { %9875 = vsyncpa [#allocation11], 1 }
 0xbf3   :  { %9876 = vsyncpa [#allocation14], 1 }
 0xbf4   :  { %9877 = vsyncpa [#allocation17], 1 }
 0xbf5   :  { %9878 = vsyncpa [#allocation6], 1 }

</bundles_post_ra>
